<compile_context>
chip_gen: v7x
topology: tpu7x:2x2x1
jax: 0.10.0
libtpu: 0.0.40
codegen_flags: <defaults>
</compile_context>

<pallas_src>
import jax
import jax.numpy as jnp
from jax.experimental import pallas as pl
from jax.experimental.pallas import tpu as pltpu

EPS = 0.8        # nn.BatchNorm2d(C, 0.8) -> eps = 0.8
ALPHA = 0.2      # LeakyReLU negative slope
COUT_PAD = 128   # lane-dense padding of the 2-channel output

# rows of the (16, 512) f32 "vector slab"
#   0:3  -> w1 (3,512)        3 -> gamma1        4 -> beta1
#   5/6  -> gamma2/beta2      7/8 -> gamma3/beta3
#   9/10 -> gamma4/beta4     11/12 -> gamma5/beta5
#   13   -> b6 (padded to 128 in cols 0:128)


def _bn_lrelu(x, g, be):
    """Train-mode BatchNorm2d over axis 0 (one-pass stats, f32) + LeakyReLU(0.2).

    Returns bf16 so the cast for the following MXU matmul is fused into this epilogue.
    """
    inv_n = 1.0 / x.shape[0]
    mean = jnp.sum(x, axis=0, keepdims=True) * inv_n
    ex2 = jnp.sum(x * x, axis=0, keepdims=True) * inv_n
    var = ex2 - mean * mean                       # safe: eps=0.8 dominates
    scale = g * jax.lax.rsqrt(var + EPS)          # fold gamma into the scale
    shift = be - mean * scale
    y = x * scale + shift
    return jnp.maximum(y, ALPHA * y).astype(jnp.bfloat16)   # LeakyReLU, fused bf16 cast


def disc_kernel(p_ref, vec_ref, w_ref, w6_ref, out_ref):
    vec = vec_ref[...]                            # (16, 512) f32 — all small params
    p = p_ref[...]                                # (M, 3)    f32

    # layer 1: Conv2d(1->512, kernel=(1,3)) — K=3 is MXU-hostile, do 3 VPU FMAs.
    # (conv bias dropped: train-mode BN cancels it exactly)
    x = p[:, 0:1] * vec[0:1, :]
    x = x + p[:, 1:2] * vec[1:2, :]
    x = x + p[:, 2:3] * vec[2:3, :]
    x = _bn_lrelu(x, vec[3:4, :], vec[4:5, :])    # -> bf16 (M, 512)

    # layers 2..5: Conv2d 1x1 (bf16 MXU matmul, f32 accumulation) + BN + LeakyReLU
    # weight rows inside the (1280, 256) bf16 slab, plus gamma/beta rows in the vec slab
    for (r0, rows, gi, bi) in ((0, 512, 5, 6),
                               (512, 256, 7, 8),
                               (768, 256, 9, 10),
                               (1024, 256, 11, 12)):
        y = jnp.dot(x, w_ref[r0:r0 + rows, :], preferred_element_type=jnp.float32)
        x = _bn_lrelu(y, vec[gi:gi + 1, 0:256], vec[bi:bi + 1, 0:256])

    # final layer: Conv2d(256 -> 2, 1x1), zero-padded to 128 lanes -> unmasked stores
    out_ref[...] = (jnp.dot(x, w6_ref[...], preferred_element_type=jnp.float32)
                    + vec[13:14, 0:128])


def make_params(key):
    """Deterministic synthetic parameters (f32 master copies, torch-equivalent)."""
    dims = [(3, 512), (512, 256), (256, 256), (256, 256), (256, 256), (256, 2)]
    layers = []
    for i, (cin, cout) in enumerate(dims):
        key, kw, kb, kg, kbe = jax.random.split(key, 5)
        layer = {
            "w": jax.random.normal(kw, (cin, cout), jnp.float32) * 0.05,
            "b": jax.random.normal(kb, (1, cout), jnp.float32) * 0.01,
        }
        if i < 5:  # BN + LeakyReLU follow layers 1..5
            layer["g"] = 1.0 + jax.random.normal(kg, (1, cout), jnp.float32) * 0.1
            layer["be"] = jax.random.normal(kbe, (1, cout), jnp.float32) * 0.1
        layers.append(layer)
    return layers


def to_kernel_params(layers):
    """Coalesced kernel params: one f32 vector slab, one bf16 weight slab, padded w6.

    Conv biases b1..b5 are intentionally dropped (train-mode BN cancels them)."""
    vec = jnp.zeros((16, 512), jnp.float32)
    vec = vec.at[0:3, :].set(layers[0]["w"])               # w1 (3,512)
    vec = vec.at[3, :].set(layers[0]["g"][0])              # gamma1
    vec = vec.at[4, :].set(layers[0]["be"][0])             # beta1
    row = 5
    for l in layers[1:5]:                                  # gamma/beta for layers 2..5
        vec = vec.at[row, 0:256].set(l["g"][0])
        vec = vec.at[row + 1, 0:256].set(l["be"][0])
        row += 2
    vec = vec.at[13, 0:2].set(layers[5]["b"][0])           # b6, lane-padded to 128

    # w2..w5 concatenated into one contiguous bf16 slab (1280, 256)
    w_slab = jnp.concatenate([l["w"].astype(jnp.bfloat16) for l in layers[1:5]], axis=0)

    # final layer weight padded 2 -> 128 output channels for unmasked lane-dense stores
    w6 = jnp.zeros((256, COUT_PAD), jnp.bfloat16).at[:, :2].set(
        layers[5]["w"].astype(jnp.bfloat16))
    return vec, w_slab, w6


def discriminator_forward(img, kparams, img_size_0, img_size_1):
    vec, w_slab, w6 = kparams
    B = img.shape[0]
    H, W = img_size_0, img_size_1
    x = img.reshape(B, 1, H, W)                    # img.view(B, 1, H, W)
    Wout = W - 2                                   # kernel (1,3), pad 0, stride 1
    # im2col for the (1,3) conv (tiny wrapper-side gather): patches[.,k]=x[b,0,h,w+k]
    # (allow_input_fusion could fold this into the Pallas input DMA; left to XLA here.)
    patches = jnp.stack([x[:, 0, :, k:k + Wout] for k in range(3)], axis=-1)
    patches = patches.reshape(B * H * Wout, 3).astype(jnp.float32)

    M = B * H * Wout
    vspec = pl.BlockSpec(memory_space=pltpu.MemorySpace.VMEM)

    flops = 2 * M * (3 * 512 + 512 * 256 + 3 * 256 * 256 + 256 * COUT_PAD)
    w_bytes = sum(int(p.size) * p.dtype.itemsize for p in kparams)
    ce = pl.CostEstimate(flops=flops,
                         transcendentals=512 + 4 * 256,          # rsqrt per BN column
                         bytes_accessed=M * 3 * 4 + w_bytes + M * COUT_PAD * 4)

    # Scoped VMEM sized from the actual live set (~7 KiB/row activations + params/out),
    # capped below v7x's 64 MiB physical VMEM (v5e default scoped limit is only 16 MiB).
    vmem_bytes = int(M * 7 * 1024 + (4 << 20))
    vmem_bytes = min(max(vmem_bytes, 8 << 20), 48 << 20)

    # NOTE: BN needs global axis-0 stats, so the whole (M,512) activation stack stays
    # VMEM resident (no M grid). Fine at these sizes; for much larger M split the M axis
    # and exchange BN partial sums (also lets v7x use its second TensorCore).
    out_flat = pl.pallas_call(
        disc_kernel,
        out_shape=jax.ShapeDtypeStruct((M, COUT_PAD), jnp.float32),
        in_specs=[vspec, vspec, vspec, vspec],
        out_specs=vspec,
        cost_estimate=ce,
        compiler_params=pltpu.CompilerParams(vmem_limit_bytes=vmem_bytes),
    )(patches, vec, w_slab, w6)

    # slice the 2 real channels, back to NCHW: (M,128) -> (B,H,Wout,2) -> (B,2,H,Wout)
    return out_flat[:, :2].reshape(B, H, Wout, 2).transpose(0, 3, 1, 2)


def reference_forward(img, layers, H, W):
    """Pure-JAX f32 reference (two-pass BN, full-precision matmuls, WITH conv biases —
    validates that dropping b1..b5 inside the kernel is a mathematical no-op)."""
    B = img.shape[0]
    x = img.reshape(B, 1, H, W)
    Wout = W - 2
    patches = jnp.stack([x[:, 0, :, k:k + Wout] for k in range(3)], axis=-1)
    a = patches.reshape(B * H * Wout, 3).astype(jnp.float32)
    for i, l in enumerate(layers):
        a = a @ l["w"] + l["b"]
        if i < 5:
            mean = jnp.mean(a, axis=0, keepdims=True)
            var = jnp.mean(jnp.square(a - mean), axis=0, keepdims=True)
            y = (a - mean) * jax.lax.rsqrt(var + EPS) * l["g"] + l["be"]
            a = jnp.where(y > 0, y, ALPHA * y)
    return a.reshape(B, H, Wout, 2).transpose(0, 3, 1, 2)


if __name__ == "__main__":
    key = jax.random.PRNGKey(0)
    k_img, k_par = jax.random.split(key)

    B, H, W = 2, 8, 16           # opt.img_size_0 = 8, opt.img_size_1 = 16
    img = jax.random.normal(k_img, (B, 1, H, W), jnp.float32)
    layers = make_params(k_par)
    kparams = to_kernel_params(layers)

    out = discriminator_forward(img, kparams, H, W)
    out = jax.block_until_ready(out)

    assert out.shape == (B, 2, H, W - 2), out.shape
    assert jnp.all(jnp.isfinite(out))
    ref = reference_forward(img, layers, H, W)
    assert float(jnp.max(jnp.abs(out - ref))) < 0.05  # bf16 matmul drift budget
    print("KERNEL_OK")
</pallas_src>

<mosaic_0001>
module attributes {stable_mosaic.version = 11 : i64} {
  func.func @disc_kernel(%arg0: memref<224x3xf32, #tpu.memory_space<vmem>>, %arg1: memref<16x512xf32, #tpu.memory_space<vmem>>, %arg2: memref<1280x256xbf16, #tpu.memory_space<vmem>>, %arg3: memref<256x128xbf16, #tpu.memory_space<vmem>>, %arg4: memref<224x128xf32, #tpu.memory_space<vmem>>) attributes {dimension_semantics = [], scalar_prefetch = 0 : i64, scratch_operands = 0 : i64, tpu.core_type = #tpu.core_type<tc>} {
    %c0 = arith.constant 0 : index
    %c0_0 = arith.constant 0 : index
    %0 = vector.load %arg1[%c0, %c0_0] : memref<16x512xf32, #tpu.memory_space<vmem>>, vector<16x512xf32>
    %c0_1 = arith.constant 0 : index
    %c0_2 = arith.constant 0 : index
    %1 = vector.load %arg0[%c0_1, %c0_2] : memref<224x3xf32, #tpu.memory_space<vmem>>, vector<224x3xf32>
    %2 = vector.extract_strided_slice %1 {offsets = [0, 0], sizes = [224, 1], strides = [1, 1]} : vector<224x3xf32> to vector<224x1xf32>
    %3 = vector.extract_strided_slice %0 {offsets = [0, 0], sizes = [1, 512], strides = [1, 1]} : vector<16x512xf32> to vector<1x512xf32>
    %4 = vector.broadcast %2 : vector<224x1xf32> to vector<224x512xf32>
    %5 = vector.broadcast %3 : vector<1x512xf32> to vector<224x512xf32>
    %6 = arith.mulf %4, %5 : vector<224x512xf32>
    %7 = vector.extract_strided_slice %1 {offsets = [0, 1], sizes = [224, 1], strides = [1, 1]} : vector<224x3xf32> to vector<224x1xf32>
    %8 = vector.extract_strided_slice %0 {offsets = [1, 0], sizes = [1, 512], strides = [1, 1]} : vector<16x512xf32> to vector<1x512xf32>
    %9 = vector.broadcast %7 : vector<224x1xf32> to vector<224x512xf32>
    %10 = vector.broadcast %8 : vector<1x512xf32> to vector<224x512xf32>
    %11 = arith.mulf %9, %10 : vector<224x512xf32>
    %12 = arith.addf %6, %11 : vector<224x512xf32>
    %13 = vector.extract_strided_slice %1 {offsets = [0, 2], sizes = [224, 1], strides = [1, 1]} : vector<224x3xf32> to vector<224x1xf32>
    %14 = vector.extract_strided_slice %0 {offsets = [2, 0], sizes = [1, 512], strides = [1, 1]} : vector<16x512xf32> to vector<1x512xf32>
    %15 = vector.broadcast %13 : vector<224x1xf32> to vector<224x512xf32>
    %16 = vector.broadcast %14 : vector<1x512xf32> to vector<224x512xf32>
    %17 = arith.mulf %15, %16 : vector<224x512xf32>
    %18 = arith.addf %12, %17 : vector<224x512xf32>
    %19 = vector.extract_strided_slice %0 {offsets = [3, 0], sizes = [1, 512], strides = [1, 1]} : vector<16x512xf32> to vector<1x512xf32>
    %20 = vector.extract_strided_slice %0 {offsets = [4, 0], sizes = [1, 512], strides = [1, 1]} : vector<16x512xf32> to vector<1x512xf32>
    %cst = arith.constant dense<0.000000e+00> : vector<512xf32>
    %21 = vector.multi_reduction <add>, %18, %cst [0] : vector<224x512xf32> to vector<512xf32>
    %22 = vector.shape_cast %21 : vector<512xf32> to vector<1x512xf32>
    %cst_3 = arith.constant 0.00446428591 : f32
    %23 = vector.broadcast %cst_3 : f32 to vector<1x512xf32>
    %24 = arith.mulf %22, %23 : vector<1x512xf32>
    %25 = arith.mulf %18, %18 : vector<224x512xf32>
    %cst_4 = arith.constant dense<0.000000e+00> : vector<512xf32>
    %26 = vector.multi_reduction <add>, %25, %cst_4 [0] : vector<224x512xf32> to vector<512xf32>
    %27 = vector.shape_cast %26 : vector<512xf32> to vector<1x512xf32>
    %cst_5 = arith.constant 0.00446428591 : f32
    %28 = vector.broadcast %cst_5 : f32 to vector<1x512xf32>
    %29 = arith.mulf %27, %28 : vector<1x512xf32>
    %30 = arith.mulf %24, %24 : vector<1x512xf32>
    %31 = arith.subf %29, %30 : vector<1x512xf32>
    %cst_6 = arith.constant 8.000000e-01 : f32
    %32 = vector.broadcast %cst_6 : f32 to vector<1x512xf32>
    %33 = arith.addf %31, %32 : vector<1x512xf32>
    %34 = math.rsqrt %33 : vector<1x512xf32>
    %35 = arith.mulf %19, %34 : vector<1x512xf32>
    %36 = arith.mulf %24, %35 : vector<1x512xf32>
    %37 = arith.subf %20, %36 : vector<1x512xf32>
    %38 = vector.broadcast %35 : vector<1x512xf32> to vector<224x512xf32>
    %39 = arith.mulf %18, %38 : vector<224x512xf32>
    %40 = vector.broadcast %37 : vector<1x512xf32> to vector<224x512xf32>
    %41 = arith.addf %39, %40 : vector<224x512xf32>
    %cst_7 = arith.constant 2.000000e-01 : f32
    %42 = vector.broadcast %cst_7 : f32 to vector<224x512xf32>
    %43 = arith.mulf %42, %41 : vector<224x512xf32>
    %44 = arith.maximumf %41, %43 : vector<224x512xf32>
    %45 = arith.truncf %44 : vector<224x512xf32> to vector<224x512xbf16>
    %c0_8 = arith.constant 0 : index
    %c0_9 = arith.constant 0 : index
    %46 = vector.load %arg2[%c0_8, %c0_9] : memref<1280x256xbf16, #tpu.memory_space<vmem>>, vector<512x256xbf16>
    %cst_10 = arith.constant dense<0.000000e+00> : vector<224x256xf32>
    %47 = tpu.matmul %45, %46, %cst_10 {dimension_numbers = #tpu.dot_dimension_numbers<[1], [0], [0], [1], [0, 0, 1, 1], [], []>} : vector<224x512xbf16>, vector<512x256xbf16>, vector<224x256xf32> -> vector<224x256xf32>
    %48 = vector.extract_strided_slice %0 {offsets = [5, 0], sizes = [1, 256], strides = [1, 1]} : vector<16x512xf32> to vector<1x256xf32>
    %49 = vector.extract_strided_slice %0 {offsets = [6, 0], sizes = [1, 256], strides = [1, 1]} : vector<16x512xf32> to vector<1x256xf32>
    %cst_11 = arith.constant dense<0.000000e+00> : vector<256xf32>
    %50 = vector.multi_reduction <add>, %47, %cst_11 [0] : vector<224x256xf32> to vector<256xf32>
    %51 = vector.shape_cast %50 : vector<256xf32> to vector<1x256xf32>
    %cst_12 = arith.constant 0.00446428591 : f32
    %52 = vector.broadcast %cst_12 : f32 to vector<1x256xf32>
    %53 = arith.mulf %51, %52 : vector<1x256xf32>
    %54 = arith.mulf %47, %47 : vector<224x256xf32>
    %cst_13 = arith.constant dense<0.000000e+00> : vector<256xf32>
    %55 = vector.multi_reduction <add>, %54, %cst_13 [0] : vector<224x256xf32> to vector<256xf32>
    %56 = vector.shape_cast %55 : vector<256xf32> to vector<1x256xf32>
    %cst_14 = arith.constant 0.00446428591 : f32
    %57 = vector.broadcast %cst_14 : f32 to vector<1x256xf32>
    %58 = arith.mulf %56, %57 : vector<1x256xf32>
    %59 = arith.mulf %53, %53 : vector<1x256xf32>
    %60 = arith.subf %58, %59 : vector<1x256xf32>
    %cst_15 = arith.constant 8.000000e-01 : f32
    %61 = vector.broadcast %cst_15 : f32 to vector<1x256xf32>
    %62 = arith.addf %60, %61 : vector<1x256xf32>
    %63 = math.rsqrt %62 : vector<1x256xf32>
    %64 = arith.mulf %48, %63 : vector<1x256xf32>
    %65 = arith.mulf %53, %64 : vector<1x256xf32>
    %66 = arith.subf %49, %65 : vector<1x256xf32>
    %67 = vector.broadcast %64 : vector<1x256xf32> to vector<224x256xf32>
    %68 = arith.mulf %47, %67 : vector<224x256xf32>
    %69 = vector.broadcast %66 : vector<1x256xf32> to vector<224x256xf32>
    %70 = arith.addf %68, %69 : vector<224x256xf32>
    %cst_16 = arith.constant 2.000000e-01 : f32
    %71 = vector.broadcast %cst_16 : f32 to vector<224x256xf32>
    %72 = arith.mulf %71, %70 : vector<224x256xf32>
    %73 = arith.maximumf %70, %72 : vector<224x256xf32>
    %74 = arith.truncf %73 : vector<224x256xf32> to vector<224x256xbf16>
    %c512 = arith.constant 512 : index
    %c0_17 = arith.constant 0 : index
    %75 = vector.load %arg2[%c512, %c0_17] : memref<1280x256xbf16, #tpu.memory_space<vmem>>, vector<256x256xbf16>
    %cst_18 = arith.constant dense<0.000000e+00> : vector<224x256xf32>
    %76 = tpu.matmul %74, %75, %cst_18 {dimension_numbers = #tpu.dot_dimension_numbers<[1], [0], [0], [1], [0, 0, 1, 1], [], []>} : vector<224x256xbf16>, vector<256x256xbf16>, vector<224x256xf32> -> vector<224x256xf32>
    %77 = vector.extract_strided_slice %0 {offsets = [7, 0], sizes = [1, 256], strides = [1, 1]} : vector<16x512xf32> to vector<1x256xf32>
    %78 = vector.extract_strided_slice %0 {offsets = [8, 0], sizes = [1, 256], strides = [1, 1]} : vector<16x512xf32> to vector<1x256xf32>
    %cst_19 = arith.constant dense<0.000000e+00> : vector<256xf32>
    %79 = vector.multi_reduction <add>, %76, %cst_19 [0] : vector<224x256xf32> to vector<256xf32>
    %80 = vector.shape_cast %79 : vector<256xf32> to vector<1x256xf32>
    %cst_20 = arith.constant 0.00446428591 : f32
    %81 = vector.broadcast %cst_20 : f32 to vector<1x256xf32>
    %82 = arith.mulf %80, %81 : vector<1x256xf32>
    %83 = arith.mulf %76, %76 : vector<224x256xf32>
    %cst_21 = arith.constant dense<0.000000e+00> : vector<256xf32>
    %84 = vector.multi_reduction <add>, %83, %cst_21 [0] : vector<224x256xf32> to vector<256xf32>
    %85 = vector.shape_cast %84 : vector<256xf32> to vector<1x256xf32>
    %cst_22 = arith.constant 0.00446428591 : f32
    %86 = vector.broadcast %cst_22 : f32 to vector<1x256xf32>
    %87 = arith.mulf %85, %86 : vector<1x256xf32>
    %88 = arith.mulf %82, %82 : vector<1x256xf32>
    %89 = arith.subf %87, %88 : vector<1x256xf32>
    %cst_23 = arith.constant 8.000000e-01 : f32
    %90 = vector.broadcast %cst_23 : f32 to vector<1x256xf32>
    %91 = arith.addf %89, %90 : vector<1x256xf32>
    %92 = math.rsqrt %91 : vector<1x256xf32>
    %93 = arith.mulf %77, %92 : vector<1x256xf32>
    %94 = arith.mulf %82, %93 : vector<1x256xf32>
    %95 = arith.subf %78, %94 : vector<1x256xf32>
    %96 = vector.broadcast %93 : vector<1x256xf32> to vector<224x256xf32>
    %97 = arith.mulf %76, %96 : vector<224x256xf32>
    %98 = vector.broadcast %95 : vector<1x256xf32> to vector<224x256xf32>
    %99 = arith.addf %97, %98 : vector<224x256xf32>
    %cst_24 = arith.constant 2.000000e-01 : f32
    %100 = vector.broadcast %cst_24 : f32 to vector<224x256xf32>
    %101 = arith.mulf %100, %99 : vector<224x256xf32>
    %102 = arith.maximumf %99, %101 : vector<224x256xf32>
    %103 = arith.truncf %102 : vector<224x256xf32> to vector<224x256xbf16>
    %c768 = arith.constant 768 : index
    %c0_25 = arith.constant 0 : index
    %104 = vector.load %arg2[%c768, %c0_25] : memref<1280x256xbf16, #tpu.memory_space<vmem>>, vector<256x256xbf16>
    %cst_26 = arith.constant dense<0.000000e+00> : vector<224x256xf32>
    %105 = tpu.matmul %103, %104, %cst_26 {dimension_numbers = #tpu.dot_dimension_numbers<[1], [0], [0], [1], [0, 0, 1, 1], [], []>} : vector<224x256xbf16>, vector<256x256xbf16>, vector<224x256xf32> -> vector<224x256xf32>
    %106 = vector.extract_strided_slice %0 {offsets = [9, 0], sizes = [1, 256], strides = [1, 1]} : vector<16x512xf32> to vector<1x256xf32>
    %107 = vector.extract_strided_slice %0 {offsets = [10, 0], sizes = [1, 256], strides = [1, 1]} : vector<16x512xf32> to vector<1x256xf32>
    %cst_27 = arith.constant dense<0.000000e+00> : vector<256xf32>
    %108 = vector.multi_reduction <add>, %105, %cst_27 [0] : vector<224x256xf32> to vector<256xf32>
    %109 = vector.shape_cast %108 : vector<256xf32> to vector<1x256xf32>
    %cst_28 = arith.constant 0.00446428591 : f32
    %110 = vector.broadcast %cst_28 : f32 to vector<1x256xf32>
    %111 = arith.mulf %109, %110 : vector<1x256xf32>
    %112 = arith.mulf %105, %105 : vector<224x256xf32>
    %cst_29 = arith.constant dense<0.000000e+00> : vector<256xf32>
    %113 = vector.multi_reduction <add>, %112, %cst_29 [0] : vector<224x256xf32> to vector<256xf32>
    %114 = vector.shape_cast %113 : vector<256xf32> to vector<1x256xf32>
    %cst_30 = arith.constant 0.00446428591 : f32
    %115 = vector.broadcast %cst_30 : f32 to vector<1x256xf32>
    %116 = arith.mulf %114, %115 : vector<1x256xf32>
    %117 = arith.mulf %111, %111 : vector<1x256xf32>
    %118 = arith.subf %116, %117 : vector<1x256xf32>
    %cst_31 = arith.constant 8.000000e-01 : f32
    %119 = vector.broadcast %cst_31 : f32 to vector<1x256xf32>
    %120 = arith.addf %118, %119 : vector<1x256xf32>
    %121 = math.rsqrt %120 : vector<1x256xf32>
    %122 = arith.mulf %106, %121 : vector<1x256xf32>
    %123 = arith.mulf %111, %122 : vector<1x256xf32>
    %124 = arith.subf %107, %123 : vector<1x256xf32>
    %125 = vector.broadcast %122 : vector<1x256xf32> to vector<224x256xf32>
    %126 = arith.mulf %105, %125 : vector<224x256xf32>
    %127 = vector.broadcast %124 : vector<1x256xf32> to vector<224x256xf32>
    %128 = arith.addf %126, %127 : vector<224x256xf32>
    %cst_32 = arith.constant 2.000000e-01 : f32
    %129 = vector.broadcast %cst_32 : f32 to vector<224x256xf32>
    %130 = arith.mulf %129, %128 : vector<224x256xf32>
    %131 = arith.maximumf %128, %130 : vector<224x256xf32>
    %132 = arith.truncf %131 : vector<224x256xf32> to vector<224x256xbf16>
    %c1024 = arith.constant 1024 : index
    %c0_33 = arith.constant 0 : index
    %133 = vector.load %arg2[%c1024, %c0_33] : memref<1280x256xbf16, #tpu.memory_space<vmem>>, vector<256x256xbf16>
    %cst_34 = arith.constant dense<0.000000e+00> : vector<224x256xf32>
    %134 = tpu.matmul %132, %133, %cst_34 {dimension_numbers = #tpu.dot_dimension_numbers<[1], [0], [0], [1], [0, 0, 1, 1], [], []>} : vector<224x256xbf16>, vector<256x256xbf16>, vector<224x256xf32> -> vector<224x256xf32>
    %135 = vector.extract_strided_slice %0 {offsets = [11, 0], sizes = [1, 256], strides = [1, 1]} : vector<16x512xf32> to vector<1x256xf32>
    %136 = vector.extract_strided_slice %0 {offsets = [12, 0], sizes = [1, 256], strides = [1, 1]} : vector<16x512xf32> to vector<1x256xf32>
    %cst_35 = arith.constant dense<0.000000e+00> : vector<256xf32>
    %137 = vector.multi_reduction <add>, %134, %cst_35 [0] : vector<224x256xf32> to vector<256xf32>
    %138 = vector.shape_cast %137 : vector<256xf32> to vector<1x256xf32>
    %cst_36 = arith.constant 0.00446428591 : f32
    %139 = vector.broadcast %cst_36 : f32 to vector<1x256xf32>
    %140 = arith.mulf %138, %139 : vector<1x256xf32>
    %141 = arith.mulf %134, %134 : vector<224x256xf32>
    %cst_37 = arith.constant dense<0.000000e+00> : vector<256xf32>
    %142 = vector.multi_reduction <add>, %141, %cst_37 [0] : vector<224x256xf32> to vector<256xf32>
    %143 = vector.shape_cast %142 : vector<256xf32> to vector<1x256xf32>
    %cst_38 = arith.constant 0.00446428591 : f32
    %144 = vector.broadcast %cst_38 : f32 to vector<1x256xf32>
    %145 = arith.mulf %143, %144 : vector<1x256xf32>
    %146 = arith.mulf %140, %140 : vector<1x256xf32>
    %147 = arith.subf %145, %146 : vector<1x256xf32>
    %cst_39 = arith.constant 8.000000e-01 : f32
    %148 = vector.broadcast %cst_39 : f32 to vector<1x256xf32>
    %149 = arith.addf %147, %148 : vector<1x256xf32>
    %150 = math.rsqrt %149 : vector<1x256xf32>
    %151 = arith.mulf %135, %150 : vector<1x256xf32>
    %152 = arith.mulf %140, %151 : vector<1x256xf32>
    %153 = arith.subf %136, %152 : vector<1x256xf32>
    %154 = vector.broadcast %151 : vector<1x256xf32> to vector<224x256xf32>
    %155 = arith.mulf %134, %154 : vector<224x256xf32>
    %156 = vector.broadcast %153 : vector<1x256xf32> to vector<224x256xf32>
    %157 = arith.addf %155, %156 : vector<224x256xf32>
    %cst_40 = arith.constant 2.000000e-01 : f32
    %158 = vector.broadcast %cst_40 : f32 to vector<224x256xf32>
    %159 = arith.mulf %158, %157 : vector<224x256xf32>
    %160 = arith.maximumf %157, %159 : vector<224x256xf32>
    %161 = arith.truncf %160 : vector<224x256xf32> to vector<224x256xbf16>
    %c0_41 = arith.constant 0 : index
    %c0_42 = arith.constant 0 : index
    %162 = vector.load %arg3[%c0_41, %c0_42] : memref<256x128xbf16, #tpu.memory_space<vmem>>, vector<256x128xbf16>
    %cst_43 = arith.constant dense<0.000000e+00> : vector<224x128xf32>
    %163 = tpu.matmul %161, %162, %cst_43 {dimension_numbers = #tpu.dot_dimension_numbers<[1], [0], [0], [1], [0, 0, 1, 1], [], []>} : vector<224x256xbf16>, vector<256x128xbf16>, vector<224x128xf32> -> vector<224x128xf32>
    %164 = vector.extract_strided_slice %0 {offsets = [13, 0], sizes = [1, 128], strides = [1, 1]} : vector<16x512xf32> to vector<1x128xf32>
    %165 = vector.broadcast %164 : vector<1x128xf32> to vector<224x128xf32>
    %166 = arith.addf %163, %165 : vector<224x128xf32>
    %c0_44 = arith.constant 0 : index
    %c0_45 = arith.constant 0 : index
    %167 = vector.load %arg4[%c0_44, %c0_45] : memref<224x128xf32, #tpu.memory_space<vmem>>, vector<224x128xf32>
    tpu.vector_store %arg4[%c0_44, %c0_45], %166 {strides = array<i32>} : memref<224x128xf32, #tpu.memory_space<vmem>>, vector<224x128xf32>,
    return
  }
}

</mosaic_0001>

<bundles_post_ra>
// kernel: tpu_custom_call.1
= control target key start
LH: loop header
LB: loop body
LE: loop exit
PB: predicated region body
PF: predicated region fallthrough
CT: control target
= control target key end

     0   :  { %9 = vsyncpa [#allocation3], 0  ;;  %s11399_s0 = inlined_call_operand.vmem [shape: f32[224,3], index: 0, kind: input, shape index: {}]   ;;  %s11400_s1 = inlined_call_operand.vmem [shape: f32[16,512], index: 1, kind: input, shape index: {}]   ;;  %s11401_s2 = inlined_call_operand.hbm [shape: bf16[1280,256], index: 2, kind: input, shape index: {}]   ;;  %s11402_s3 = inlined_call_operand.vmem [shape: bf16[256,128], index: 3, kind: input, shape index: {}]   ;;  %s11403_s4 = inlined_call_operand.hbm [shape: f32[224,128], index: 4, kind: output, shape index: {}]  }
   0x1   :  { %10 = vsyncpa [#allocation4], 0  ;;  %s6797_s15 = smov [#allocation2]   ;;  %s6749_s19 = scalar_lea.hbm %s11401_s2, 20480 }
   0x2   :  { %s20_s16 = sshll.u32 %s6797_s15, 4  ;;  %p6750_p0 = scmp.ne.s32.totalorder %s11401_s2, %s6749_s19  ;;  %s21_s16 = int_to_ptr.vmem [resolvable:$true] %s20_s16 }
   0x3   :  { %p6753_p1 = scmp.lt.u32.totalorder %s6749_s19, %s11401_s2 }
   0x5   :  { %p6755_p2 = pnand %p6753_p1, %p6750_p0 }
   0x7   :  { %6758 = shalt.err (!%p6755_p2)
}
   0x8   :  { %s6759_s24 = scalar_lea.vmem %s21_s16, 20480  ;;  %p6764_p4 = scmp.lt.s32.totalorder %s21_s16, %s21_s16 }
   0x9   :  { %p6760_p3 = scmp.ne.s32.totalorder %s21_s16, %s6759_s24  ;;  %p6765_p5 = scmp.lt.s32.totalorder %s6759_s24, %s6759_s24 }
   0xb   :  { %p6766_p6 = por %p6765_p5, %p6764_p4 }
   0xd   :  { %p6767_p7 = pnand %p6766_p6, %p6760_p3 }
   0xf   :  { %6770 = shalt.err (!%p6767_p7)
}
  0x10   :  { %s6798_s25 = smov 128   ;;  %s6799_s26 = smov 8  }
  0x11   :  { %26 = dma.hbm_to_vmem [thread:$0]  %s11401_s2, 20480, %s21_s16, [#allocation3], %s6798_s25, %s6798_s25, %s6799_s26  }
  0x12   :  { %6793 = dma.done.wait [#allocation3], 20480  }
  0x13   :  { %6794 = vsyncadd [#allocation3], 4294946816  ;;  %v11408_v0 = vmov 2   ;;  %v11406_v1 = vmov 1   ;;  %v6849_v2 = vld [vmem:[%s11399_s0] sm:$0xff]  ;;  %v6856_v3 = vld [vmem:[%s11399_s0 + $0x28] sm:$0xff]  ;;  %v207_v40 = vlaneseq }
  0x14   :  { %6406 = vset.pattern.permute.xlu0 %v11408_v0  ;;  %6405 = vset.pattern.permute.xlu1 %v11406_v1  ;;  %v6861_v4 = vld [vmem:[%s11399_s0 + $0x8] sm:$0xff]  ;;  %v6868_v5 = vld [vmem:[%s11399_s0 + $0x30] sm:$0xff]  ;;  %v6885_v8 = vld [vmem:[%s11399_s0 + $0x58] sm:$0xff]  ;;  %v11404_v11 = vmov 0  }
  0x15   :  { %688 = vperm.xlu0 %6406, %v6849_v2   ;;  %336 = vperm.xlu1 %6405, %v6849_v2   ;;  %v6873_v6 = vld [vmem:[%s11399_s0 + $0x10] sm:$0xff]  ;;  %v42_v9 = vld [vmem:[%s11399_s0 + $0x18] sm:$0xff]  ;;  %v6903_v12 = vld [vmem:[%s11399_s0 + $0x80] sm:$0xff]  ;;  %v7059_v43 = vshrl.u32 %v207_v40, 7 }
  0x16   :  { %v6878_v7 = vld [vmem:[%s11399_s0 + $0x50] sm:$0xff]  ;;  %v6896_v10 = vld [vmem:[%s11399_s0 + $0x78] sm:$0xff]  ;;  %v6911_v13 = vld [vmem:[%s11399_s0 + $0xa0] sm:$0xff] }
  0x17   :  { %v43_v14 = vld [vmem:[%s11399_s0 + $0x20] sm:$0xff]  ;;  %v6921_v15 = vld [vmem:[%s11399_s0 + $0xa8] sm:$0xff]  ;;  %v46_v19 = vld [vmem:[%s11399_s0 + $0x38] sm:$0xff]  ;;  %11615 = vst [vmem:[#allocation10_spill] sm:$0xff] %v7059_v43  ;;  %v7064_v46 = vsub.s32 0, %v7059_v43  ;;  %v7068_v47 = vsub.s32 1, %v7059_v43 }
  0x18   :  { %v47_v16 = vld [vmem:[%s11399_s0 + $0x40] sm:$0xff]  ;;  %v48_v17 = vld [vmem:[%s11399_s0 + $0x48] sm:$0xff]  ;;  %v6948_v20 = vld [vmem:[%s11399_s0 + $0x70] sm:$0xff]  ;;  %v7074_v49 = vsub.s32 2, %v7059_v43 }
  0x19   :  { %708 = vperm.xlu0 %6406, %v6856_v3   ;;  %340 = vperm.xlu1 %6405, %v6861_v4   ;;  %v52_v18 = vld [vmem:[%s11399_s0 + $0x68] sm:$0xff]  ;;  %v6953_v21 = vld [vmem:[%s11399_s0 + $0x90] sm:$0xff]  ;;  %v6960_v22 = vld [vmem:[%s11399_s0 + $0x98] sm:$0xff]  ;;  %11616 = vst [vmem:[#allocation11_spill] sm:$0xff] %v7064_v46 }
  0x1a   :  { %v6967_v23 = vld [vmem:[%s11399_s0 + $0xb8] sm:$0xff]  ;;  %v6974_v24 = vld [vmem:[%s11399_s0 + $0xc0] sm:$0xff]  ;;  %v7009_v26 = vld [vmem:[%s11399_s0 + $0xc8] sm:$0xff]  ;;  %11617 = vst [vmem:[#allocation12_spill] sm:$0xff] %v7068_v47 }
  0x1b   :  { %v51_v25 = vld [vmem:[%s11399_s0 + $0x60] sm:$0xff]  ;;  %11613 = vst [vmem:[#allocation8_spill] sm:$0xff] %v7009_v26  ;;  %v7016_v27 = vld [vmem:[%s11399_s0 + $0xd0] sm:$0xff]  ;;  %v56_v36 = vld [vmem:[%s11399_s0 + $0x88] sm:$0xff] }
  0x1c   :  { %11614 = vst [vmem:[#allocation9_spill] sm:$0xff] %v7016_v27  ;;  %v33_v48 = vld [vmem:[%s11400_s1] sm:$0xff]  ;;  %11618 = vst [vmem:[#allocation13_spill] sm:$0xff] %v7074_v49  ;;  %v34_v50 = vld [vmem:[%s11400_s1 + $0x8] sm:$0xff] }
  0x1d   :  { %712 = vperm.xlu0 %6406, %v6868_v5   ;;  %344 = vperm.xlu1 %6405, %v6873_v6   ;;  %v35_v51 = vld [vmem:[%s11400_s1 + $0x10] sm:$0xff]  ;;  %v36_v52 = vld [vmem:[%s11400_s1 + $0x18] sm:$0xff]  ;;  %v7088_v54 = vrot.slane %v33_v48, %v7064_v46  ;;  %v7091_v55 = vrot.slane %v34_v50, %v7064_v46  ;;  %v7100_v59 = vrot.slane %v33_v48, %v7068_v47 }
  0x1e   :  { %v7094_v56 = vrot.slane %v35_v51, %v7064_v46  ;;  %v7097_v57 = vrot.slane %v36_v52, %v7064_v46  ;;  %v7103_v60 = vrot.slane %v34_v50, %v7068_v47  ;;  %v7106_v61 = vrot.slane %v35_v51, %v7068_v47 }
  0x1f   :  { %v7109_v62 = vrot.slane %v33_v48, %v7074_v49  ;;  %v7113_v63 = vrot.slane %v36_v52, %v7068_v47 }
  0x21   :  { %728 = vperm.xlu0 %6406, %v6878_v7   ;;  %6407 = vset.pattern.permute.xlu1 %v11408_v0 }
  0x22   :  { %692 = vperm.xlu1 %6407, %v6861_v4  }
  0x25   :  { %732 = vperm.xlu0 %6406, %v6885_v8  }
  0x26   :  { %6408 = vset.pattern.permute.xlu1 %v11404_v11 }
  0x27   :  { %84 = vperm.xlu1 %6408, %v42_v9  }
  0x29   :  { %748 = vperm.xlu0 %6406, %v6896_v10  }
  0x2b   :  { %6409 = vset.pattern.permute.xlu1 %v11408_v0 }
  0x2c   :  { %696 = vperm.xlu1 %6409, %v6873_v6  }
  0x2d   :  { %752 = vperm.xlu0 %6406, %v6903_v12  }
  0x30   :  { %6410 = vset.pattern.permute.xlu1 %v11404_v11 }
  0x31   :  { %768 = vperm.xlu0 %6406, %v6911_v13   ;;  %89 = vperm.xlu1 %6410, %v43_v14  }
  0x35   :  { %772 = vperm.xlu0 %6406, %v6921_v15   ;;  %6411 = vset.pattern.permute.xlu1 %v11408_v0 }
  0x36   :  { %700 = vperm.xlu1 %6411, %v42_v9  }
  0x39   :  { %6444 = vset.pattern.permute.xlu0 %v11406_v1 }
  0x3a   :  { %348 = vperm.xlu0 %6444, %v42_v9   ;;  %6412 = vset.pattern.permute.xlu1 %v11406_v1 }
  0x3b   :  { %356 = vperm.xlu1 %6412, %v6856_v3  }
  0x3e   :  { %352 = vperm.xlu0 %6444, %v43_v14  }
  0x3f   :  { %6413 = vset.pattern.permute.xlu1 %v11408_v0 }
  0x40   :  { %704 = vperm.xlu1 %6413, %v43_v14  }
  0x42   :  { %368 = vperm.xlu0 %6444, %v47_v16  }
  0x44   :  { %6414 = vset.pattern.permute.xlu1 %v11406_v1 }
  0x45   :  { %360 = vperm.xlu1 %6414, %v6868_v5  }
  0x46   :  { %372 = vperm.xlu0 %6444, %v48_v17  }
  0x49   :  { %6415 = vset.pattern.permute.xlu1 %v11404_v11 }
  0x4a   :  { %388 = vperm.xlu0 %6444, %v52_v18   ;;  %104 = vperm.xlu1 %6415, %v46_v19  }
  0x4e   :  { %392 = vperm.xlu0 %6444, %v6948_v20   ;;  %6416 = vset.pattern.permute.xlu1 %v11406_v1 }
  0x4f   :  { %364 = vperm.xlu1 %6416, %v46_v19  }
  0x52   :  { %408 = vperm.xlu0 %6444, %v6953_v21  }
  0x53   :  { %6417 = vset.pattern.permute.xlu1 %v11404_v11 }
  0x54   :  { %109 = vperm.xlu1 %6417, %v47_v16  }
  0x56   :  { %412 = vperm.xlu0 %6444, %v6960_v22  }
  0x58   :  { %6418 = vset.pattern.permute.xlu1 %v11408_v0 }
  0x59   :  { %716 = vperm.xlu1 %6418, %v46_v19  }
  0x5a   :  { %428 = vperm.xlu0 %6444, %v6967_v23  }
  0x5d   :  { %6419 = vset.pattern.permute.xlu1 %v11404_v11 }
  0x5e   :  { %432 = vperm.xlu0 %6444, %v6974_v24   ;;  %114 = vperm.xlu1 %6419, %v48_v17  }
  0x62   :  { %6448 = vset.pattern.permute.xlu0 %v11404_v11  ;;  %6420 = vset.pattern.permute.xlu1 %v11408_v0 }
  0x63   :  { %69 = vperm.xlu0 %6448, %v6849_v2   ;;  %720 = vperm.xlu1 %6420, %v47_v16   ;;  %v7116_v2 = vrot.slane %v34_v50, %v7074_v49 }
  0x67   :  { %74 = vperm.xlu0 %6448, %v6861_v4   ;;  %6421 = vset.pattern.permute.xlu1 %v11406_v1  ;;  %v7122_v4 = vrot.slane %v36_v52, %v7074_v49 }
  0x68   :  { %376 = vperm.xlu1 %6421, %v6878_v7  }
  0x6b   :  { %79 = vperm.xlu0 %6448, %v6873_v6  }
  0x6c   :  { %6422 = vset.pattern.permute.xlu1 %v11408_v0 }
  0x6d   :  { %724 = vperm.xlu1 %6422, %v48_v17  }
  0x6f   :  { %94 = vperm.xlu0 %6448, %v6856_v3   ;;  %v7119_v3 = vrot.slane %v35_v51, %v7074_v49 }
  0x71   :  { %6423 = vset.pattern.permute.xlu1 %v11406_v1 }
  0x72   :  { %380 = vperm.xlu1 %6423, %v6885_v8  }
  0x73   :  { %99 = vperm.xlu0 %6448, %v6868_v5  }
  0x76   :  { %6424 = vset.pattern.permute.xlu1 %v11404_v11 }
  0x77   :  { %119 = vperm.xlu0 %6448, %v6878_v7   ;;  %129 = vperm.xlu1 %6424, %v51_v25  }
  0x7b   :  { %124 = vperm.xlu0 %6448, %v6885_v8   ;;  %6425 = vset.pattern.permute.xlu1 %v11406_v1 }
  0x7c   :  { %384 = vperm.xlu1 %6425, %v51_v25  }
  0x7f   :  { %144 = vperm.xlu0 %6448, %v6896_v10  }
  0x80   :  { %6426 = vset.pattern.permute.xlu1 %v11404_v11 }
  0x81   :  { %134 = vperm.xlu1 %6426, %v52_v18  }
  0x83   :  { %149 = vperm.xlu0 %6448, %v6903_v12  }
  0x85   :  { %6427 = vset.pattern.permute.xlu1 %v11408_v0 }
  0x86   :  { %736 = vperm.xlu1 %6427, %v51_v25  }
  0x87   :  { %169 = vperm.xlu0 %6448, %v6911_v13  }
  0x8a   :  { %6428 = vset.pattern.permute.xlu1 %v11404_v11 }
  0x8b   :  { %139 = vperm.xlu1 %6428, %v6948_v20   ;;  %174 = vperm.xlu0 %6448, %v6921_v15  }
  0x8f   :  { %6429 = vset.pattern.permute.xlu1 %v11408_v0  ;;  %194 = vperm.xlu0 %6448, %v7009_v26  }
  0x90   :  { %740 = vperm.xlu1 %6429, %v52_v18  }
  0x93   :  { %199 = vperm.xlu0 %6448, %v7016_v27  }
  0x94   :  { %6430 = vset.pattern.permute.xlu1 %v11406_v1  ;;  %v7020_v28 = vpop.permute.xlu1 %336  ;;  %v7022_v29 = vpop.permute.xlu0 %688 }
  0x95   :  { %396 = vperm.xlu1 %6430, %v6896_v10  }
  0x97   :  { %6453 = vset.pattern.permute.xlu0 %v11408_v0 }
  0x98   :  { %v7026_v30 = vpop.permute.xlu1 %340  ;;  %v7028_v31 = vpop.permute.xlu0 %708  ;;  %788 = vperm.xlu0 %6453, %v7009_v26  }
  0x99   :  { %6431 = vset.pattern.permute.xlu1 %v11408_v0 }
  0x9a   :  { %744 = vperm.xlu1 %6431, %v6948_v20  }
  0x9c   :  { %v7033_v32 = vpop.permute.xlu1 %344  ;;  %v7035_v33 = vpop.permute.xlu0 %712  ;;  %792 = vperm.xlu0 %6453, %v7016_v27  }
  0x9d   :  { %v7253_v49 = vmul.f32 %v7106_v61, %v7033_v32  ;;  %v7257_v47 = vmul.f32 %v7113_v63, %v7033_v32  ;;  %v7269_v46 = vmul.f32 %v7119_v3, %v7035_v33  ;;  %v7273_v43 = vmul.f32 %v7122_v4, %v7035_v33 }
  0x9e   :  { %6432 = vset.pattern.permute.xlu1 %v11406_v1 }
  0x9f   :  { %400 = vperm.xlu1 %6432, %v6903_v12   ;;  %11634 = vst [vmem:[#allocation28_spill] sm:$0xff] %v7253_v49  ;;  %11635 = vst [vmem:[#allocation29_spill] sm:$0xff] %v7257_v47 }
  0xa0   :  { %v7040_v34 = vpop.permute.xlu0 %728  ;;  %11638 = vst [vmem:[#allocation32_spill] sm:$0xff] %v7269_v46  ;;  %11639 = vst [vmem:[#allocation33_spill] sm:$0xff] %v7273_v43 }
  0xa1   :  { %v7042_v35 = vpop.permute.xlu1 %692  ;;  %v7291_v46 = vmul.f32 %v7122_v4, %v7040_v34 }
  0xa2   :  { %v7299_v43 = vmul.f32 %v7116_v2, %v7042_v35 }
  0xa3   :  { %6433 = vset.pattern.permute.xlu1 %v11404_v11  ;;  %11643 = vst [vmem:[#allocation37_spill] sm:$0xff] %v7291_v46 }
  0xa4   :  { %154 = vperm.xlu1 %6433, %v56_v36   ;;  %v7048_v37 = vpop.permute.xlu0 %732  ;;  %11644 = vst [vmem:[#allocation38_spill] sm:$0xff] %v7299_v43 }
  0xa5   :  { %v7316_v46 = vmul.f32 %v7116_v2, %v7048_v37 }
  0xa6   :  { %v85_v38 = vpop.permute.xlu1 %84 }
  0xa7   :  { %v235_v5 = vmul.f32 %v7088_v54, %v85_v38  ;;  %v236_v6 = vmul.f32 %v7091_v55, %v85_v38  ;;  %v237_v7 = vmul.f32 %v7094_v56, %v85_v38  ;;  %v238_v8 = vmul.f32 %v7097_v57, %v85_v38  ;;  %11648 = vst [vmem:[#allocation42_spill] sm:$0xff] %v7316_v46 }
  0xa8   :  { %6434 = vset.pattern.permute.xlu1 %v11406_v1  ;;  %v7051_v39 = vpop.permute.xlu0 %748 }
  0xa9   :  { %404 = vperm.xlu1 %6434, %v56_v36   ;;  %v7337_v46 = vmul.f32 %v7119_v3, %v7051_v39 }
  0xab   :  { %v7053_v41 = vpop.permute.xlu1 %696  ;;  %11653 = vst [vmem:[#allocation47_spill] sm:$0xff] %v7337_v46 }
  0xac   :  { %v7055_v42 = vpop.permute.xlu0 %752  ;;  %v7360_v47 = vmul.f32 %v7109_v62, %v7053_v41  ;;  %v7368_v49 = vmul.f32 %v7119_v3, %v7053_v41 }
  0xad   :  { %6435 = vset.pattern.permute.xlu1 %v11404_v11 }
  0xae   :  { %159 = vperm.xlu1 %6435, %v6953_v21   ;;  %11655 = vst [vmem:[#allocation49_spill] sm:$0xff] %v7360_v47  ;;  %11657 = vst [vmem:[#allocation51_spill] sm:$0xff] %v7368_v49  ;;  %v7384_v49 = vmul.f32 %v7116_v2, %v7055_v42 }
  0xb0   :  { %v90_v44 = vpop.permute.xlu1 %89  ;;  %v7061_v45 = vpop.permute.xlu0 %768  ;;  %11660 = vst [vmem:[#allocation53_spill] sm:$0xff] %v7384_v49 }
  0xb1   :  { %v239_v50 = vmul.f32 %v7088_v54, %v90_v44  ;;  %v240_v51 = vmul.f32 %v7091_v55, %v90_v44  ;;  %v241_v52 = vmul.f32 %v7094_v56, %v90_v44 }
  0xb2   :  { %6436 = vset.pattern.permute.xlu1 %v11408_v0 }
  0xb3   :  { %756 = vperm.xlu1 %6436, %v56_v36  }
  0xb4   :  { %v7085_v53 = vpop.permute.xlu0 %772 }
  0xb5   :  { %v701_v58 = vpop.permute.xlu1 %700 }
  0xb6   :  { %v827_v18 = vmul.f32 %v7109_v62, %v701_v58  ;;  %v828_v19 = vmul.f32 %v7116_v2, %v701_v58  ;;  %v829_v20 = vmul.f32 %v7119_v3, %v701_v58  ;;  %v830_v25 = vmul.f32 %v7122_v4, %v701_v58 }
  0xb7   :  { %6437 = vset.pattern.permute.xlu1 %v11404_v11 }
  0xb8   :  { %164 = vperm.xlu1 %6437, %v6960_v22  }
  0xb9   :  { %v349_v9 = vpop.permute.xlu0 %348 }
  0xba   :  { %v475_v10 = vmul.f32 %v7100_v59, %v349_v9  ;;  %v476_v12 = vmul.f32 %v7103_v60, %v349_v9  ;;  %v477_v14 = vmul.f32 %v7106_v61, %v349_v9  ;;  %v478_v16 = vmul.f32 %v7113_v63, %v349_v9  ;;  %v7133_v17 = vpop.permute.xlu1 %356 }
  0xbb   :  { %v242_v9 = vmul.f32 %v7097_v57, %v90_v44 }
  0xbc   :  { %v587_v36 = vadd.f32 %v475_v10, %v235_v5  ;;  %v588_v38 = vadd.f32 %v476_v12, %v236_v6  ;;  %v589_v40 = vadd.f32 %v477_v14, %v237_v7  ;;  %v590_v48 = vadd.f32 %v478_v16, %v238_v8  ;;  %6438 = vset.pattern.permute.xlu1 %v11408_v0 }
  0xbd   :  { %v353_v11 = vpop.permute.xlu0 %352  ;;  %760 = vperm.xlu1 %6438, %v6953_v21  }
  0xbe   :  { %v7145_v1 = vadd.f32 %v827_v18, %v587_v36  ;;  %v7147_v58 = vadd.f32 %v828_v19, %v588_v38  ;;  %v7149_v5 = vadd.f32 %v829_v20, %v589_v40  ;;  %v7151_v6 = vadd.f32 %v830_v25, %v590_v48 }
  0xbf   :  { %v479_v7 = vmul.f32 %v7100_v59, %v353_v11  ;;  %v480_v8 = vmul.f32 %v7103_v60, %v353_v11  ;;  %v481_v10 = vmul.f32 %v7106_v61, %v353_v11  ;;  %v482_v12 = vmul.f32 %v7113_v63, %v353_v11  ;;  %v705_v44 = vpop.permute.xlu1 %704 }
  0xc0   :  { %11619 = vst [vmem:[#allocation14_spill] sm:$0xff] %v7145_v1  ;;  %11620 = vst [vmem:[#allocation15_spill] sm:$0xff] %v7147_v58  ;;  %v11623_v36 = vmov 1   ;;  %v831_v20 = vmul.f32 %v7109_v62, %v705_v44  ;;  %v832_v25 = vmul.f32 %v7116_v2, %v705_v44  ;;  %v833_v38 = vmul.f32 %v7119_v3, %v705_v44 }
  0xc1   :  { %11621 = vst [vmem:[#allocation16_spill] sm:$0xff] %v7149_v5  ;;  %11622 = vst [vmem:[#allocation17_spill] sm:$0xff] %v7151_v6  ;;  %v591_v14 = vadd.f32 %v479_v7, %v239_v50  ;;  %v592_v16 = vadd.f32 %v480_v8, %v240_v51  ;;  %v593_v21 = vadd.f32 %v481_v10, %v241_v52  ;;  %6439 = vset.pattern.permute.xlu1 %v11623_v36  ;;  %v7158_v19 = vpop.permute.xlu0 %368 }
  0xc2   :  { %v594_v18 = vadd.f32 %v482_v12, %v242_v9  ;;  %v834_v40 = vmul.f32 %v7122_v4, %v705_v44  ;;  %416 = vperm.xlu1 %6439, %v6911_v13   ;;  %v7167_v11 = vmul.f32 %v7100_v59, %v7020_v28  ;;  %v7171_v48 = vmul.f32 %v7103_v60, %v7020_v28 }
  0xc3   :  { %v7175_v50 = vmul.f32 %v7106_v61, %v7020_v28  ;;  %v7179_v51 = vmul.f32 %v7113_v63, %v7020_v28  ;;  %v7181_v52 = vadd.f32 %v831_v20, %v591_v14  ;;  %v7183_v9 = vadd.f32 %v832_v25, %v592_v16 }
  0xc4   :  { %v7185_v13 = vadd.f32 %v833_v38, %v593_v21  ;;  %v7187_v7 = vadd.f32 %v834_v40, %v594_v18  ;;  %v7189_v8 = vpop.permute.xlu1 %360  ;;  %v7193_v10 = vmul.f32 %v7109_v62, %v7022_v29  ;;  %v7197_v12 = vmul.f32 %v7116_v2, %v7022_v29 }
  0xc5   :  { %11624 = vst [vmem:[#allocation18_spill] sm:$0xff] %v7181_v52  ;;  %11625 = vst [vmem:[#allocation19_spill] sm:$0xff] %v7183_v9  ;;  %v7201_v28 = vmul.f32 %v7119_v3, %v7022_v29  ;;  %v7205_v44 = vmul.f32 %v7122_v4, %v7022_v29  ;;  %v7207_v14 = vpop.permute.xlu0 %372  ;;  %v7211_v16 = vmul.f32 %v7100_v59, %v7026_v30 }
  0xc6   :  { %11626 = vst [vmem:[#allocation20_spill] sm:$0xff] %v7185_v13  ;;  %11627 = vst [vmem:[#allocation21_spill] sm:$0xff] %v7187_v7  ;;  %v7215_v21 = vmul.f32 %v7103_v60, %v7026_v30  ;;  %v7219_v18 = vmul.f32 %v7106_v61, %v7026_v30  ;;  %v7223_v20 = vmul.f32 %v7113_v63, %v7026_v30  ;;  %6440 = vset.pattern.permute.xlu1 %v11408_v0 }
  0xc7   :  { %v7228_v29 = vmul.f32 %v7109_v62, %v7028_v31  ;;  %v7232_v25 = vmul.f32 %v7116_v2, %v7028_v31  ;;  %v7236_v38 = vmul.f32 %v7119_v3, %v7028_v31  ;;  %v7240_v40 = vmul.f32 %v7122_v4, %v7028_v31  ;;  %764 = vperm.xlu1 %6440, %v6960_v22  }
  0xc8   :  { %v7245_v30 = vmul.f32 %v7100_v59, %v7033_v32  ;;  %v7249_v0 = vmul.f32 %v7103_v60, %v7033_v32  ;;  %v7261_v31 = vmul.f32 %v7109_v62, %v7035_v33  ;;  %v7265_v22 = vmul.f32 %v7116_v2, %v7035_v33 }
  0xc9   :  { %11628 = vst [vmem:[#allocation22_spill] sm:$0xff] %v7228_v29  ;;  %11629 = vst [vmem:[#allocation23_spill] sm:$0xff] %v7232_v25  ;;  %v7279_v32 = vmul.f32 %v7109_v62, %v7040_v34  ;;  %v7295_v33 = vmul.f32 %v7109_v62, %v7042_v35  ;;  %v7324_v25 = vmul.f32 %v7122_v4, %v7048_v37 }
  0xca   :  { %11630 = vst [vmem:[#allocation24_spill] sm:$0xff] %v7236_v38  ;;  %11631 = vst [vmem:[#allocation25_spill] sm:$0xff] %v7240_v40  ;;  %v105_v40 = vpop.permute.xlu1 %104  ;;  %v7275_v38 = vpop.permute.xlu0 %388 }
  0xcb   :  { %11632 = vst [vmem:[#allocation26_spill] sm:$0xff] %v7245_v30  ;;  %11633 = vst [vmem:[#allocation27_spill] sm:$0xff] %v7249_v0  ;;  %6441 = vset.pattern.permute.xlu1 %v11623_v36  ;;  %v254_v29 = vmul.f32 %v7097_v57, %v105_v40  ;;  %v7372_v0 = vmul.f32 %v7122_v4, %v7053_v41  ;;  %v11658_v30 = vmov 0  }
  0xcc   :  { %11636 = vst [vmem:[#allocation30_spill] sm:$0xff] %v7261_v31  ;;  %11637 = vst [vmem:[#allocation31_spill] sm:$0xff] %v7265_v22  ;;  %v7283_v31 = vmul.f32 %v7116_v2, %v7040_v34  ;;  %v7287_v22 = vmul.f32 %v7119_v3, %v7040_v34  ;;  %v7312_v34 = vmul.f32 %v7109_v62, %v7048_v37  ;;  %420 = vperm.xlu1 %6441, %v6921_v15  }
  0xcd   :  { %11640 = vst [vmem:[#allocation34_spill] sm:$0xff] %v7279_v32  ;;  %v7303_v32 = vmul.f32 %v7119_v3, %v7042_v35  ;;  %11650 = vst [vmem:[#allocation44_spill] sm:$0xff] %v7324_v25  ;;  %v251_v15 = vmul.f32 %v7088_v54, %v105_v40  ;;  %v252_v25 = vmul.f32 %v7091_v55, %v105_v40 }
  0xce   :  { %11641 = vst [vmem:[#allocation35_spill] sm:$0xff] %v7283_v31  ;;  %11642 = vst [vmem:[#allocation36_spill] sm:$0xff] %v7287_v22  ;;  %v7307_v31 = vmul.f32 %v7122_v4, %v7042_v35  ;;  %v7320_v22 = vmul.f32 %v7119_v3, %v7048_v37  ;;  %v7329_v35 = vmul.f32 %v7109_v62, %v7051_v39  ;;  %v7343_v37 = vpop.permute.xlu0 %392  ;;  %v365_v27 = vpop.permute.xlu1 %364 }
  0xcf   :  { %11645 = vst [vmem:[#allocation39_spill] sm:$0xff] %v7303_v32  ;;  %11647 = vst [vmem:[#allocation41_spill] sm:$0xff] %v7312_v34  ;;  %v7333_v34 = vmul.f32 %v7116_v2, %v7051_v39  ;;  %v491_v46 = vmul.f32 %v7100_v59, %v365_v27  ;;  %v494_v26 = vmul.f32 %v7113_v63, %v365_v27 }
  0xd0   :  { %11646 = vst [vmem:[#allocation40_spill] sm:$0xff] %v7307_v31  ;;  %11649 = vst [vmem:[#allocation43_spill] sm:$0xff] %v7320_v22  ;;  %v7341_v22 = vmul.f32 %v7122_v4, %v7051_v39  ;;  %v492_v39 = vmul.f32 %v7103_v60, %v365_v27  ;;  %6442 = vset.pattern.permute.xlu1 %v11658_v30 }
  0xd1   :  { %11651 = vst [vmem:[#allocation45_spill] sm:$0xff] %v7329_v35  ;;  %11652 = vst [vmem:[#allocation46_spill] sm:$0xff] %v7333_v34  ;;  %v253_v35 = vmul.f32 %v7094_v56, %v105_v40  ;;  %v7352_v34 = vld [vmem:[%s11399_s0 + $0xb0] sm:$0xff]  ;;  %v7364_v40 = vmul.f32 %v7116_v2, %v7053_v41  ;;  %v603_v31 = vadd.f32 %v491_v46, %v251_v15 }
  0xd2   :  { %11654 = vst [vmem:[#allocation48_spill] sm:$0xff] %v7341_v22  ;;  %v493_v22 = vmul.f32 %v7106_v61, %v365_v27  ;;  %v604_v27 = vadd.f32 %v492_v39, %v252_v25  ;;  %v606_v43 = vadd.f32 %v494_v26, %v254_v29  ;;  %179 = vperm.xlu1 %6442, %v7352_v34   ;;  %v7376_v47 = vpop.permute.xlu0 %408 }
  0xd3   :  { %11656 = vst [vmem:[#allocation50_spill] sm:$0xff] %v7364_v40  ;;  %v7380_v40 = vmul.f32 %v7109_v62, %v7055_v42  ;;  %v497_v41 = vmul.f32 %v7106_v61, %v7158_v19  ;;  %v498_v46 = vmul.f32 %v7113_v63, %v7158_v19  ;;  %v7392_v26 = vmul.f32 %v7119_v3, %v7055_v42 }
  0xd4   :  { %v605_v32 = vadd.f32 %v493_v22, %v253_v35  ;;  %v7396_v29 = vmul.f32 %v7122_v4, %v7055_v42  ;;  %v7400_v25 = vmul.f32 %v7109_v62, %v7061_v45  ;;  %v7404_v22 = vmul.f32 %v7116_v2, %v7061_v45  ;;  %v110_v35 = vpop.permute.xlu1 %109 }
  0xd5   :  { %11659 = vst [vmem:[#allocation52_spill] sm:$0xff] %v7380_v40  ;;  %11661 = vst [vmem:[#allocation54_spill] sm:$0xff] %v7392_v26  ;;  %v7408_v15 = vmul.f32 %v7119_v3, %v7061_v45  ;;  %v7412_v39 = vmul.f32 %v7122_v4, %v7061_v45  ;;  %v257_v42 = vmul.f32 %v7094_v56, %v110_v35 }
  0xd6   :  { %11662 = vst [vmem:[#allocation55_spill] sm:$0xff] %v7396_v29  ;;  %11663 = vst [vmem:[#allocation56_spill] sm:$0xff] %v7400_v25  ;;  %v258_v49 = vmul.f32 %v7097_v57, %v110_v35  ;;  %v7418_v25 = vmul.f32 %v7109_v62, %v7085_v53  ;;  %v7426_v40 = vmul.f32 %v7119_v3, %v7085_v53  ;;  %6443 = vset.pattern.permute.xlu1 %v11623_v36 }
  0xd7   :  { %11664 = vst [vmem:[#allocation57_spill] sm:$0xff] %v7404_v22  ;;  %11665 = vst [vmem:[#allocation58_spill] sm:$0xff] %v7408_v15  ;;  %v7422_v22 = vmul.f32 %v7116_v2, %v7085_v53  ;;  %v7430_v45 = vmul.f32 %v7122_v4, %v7085_v53  ;;  %v7437_v15 = vmul.f32 %v7100_v59, %v7133_v17  ;;  %424 = vperm.xlu1 %6443, %v7352_v34  }
  0xd8   :  { %11666 = vst [vmem:[#allocation59_spill] sm:$0xff] %v7412_v39  ;;  %11667 = vst [vmem:[#allocation60_spill] sm:$0xff] %v7418_v25  ;;  %v7433_v39 = vpop.permute.xlu0 %412  ;;  %v7441_v25 = vmul.f32 %v7103_v60, %v7133_v17  ;;  %v7445_v29 = vadd.f32 %v498_v46, %v258_v49  ;;  %v7450_v53 = vmul.f32 %v7145_v1, %v7145_v1 }
  0xd9   :  { %11668 = vst [vmem:[#allocation61_spill] sm:$0xff] %v7422_v22  ;;  %11669 = vst [vmem:[#allocation62_spill] sm:$0xff] %v7426_v40  ;;  %v7443_v22 = vadd.f32 %v497_v41, %v257_v42  ;;  %v7458_v40 = vmul.f32 %v7106_v61, %v7133_v17  ;;  %v7462_v41 = vmul.f32 %v7113_v63, %v7133_v17 }
  0xda   :  { %11670 = vst [vmem:[#allocation63_spill] sm:$0xff] %v7430_v45  ;;  %11671 = vst [vmem:[#allocation64_spill] sm:$0xff] %v7437_v15  ;;  %v7454_v45 = vmul.f32 %v7147_v58, %v7147_v58  ;;  %v7466_v49 = vmul.f32 %v7149_v5, %v7149_v5  ;;  %v7470_v46 = vmul.f32 %v7151_v6, %v7151_v6 }
  0xdb   :  { %11672 = vst [vmem:[#allocation65_spill] sm:$0xff] %v7441_v25  ;;  %11673 = vst [vmem:[#allocation66_spill] sm:$0xff] %v7450_v53  ;;  %v495_v42 = vmul.f32 %v7100_v59, %v7158_v19  ;;  %v496_v26 = vmul.f32 %v7103_v60, %v7158_v19  ;;  %v717_v25 = vpop.permute.xlu1 %716  ;;  %v7492_v19 = vmul.f32 %v7106_v61, %v7189_v8  ;;  %6445 = vset.pattern.permute.xlu1 %v11658_v30 }
  0xdc   :  { %11674 = vst [vmem:[#allocation67_spill] sm:$0xff] %v7454_v45  ;;  %11675 = vst [vmem:[#allocation68_spill] sm:$0xff] %v7458_v40  ;;  %v843_v40 = vmul.f32 %v7109_v62, %v717_v25  ;;  %v844_v17 = vmul.f32 %v7116_v2, %v717_v25  ;;  %v846_v15 = vmul.f32 %v7122_v4, %v717_v25  ;;  %184 = vperm.xlu1 %6445, %v6967_v23  }
  0xdd   :  { %11676 = vst [vmem:[#allocation69_spill] sm:$0xff] %v7462_v41  ;;  %11677 = vst [vmem:[#allocation70_spill] sm:$0xff] %v7466_v49  ;;  %v845_v41 = vmul.f32 %v7119_v3, %v717_v25  ;;  %v7480_v49 = vpop.permute.xlu0 %428  ;;  %v7488_v45 = vmul.f32 %v7103_v60, %v7189_v8  ;;  %v7496_v53 = vmul.f32 %v7113_v63, %v7189_v8 }
  0xde   :  { %11678 = vst [vmem:[#allocation71_spill] sm:$0xff] %v7470_v46  ;;  %v7484_v46 = vmul.f32 %v7100_v59, %v7189_v8  ;;  %11681 = vst [vmem:[#allocation74_spill] sm:$0xff] %v7492_v19  ;;  %v7499_v25 = vadd.f32 %v843_v40, %v603_v31  ;;  %v7501_v6 = vadd.f32 %v844_v17, %v604_v27 }
  0xdf   :  { %11680 = vst [vmem:[#allocation73_spill] sm:$0xff] %v7488_v45  ;;  %11682 = vst [vmem:[#allocation75_spill] sm:$0xff] %v7496_v53  ;;  %v7503_v5 = vadd.f32 %v845_v41, %v605_v32  ;;  %v7510_v45 = vmul.f32 %v7181_v52, %v7181_v52  ;;  %v7514_v8 = vmul.f32 %v7183_v9, %v7183_v9  ;;  %v115_v41 = vpop.permute.xlu1 %114 }
  0xe0   :  { %11679 = vst [vmem:[#allocation72_spill] sm:$0xff] %v7484_v46  ;;  %11683 = vst [vmem:[#allocation76_spill] sm:$0xff] %v7499_v25  ;;  %v7505_v46 = vadd.f32 %v846_v15, %v606_v43  ;;  %v501_v31 = vmul.f32 %v7106_v61, %v7207_v14  ;;  %v502_v40 = vmul.f32 %v7113_v63, %v7207_v14 }
  0xe1   :  { %11684 = vst [vmem:[#allocation77_spill] sm:$0xff] %v7501_v6  ;;  %11685 = vst [vmem:[#allocation78_spill] sm:$0xff] %v7503_v5  ;;  %v7522_v43 = vmul.f32 %v7185_v13, %v7185_v13  ;;  %v7526_v32 = vmul.f32 %v7187_v7, %v7187_v7  ;;  %v7530_v27 = vmul.f32 %v7100_v59, %v7207_v14  ;;  %v7536_v17 = vpop.permute.xlu0 %432 }
  0xe2   :  { %11686 = vst [vmem:[#allocation79_spill] sm:$0xff] %v7505_v46  ;;  %11687 = vst [vmem:[#allocation80_spill] sm:$0xff] %v7510_v45  ;;  %v7534_v15 = vmul.f32 %v7103_v60, %v7207_v14  ;;  %v255_v46 = vmul.f32 %v7088_v54, %v110_v35  ;;  %v256_v5 = vmul.f32 %v7091_v55, %v110_v35  ;;  %v11696_v35 = vmov 2  }
  0xe3   :  { %11688 = vst [vmem:[#allocation81_spill] sm:$0xff] %v7514_v8  ;;  %11689 = vst [vmem:[#allocation82_spill] sm:$0xff] %v7522_v43  ;;  %v261_v6 = vmul.f32 %v7094_v56, %v115_v41  ;;  %v262_v25 = vmul.f32 %v7097_v57, %v115_v41  ;;  %v7544_v53 = vmul.f32 %v7100_v59, %v7275_v38  ;;  %6446 = vset.pattern.permute.xlu1 %v11696_v35 }
  0xe4   :  { %11690 = vst [vmem:[#allocation83_spill] sm:$0xff] %v7526_v32  ;;  %11691 = vst [vmem:[#allocation84_spill] sm:$0xff] %v7536_v17  ;;  %v7548_v19 = vmul.f32 %v7103_v60, %v7275_v38  ;;  %v7552_v14 = vmul.f32 %v7106_v61, %v7275_v38  ;;  %v7556_v17 = vmul.f32 %v7113_v63, %v7275_v38  ;;  %776 = vperm.xlu1 %6446, %v7352_v34  }
  0xe5   :  { %11692 = vst [vmem:[#allocation85_spill] sm:$0xff] %v7544_v53  ;;  %v7561_v32 = vmul.f32 %v7100_v59, %v7343_v37  ;;  %v7565_v53 = vmul.f32 %v7103_v60, %v7343_v37  ;;  %v7567_v43 = vadd.f32 %v501_v31, %v261_v6  ;;  %v7574_v38 = vmul.f32 %v7106_v61, %v7343_v37 }
  0xe6   :  { %11693 = vst [vmem:[#allocation86_spill] sm:$0xff] %v7548_v19  ;;  %11694 = vst [vmem:[#allocation87_spill] sm:$0xff] %v7552_v14  ;;  %v7569_v19 = vadd.f32 %v502_v40, %v262_v25  ;;  %v7586_v6 = vmul.f32 %v7103_v60, %v7376_v47  ;;  %v7590_v25 = vmul.f32 %v7106_v61, %v7376_v47 }
  0xe7   :  { %11695 = vst [vmem:[#allocation88_spill] sm:$0xff] %v7556_v17  ;;  %11697 = vst [vmem:[#allocation89_spill] sm:$0xff] %v7561_v32  ;;  %v7578_v17 = vmul.f32 %v7113_v63, %v7343_v37  ;;  %v7582_v32 = vmul.f32 %v7100_v59, %v7376_v47  ;;  %v7594_v34 = vmul.f32 %v7113_v63, %v7376_v47  ;;  %v70_v37 = vpop.permute.xlu0 %69 }
  0xe8   :  { %11698 = vst [vmem:[#allocation90_spill] sm:$0xff] %v7565_v53  ;;  %11699 = vst [vmem:[#allocation91_spill] sm:$0xff] %v7574_v38  ;;  %v607_v31 = vadd.f32 %v495_v42, %v255_v46  ;;  %v608_v40 = vadd.f32 %v496_v26, %v256_v5  ;;  %v721_v53 = vpop.permute.xlu1 %720  ;;  %v225_v38 = vmul.f32 %v7094_v56, %v70_v37  ;;  %6447 = vset.pattern.permute.xlu1 %v11658_v30 }
  0xe9   :  { %11700 = vst [vmem:[#allocation92_spill] sm:$0xff] %v7578_v17  ;;  %11701 = vst [vmem:[#allocation93_spill] sm:$0xff] %v7582_v32  ;;  %v223_v17 = vmul.f32 %v7088_v54, %v70_v37  ;;  %v224_v32 = vmul.f32 %v7091_v55, %v70_v37  ;;  %v847_v14 = vmul.f32 %v7109_v62, %v721_v53  ;;  %189 = vperm.xlu1 %6447, %v6974_v24  }
  0xea   :  { %11702 = vst [vmem:[#allocation94_spill] sm:$0xff] %v7586_v6  ;;  %11703 = vst [vmem:[#allocation95_spill] sm:$0xff] %v7590_v25  ;;  %v226_v6 = vmul.f32 %v7097_v57, %v70_v37  ;;  %v848_v25 = vmul.f32 %v7116_v2, %v721_v53  ;;  %v849_v8 = vmul.f32 %v7119_v3, %v721_v53 }
  0xeb   :  { %11704 = vst [vmem:[#allocation96_spill] sm:$0xff] %v7594_v34  ;;  %v850_v47 = vmul.f32 %v7122_v4, %v721_v53  ;;  %v575_v5 = vadd.f32 %v7167_v11, %v223_v17  ;;  %v576_v26 = vadd.f32 %v7171_v48, %v224_v32  ;;  %v577_v46 = vadd.f32 %v7175_v50, %v225_v38  ;;  %v75_v7 = vpop.permute.xlu0 %74 }
  0xec   :  { %v578_v42 = vadd.f32 %v7179_v51, %v226_v6  ;;  %v7610_v37 = vadd.f32 %v847_v14, %v607_v31  ;;  %v7612_v34 = vadd.f32 %v848_v25, %v608_v40  ;;  %v7615_v45 = vadd.f32 %v849_v8, %v7443_v22  ;;  %v7632_v32 = vpop.permute.xlu1 %376 }
  0xed   :  { %v7618_v53 = vadd.f32 %v850_v47, %v7445_v29  ;;  %v7621_v11 = vadd.f32 %v7193_v10, %v575_v5  ;;  %v7624_v48 = vadd.f32 %v7197_v12, %v576_v26  ;;  %v7627_v50 = vadd.f32 %v7201_v28, %v577_v46  ;;  %6449 = vset.pattern.permute.xlu1 %v11696_v35 }
  0xee   :  { %11705 = vst [vmem:[#allocation97_spill] sm:$0xff] %v7610_v37  ;;  %11706 = vst [vmem:[#allocation98_spill] sm:$0xff] %v7612_v34  ;;  %v7630_v51 = vadd.f32 %v7205_v44, %v578_v42  ;;  %v7636_v22 = vmul.f32 %v7100_v59, %v7433_v39  ;;  %v7640_v29 = vmul.f32 %v7103_v60, %v7433_v39  ;;  %780 = vperm.xlu1 %6449, %v6967_v23  }
  0xef   :  { %11707 = vst [vmem:[#allocation99_spill] sm:$0xff] %v7615_v45  ;;  %11708 = vst [vmem:[#allocation100_spill] sm:$0xff] %v7618_v53  ;;  %v7644_v10 = vmul.f32 %v7106_v61, %v7433_v39  ;;  %v7648_v12 = vmul.f32 %v7113_v63, %v7433_v39  ;;  %v7652_v28 = vmul.f32 %v7100_v59, %v7480_v49  ;;  %v80_v25 = vpop.permute.xlu0 %79  ;;  %v11728_v53 = vld [vmem:[#allocation28_spill] sm:$0xff]  ;;  %v11729_v45 = vld [vmem:[#allocation29_spill] sm:$0xff] }
  0xf0   :  { %11709 = vst [vmem:[#allocation101_spill] sm:$0xff] %v7621_v11  ;;  %11710 = vst [vmem:[#allocation102_spill] sm:$0xff] %v7624_v48  ;;  %v7656_v44 = vmul.f32 %v7103_v60, %v7480_v49  ;;  %v259_v8 = vmul.f32 %v7088_v54, %v115_v41  ;;  %v260_v17 = vmul.f32 %v7091_v55, %v115_v41  ;;  %v725_v46 = vpop.permute.xlu1 %724 }
  0xf1   :  { %11711 = vst [vmem:[#allocation103_spill] sm:$0xff] %v7627_v50  ;;  %11712 = vst [vmem:[#allocation104_spill] sm:$0xff] %v7630_v51  ;;  %v227_v14 = vmul.f32 %v7088_v54, %v75_v7  ;;  %v228_v38 = vmul.f32 %v7091_v55, %v75_v7  ;;  %v229_v39 = vmul.f32 %v7094_v56, %v75_v7 }
  0xf2   :  { %11713 = vst [vmem:[#allocation105_spill] sm:$0xff] %v7636_v22  ;;  %11714 = vst [vmem:[#allocation106_spill] sm:$0xff] %v7640_v29  ;;  %v230_v6 = vmul.f32 %v7097_v57, %v75_v7  ;;  %v1175_v31 = vmul.f32 %v7621_v11, %v7621_v11  ;;  %v1176_v40 = vmul.f32 %v7624_v48, %v7624_v48  ;;  %6450 = vset.pattern.permute.xlu1 %v11623_v36 }
  0xf3   :  { %11715 = vst [vmem:[#allocation107_spill] sm:$0xff] %v7644_v10  ;;  %11716 = vst [vmem:[#allocation108_spill] sm:$0xff] %v7648_v12  ;;  %v1177_v41 = vmul.f32 %v7627_v50, %v7627_v50  ;;  %v1178_v47 = vmul.f32 %v7630_v51, %v7630_v51  ;;  %v579_v5 = vadd.f32 %v7211_v16, %v227_v14  ;;  %v11720_v12 = vld [vmem:[#allocation38_spill] sm:$0xff] }
  0xf4   :  { %11717 = vst [vmem:[#allocation109_spill] sm:$0xff] %v7652_v28  ;;  %11718 = vst [vmem:[#allocation110_spill] sm:$0xff] %v7656_v44  ;;  %v580_v26 = vadd.f32 %v7215_v21, %v228_v38  ;;  %v581_v7 = vadd.f32 %v7219_v18, %v229_v39  ;;  %v582_v23 = vadd.f32 %v7223_v20, %v230_v6  ;;  %v11722_v21 = vld [vmem:[#allocation39_spill] sm:$0xff]  ;;  %v11724_v18 = vld [vmem:[#allocation40_spill] sm:$0xff] }
  0xf5   :  { %v231_v42 = vmul.f32 %v7088_v54, %v80_v25  ;;  %v232_v44 = vmul.f32 %v7091_v55, %v80_v25  ;;  %v233_v28 = vmul.f32 %v7094_v56, %v80_v25  ;;  %v234_v29 = vmul.f32 %v7097_v57, %v80_v25  ;;  %v11726_v38 = vld [vmem:[#allocation26_spill] sm:$0xff]  ;;  %v11727_v6 = vld [vmem:[#allocation27_spill] sm:$0xff] }
  0xf6   :  { %v7683_v22 = vadd.f32 %v7295_v33, %v579_v5  ;;  %v7686_v16 = vadd.f32 %v11720_v12, %v580_v26  ;;  %v7689_v14 = vadd.f32 %v11722_v21, %v581_v7  ;;  %v7692_v20 = vadd.f32 %v11724_v18, %v582_v23  ;;  %v11730_v5 = vld [vmem:[#allocation8_spill] sm:$0xff]  ;;  %v11733_v18 = vld [vmem:[#allocation50_spill] sm:$0xff] }
  0xf7   :  { %v583_v39 = vadd.f32 %v11726_v38, %v231_v42  ;;  %v584_v10 = vadd.f32 %v11727_v6, %v232_v44  ;;  %v585_v25 = vadd.f32 %v11728_v53, %v233_v28  ;;  %v586_v33 = vadd.f32 %v11729_v45, %v234_v29  ;;  %436 = vperm.xlu1 %6450, %v11730_v5   ;;  %v7716_v28 = vpop.permute.xlu1 %380  ;;  %v11731_v42 = vld [vmem:[#allocation49_spill] sm:$0xff]  ;;  %v11735_v6 = vld [vmem:[#allocation51_spill] sm:$0xff] }
  0xf8   :  { %11719 = vst [vmem:[#allocation111_spill] sm:$0xff] %v7683_v22  ;;  %11721 = vst [vmem:[#allocation38_spill] sm:$0xff] %v7686_v16  ;;  %v1039_v12 = vadd.f32 %v7683_v22, %v7621_v11  ;;  %v1072_v26 = vadd.f32 %v7686_v16, %v7624_v48  ;;  %v1105_v7 = vadd.f32 %v7689_v14, %v7627_v50  ;;  %v11774_v48 = vld [vmem:[#allocation31_spill] sm:$0xff] }
  0xf9   :  { %11723 = vst [vmem:[#allocation39_spill] sm:$0xff] %v7689_v14  ;;  %11725 = vst [vmem:[#allocation40_spill] sm:$0xff] %v7692_v20  ;;  %v1138_v23 = vadd.f32 %v7692_v20, %v7630_v51  ;;  %v1179_v44 = vmul.f32 %v7683_v22, %v7683_v22  ;;  %v1180_v45 = vmul.f32 %v7686_v16, %v7686_v16 }
  0xfa   :  { %v1181_v53 = vmul.f32 %v7689_v14, %v7689_v14  ;;  %v1182_v29 = vmul.f32 %v7692_v20, %v7692_v20  ;;  %v7719_v21 = vadd.f32 %v11731_v42, %v583_v39  ;;  %v7722_v38 = vadd.f32 %v11733_v18, %v584_v10 }
  0xfb   :  { %v7725_v5 = vadd.f32 %v11735_v6, %v585_v25  ;;  %v7728_v50 = vadd.f32 %v7372_v0, %v586_v33  ;;  %v1287_v51 = vadd.f32 %v1179_v44, %v1175_v31  ;;  %v1320_v22 = vadd.f32 %v1180_v45, %v1176_v40  ;;  %6451 = vset.pattern.permute.xlu1 %v11696_v35  ;;  %v95_v45 = vpop.permute.xlu0 %94 }
  0xfc   :  { %11732 = vst [vmem:[#allocation26_spill] sm:$0xff] %v7719_v21  ;;  %11734 = vst [vmem:[#allocation27_spill] sm:$0xff] %v7722_v38  ;;  %v1353_v14 = vadd.f32 %v1181_v53, %v1177_v41  ;;  %v1386_v16 = vadd.f32 %v1182_v29, %v1178_v47  ;;  %v1040_v20 = vadd.f32 %v1039_v12, %v7719_v21  ;;  %784 = vperm.xlu1 %6451, %v6974_v24   ;;  %v7754_v12 = vpop.permute.xlu1 %129 }
  0xfd   :  { %11736 = vst [vmem:[#allocation28_spill] sm:$0xff] %v7725_v5  ;;  %11737 = vst [vmem:[#allocation29_spill] sm:$0xff] %v7728_v50  ;;  %v1073_v39 = vadd.f32 %v1072_v26, %v7722_v38  ;;  %v1106_v42 = vadd.f32 %v1105_v7, %v7725_v5  ;;  %v1139_v10 = vadd.f32 %v1138_v23, %v7728_v50 }
  0xfe   :  { %v1183_v0 = vmul.f32 %v7719_v21, %v7719_v21  ;;  %v1184_v31 = vmul.f32 %v7722_v38, %v7722_v38  ;;  %v1185_v40 = vmul.f32 %v7725_v5, %v7725_v5  ;;  %v1186_v41 = vmul.f32 %v7728_v50, %v7728_v50  ;;  %v11754_v50 = vld [vmem:[#allocation69_spill] sm:$0xff] }
  0xff   :  { %v7746_v47 = vmul.f32 %v7106_v61, %v7480_v49  ;;  %v7750_v25 = vmul.f32 %v7113_v63, %v7480_v49  ;;  %v611_v24 = vadd.f32 %v7530_v27, %v259_v8  ;;  %v612_v33 = vadd.f32 %v7534_v15, %v260_v17  ;;  %v11740_v8 = vld [vmem:[#allocation16_spill] sm:$0xff]  ;;  %v100_v21 = vpop.permute.xlu0 %99 }
 0x100   :  { %v1288_v26 = vadd.f32 %v1287_v51, %v1183_v0  ;;  %v1321_v7 = vadd.f32 %v1320_v22, %v1184_v31  ;;  %v1354_v23 = vadd.f32 %v1353_v14, %v1185_v40  ;;  %v1387_v44 = vadd.f32 %v1386_v16, %v1186_v41  ;;  %6452 = vset.pattern.permute.xlu1 %v11623_v36  ;;  %v11741_v22 = vld [vmem:[#allocation17_spill] sm:$0xff]  ;;  %v7780_v31 = vpop.permute.xlu1 %384  ;;  %v66_v40 = vld [vmem:[%s11399_s0 + $0xd8] sm:$0xff]  ;;  %v11747_v41 = vld [vmem:[#allocation66_spill] sm:$0xff] }
 0x101   :  { %11738 = vst [vmem:[#allocation8_spill] sm:$0xff] %v7746_v47  ;;  %11739 = vst [vmem:[#allocation49_spill] sm:$0xff] %v7750_v25  ;;  %v851_v53 = vmul.f32 %v7109_v62, %v725_v46  ;;  %v852_v29 = vmul.f32 %v7116_v2, %v725_v46  ;;  %v853_v18 = vmul.f32 %v7119_v3, %v725_v46  ;;  %v11742_v16 = vld [vmem:[#allocation9_spill] sm:$0xff]  ;;  %v6462_v47 = vld [vmem:[#allocation2 + $0x10] ss:$8 sps:$4 sm:$0xff]  }
 0x102   :  { %v854_v49 = vmul.f32 %v7122_v4, %v725_v46  ;;  %v1041_v27 = vadd.f32 %v1040_v20, %v7145_v1  ;;  %v1074_v15 = vadd.f32 %v1073_v39, %v7147_v58  ;;  %v1107_v51 = vadd.f32 %v1106_v42, %v11740_v8  ;;  %440 = vperm.xlu1 %6452, %v11742_v16   ;;  %v11752_v8 = vld [vmem:[#allocation65_spill] sm:$0xff] }
 0x103   :  { %v1140_v17 = vadd.f32 %v1139_v10, %v11741_v22  ;;  %v7766_v14 = vadd.f32 %v851_v53, %v611_v24  ;;  %v7768_v6 = vadd.f32 %v852_v29, %v612_v33  ;;  %v7771_v0 = vadd.f32 %v853_v18, %v7567_v43  ;;  %v11748_v24 = vld [vmem:[#allocation67_spill] sm:$0xff]  ;;  %v11753_v22 = vld [vmem:[#allocation68_spill] sm:$0xff] }
 0x104   :  { %v7774_v46 = vadd.f32 %v854_v49, %v7569_v19  ;;  %v243_v20 = vmul.f32 %v7088_v54, %v95_v45  ;;  %v244_v39 = vmul.f32 %v7091_v55, %v95_v45  ;;  %v245_v42 = vmul.f32 %v7094_v56, %v95_v45  ;;  %v11749_v19 = vld [vmem:[#allocation70_spill] sm:$0xff]  ;;  %v11750_v29 = vld [vmem:[#allocation71_spill] sm:$0xff]  ;;  %v11751_v49 = vld [vmem:[#allocation64_spill] sm:$0xff] }
 0x105   :  { %11743 = vst [vmem:[#allocation50_spill] sm:$0xff] %v7766_v14  ;;  %11744 = vst [vmem:[#allocation51_spill] sm:$0xff] %v7768_v6  ;;  %v246_v10 = vmul.f32 %v7097_v57, %v95_v45  ;;  %v1289_v43 = vadd.f32 %v1288_v26, %v11747_v41  ;;  %v1322_v33 = vadd.f32 %v1321_v7, %v11748_v24 }
 0x106   :  { %11745 = vst [vmem:[#allocation9_spill] sm:$0xff] %v7771_v0  ;;  %11746 = vst [vmem:[#allocation112_spill] sm:$0xff] %v7774_v46  ;;  %v1355_v53 = vadd.f32 %v1354_v23, %v11749_v19  ;;  %v1388_v18 = vadd.f32 %v1387_v44, %v11750_v29  ;;  %v595_v16 = vadd.f32 %v11751_v49, %v243_v20  ;;  %6454 = vset.pattern.permute.xlu1 %v11658_v30  ;;  %v11755_v23 = vld [vmem:[#allocation21_spill] sm:$0xff]  ;;  %v11756_v44 = vld [vmem:[#allocation22_spill] sm:$0xff]  ;;  %v7814_v49 = vpop.permute.xlu1 %134 }
 0x107   :  { %v596_v5 = vadd.f32 %v11752_v8, %v244_v39  ;;  %v597_v45 = vadd.f32 %v11753_v22, %v245_v42  ;;  %v598_v1 = vadd.f32 %v11754_v50, %v246_v10  ;;  %v1042_v58 = vadd.f32 %v1041_v27, %v7181_v52  ;;  %204 = vperm.xlu1 %6454, %v66_v40   ;;  %v11758_v8 = vld [vmem:[#allocation23_spill] sm:$0xff]  ;;  %v11760_v22 = vld [vmem:[#allocation24_spill] sm:$0xff]  ;;  %v11762_v42 = vld [vmem:[#allocation25_spill] sm:$0xff] }
 0x108   :  { %v1075_v26 = vadd.f32 %v1074_v15, %v7183_v9  ;;  %v1108_v7 = vadd.f32 %v1107_v51, %v7185_v13  ;;  %v1141_v41 = vadd.f32 %v1140_v17, %v11755_v23  ;;  %v7799_v20 = vadd.f32 %v11756_v44, %v595_v16  ;;  %v11764_v27 = vld [vmem:[#allocation80_spill] sm:$0xff]  ;;  %v11765_v15 = vld [vmem:[#allocation81_spill] sm:$0xff]  ;;  %v11766_v51 = vld [vmem:[#allocation82_spill] sm:$0xff] }
 0x109   :  { %v7802_v39 = vadd.f32 %v11758_v8, %v596_v5  ;;  %v7805_v50 = vadd.f32 %v11760_v22, %v597_v45  ;;  %v7808_v30 = vadd.f32 %v11762_v42, %v598_v1  ;;  %v1290_v10 = vadd.f32 %v1289_v43, %v11764_v27  ;;  %v11767_v17 = vld [vmem:[#allocation83_spill] sm:$0xff]  ;;  %v120_v42 = vpop.permute.xlu0 %119  ;;  %v11772_v9 = vld [vmem:[#allocation30_spill] sm:$0xff] }
 0x10a   :  { %11757 = vst [vmem:[#allocation66_spill] sm:$0xff] %v7799_v20  ;;  %v1323_v24 = vadd.f32 %v1322_v33, %v11765_v15  ;;  %v1356_v19 = vadd.f32 %v1355_v53, %v11766_v51  ;;  %v1389_v29 = vadd.f32 %v1388_v18, %v11767_v17  ;;  %v503_v5 = vmul.f32 %v7100_v59, %v7632_v32 }
 0x10b   :  { %11759 = vst [vmem:[#allocation67_spill] sm:$0xff] %v7802_v39  ;;  %11761 = vst [vmem:[#allocation70_spill] sm:$0xff] %v7805_v50  ;;  %v504_v16 = vmul.f32 %v7103_v60, %v7632_v32  ;;  %v505_v1 = vmul.f32 %v7106_v61, %v7632_v32  ;;  %v506_v43 = vmul.f32 %v7113_v63, %v7632_v32  ;;  %6455 = vset.pattern.permute.xlu1 %v11623_v36 }
 0x10c   :  { %11763 = vst [vmem:[#allocation71_spill] sm:$0xff] %v7808_v30  ;;  %v1195_v33 = vmul.f32 %v7799_v20, %v7799_v20  ;;  %v1196_v53 = vmul.f32 %v7802_v39, %v7802_v39  ;;  %v1197_v18 = vmul.f32 %v7805_v50, %v7805_v50  ;;  %v1198_v45 = vmul.f32 %v7808_v30, %v7808_v30 }
 0x10d   :  { %v1043_v44 = vadd.f32 %v1042_v58, %v7799_v20  ;;  %v1076_v8 = vadd.f32 %v1075_v26, %v7802_v39  ;;  %v1109_v32 = vadd.f32 %v1108_v7, %v7805_v50  ;;  %v1142_v22 = vadd.f32 %v1141_v41, %v7808_v30  ;;  %444 = vperm.xlu1 %6455, %v66_v40   ;;  %v7841_v20 = vpop.permute.xlu1 %736 }
 0x10e   :  { %v1291_v27 = vadd.f32 %v1290_v10, %v1195_v33  ;;  %v1324_v15 = vadd.f32 %v1323_v24, %v1196_v53  ;;  %v1357_v51 = vadd.f32 %v1356_v19, %v1197_v18  ;;  %v1390_v17 = vadd.f32 %v1389_v29, %v1198_v45  ;;  %v11768_v24 = vld [vmem:[#allocation72_spill] sm:$0xff]  ;;  %v11769_v29 = vld [vmem:[#allocation73_spill] sm:$0xff]  ;;  %v11770_v53 = vld [vmem:[#allocation74_spill] sm:$0xff] }
 0x10f   :  { %v247_v13 = vmul.f32 %v7088_v54, %v100_v21  ;;  %v248_v23 = vmul.f32 %v7091_v55, %v100_v21  ;;  %v249_v36 = vmul.f32 %v7094_v56, %v100_v21  ;;  %v250_v58 = vmul.f32 %v7097_v57, %v100_v21  ;;  %v11771_v45 = vld [vmem:[#allocation75_spill] sm:$0xff] }
 0x110   :  { %v263_v26 = vmul.f32 %v7088_v54, %v120_v42  ;;  %v264_v7 = vmul.f32 %v7091_v55, %v120_v42  ;;  %v265_v41 = vmul.f32 %v7094_v56, %v120_v42  ;;  %v266_v10 = vmul.f32 %v7097_v57, %v120_v42 }
 0x111   :  { %v599_v19 = vadd.f32 %v11768_v24, %v247_v13  ;;  %v600_v33 = vadd.f32 %v11769_v29, %v248_v23  ;;  %v601_v18 = vadd.f32 %v11770_v53, %v249_v36  ;;  %v602_v50 = vadd.f32 %v11771_v45, %v250_v58  ;;  %6456 = vset.pattern.permute.xlu1 %v11696_v35  ;;  %v11776_v13 = vld [vmem:[#allocation32_spill] sm:$0xff]  ;;  %v11778_v23 = vld [vmem:[#allocation33_spill] sm:$0xff]  ;;  %v11780_v58 = vld [vmem:[#allocation34_spill] sm:$0xff] }
 0x112   :  { %v615_v21 = vadd.f32 %v503_v5, %v263_v26  ;;  %v616_v30 = vadd.f32 %v504_v16, %v264_v7  ;;  %v617_v52 = vadd.f32 %v505_v1, %v265_v41  ;;  %v618_v39 = vadd.f32 %v506_v43, %v266_v10  ;;  %796 = vperm.xlu1 %6456, %v66_v40   ;;  %v11782_v35 = vld [vmem:[#allocation35_spill] sm:$0xff]  ;;  %v11784_v16 = vld [vmem:[#allocation36_spill] sm:$0xff]  ;;  %v11790_v7 = vld [vmem:[#allocation77_spill] sm:$0xff] }
 0x113   :  { %v7853_v38 = vadd.f32 %v11772_v9, %v599_v19  ;;  %v7856_v42 = vadd.f32 %v11774_v48, %v600_v33  ;;  %v7859_v24 = vadd.f32 %v11776_v13, %v601_v18  ;;  %v7862_v36 = vadd.f32 %v11778_v23, %v602_v50  ;;  %v11786_v9 = vld [vmem:[#allocation37_spill] sm:$0xff]  ;;  %v7876_v48 = vpop.permute.xlu1 %139  ;;  %v11789_v43 = vld [vmem:[#allocation76_spill] sm:$0xff]  ;;  %v11791_v41 = vld [vmem:[#allocation78_spill] sm:$0xff] }
 0x114   :  { %v7865_v29 = vadd.f32 %v11780_v58, %v615_v21  ;;  %v7868_v5 = vadd.f32 %v11782_v35, %v616_v30  ;;  %v7871_v40 = vadd.f32 %v11784_v16, %v617_v52  ;;  %v7874_v1 = vadd.f32 %v11786_v9, %v618_v39  ;;  %11788 = vst [vmem:[#allocation80_spill] sm:$0xff] %v7876_v48  ;;  %v11792_v19 = vld [vmem:[#allocation79_spill] sm:$0xff]  ;;  %v6457_v33 = vld [vmem:[#allocation2 + $0x4] ss:$8 sps:$4 sm:$0xff]   ;;  %v6459_v52 = vld [vmem:[#allocation2] ss:$8 sps:$4 sm:$0xff]  }
 0x115   :  { %11773 = vst [vmem:[#allocation64_spill] sm:$0xff] %v7853_v38  ;;  %11775 = vst [vmem:[#allocation65_spill] sm:$0xff] %v7856_v42  ;;  %v1203_v26 = vmul.f32 %v11789_v43, %v11789_v43  ;;  %v1204_v50 = vmul.f32 %v11790_v7, %v11790_v7  ;;  %v1205_v10 = vmul.f32 %v11791_v41, %v11791_v41  ;;  %v6460_v21 = vld [vmem:[#allocation2 + $0x14] ss:$8 sps:$4 sm:$0xff]   ;;  %2383 = vmatprep.subr.bf16.mxu0 %v6457_v33  ;;  %v11793_v48 = vld [vmem:[#allocation84_spill] sm:$0xff] }
 0x116   :  { %11777 = vst [vmem:[#allocation68_spill] sm:$0xff] %v7859_v24  ;;  %11779 = vst [vmem:[#allocation69_spill] sm:$0xff] %v7862_v36  ;;  %v1206_v30 = vmul.f32 %v11792_v19, %v11792_v19  ;;  %v1199_v39 = vmul.f32 %v7853_v38, %v7853_v38  ;;  %v1200_v53 = vmul.f32 %v7856_v42, %v7856_v42  ;;  %2384 = vmatpush1.bf16.msra.mxu0 %v6459_v52  ;;  %v11799_v52 = vld [vmem:[#allocation100_spill] sm:$0xff] }
 0x117   :  { %11781 = vst [vmem:[#allocation22_spill] sm:$0xff] %v7865_v29  ;;  %11783 = vst [vmem:[#allocation23_spill] sm:$0xff] %v7868_v5  ;;  %v1201_v18 = vmul.f32 %v7859_v24, %v7859_v24  ;;  %v1202_v45 = vmul.f32 %v7862_v36, %v7862_v36  ;;  %v1044_v13 = vadd.f32 %v1043_v44, %v7853_v38  ;;  %2385 = vmatprep.subr.bf16.mxu0 %v6460_v21 }
 0x118   :  { %11785 = vst [vmem:[#allocation24_spill] sm:$0xff] %v7871_v40  ;;  %11787 = vst [vmem:[#allocation25_spill] sm:$0xff] %v7874_v1  ;;  %v1077_v23 = vadd.f32 %v1076_v8, %v7856_v42  ;;  %v1110_v58 = vadd.f32 %v1109_v32, %v7859_v24  ;;  %v1143_v35 = vadd.f32 %v1142_v22, %v7862_v36  ;;  %v7914_v22 = vpop.permute.xlu1 %740 }
 0x119   :  { %v1292_v16 = vadd.f32 %v1291_v27, %v1199_v39  ;;  %v1325_v9 = vadd.f32 %v1324_v15, %v1200_v53  ;;  %v1358_v11 = vadd.f32 %v1357_v51, %v1201_v18  ;;  %v1391_v25 = vadd.f32 %v1390_v17, %v1202_v45  ;;  %v6463_v27 = vld [vmem:[#allocation2 + $0x24] ss:$8 sps:$4 sm:$0xff]   ;;  %v11798_v17 = vld [vmem:[#allocation99_spill] sm:$0xff] }
 0x11a   :  { %v7900_v1 = vmul.f32 %v7100_v59, %v11793_v48  ;;  %v7904_v44 = vmul.f32 %v7103_v60, %v11793_v48  ;;  %v7908_v8 = vmul.f32 %v7106_v61, %v11793_v48  ;;  %v7912_v32 = vmul.f32 %v7113_v63, %v11793_v48  ;;  %2386 = vmatpush1.bf16.msra.mxu0 %v6462_v47 }
 0x11b   :  { %v1207_v15 = vmul.f32 %v7610_v37, %v7610_v37  ;;  %v1208_v51 = vmul.f32 %v7612_v34, %v7612_v34  ;;  %v1209_v33 = vmul.f32 %v11798_v17, %v11798_v17  ;;  %v1210_v39 = vmul.f32 %v11799_v52, %v11799_v52  ;;  %2387 = vmatprep.subr.bf16.mxu0 %v6463_v27 }
 0x11c   :  { %11794 = vst [vmem:[#allocation81_spill] sm:$0xff] %v7900_v1  ;;  %11795 = vst [vmem:[#allocation82_spill] sm:$0xff] %v7904_v44  ;;  %v1045_v53 = vadd.f32 %v1044_v13, %v11789_v43  ;;  %v1078_v48 = vadd.f32 %v1077_v23, %v11790_v7  ;;  %v1111_v18 = vadd.f32 %v1110_v58, %v11791_v41 }
 0x11d   :  { %11796 = vst [vmem:[#allocation83_spill] sm:$0xff] %v7908_v8  ;;  %11797 = vst [vmem:[#allocation72_spill] sm:$0xff] %v7912_v32  ;;  %v1144_v45 = vadd.f32 %v1143_v35, %v11792_v19  ;;  %v1293_v21 = vadd.f32 %v1292_v16, %v1203_v26  ;;  %v1326_v24 = vadd.f32 %v1325_v9, %v1204_v50  ;;  %v125_v50 = vpop.permute.xlu0 %124 }
 0x11e   :  { %v1359_v36 = vadd.f32 %v1358_v11, %v1205_v10  ;;  %v1392_v38 = vadd.f32 %v1391_v25, %v1206_v30  ;;  %v1211_v42 = vmul.f32 %v7766_v14, %v7766_v14  ;;  %v1212_v44 = vmul.f32 %v7768_v6, %v7768_v6  ;;  %v7944_v10 = vpop.permute.xlu1 %396 }
 0x11f   :  { %v1213_v13 = vmul.f32 %v7771_v0, %v7771_v0  ;;  %v1214_v23 = vmul.f32 %v7774_v46, %v7774_v46  ;;  %v507_v26 = vmul.f32 %v7100_v59, %v7716_v28  ;;  %v508_v11 = vmul.f32 %v7103_v60, %v7716_v28 }
 0x120   :  { %v509_v47 = vmul.f32 %v7106_v61, %v7716_v28  ;;  %v510_v25 = vmul.f32 %v7113_v63, %v7716_v28  ;;  %v1046_v30 = vadd.f32 %v1045_v53, %v7610_v37  ;;  %v1079_v58 = vadd.f32 %v1078_v48, %v7612_v34 }
 0x121   :  { %v1112_v35 = vadd.f32 %v1111_v18, %v11798_v17  ;;  %v1145_v16 = vadd.f32 %v1144_v45, %v11799_v52  ;;  %v1294_v9 = vadd.f32 %v1293_v21, %v1207_v15  ;;  %v1327_v27 = vadd.f32 %v1326_v24, %v1208_v51  ;;  %v11800_v17 = vld [vmem:[#allocation41_spill] sm:$0xff] }
 0x122   :  { %v1360_v41 = vadd.f32 %v1359_v36, %v1209_v33  ;;  %v1393_v19 = vadd.f32 %v1392_v38, %v1210_v39  ;;  %v267_v43 = vmul.f32 %v7088_v54, %v125_v50  ;;  %v268_v7 = vmul.f32 %v7091_v55, %v125_v50  ;;  %v7962_v39 = vpop.permute.xlu1 %744 }
 0x123   :  { %v269_v28 = vmul.f32 %v7094_v56, %v125_v50  ;;  %v270_v1 = vmul.f32 %v7097_v57, %v125_v50  ;;  %v271_v53 = vmul.f32 %v7088_v54, %v7754_v12  ;;  %v272_v48 = vmul.f32 %v7091_v55, %v7754_v12 }
 0x124   :  { %v273_v15 = vmul.f32 %v7094_v56, %v7754_v12  ;;  %v274_v38 = vmul.f32 %v7097_v57, %v7754_v12  ;;  %v619_v24 = vadd.f32 %v507_v26, %v267_v43  ;;  %v620_v36 = vadd.f32 %v508_v11, %v268_v7  ;;  %v11802_v43 = vld [vmem:[#allocation42_spill] sm:$0xff]  ;;  %v11806_v11 = vld [vmem:[#allocation44_spill] sm:$0xff] }
 0x125   :  { %v621_v51 = vadd.f32 %v509_v47, %v269_v28  ;;  %v622_v33 = vadd.f32 %v510_v25, %v270_v1  ;;  %v511_v18 = vmul.f32 %v7100_v59, %v7780_v31  ;;  %v512_v45 = vmul.f32 %v7103_v60, %v7780_v31  ;;  %v11804_v1 = vld [vmem:[#allocation43_spill] sm:$0xff] }
 0x126   :  { %v513_v21 = vmul.f32 %v7106_v61, %v7780_v31  ;;  %v514_v50 = vmul.f32 %v7113_v63, %v7780_v31  ;;  %v7973_v12 = vadd.f32 %v11800_v17, %v619_v24  ;;  %v7976_v7 = vadd.f32 %v11802_v43, %v620_v36 }
 0x127   :  { %v7979_v26 = vadd.f32 %v11804_v1, %v621_v51  ;;  %v7982_v47 = vadd.f32 %v11806_v11, %v622_v33  ;;  %v623_v25 = vadd.f32 %v511_v18, %v271_v53  ;;  %v624_v28 = vadd.f32 %v512_v45, %v272_v48  ;;  %v7992_v53 = vpop.permute.xlu1 %400 }
 0x128   :  { %11801 = vst [vmem:[#allocation73_spill] sm:$0xff] %v7973_v12  ;;  %11803 = vst [vmem:[#allocation74_spill] sm:$0xff] %v7976_v7  ;;  %v625_v52 = vadd.f32 %v513_v21, %v273_v15  ;;  %v626_v37 = vadd.f32 %v514_v50, %v274_v38  ;;  %v1047_v34 = vadd.f32 %v1046_v30, %v7766_v14 }
 0x129   :  { %11805 = vst [vmem:[#allocation75_spill] sm:$0xff] %v7979_v26  ;;  %11807 = vst [vmem:[#allocation30_spill] sm:$0xff] %v7982_v47  ;;  %v1080_v31 = vadd.f32 %v1079_v58, %v7768_v6  ;;  %v1113_v17 = vadd.f32 %v1112_v35, %v7771_v0  ;;  %v1146_v24 = vadd.f32 %v1145_v16, %v7774_v46  ;;  %v11808_v16 = vld [vmem:[#allocation87_spill] sm:$0xff] }
 0x12a   :  { %v1295_v36 = vadd.f32 %v1294_v9, %v1211_v42  ;;  %v1328_v43 = vadd.f32 %v1327_v27, %v1212_v44  ;;  %v277_v51 = vmul.f32 %v7094_v56, %v7814_v49  ;;  %v278_v33 = vmul.f32 %v7097_v57, %v7814_v49  ;;  %v11809_v27 = vld [vmem:[#allocation88_spill] sm:$0xff] }
 0x12b   :  { %v863_v48 = vmul.f32 %v7109_v62, %v7841_v20  ;;  %v864_v30 = vmul.f32 %v7116_v2, %v7841_v20  ;;  %v865_v58 = vmul.f32 %v7119_v3, %v7841_v20  ;;  %v866_v42 = vmul.f32 %v7122_v4, %v7841_v20  ;;  %v8026_v11 = vpop.permute.xlu1 %154 }
 0x12c   :  { %v1361_v44 = vadd.f32 %v1360_v41, %v1213_v13  ;;  %v1394_v35 = vadd.f32 %v1393_v19, %v1214_v23  ;;  %v629_v9 = vadd.f32 %v11808_v16, %v277_v51  ;;  %v630_v15 = vadd.f32 %v11809_v27, %v278_v33  ;;  %v11814_v19 = vld [vmem:[#allocation25_spill] sm:$0xff] }
 0x12d   :  { %v8004_v38 = vadd.f32 %v863_v48, %v623_v25  ;;  %v8006_v18 = vadd.f32 %v864_v30, %v624_v28  ;;  %v8008_v45 = vadd.f32 %v865_v58, %v625_v52  ;;  %v8010_v21 = vadd.f32 %v866_v42, %v626_v37  ;;  %v11815_v58 = vld [vmem:[#allocation80_spill] sm:$0xff] }
 0x12e   :  { %v1215_v50 = vmul.f32 %v7865_v29, %v7865_v29  ;;  %v1216_v20 = vmul.f32 %v7868_v5, %v7868_v5  ;;  %v1217_v41 = vmul.f32 %v7871_v40, %v7871_v40  ;;  %v1218_v13 = vmul.f32 %v11814_v19, %v11814_v19 }
 0x12f   :  { %11810 = vst [vmem:[#allocation31_spill] sm:$0xff] %v8004_v38  ;;  %11811 = vst [vmem:[#allocation32_spill] sm:$0xff] %v8006_v18  ;;  %v1048_v23 = vadd.f32 %v1047_v34, %v7865_v29  ;;  %v1081_v1 = vadd.f32 %v1080_v31, %v7868_v5  ;;  %v275_v37 = vmul.f32 %v7088_v54, %v7814_v49  ;;  %v8054_v46 = vpop.permute.xlu1 %404 }
 0x130   :  { %11812 = vst [vmem:[#allocation33_spill] sm:$0xff] %v8008_v45  ;;  %11813 = vst [vmem:[#allocation34_spill] sm:$0xff] %v8010_v21  ;;  %v276_v52 = vmul.f32 %v7091_v55, %v7814_v49  ;;  %v1114_v25 = vadd.f32 %v1113_v17, %v7871_v40  ;;  %v1147_v28 = vadd.f32 %v1146_v24, %v11814_v19  ;;  %v11819_v19 = vld [vmem:[#allocation92_spill] sm:$0xff] }
 0x131   :  { %v1296_v51 = vadd.f32 %v1295_v36, %v1215_v50  ;;  %v1329_v33 = vadd.f32 %v1328_v43, %v1216_v20  ;;  %v8030_v48 = vadd.f32 %v1361_v44, %v1217_v41  ;;  %v8032_v30 = vadd.f32 %v1394_v35, %v1218_v13  ;;  %v11816_v43 = vld [vmem:[#allocation85_spill] sm:$0xff]  ;;  %v11817_v44 = vld [vmem:[#allocation86_spill] sm:$0xff]  ;;  %v145_v50 = vpop.permute.xlu0 %144  ;;  %v11818_v13 = vld [vmem:[#allocation91_spill] sm:$0xff] }
 0x132   :  { %v1219_v34 = vmul.f32 %v7973_v12, %v7973_v12  ;;  %v1220_v31 = vmul.f32 %v7976_v7, %v7976_v7  ;;  %v1221_v49 = vmul.f32 %v7979_v26, %v7979_v26  ;;  %v1222_v17 = vmul.f32 %v7982_v47, %v7982_v47 }
 0x133   :  { %v281_v24 = vmul.f32 %v7094_v56, %v11815_v58  ;;  %v282_v36 = vmul.f32 %v7097_v57, %v11815_v58  ;;  %v627_v42 = vadd.f32 %v11816_v43, %v275_v37  ;;  %v628_v35 = vadd.f32 %v11817_v44, %v276_v52 }
 0x134   :  { %v1049_v16 = vadd.f32 %v1048_v23, %v7973_v12  ;;  %v1082_v27 = vadd.f32 %v1081_v1, %v7976_v7  ;;  %v1115_v20 = vadd.f32 %v1114_v25, %v7979_v26  ;;  %v1148_v41 = vadd.f32 %v1147_v28, %v7982_v47  ;;  %v6465_v25 = vld [vmem:[#allocation2 + $0x20] ss:$8 sps:$4 sm:$0xff]  }
 0x135   :  { %v633_v40 = vadd.f32 %v11818_v13, %v281_v24  ;;  %v634_v0 = vadd.f32 %v11819_v19, %v282_v36  ;;  %v867_v37 = vmul.f32 %v7109_v62, %v7914_v22  ;;  %v868_v52 = vmul.f32 %v7116_v2, %v7914_v22  ;;  %2388 = vmatpush1.bf16.msra.mxu0 %v6465_v25 }
 0x136   :  { %v869_v23 = vmul.f32 %v7119_v3, %v7914_v22  ;;  %v870_v1 = vmul.f32 %v7122_v4, %v7914_v22  ;;  %v283_v28 = vmul.f32 %v7088_v54, %v145_v50  ;;  %v284_v24 = vmul.f32 %v7091_v55, %v145_v50 }
 0x137   :  { %v285_v19 = vmul.f32 %v7094_v56, %v145_v50  ;;  %v286_v36 = vmul.f32 %v7097_v57, %v145_v50  ;;  %v8068_v43 = vadd.f32 %v867_v37, %v627_v42  ;;  %v8070_v44 = vadd.f32 %v868_v52, %v628_v35  ;;  %v6466_v50 = vld [vmem:[#allocation2 + $0x34] ss:$8 sps:$4 sm:$0xff]   ;;  %v8092_v52 = vpop.permute.xlu1 %159 }
 0x138   :  { %v8072_v13 = vadd.f32 %v869_v23, %v629_v9  ;;  %v8074_v26 = vadd.f32 %v870_v1, %v630_v15  ;;  %v523_v22 = vmul.f32 %v7100_v59, %v7944_v10  ;;  %v524_v47 = vmul.f32 %v7103_v60, %v7944_v10  ;;  %11824 = vst [vmem:[#allocation41_spill] sm:$0xff] %v8092_v52  ;;  %v6468_v23 = vld [vmem:[#allocation2 + $0x30] ss:$8 sps:$4 sm:$0xff]  }
 0x139   :  { %11820 = vst [vmem:[#allocation35_spill] sm:$0xff] %v8068_v43  ;;  %11821 = vst [vmem:[#allocation36_spill] sm:$0xff] %v8070_v44  ;;  %v525_v12 = vmul.f32 %v7106_v61, %v7944_v10  ;;  %v526_v42 = vmul.f32 %v7113_v63, %v7944_v10  ;;  %v1223_v9 = vmul.f32 %v8004_v38, %v8004_v38  ;;  %2389 = vmatprep.subr.bf16.mxu0 %v6466_v50  ;;  %v150_v50 = vpop.permute.xlu0 %149 }
 0x13a   :  { %11822 = vst [vmem:[#allocation37_spill] sm:$0xff] %v8072_v13  ;;  %11823 = vst [vmem:[#allocation84_spill] sm:$0xff] %v8074_v26  ;;  %v1224_v15 = vmul.f32 %v8006_v18, %v8006_v18  ;;  %v1225_v35 = vmul.f32 %v8008_v45, %v8008_v45  ;;  %v1226_v37 = vmul.f32 %v8010_v21, %v8010_v21  ;;  %2390 = vmatpush1.bf16.msra.mxu0 %v6468_v23 }
 0x13b   :  { %v1050_v1 = vadd.f32 %v1049_v16, %v8004_v38  ;;  %v1083_v10 = vadd.f32 %v1082_v27, %v8006_v18  ;;  %v1116_v25 = vadd.f32 %v1115_v20, %v8008_v45  ;;  %v1149_v29 = vadd.f32 %v1148_v41, %v8010_v21  ;;  %v6469_v38 = vld [vmem:[#allocation2 + $0x44] ss:$8 sps:$4 sm:$0xff]   ;;  %v11827_v20 = vld [vmem:[#allocation46_spill] sm:$0xff] }
 0x13c   :  { %v635_v7 = vadd.f32 %v523_v22, %v283_v28  ;;  %v636_v5 = vadd.f32 %v524_v47, %v284_v24  ;;  %v637_v14 = vadd.f32 %v525_v12, %v285_v19  ;;  %v638_v6 = vadd.f32 %v526_v42, %v286_v36  ;;  %v11825_v27 = vld [vmem:[#allocation45_spill] sm:$0xff]  ;;  %v11829_v28 = vld [vmem:[#allocation47_spill] sm:$0xff]  ;;  %v11831_v12 = vld [vmem:[#allocation48_spill] sm:$0xff]  ;;  %2391 = vmatprep.subr.bf16.mxu0 %v6469_v38 }
 0x13d   :  { %v1297_v32 = vadd.f32 %v1296_v51, %v1219_v34  ;;  %v1330_v8 = vadd.f32 %v1329_v33, %v1220_v31  ;;  %v279_v52 = vmul.f32 %v7088_v54, %v11815_v58  ;;  %v280_v16 = vmul.f32 %v7091_v55, %v11815_v58  ;;  %v6471_v51 = vld [vmem:[#allocation2 + $0x40] ss:$8 sps:$4 sm:$0xff]   ;;  %v8120_v58 = vpop.permute.xlu1 %756  ;;  %v6472_v38 = vld [vmem:[#allocation2 + $0x54] ss:$8 sps:$4 sm:$0xff]  }
 0x13e   :  { %v8103_v18 = vadd.f32 %v11825_v27, %v635_v7  ;;  %v8106_v41 = vadd.f32 %v11827_v20, %v636_v5  ;;  %v8109_v47 = vadd.f32 %v11829_v28, %v637_v14  ;;  %v8112_v24 = vadd.f32 %v11831_v12, %v638_v6  ;;  %2392 = vmatpush1.bf16.msra.mxu0 %v6471_v51  ;;  %v11836_v36 = vld [vmem:[#allocation90_spill] sm:$0xff] }
 0x13f   :  { %v1363_v33 = vadd.f32 %v8030_v48, %v1221_v49  ;;  %v1396_v34 = vadd.f32 %v8032_v30, %v1222_v17  ;;  %v873_v31 = vmul.f32 %v7119_v3, %v7962_v39  ;;  %v874_v7 = vmul.f32 %v7122_v4, %v7962_v39  ;;  %2393 = vmatprep.subr.bf16.mxu0 %v6472_v38 }
 0x140   :  { %11826 = vst [vmem:[#allocation42_spill] sm:$0xff] %v8103_v18  ;;  %11828 = vst [vmem:[#allocation43_spill] sm:$0xff] %v8106_v41  ;;  %v1298_v5 = vadd.f32 %v1297_v32, %v1223_v9  ;;  %v1331_v14 = vadd.f32 %v1330_v8, %v1224_v15  ;;  %v871_v6 = vmul.f32 %v7109_v62, %v7962_v39  ;;  %v11835_v32 = vld [vmem:[#allocation89_spill] sm:$0xff]  ;;  %v6474_v9 = vld [vmem:[#allocation2 + $0x50] ss:$8 sps:$4 sm:$0xff]  }
 0x141   :  { %11830 = vst [vmem:[#allocation44_spill] sm:$0xff] %v8109_v47  ;;  %11832 = vst [vmem:[#allocation87_spill] sm:$0xff] %v8112_v24  ;;  %v872_v19 = vmul.f32 %v7116_v2, %v7962_v39  ;;  %v1227_v48 = vmul.f32 %v8068_v43, %v8068_v43  ;;  %v1228_v30 = vmul.f32 %v8070_v44, %v8070_v44  ;;  %v8148_v28 = vpop.permute.xlu1 %164 }
 0x142   :  { %v8130_v49 = vadd.f32 %v873_v31, %v633_v40  ;;  %v8132_v17 = vadd.f32 %v874_v7, %v634_v0  ;;  %v631_v8 = vadd.f32 %v11835_v32, %v279_v52  ;;  %v632_v22 = vadd.f32 %v11836_v36, %v280_v16  ;;  %2394 = vmatpush1.bf16.msra.mxu0 %v6474_v9 }
 0x143   :  { %v1229_v42 = vmul.f32 %v8072_v13, %v8072_v13  ;;  %v1230_v39 = vmul.f32 %v8074_v26, %v8074_v26  ;;  %v1364_v15 = vadd.f32 %v1363_v33, %v1225_v35  ;;  %v1397_v23 = vadd.f32 %v1396_v34, %v1226_v37  ;;  %v6477_v34 = vld [vmem:[#allocation2 + $0x60] ss:$8 sps:$4 sm:$0xff]  }
 0x144   :  { %11833 = vst [vmem:[#allocation88_spill] sm:$0xff] %v8130_v49  ;;  %11834 = vst [vmem:[#allocation80_spill] sm:$0xff] %v8132_v17  ;;  %v1051_v40 = vadd.f32 %v1050_v1, %v8068_v43  ;;  %v1084_v0 = vadd.f32 %v1083_v10, %v8070_v44  ;;  %v1117_v27 = vadd.f32 %v1116_v25, %v8072_v13  ;;  %v6475_v1 = vld [vmem:[#allocation2 + $0x64] ss:$8 sps:$4 sm:$0xff]  }
 0x145   :  { %v1150_v52 = vadd.f32 %v1149_v29, %v8074_v26  ;;  %v8144_v16 = vadd.f32 %v871_v6, %v631_v8  ;;  %v8146_v20 = vadd.f32 %v872_v19, %v632_v22  ;;  %v1299_v12 = vadd.f32 %v1298_v5, %v1227_v48  ;;  %2395 = vmatprep.subr.bf16.mxu0 %v6475_v1  ;;  %v8182_v22 = vpop.permute.xlu1 %760  ;;  %v6499_v43 = vld [vmem:[#allocation2 + $0xe4] ss:$8 sps:$4 sm:$0xff]  }
 0x146   :  { %v1332_v51 = vadd.f32 %v1331_v14, %v1228_v30  ;;  %v289_v35 = vmul.f32 %v7094_v56, %v150_v50  ;;  %v290_v37 = vmul.f32 %v7097_v57, %v150_v50  ;;  %v1365_v10 = vadd.f32 %v1364_v15, %v1229_v42  ;;  %2396 = vmatpush1.bf16.msra.mxu0 %v6477_v34  ;;  %v6478_v42 = vld [vmem:[#allocation2 + $0x74] ss:$8 sps:$4 sm:$0xff]  }
 0x147   :  { %11837 = vst [vmem:[#allocation85_spill] sm:$0xff] %v8144_v16  ;;  %11838 = vst [vmem:[#allocation86_spill] sm:$0xff] %v8146_v20  ;;  %v1398_v33 = vadd.f32 %v1397_v23, %v1230_v39  ;;  %v8154_v25 = vmul.f32 %v8103_v18, %v8103_v18  ;;  %v8158_v29 = vmul.f32 %v8106_v41, %v8106_v41  ;;  %v6480_v23 = vld [vmem:[#allocation2 + $0x70] ss:$8 sps:$4 sm:$0xff]   ;;  %2397 = vmatprep.subr.bf16.mxu0 %v6478_v42  ;;  %v6484_v42 = vld [vmem:[#allocation2 + $0x94] ss:$8 sps:$4 sm:$0xff]  }
 0x148   :  { %v8162_v31 = vmul.f32 %v8109_v47, %v8109_v47  ;;  %v8166_v7 = vmul.f32 %v8112_v24, %v8112_v24  ;;  %v529_v5 = vmul.f32 %v7106_v61, %v7992_v53  ;;  %v530_v14 = vmul.f32 %v7113_v63, %v7992_v53  ;;  %v11841_v34 = vld [vmem:[#allocation55_spill] sm:$0xff] }
 0x149   :  { %v1231_v6 = vmul.f32 %v8144_v16, %v8144_v16  ;;  %v1232_v19 = vmul.f32 %v8146_v20, %v8146_v20  ;;  %v287_v48 = vmul.f32 %v7088_v54, %v150_v50  ;;  %v288_v30 = vmul.f32 %v7091_v55, %v150_v50  ;;  %v8206_v21 = vpop.permute.xlu1 %416 }
 0x14a   :  { %v527_v38 = vmul.f32 %v7100_v59, %v7992_v53  ;;  %v528_v32 = vmul.f32 %v7103_v60, %v7992_v53  ;;  %v641_v8 = vadd.f32 %v529_v5, %v289_v35  ;;  %v642_v36 = vadd.f32 %v530_v14, %v290_v37  ;;  %v11839_v35 = vld [vmem:[#allocation54_spill] sm:$0xff]  ;;  %2398 = vmatpush1.bf16.msra.mxu0 %v6480_v23  ;;  %v11843_v23 = vld [vmem:[#allocation41_spill] sm:$0xff] }
 0x14b   :  { %v1052_v39 = vadd.f32 %v1051_v40, %v8144_v16  ;;  %v1085_v9 = vadd.f32 %v1084_v0, %v8146_v20  ;;  %v1233_v15 = vmul.f32 %v8130_v49, %v8130_v49  ;;  %v1234_v50 = vmul.f32 %v8132_v17, %v8132_v17  ;;  %v6481_v40 = vld [vmem:[#allocation2 + $0x84] ss:$8 sps:$4 sm:$0xff]  }
 0x14c   :  { %v1118_v1 = vadd.f32 %v1117_v27, %v8130_v49  ;;  %v1151_v53 = vadd.f32 %v1150_v52, %v8132_v17  ;;  %v8193_v37 = vadd.f32 %v11839_v35, %v641_v8  ;;  %v8196_v5 = vadd.f32 %v11841_v34, %v642_v36  ;;  %v6483_v52 = vld [vmem:[#allocation2 + $0x80] ss:$8 sps:$4 sm:$0xff]   ;;  %2399 = vmatprep.subr.bf16.mxu0 %v6481_v40 }
 0x14d   :  { %v293_v0 = vmul.f32 %v7094_v56, %v8026_v11  ;;  %v294_v14 = vmul.f32 %v7097_v57, %v8026_v11  ;;  %v533_v13 = vmul.f32 %v7106_v61, %v8054_v46  ;;  %v534_v27 = vmul.f32 %v7113_v63, %v8054_v46 }
 0x14e   :  { %11840 = vst [vmem:[#allocation91_spill] sm:$0xff] %v8193_v37  ;;  %11842 = vst [vmem:[#allocation92_spill] sm:$0xff] %v8196_v5  ;;  %v1300_v8 = vadd.f32 %v1299_v12, %v1231_v6  ;;  %v1333_v35 = vadd.f32 %v1332_v51, %v1232_v19  ;;  %v639_v36 = vadd.f32 %v527_v38, %v287_v48  ;;  %2400 = vmatpush1.bf16.msra.mxu0 %v6483_v52  ;;  %v11844_v19 = vld [vmem:[#allocation52_spill] sm:$0xff] }
 0x14f   :  { %v640_v34 = vadd.f32 %v528_v32, %v288_v30  ;;  %v1366_v49 = vadd.f32 %v1365_v10, %v1233_v15  ;;  %v1399_v17 = vadd.f32 %v1398_v33, %v1234_v50  ;;  %v645_v45 = vadd.f32 %v533_v13, %v293_v0  ;;  %v11846_v30 = vld [vmem:[#allocation53_spill] sm:$0xff]  ;;  %v11848_v32 = vld [vmem:[#allocation95_spill] sm:$0xff]  ;;  %v11849_v50 = vld [vmem:[#allocation96_spill] sm:$0xff]  ;;  %2401 = vmatprep.subr.bf16.mxu0 %v6484_v42  ;;  %v8244_v42 = vpop.permute.xlu1 %764 }
 0x150   :  { %v646_v26 = vadd.f32 %v534_v27, %v294_v14  ;;  %v291_v16 = vmul.f32 %v7088_v54, %v8026_v11  ;;  %v292_v20 = vmul.f32 %v7091_v55, %v8026_v11  ;;  %v297_v12 = vmul.f32 %v7094_v56, %v11843_v23  ;;  %v6486_v11 = vld [vmem:[#allocation2 + $0x90] ss:$8 sps:$4 sm:$0xff]  }
 0x151   :  { %v298_v51 = vmul.f32 %v7097_v57, %v11843_v23  ;;  %v531_v10 = vmul.f32 %v7100_v59, %v8054_v46  ;;  %v532_v13 = vmul.f32 %v7103_v60, %v8054_v46  ;;  %v885_v33 = vmul.f32 %v7119_v3, %v8120_v58  ;;  %v6487_v46 = vld [vmem:[#allocation2 + $0xa4] ss:$8 sps:$4 sm:$0xff]  }
 0x152   :  { %v886_v6 = vmul.f32 %v7122_v4, %v8120_v58  ;;  %v8225_v48 = vadd.f32 %v11844_v19, %v639_v36  ;;  %v8228_v38 = vadd.f32 %v11846_v30, %v640_v34  ;;  %v649_v15 = vadd.f32 %v11848_v32, %v297_v12  ;;  %2402 = vmatpush1.bf16.msra.mxu0 %v6486_v11 }
 0x153   :  { %v650_v40 = vadd.f32 %v11849_v50, %v298_v51  ;;  %v883_v0 = vmul.f32 %v7109_v62, %v8120_v58  ;;  %v884_v14 = vmul.f32 %v7116_v2, %v8120_v58  ;;  %v8236_v27 = vadd.f32 %v885_v33, %v645_v45  ;;  %2403 = vmatprep.subr.bf16.mxu0 %v6487_v46  ;;  %v8278_v11 = vpop.permute.xlu1 %420  ;;  %v6492_v50 = vld [vmem:[#allocation2 + $0xb0] ss:$8 sps:$4 sm:$0xff]  }
 0x154   :  { %11845 = vst [vmem:[#allocation45_spill] sm:$0xff] %v8225_v48  ;;  %11847 = vst [vmem:[#allocation46_spill] sm:$0xff] %v8228_v38  ;;  %v8238_v52 = vadd.f32 %v886_v6, %v646_v26  ;;  %v1053_v36 = vadd.f32 %v1052_v39, %v8103_v18  ;;  %v1086_v34 = vadd.f32 %v1085_v9, %v8106_v41  ;;  %v6489_v26 = vld [vmem:[#allocation2 + $0xa0] ss:$8 sps:$4 sm:$0xff]   ;;  %v170_v6 = vpop.permute.xlu0 %169 }
 0x155   :  { %11850 = vst [vmem:[#allocation47_spill] sm:$0xff] %v8236_v27  ;;  %v1119_v12 = vadd.f32 %v1118_v1, %v8109_v47  ;;  %v1152_v51 = vadd.f32 %v1151_v53, %v8112_v24  ;;  %v643_v19 = vadd.f32 %v531_v10, %v291_v16  ;;  %v644_v30 = vadd.f32 %v532_v13, %v292_v20  ;;  %v6490_v16 = vld [vmem:[#allocation2 + $0xb4] ss:$8 sps:$4 sm:$0xff]   ;;  %v6495_v47 = vld [vmem:[#allocation2 + $0xc0] ss:$8 sps:$4 sm:$0xff]  }
 0x156   :  { %11851 = vst [vmem:[#allocation48_spill] sm:$0xff] %v8238_v52  ;;  %v295_v32 = vmul.f32 %v7088_v54, %v11843_v23  ;;  %v296_v45 = vmul.f32 %v7091_v55, %v11843_v23  ;;  %v1301_v58 = vadd.f32 %v1300_v8, %v8154_v25  ;;  %v1334_v39 = vadd.f32 %v1333_v35, %v8158_v29  ;;  %v11855_v8 = vld [vmem:[#allocation94_spill] sm:$0xff] }
 0x157   :  { %v8253_v9 = vadd.f32 %v1366_v49, %v8162_v31  ;;  %v8256_v1 = vadd.f32 %v1399_v17, %v8166_v7  ;;  %v1239_v20 = vmul.f32 %v8225_v48, %v8225_v48  ;;  %v1240_v53 = vmul.f32 %v8228_v38, %v8228_v38  ;;  %v11854_v31 = vld [vmem:[#allocation93_spill] sm:$0xff]  ;;  %2404 = vmatpush1.bf16.msra.mxu0 %v6489_v26 }
 0x158   :  { %v8262_v23 = vadd.f32 %v883_v0, %v643_v19  ;;  %v8264_v10 = vadd.f32 %v884_v14, %v644_v30  ;;  %v1241_v25 = vmul.f32 %v8193_v37, %v8193_v37  ;;  %v1242_v49 = vmul.f32 %v8196_v5, %v8196_v5  ;;  %v11856_v14 = vld [vmem:[#allocation107_spill] sm:$0xff]  ;;  %v11857_v30 = vld [vmem:[#allocation108_spill] sm:$0xff]  ;;  %2405 = vmatprep.subr.bf16.mxu0 %v6490_v16 }
 0x159   :  { %v301_v17 = vmul.f32 %v7094_v56, %v8148_v28  ;;  %v302_v29 = vmul.f32 %v7097_v57, %v8148_v28  ;;  %v647_v7 = vadd.f32 %v11854_v31, %v295_v32  ;;  %v648_v35 = vadd.f32 %v11855_v8, %v296_v45  ;;  %v6493_v45 = vld [vmem:[#allocation2 + $0xc4] ss:$8 sps:$4 sm:$0xff]  }
 0x15a   :  { %11852 = vst [vmem:[#allocation89_spill] sm:$0xff] %v8262_v23  ;;  %11853 = vst [vmem:[#allocation90_spill] sm:$0xff] %v8264_v10  ;;  %v1054_v13 = vadd.f32 %v1053_v36, %v8225_v48  ;;  %v1087_v33 = vadd.f32 %v1086_v34, %v8228_v38  ;;  %v1120_v46 = vadd.f32 %v1119_v12, %v8193_v37 }
 0x15b   :  { %v1153_v0 = vadd.f32 %v1152_v51, %v8196_v5  ;;  %v8283_v19 = vadd.f32 %v11856_v14, %v301_v17  ;;  %v8286_v32 = vadd.f32 %v11857_v30, %v302_v29  ;;  %v1243_v36 = vmul.f32 %v8262_v23, %v8262_v23  ;;  %2406 = vmatpush1.bf16.msra.mxu0 %v6492_v50 }
 0x15c   :  { %v1244_v34 = vmul.f32 %v8264_v10, %v8264_v10  ;;  %v889_v26 = vmul.f32 %v7119_v3, %v8182_v22  ;;  %v890_v12 = vmul.f32 %v7122_v4, %v8182_v22  ;;  %v1245_v51 = vmul.f32 %v8236_v27, %v8236_v27  ;;  %2407 = vmatprep.subr.bf16.mxu0 %v6493_v45 }
 0x15d   :  { %v1246_v17 = vmul.f32 %v8238_v52, %v8238_v52  ;;  %v887_v16 = vmul.f32 %v7109_v62, %v8182_v22  ;;  %v888_v29 = vmul.f32 %v7116_v2, %v8182_v22  ;;  %v305_v14 = vmul.f32 %v7094_v56, %v170_v6 }
 0x15e   :  { %v8304_v31 = vadd.f32 %v889_v26, %v649_v15  ;;  %v8306_v8 = vadd.f32 %v890_v12, %v650_v40  ;;  %v306_v30 = vmul.f32 %v7097_v57, %v170_v6  ;;  %v1055_v24 = vadd.f32 %v1054_v13, %v8262_v23  ;;  %v8316_v15 = vpop.permute.xlu1 %179  ;;  %v6496_v40 = vld [vmem:[#allocation2 + $0xd4] ss:$8 sps:$4 sm:$0xff]   ;;  %v175_v23 = vpop.permute.xlu0 %174 }
 0x15f   :  { %v1088_v37 = vadd.f32 %v1087_v33, %v8264_v10  ;;  %v545_v5 = vmul.f32 %v7106_v61, %v8206_v21  ;;  %v546_v22 = vmul.f32 %v7113_v63, %v8206_v21  ;;  %v1302_v26 = vadd.f32 %v1301_v58, %v1239_v20  ;;  %2408 = vmatpush1.bf16.msra.mxu0 %v6495_v47 }
 0x160   :  { %11858 = vst [vmem:[#allocation54_spill] sm:$0xff] %v8304_v31  ;;  %11859 = vst [vmem:[#allocation55_spill] sm:$0xff] %v8306_v8  ;;  %v1335_v12 = vadd.f32 %v1334_v39, %v1240_v53  ;;  %v299_v50 = vmul.f32 %v7088_v54, %v8148_v28  ;;  %v300_v13 = vmul.f32 %v7091_v55, %v8148_v28  ;;  %v6498_v53 = vld [vmem:[#allocation2 + $0xd0] ss:$8 sps:$4 sm:$0xff]   ;;  %2409 = vmatprep.subr.bf16.mxu0 %v6496_v40 }
 0x161   :  { %v303_v33 = vmul.f32 %v7088_v54, %v170_v6  ;;  %v304_v10 = vmul.f32 %v7091_v55, %v170_v6  ;;  %v543_v48 = vmul.f32 %v7100_v59, %v8206_v21  ;;  %v544_v45 = vmul.f32 %v7103_v60, %v8206_v21 }
 0x162   :  { %v8328_v38 = vadd.f32 %v887_v16, %v647_v7  ;;  %v8330_v58 = vadd.f32 %v888_v29, %v648_v35  ;;  %v657_v39 = vadd.f32 %v545_v5, %v305_v14  ;;  %v658_v20 = vadd.f32 %v546_v22, %v306_v30  ;;  %v11862_v7 = vld [vmem:[#allocation58_spill] sm:$0xff]  ;;  %v11864_v35 = vld [vmem:[#allocation59_spill] sm:$0xff]  ;;  %v8342_v47 = vpop.permute.xlu1 %424  ;;  %v11866_v30 = vld [vmem:[#allocation105_spill] sm:$0xff] }
 0x163   :  { %v1121_v28 = vadd.f32 %v1120_v46, %v8236_v27  ;;  %v1154_v18 = vadd.f32 %v1153_v0, %v8238_v52  ;;  %v1368_v6 = vadd.f32 %v8253_v9, %v1241_v25  ;;  %v1401_v41 = vadd.f32 %v8256_v1, %v1242_v49  ;;  %v11867_v25 = vld [vmem:[#allocation106_spill] sm:$0xff]  ;;  %2410 = vmatpush1.bf16.msra.mxu0 %v6498_v53  ;;  %v6501_v22 = vld [vmem:[#allocation2 + $0xe0] ss:$8 sps:$4 sm:$0xff]  }
 0x164   :  { %11860 = vst [vmem:[#allocation41_spill] sm:$0xff] %v8328_v38  ;;  %11861 = vst [vmem:[#allocation52_spill] sm:$0xff] %v8330_v58  ;;  %v1303_v44 = vadd.f32 %v1302_v26, %v1243_v36  ;;  %v1336_v21 = vadd.f32 %v1335_v12, %v1244_v34  ;;  %v8337_v16 = vadd.f32 %v11862_v7, %v657_v39  ;;  %v195_v34 = vpop.permute.xlu0 %194  ;;  %2411 = vmatprep.subr.bf16.mxu0 %v6499_v43  ;;  %v6504_v7 = vld [vmem:[#allocation2 + $0xf0] ss:$8 sps:$4 sm:$0xff]  }
 0x165   :  { %v8340_v5 = vadd.f32 %v11864_v35, %v658_v20  ;;  %v1369_v29 = vadd.f32 %v1368_v6, %v1245_v51  ;;  %v1402_v46 = vadd.f32 %v1401_v41, %v1246_v17  ;;  %v655_v14 = vadd.f32 %v543_v48, %v303_v33  ;;  %v6502_v51 = vld [vmem:[#allocation2 + $0xf4] ss:$8 sps:$4 sm:$0xff]  }
 0x166   :  { %11863 = vst [vmem:[#allocation53_spill] sm:$0xff] %v8337_v16  ;;  %v656_v0 = vadd.f32 %v544_v45, %v304_v10  ;;  %v651_v9 = vadd.f32 %v11866_v30, %v299_v50  ;;  %v652_v1 = vadd.f32 %v11867_v25, %v300_v13  ;;  %v1247_v49 = vmul.f32 %v8328_v38, %v8328_v38  ;;  %v11868_v13 = vld [vmem:[#allocation56_spill] sm:$0xff]  ;;  %v11870_v45 = vld [vmem:[#allocation57_spill] sm:$0xff] }
 0x167   :  { %11865 = vst [vmem:[#allocation95_spill] sm:$0xff] %v8340_v5  ;;  %v1248_v36 = vmul.f32 %v8330_v58, %v8330_v58  ;;  %v1249_v40 = vmul.f32 %v8304_v31, %v8304_v31  ;;  %v1250_v41 = vmul.f32 %v8306_v8, %v8306_v8  ;;  %v893_v48 = vmul.f32 %v7119_v3, %v8244_v42  ;;  %v6507_v30 = vld [vmem:[#allocation2 + $0x104] ss:$8 sps:$4 sm:$0xff]  }
 0x168   :  { %v894_v10 = vmul.f32 %v7122_v4, %v8244_v42  ;;  %v1056_v17 = vadd.f32 %v1055_v24, %v8328_v38  ;;  %v1089_v26 = vadd.f32 %v1088_v37, %v8330_v58  ;;  %v891_v12 = vmul.f32 %v7109_v62, %v8244_v42  ;;  %v8376_v24 = vpop.permute.xlu1 %184  ;;  %2412 = vmatpush1.bf16.msra.mxu0 %v6501_v22  ;;  %v11879_v58 = vld [vmem:[#allocation62_spill] sm:$0xff] }
 0x169   :  { %v892_v50 = vmul.f32 %v7116_v2, %v8244_v42  ;;  %v8365_v33 = vadd.f32 %v11868_v13, %v655_v14  ;;  %v8368_v39 = vadd.f32 %v11870_v45, %v656_v0  ;;  %v8371_v20 = vadd.f32 %v893_v48, %v8283_v19  ;;  %2413 = vmatprep.subr.bf16.mxu0 %v6502_v51 }
 0x16a   :  { %v8374_v43 = vadd.f32 %v894_v10, %v8286_v32  ;;  %v1122_v37 = vadd.f32 %v1121_v28, %v8304_v31  ;;  %v1155_v53 = vadd.f32 %v1154_v18, %v8306_v8  ;;  %v1304_v6 = vadd.f32 %v1303_v44, %v1247_v49  ;;  %v200_v18 = vpop.permute.xlu0 %199 }
 0x16b   :  { %11869 = vst [vmem:[#allocation96_spill] sm:$0xff] %v8365_v33  ;;  %11871 = vst [vmem:[#allocation93_spill] sm:$0xff] %v8368_v39  ;;  %v1337_v42 = vadd.f32 %v1336_v21, %v1248_v36  ;;  %v1370_v35 = vadd.f32 %v1369_v29, %v1249_v40  ;;  %v1403_v14 = vadd.f32 %v1402_v46, %v1250_v41 }
 0x16c   :  { %11872 = vst [vmem:[#allocation94_spill] sm:$0xff] %v8371_v20  ;;  %11873 = vst [vmem:[#allocation107_spill] sm:$0xff] %v8374_v43  ;;  %v307_v0 = vmul.f32 %v7088_v54, %v175_v23  ;;  %v308_v19 = vmul.f32 %v7091_v55, %v175_v23  ;;  %v309_v32 = vmul.f32 %v7094_v56, %v175_v23  ;;  %v777_v36 = vpop.permute.xlu1 %776  ;;  %2414 = vmatpush1.bf16.msra.mxu0 %v6504_v7 }
 0x16d   :  { %v310_v25 = vmul.f32 %v7097_v57, %v175_v23  ;;  %v8384_v48 = vadd.f32 %v891_v12, %v651_v9  ;;  %v8386_v28 = vadd.f32 %v892_v50, %v652_v1  ;;  %v8390_v44 = vmul.f32 %v8365_v33, %v8365_v33  ;;  %2556 = vmatprep.subr.bf16.mxu0 %v6507_v30 }
 0x16e   :  { %v8394_v21 = vmul.f32 %v8368_v39, %v8368_v39  ;;  %v8398_v29 = vmul.f32 %v8337_v16, %v8337_v16  ;;  %v8402_v23 = vmul.f32 %v8340_v5, %v8340_v5  ;;  %v8405_v46 = vmul.f32 %v7088_v54, %v195_v34 }
 0x16f   :  { %11874 = vst [vmem:[#allocation108_spill] sm:$0xff] %v8384_v48  ;;  %11875 = vst [vmem:[#allocation58_spill] sm:$0xff] %v8386_v28  ;;  %v8408_v9 = vmul.f32 %v7091_v55, %v195_v34  ;;  %v8411_v1 = vmul.f32 %v7094_v56, %v195_v34  ;;  %v8414_v49 = vmul.f32 %v7097_v57, %v195_v34 }
 0x170   :  { %v8417_v22 = vmul.f32 %v7088_v54, %v200_v18  ;;  %v8420_v40 = vmul.f32 %v7091_v55, %v200_v18  ;;  %v549_v41 = vmul.f32 %v7106_v61, %v8278_v11  ;;  %v550_v10 = vmul.f32 %v7113_v63, %v8278_v11 }
 0x171   :  { %v1251_v51 = vmul.f32 %v8384_v48, %v8384_v48  ;;  %v1252_v34 = vmul.f32 %v8386_v28, %v8386_v28  ;;  %v8431_v12 = vmul.f32 %v7094_v56, %v200_v18  ;;  %v8434_v50 = vmul.f32 %v7097_v57, %v200_v18 }
 0x172   :  { %11876 = vst [vmem:[#allocation59_spill] sm:$0xff] %v8417_v22  ;;  %11877 = vst [vmem:[#allocation105_spill] sm:$0xff] %v8420_v40  ;;  %v547_v13 = vmul.f32 %v7100_v59, %v8278_v11  ;;  %v548_v45 = vmul.f32 %v7103_v60, %v8278_v11  ;;  %v661_v7 = vadd.f32 %v549_v41, %v309_v32  ;;  %v11881_v11 = vld [vmem:[#allocation63_spill] sm:$0xff] }
 0x173   :  { %11878 = vst [vmem:[#allocation106_spill] sm:$0xff] %v8434_v50  ;;  %v662_v30 = vadd.f32 %v550_v10, %v310_v25  ;;  %v1057_v31 = vadd.f32 %v1056_v17, %v8384_v48  ;;  %v1090_v8 = vadd.f32 %v1089_v26, %v8386_v28  ;;  %v1253_v27 = vmul.f32 %v8371_v20, %v8371_v20  ;;  %v8454_v25 = vpop.permute.xlu1 %189 }
 0x174   :  { %v1254_v52 = vmul.f32 %v8374_v43, %v8374_v43  ;;  %v1123_v18 = vadd.f32 %v1122_v37, %v8371_v20  ;;  %v1156_v38 = vadd.f32 %v1155_v53, %v8374_v43  ;;  %v8449_v40 = vadd.f32 %v11879_v58, %v661_v7 }
 0x175   :  { %v8452_v32 = vadd.f32 %v11881_v11, %v662_v30  ;;  %v313_v17 = vmul.f32 %v7094_v56, %v8316_v15  ;;  %v314_v26 = vmul.f32 %v7097_v57, %v8316_v15  ;;  %v553_v41 = vmul.f32 %v7106_v61, %v8342_v47 }
 0x176   :  { %11880 = vst [vmem:[#allocation56_spill] sm:$0xff] %v8449_v40  ;;  %v554_v37 = vmul.f32 %v7113_v63, %v8342_v47  ;;  %v1305_v53 = vadd.f32 %v1304_v6, %v1251_v51  ;;  %v1338_v58 = vadd.f32 %v1337_v42, %v1252_v34  ;;  %v659_v10 = vadd.f32 %v547_v13, %v307_v0  ;;  %v11887_v51 = vld [vmem:[#allocation8_spill] sm:$0xff]  ;;  %v11888_v13 = vld [vmem:[#allocation49_spill] sm:$0xff] }
 0x177   :  { %11882 = vst [vmem:[#allocation57_spill] sm:$0xff] %v8452_v32  ;;  %v660_v7 = vadd.f32 %v548_v45, %v308_v19  ;;  %v1371_v30 = vadd.f32 %v1370_v35, %v1253_v27  ;;  %v1404_v11 = vadd.f32 %v1403_v14, %v1254_v52  ;;  %v665_v20 = vadd.f32 %v553_v41, %v313_v17  ;;  %v781_v35 = vpop.permute.xlu1 %780  ;;  %v11883_v14 = vld [vmem:[#allocation60_spill] sm:$0xff] }
 0x178   :  { %v666_v43 = vadd.f32 %v554_v37, %v314_v26  ;;  %v311_v48 = vmul.f32 %v7088_v54, %v8316_v15  ;;  %v312_v28 = vmul.f32 %v7091_v55, %v8316_v15  ;;  %v317_v22 = vmul.f32 %v7094_v56, %v8376_v24  ;;  %v11885_v15 = vld [vmem:[#allocation61_spill] sm:$0xff] }
 0x179   :  { %v318_v50 = vmul.f32 %v7097_v57, %v8376_v24  ;;  %v551_v6 = vmul.f32 %v7100_v59, %v8342_v47  ;;  %v552_v27 = vmul.f32 %v7103_v60, %v8342_v47  ;;  %v905_v52 = vmul.f32 %v7119_v3, %v777_v36 }
 0x17a   :  { %v906_v42 = vmul.f32 %v7122_v4, %v777_v36  ;;  %v8479_v0 = vadd.f32 %v11883_v14, %v659_v10  ;;  %v8482_v19 = vadd.f32 %v11885_v15, %v660_v7  ;;  %v669_v34 = vadd.f32 %v11887_v51, %v317_v22  ;;  %v11893_v51 = vld [vmem:[#allocation83_spill] sm:$0xff] }
 0x17b   :  { %v670_v45 = vadd.f32 %v11888_v13, %v318_v50  ;;  %v903_v17 = vmul.f32 %v7109_v62, %v777_v36  ;;  %v904_v26 = vmul.f32 %v7116_v2, %v777_v36  ;;  %v8488_v47 = vadd.f32 %v905_v52, %v665_v20  ;;  %v437_v52 = vpop.permute.xlu1 %436 }
 0x17c   :  { %11884 = vst [vmem:[#allocation62_spill] sm:$0xff] %v8479_v0  ;;  %11886 = vst [vmem:[#allocation63_spill] sm:$0xff] %v8482_v19  ;;  %v8490_v41 = vadd.f32 %v906_v42, %v666_v43  ;;  %v1058_v37 = vadd.f32 %v1057_v31, %v8365_v33  ;;  %v1091_v10 = vadd.f32 %v1090_v8, %v8368_v39 }
 0x17d   :  { %v1124_v14 = vadd.f32 %v1123_v18, %v8337_v16  ;;  %v1157_v7 = vadd.f32 %v1156_v38, %v8340_v5  ;;  %v663_v15 = vadd.f32 %v551_v6, %v311_v48  ;;  %v664_v22 = vadd.f32 %v552_v27, %v312_v28 }
 0x17e   :  { %v315_v50 = vmul.f32 %v7088_v54, %v8376_v24  ;;  %v316_v36 = vmul.f32 %v7091_v55, %v8376_v24  ;;  %v1306_v20 = vadd.f32 %v1305_v53, %v8390_v44  ;;  %v1339_v43 = vadd.f32 %v1338_v58, %v8394_v21  ;;  %v11892_v58 = vld [vmem:[#allocation110_spill] sm:$0xff] }
 0x17f   :  { %v1372_v31 = vadd.f32 %v1371_v30, %v8398_v29  ;;  %v1405_v8 = vadd.f32 %v1404_v11, %v8402_v23  ;;  %v1259_v38 = vmul.f32 %v8479_v0, %v8479_v0  ;;  %v1260_v48 = vmul.f32 %v8482_v19, %v8482_v19  ;;  %v11891_v23 = vld [vmem:[#allocation109_spill] sm:$0xff] }
 0x180   :  { %v8508_v28 = vadd.f32 %v903_v17, %v663_v15  ;;  %v8510_v18 = vadd.f32 %v904_v26, %v664_v22  ;;  %v1261_v24 = vmul.f32 %v8449_v40, %v8449_v40  ;;  %v1262_v44 = vmul.f32 %v8452_v32, %v8452_v32  ;;  %v11894_v17 = vld [vmem:[#allocation72_spill] sm:$0xff] }
 0x181   :  { %v321_v21 = vmul.f32 %v7094_v56, %v8454_v25  ;;  %v322_v29 = vmul.f32 %v7097_v57, %v8454_v25  ;;  %v667_v53 = vadd.f32 %v11891_v23, %v315_v50  ;;  %v668_v30 = vadd.f32 %v11892_v58, %v316_v36  ;;  %v785_v36 = vpop.permute.xlu1 %784 }
 0x182   :  { %11889 = vst [vmem:[#allocation60_spill] sm:$0xff] %v8508_v28  ;;  %11890 = vst [vmem:[#allocation61_spill] sm:$0xff] %v8510_v18  ;;  %v1059_v11 = vadd.f32 %v1058_v37, %v8479_v0  ;;  %v1092_v6 = vadd.f32 %v1091_v10, %v8482_v19  ;;  %v1125_v27 = vadd.f32 %v1124_v14, %v8449_v40  ;;  %v11895_v0 = vld [vmem:[#allocation81_spill] sm:$0xff]  ;;  %v11896_v19 = vld [vmem:[#allocation82_spill] sm:$0xff] }
 0x183   :  { %v1158_v42 = vadd.f32 %v1157_v7, %v8452_v32  ;;  %v673_v13 = vadd.f32 %v11893_v51, %v321_v21  ;;  %v674_v26 = vadd.f32 %v11894_v17, %v322_v29  ;;  %v1263_v15 = vmul.f32 %v8508_v28, %v8508_v28 }
 0x184   :  { %v1264_v22 = vmul.f32 %v8510_v18, %v8510_v18  ;;  %v909_v50 = vmul.f32 %v7119_v3, %v781_v35  ;;  %v910_v37 = vmul.f32 %v7122_v4, %v781_v35  ;;  %v1060_v10 = vadd.f32 %v1059_v11, %v8508_v28 }
 0x185   :  { %v1093_v14 = vadd.f32 %v1092_v6, %v8510_v18  ;;  %v1265_v7 = vmul.f32 %v8488_v47, %v8488_v47  ;;  %v1266_v21 = vmul.f32 %v8490_v41, %v8490_v41  ;;  %v907_v29 = vmul.f32 %v7109_v62, %v781_v35 }
 0x186   :  { %v908_v23 = vmul.f32 %v7116_v2, %v781_v35  ;;  %v8542_v58 = vadd.f32 %v909_v50, %v669_v34  ;;  %v8544_v51 = vadd.f32 %v910_v37, %v670_v45  ;;  %v1307_v17 = vadd.f32 %v1306_v20, %v1259_v38  ;;  %v441_v38 = vpop.permute.xlu1 %440 }
 0x187   :  { %v1340_v40 = vadd.f32 %v1339_v43, %v1260_v48  ;;  %v319_v11 = vmul.f32 %v7088_v54, %v8454_v25  ;;  %v320_v6 = vmul.f32 %v7091_v55, %v8454_v25  ;;  %v563_v16 = vmul.f32 %v7100_v59, %v437_v52 }
 0x188   :  { %v564_v32 = vmul.f32 %v7103_v60, %v437_v52  ;;  %v565_v5 = vmul.f32 %v7106_v61, %v437_v52  ;;  %v566_v35 = vmul.f32 %v7113_v63, %v437_v52  ;;  %v1126_v34 = vadd.f32 %v1125_v27, %v8488_v47 }
 0x189   :  { %v1159_v45 = vadd.f32 %v1158_v42, %v8490_v41  ;;  %v1373_v20 = vadd.f32 %v1372_v31, %v1261_v24  ;;  %v1406_v43 = vadd.f32 %v1405_v8, %v1262_v44  ;;  %v1308_v48 = vadd.f32 %v1307_v17, %v1263_v15  ;;  %v789_v24 = vpop.permute.xlu0 %788 }
 0x18a   :  { %v1341_v50 = vadd.f32 %v1340_v40, %v1264_v22  ;;  %v8556_v37 = vadd.f32 %v907_v29, %v667_v53  ;;  %v8558_v25 = vadd.f32 %v908_v23, %v668_v30  ;;  %v671_v33 = vadd.f32 %v11895_v0, %v319_v11 }
 0x18b   :  { %v1374_v28 = vadd.f32 %v1373_v20, %v1265_v7  ;;  %v1407_v18 = vadd.f32 %v1406_v43, %v1266_v21  ;;  %v672_v39 = vadd.f32 %v11896_v19, %v320_v6  ;;  %v675_v52 = vadd.f32 %v563_v16, %v8405_v46  ;;  %v11898_v6 = vld [vmem:[#allocation106_spill] sm:$0xff] }
 0x18c   :  { %v676_v27 = vadd.f32 %v564_v32, %v8408_v9  ;;  %v677_v31 = vadd.f32 %v565_v5, %v8411_v1  ;;  %v678_v8 = vadd.f32 %v566_v35, %v8414_v49  ;;  %v911_v40 = vmul.f32 %v7109_v62, %v785_v36  ;;  %v205_v32 = vpop.permute.xlu1 %204 }
 0x18d   :  { %v912_v44 = vmul.f32 %v7116_v2, %v785_v36  ;;  %v913_v53 = vmul.f32 %v7119_v3, %v785_v36  ;;  %v914_v30 = vmul.f32 %v7122_v4, %v785_v36  ;;  %v1061_v0 = vadd.f32 %v1060_v10, %v8556_v37  ;;  %v793_v29 = vpop.permute.xlu0 %792 }
 0x18e   :  { %v1094_v19 = vadd.f32 %v1093_v14, %v8558_v25  ;;  %v1267_v16 = vmul.f32 %v8556_v37, %v8556_v37  ;;  %v1268_v5 = vmul.f32 %v8558_v25, %v8558_v25  ;;  %v915_v46 = vmul.f32 %v7109_v62, %v789_v24 }
 0x18f   :  { %v916_v9 = vmul.f32 %v7116_v2, %v789_v24  ;;  %v8578_v1 = vadd.f32 %v913_v53, %v673_v13  ;;  %v8580_v49 = vadd.f32 %v914_v30, %v674_v26  ;;  %v8582_v42 = vadd.f32 %v911_v40, %v671_v33  ;;  %v11899_v40 = vld [vmem:[#allocation59_spill] sm:$0xff] }
 0x190   :  { %v8584_v15 = vadd.f32 %v912_v44, %v672_v39  ;;  %v569_v22 = vmul.f32 %v7106_v61, %v441_v38  ;;  %v570_v36 = vmul.f32 %v7113_v63, %v441_v38  ;;  %v1127_v10 = vadd.f32 %v1126_v34, %v8542_v58  ;;  %v11900_v44 = vld [vmem:[#allocation105_spill] sm:$0xff] }
 0x191   :  { %11897 = vst [vmem:[#allocation8_spill] sm:$0xff] %v8578_v1  ;;  %v1160_v14 = vadd.f32 %v1159_v45, %v8544_v51  ;;  %v1269_v7 = vmul.f32 %v8542_v58, %v8542_v58  ;;  %v1270_v13 = vmul.f32 %v8544_v51, %v8544_v51  ;;  %v917_v26 = vmul.f32 %v7119_v3, %v789_v24 }
 0x192   :  { %v918_v33 = vmul.f32 %v7122_v4, %v789_v24  ;;  %v567_v39 = vmul.f32 %v7100_v59, %v441_v38  ;;  %v568_v21 = vmul.f32 %v7103_v60, %v441_v38  ;;  %v1309_v23 = vadd.f32 %v1308_v48, %v1267_v16 }
 0x193   :  { %v1342_v17 = vadd.f32 %v1341_v50, %v1268_v5  ;;  %v681_v11 = vadd.f32 %v569_v22, %v8431_v12  ;;  %v682_v35 = vadd.f32 %v570_v36, %v11898_v6  ;;  %v8600_v34 = vadd.f32 %v915_v46, %v675_v52  ;;  %v445_v50 = vpop.permute.xlu1 %444 }
 0x194   :  { %v8602_v45 = vadd.f32 %v916_v9, %v676_v27  ;;  %v1062_v20 = vadd.f32 %v1061_v0, %v8582_v42  ;;  %v1095_v43 = vadd.f32 %v1094_v19, %v8584_v15  ;;  %v1271_v24 = vmul.f32 %v8582_v42, %v8582_v42 }
 0x195   :  { %v1272_v38 = vmul.f32 %v8584_v15, %v8584_v15  ;;  %v921_v48 = vmul.f32 %v7119_v3, %v793_v29  ;;  %v922_v12 = vmul.f32 %v7122_v4, %v793_v29  ;;  %v679_v52 = vadd.f32 %v567_v39, %v11899_v40 }
 0x196   :  { %v680_v27 = vadd.f32 %v568_v21, %v11900_v44  ;;  %v919_v53 = vmul.f32 %v7109_v62, %v793_v29  ;;  %v920_v30 = vmul.f32 %v7116_v2, %v793_v29  ;;  %v1273_v0 = vmul.f32 %v8578_v1, %v8578_v1 }
 0x197   :  { %v1274_v19 = vmul.f32 %v8580_v49, %v8580_v49  ;;  %v8620_v16 = vadd.f32 %v921_v48, %v681_v11  ;;  %v8622_v5 = vadd.f32 %v922_v12, %v682_v35  ;;  %v1375_v46 = vadd.f32 %v1374_v28, %v1269_v7 }
 0x198   :  { %v1408_v9 = vadd.f32 %v1407_v18, %v1270_v13  ;;  %v8624_v22 = vadd.f32 %v917_v26, %v677_v31  ;;  %v8626_v36 = vadd.f32 %v918_v33, %v678_v8  ;;  %v1275_v39 = vmul.f32 %v8600_v34, %v8600_v34  ;;  %v797_v13 = vpop.permute.xlu1 %796 }
 0x199   :  { %11901 = vst [vmem:[#allocation49_spill] sm:$0xff] %v8620_v16  ;;  %11902 = vst [vmem:[#allocation109_spill] sm:$0xff] %v8622_v5  ;;  %v1276_v21 = vmul.f32 %v8602_v45, %v8602_v45  ;;  %v1128_v29 = vadd.f32 %v1127_v10, %v8578_v1  ;;  %v1161_v6 = vadd.f32 %v1160_v14, %v8580_v49 }
 0x19a   :  { %11903 = vst [vmem:[#allocation110_spill] sm:$0xff] %v8624_v22  ;;  %11904 = vst [vmem:[#allocation83_spill] sm:$0xff] %v8626_v36  ;;  %v1310_v11 = vadd.f32 %v1309_v23, %v1271_v24  ;;  %v1343_v48 = vadd.f32 %v1342_v17, %v1272_v38  ;;  %v8634_v35 = vadd.f32 %v919_v53, %v679_v52 }
 0x19b   :  { %v8636_v28 = vadd.f32 %v920_v30, %v680_v27  ;;  %v1376_v18 = vadd.f32 %v1375_v46, %v1273_v0  ;;  %v1409_v31 = vadd.f32 %v1408_v9, %v1274_v19  ;;  %v1063_v8 = vadd.f32 %v1062_v20, %v8600_v34 }
 0x19c   :  { %v1096_v7 = vadd.f32 %v1095_v43, %v8602_v45  ;;  %v331_v26 = vmul.f32 %v7088_v54, %v205_v32  ;;  %v332_v33 = vmul.f32 %v7091_v55, %v205_v32  ;;  %v333_v10 = vmul.f32 %v7094_v56, %v205_v32 }
 0x19d   :  { %v334_v14 = vmul.f32 %v7097_v57, %v205_v32  ;;  %v571_v23 = vmul.f32 %v7100_v59, %v445_v50  ;;  %v572_v17 = vmul.f32 %v7103_v60, %v445_v50  ;;  %v573_v24 = vmul.f32 %v7106_v61, %v445_v50 }
 0x19e   :  { %v574_v38 = vmul.f32 %v7113_v63, %v445_v50  ;;  %v1279_v20 = vmul.f32 %v8634_v35, %v8634_v35  ;;  %v1280_v54 = vmul.f32 %v8636_v28, %v8636_v28  ;;  %v923_v55 = vmul.f32 %v7109_v62, %v797_v13 }
 0x19f   :  { %v924_v56 = vmul.f32 %v7116_v2, %v797_v13  ;;  %v683_v43 = vadd.f32 %v571_v23, %v331_v26  ;;  %v684_v57 = vadd.f32 %v572_v17, %v332_v33  ;;  %v685_v32 = vadd.f32 %v573_v24, %v333_v10 }
 0x1a0   :  { %v686_v59 = vadd.f32 %v574_v38, %v334_v14  ;;  %v1311_v12 = vadd.f32 %v1310_v11, %v1275_v39  ;;  %v1344_v60 = vadd.f32 %v1343_v48, %v1276_v21  ;;  %v925_v61 = vmul.f32 %v7119_v3, %v797_v13 }
 0x1a1   :  { %v926_v63 = vmul.f32 %v7122_v4, %v797_v13  ;;  %v1064_v50 = vadd.f32 %v1063_v8, %v8634_v35  ;;  %v1097_v40 = vadd.f32 %v1096_v7, %v8636_v28  ;;  %v8658_v52 = vadd.f32 %v923_v55, %v683_v43 }
 0x1a2   :  { %v8660_v44 = vadd.f32 %v924_v56, %v684_v57  ;;  %v1312_v62 = vadd.f32 %v1311_v12, %v1279_v20  ;;  %v1345_v2 = vadd.f32 %v1344_v60, %v1280_v54  ;;  %v8662_v27 = vadd.f32 %v925_v61, %v685_v32 }
 0x1a3   :  { %v8664_v53 = vadd.f32 %v926_v63, %v686_v59  ;;  %v1065_v30 = vadd.f32 %v1064_v50, %v8658_v52  ;;  %v1283_v4 = vmul.f32 %v8658_v52, %v8658_v52  ;;  %v1277_v19 = vmul.f32 %v8624_v22, %v8624_v22 }
 0x1a4   :  { %11905 = vst [vmem:[#allocation72_spill] sm:$0xff] %v8662_v27  ;;  %v1098_v3 = vadd.f32 %v1097_v40, %v8660_v44  ;;  %v1284_v0 = vmul.f32 %v8660_v44, %v8660_v44  ;;  %v1278_v46 = vmul.f32 %v8626_v36, %v8626_v36  ;;  %v1129_v48 = vadd.f32 %v1128_v29, %v8624_v22 }
 0x1a5   :  { %11906 = vst [vmem:[#allocation81_spill] sm:$0xff] %v8664_v53  ;;  %v1066_v9 = vrot.slane %v1065_v30, 4  ;;  %v1313_v21 = vadd.f32 %v1312_v62, %v1283_v4  ;;  %v1162_v8 = vadd.f32 %v1161_v6, %v8626_v36  ;;  %v1377_v7 = vadd.f32 %v1376_v18, %v1277_v19 }
 0x1a6   :  { %v1099_v39 = vrot.slane %v1098_v3, 4  ;;  %v1346_v11 = vadd.f32 %v1345_v2, %v1284_v0  ;;  %v1410_v13 = vadd.f32 %v1409_v31, %v1278_v46  ;;  %v1130_v23 = vadd.f32 %v1129_v48, %v8620_v16 }
 0x1a7   :  { %v1067_v26 = vadd.f32 %v1066_v9, %v1065_v30  ;;  %v1314_v10 = vrot.slane %v1313_v21, 4  ;;  %v1163_v17 = vadd.f32 %v1162_v8, %v8622_v5  ;;  %v1281_v24 = vmul.f32 %v8620_v16, %v8620_v16  ;;  %v11920_v16 = vld [vmem:[#allocation18_spill] sm:$0xff] }
 0x1a8   :  { %v1100_v33 = vadd.f32 %v1099_v39, %v1098_v3  ;;  %v1347_v14 = vrot.slane %v1346_v11, 4  ;;  %v1282_v38 = vmul.f32 %v8622_v5, %v8622_v5  ;;  %v1131_v18 = vadd.f32 %v1130_v23, %v8662_v27 }
 0x1a9   :  { %v1068_v20 = vrot.slane %v1067_v26, 2  ;;  %v1315_v54 = vadd.f32 %v1314_v10, %v1313_v21  ;;  %v1164_v31 = vadd.f32 %v1163_v17, %v8664_v53  ;;  %v1285_v55 = vmul.f32 %v8662_v27, %v8662_v27 }
 0x1aa   :  { %v1101_v29 = vrot.slane %v1100_v33, 2  ;;  %v1348_v6 = vadd.f32 %v1347_v14, %v1346_v11  ;;  %v1286_v56 = vmul.f32 %v8664_v53, %v8664_v53  ;;  %v1378_v12 = vadd.f32 %v1377_v7, %v1281_v24 }
 0x1ab   :  { %v1069_v43 = vadd.f32 %v1068_v20, %v1067_v26  ;;  %v1316_v32 = vrot.slane %v1315_v54, 2  ;;  %v1411_v60 = vadd.f32 %v1410_v13, %v1282_v38  ;;  %v1132_v62 = vrot.slane %v1131_v18, 4 }
 0x1ac   :  { %v1102_v57 = vadd.f32 %v1101_v29, %v1100_v33  ;;  %v1349_v59 = vrot.slane %v1348_v6, 2  ;;  %v1165_v2 = vrot.slane %v1164_v31, 4  ;;  %v1379_v30 = vadd.f32 %v1378_v12, %v1285_v55 }
 0x1ad   :  { %v1070_v61 = vrot.slane %v1069_v43, 1  ;;  %v1317_v50 = vadd.f32 %v1316_v32, %v1315_v54  ;;  %v1412_v3 = vadd.f32 %v1411_v60, %v1286_v56  ;;  %v1133_v48 = vadd.f32 %v1132_v62, %v1131_v18 }
 0x1ae   :  { %v1103_v63 = vrot.slane %v1102_v57, 1  ;;  %v1350_v40 = vadd.f32 %v1349_v59, %v1348_v6  ;;  %v1166_v8 = vadd.f32 %v1165_v2, %v1164_v31  ;;  %v1380_v7 = vrot.slane %v1379_v30, 4 }
 0x1af   :  { %v1071_v4 = vadd.f32 %v1070_v61, %v1069_v43  ;;  %v1318_v19 = vrot.slane %v1317_v50, 1  ;;  %v1413_v13 = vrot.slane %v1412_v3, 4  ;;  %v1134_v20 = vrot.slane %v1133_v48, 2 }
 0x1b0   :  { %v1104_v0 = vadd.f32 %v1103_v63, %v1102_v57  ;;  %v1351_v46 = vrot.slane %v1350_v40, 1  ;;  %v1381_v24 = vadd.f32 %v1380_v7, %v1379_v30  ;;  %v1167_v29 = vrot.slane %v1166_v8, 2  ;;  %v11907_v63 = vld [vmem:[#allocation10_spill] sm:$0xff]  ;;  %v6737_v30 = vld [vmem:[%s11400_s1] sm:$0xff] }
 0x1b1   :  { %v1171_v9 = vmul.f32 0.004464286, %v1071_v4  ;;  %v1319_v21 = vadd.f32 %v1318_v19, %v1317_v50  ;;  %v1414_v38 = vadd.f32 %v1413_v13, %v1412_v3  ;;  %v1135_v18 = vadd.f32 %v1134_v20, %v1133_v48  ;;  %v6738_v4 = vld [vmem:[%s11400_s1 + $0x8] sm:$0xff] }
 0x1b2   :  { %v1172_v39 = vmul.f32 0.004464286, %v1104_v0  ;;  %v1352_v11 = vadd.f32 %v1351_v46, %v1350_v40  ;;  %v1382_v55 = vrot.slane %v1381_v24, 2  ;;  %v1168_v31 = vadd.f32 %v1167_v29, %v1166_v8 }
 0x1b3   :  { %v1419_v26 = vmul.f32 0.004464286, %v1319_v21  ;;  %v1423_v10 = vmul.f32 %v1171_v9, %v1171_v9  ;;  %v1415_v56 = vrot.slane %v1414_v38, 2  ;;  %v1136_v32 = vrot.slane %v1135_v18, 1 }
 0x1b4   :  { %v1420_v33 = vmul.f32 0.004464286, %v1352_v11  ;;  %v1424_v14 = vmul.f32 %v1172_v39, %v1172_v39  ;;  %v1383_v43 = vadd.f32 %v1382_v55, %v1381_v24  ;;  %v1169_v59 = vrot.slane %v1168_v31, 1  ;;  %v11912_v55 = vld [vmem:[#allocation38_spill] sm:$0xff] }
 0x1b5   :  { %v1427_v23 = vsub.f32 %v1419_v26, %v1423_v10  ;;  %v1416_v57 = vadd.f32 %v1415_v56, %v1414_v38  ;;  %v8691_v50 = vsub.s32 3, %v11907_v63  ;;  %v1137_v40 = vadd.f32 %v1136_v32, %v1135_v18  ;;  %v11910_v38 = vld [vmem:[#allocation101_spill] sm:$0xff]  ;;  %v11913_v18 = vld [vmem:[#allocation111_spill] sm:$0xff] }
 0x1b6   :  { %v1428_v17 = vsub.f32 %v1420_v33, %v1424_v14  ;;  %v1384_v12 = vrot.slane %v1383_v43, 1  ;;  %v1170_v62 = vadd.f32 %v1169_v59, %v1168_v31  ;;  %v8707_v13 = vsub.s32 4, %v11907_v63  ;;  %v11915_v59 = vld [vmem:[#allocation15_spill] sm:$0xff]  ;;  %v6505_v63 = vld [vmem:[#allocation2 + $0x100] ss:$8 sps:$4 sm:$0xff]  }
 0x1b7   :  { %v1431_v54 = vadd.f32 0.8, %v1427_v23  ;;  %v1417_v60 = vrot.slane %v1416_v57, 1  ;;  %11908 = vst [vmem:[#allocation82_spill] sm:$0xff] %v8691_v50  ;;  %v8699_v11 = vmul.f32 0.004464286, %v1137_v40 }
 0x1b8   :  { %v1432_v6 = vadd.f32 0.8, %v1428_v17  ;;  %v1385_v19 = vadd.f32 %v1384_v12, %v1383_v43  ;;  %v8701_v48 = vmul.f32 0.004464286, %v1170_v62  ;;  %11909 = vst [vmem:[#allocation106_spill] sm:$0xff] %v8707_v13 }
 0x1b9   :  { %6713 = vrsqrt.f32 %v1431_v54  ;;  %v1418_v46 = vadd.f32 %v1417_v60, %v1416_v57  ;;  %v1425_v17 = vmul.f32 %v8699_v11, %v8699_v11  ;;  %v11911_v54 = vld [vmem:[#allocation102_spill] sm:$0xff]  ;;  %v11914_v57 = vld [vmem:[#allocation27_spill] sm:$0xff] }
 0x1ba   :  { %6715 = vrsqrt.f32 %v1432_v6  ;;  %v1421_v14 = vmul.f32 0.004464286, %v1385_v19  ;;  %v11916_v60 = vld [vmem:[#allocation26_spill] sm:$0xff] }
 0x1bb   :  { %v8712_v23 = vmul.f32 0.004464286, %v1418_v46 }
 0x1c3   :  { %v6714_v61 = vpop.eup %6713 }
 0x1c4   :  { %v6716_v2 = vpop.eup %6715  ;;  %v1439_v3 = vmul.f32 %v6737_v30, %v6714_v61 }
 0x1c5   :  { %v1440_v0 = vmul.f32 %v6738_v4, %v6716_v2  ;;  %v11917_v2 = vld [vmem:[#allocation14_spill] sm:$0xff] }
 0x1c6   :  { %v1443_v21 = vmul.f32 %v1439_v3, %v1171_v9  ;;  %v8704_v7 = vrot.slane %v1439_v3, %v8691_v50  ;;  %v11918_v3 = vld [vmem:[#allocation19_spill] sm:$0xff] }
 0x1c7   :  { %v1444_v8 = vmul.f32 %v1440_v0, %v1172_v39  ;;  %v8710_v33 = vrot.slane %v1440_v0, %v8691_v50  ;;  %v8718_v39 = vmul.f32 %v8701_v48, %v8701_v48 }
 0x1c8   :  { %v1451_v26 = vrot.slane %v1443_v21, 7  ;;  %v1479_v20 = vmul.f32 %v8704_v7, %v11910_v38  ;;  %v1483_v31 = vmul.f32 %v8704_v7, %v11913_v18  ;;  %v1487_v61 = vmul.f32 %v8704_v7, %v11916_v60  ;;  %v11919_v21 = vld [vmem:[#allocation67_spill] sm:$0xff] }
 0x1c9   :  { %v1452_v10 = vrot.slane %v1444_v8, 7  ;;  %v1480_v6 = vmul.f32 %v8710_v33, %v11911_v54  ;;  %v1484_v56 = vmul.f32 %v8710_v33, %v11912_v55  ;;  %v1488_v32 = vmul.f32 %v8710_v33, %v11914_v57 }
 0x1ca   :  { %v1459_v9 = vsub.f32 %v6737_v30, %v1451_v26  ;;  %v1492_v12 = vmul.f32 %v8710_v33, %v11915_v59  ;;  %v1491_v30 = vmul.f32 %v8704_v7, %v11917_v2  ;;  %v1500_v8 = vmul.f32 %v8710_v33, %v11919_v21 }
 0x1cb   :  { %v1460_v24 = vsub.f32 %v6738_v4, %v1452_v10  ;;  %v1496_v4 = vmul.f32 %v8710_v33, %v11918_v3  ;;  %v1429_v57 = vsub.f32 %v1421_v14, %v1425_v17  ;;  %v11922_v17 = vld [vmem:[#allocation65_spill] sm:$0xff] }
 0x1cc   :  { %v8723_v29 = vrot.slane %v1459_v9, %v8707_v13 }
 0x1cd   :  { %v8732_v43 = vrot.slane %v1460_v24, %v8707_v13 }
 0x1ce   :  { %v1607_v40 = vadd.f32 %v8723_v29, %v1479_v20  ;;  %v1611_v62 = vadd.f32 %v8723_v29, %v1483_v31  ;;  %v8753_v24 = vadd.f32 %v8723_v29, %v1487_v61  ;;  %v1619_v55 = vadd.f32 %v8723_v29, %v1491_v30 }
 0x1cf   :  { %v1608_v0 = vadd.f32 %v8732_v43, %v1480_v6  ;;  %v1612_v19 = vadd.f32 %v8732_v43, %v1484_v56  ;;  %v1616_v46 = vadd.f32 %v8732_v43, %v1488_v32  ;;  %v1620_v9 = vadd.f32 %v8732_v43, %v1492_v12 }
 0x1d0   :  { %v1719_v26 = vmul.f32 0.2, %v1607_v40  ;;  %v1723_v10 = vmul.f32 0.2, %v1611_v62  ;;  %v1624_v31 = vadd.f32 %v8732_v43, %v1496_v4  ;;  %v1727_v12 = vmul.f32 0.2, %v8753_v24 }
 0x1d1   :  { %v1720_v38 = vmul.f32 0.2, %v1608_v0  ;;  %v1724_v20 = vmul.f32 0.2, %v1612_v19  ;;  %v1728_v54 = vmul.f32 0.2, %v1616_v46  ;;  %v1628_v61 = vadd.f32 %v8732_v43, %v1500_v8 }
 0x1d2   :  { %v1831_v6 = vmax.f32 %v1607_v40, %v1719_v26  ;;  %v1835_v18 = vmax.f32 %v1611_v62, %v1723_v10  ;;  %v1732_v56 = vmul.f32 0.2, %v1620_v9  ;;  %v1731_v27 = vmul.f32 0.2, %v1619_v55  ;;  %v6510_v62 = vld [vmem:[#allocation2 + $0x114] ss:$8 sps:$4 sm:$0xff]  }
 0x1d3   :  { %v1832_v32 = vmax.f32 %v1608_v0, %v1720_v38  ;;  %v1836_v59 = vmax.f32 %v1612_v19, %v1724_v20  ;;  %v1840_v60 = vmax.f32 %v1616_v46, %v1728_v54  ;;  %v1495_v40 = vmul.f32 %v8704_v7, %v11920_v16  ;;  %v11921_v4 = vld [vmem:[#allocation66_spill] sm:$0xff]  ;;  %v11923_v10 = vld [vmem:[#allocation77_spill] sm:$0xff] }
 0x1d4   :  { %v1943_v2 = vpack.c.bf16 %v1835_v18, %v1831_v6  ;;  %v1844_v3 = vmax.f32 %v1620_v9, %v1732_v56  ;;  %v1736_v30 = vmul.f32 0.2, %v1624_v31  ;;  %v1740_v26 = vmul.f32 0.2, %v1628_v61  ;;  %v6508_v6 = vld [vmem:[#allocation2 + $0x110] ss:$8 sps:$4 sm:$0xff]  }
 0x1d5   :  { %v1944_v21 = vpack.c.bf16 %v1836_v59, %v1832_v32  ;;  %v1499_v14 = vmul.f32 %v8704_v7, %v11921_v4  ;;  %v1504_v0 = vmul.f32 %v8710_v33, %v11922_v17  ;;  %v1430_v19 = vsub.f32 %v8712_v23, %v8718_v39  ;;  %v11924_v56 = vld [vmem:[#allocation64_spill] sm:$0xff]  ;;  %v11928_v17 = vld [vmem:[#allocation97_spill] sm:$0xff] }
 0x1d6   :  { %v1948_v46 = vpack.c.bf16 %v1844_v3, %v1840_v60  ;;  %v1623_v8 = vadd.f32 %v8723_v29, %v1495_v40  ;;  %v1508_v9 = vmul.f32 %v8710_v33, %v11923_v10  ;;  %v1433_v16 = vadd.f32 0.8, %v1429_v57  ;;  %v6513_v60 = vld [vmem:[#allocation2 + $0x124] ss:$8 sps:$4 sm:$0xff]  }
 0x1d7   :  { %2415 = vmatprep.mubr.bf16.mxu0 %v1944_v21  ;;  %v1839_v38 = vmax.f32 %v8753_v24, %v1727_v12  ;;  %v1627_v20 = vadd.f32 %v8723_v29, %v1499_v14  ;;  %v1632_v54 = vadd.f32 %v8732_v43, %v1504_v0  ;;  %v1843_v18 = vmax.f32 %v1619_v55, %v1731_v27  ;;  %v11925_v24 = vld [vmem:[#allocation76_spill] sm:$0xff]  ;;  %v11926_v27 = vld [vmem:[#allocation98_spill] sm:$0xff] }
 0x1d8   :  { %2416 = vmatmul.mubr.bf16.vlgmr.msra.gmra.mrb[0].mxu0 %v1943_v2  ;;  %v1735_v23 = vmul.f32 0.2, %v1623_v8  ;;  %v1636_v39 = vadd.f32 %v8732_v43, %v1508_v9  ;;  %v1503_v32 = vmul.f32 %v8704_v7, %v11924_v56  ;;  %v1848_v59 = vmax.f32 %v1624_v31, %v1736_v30  ;;  %v11927_v31 = vld [vmem:[#allocation51_spill] sm:$0xff] }
 0x1d9   :  { %2557 = vmatpush1.bf16.msra.mxu0 %v6505_v63  ;;  %2425 = vmatprep.mubr.bf16.mxu0 %v1948_v46  ;;  %v1852_v57 = vmax.f32 %v1628_v61, %v1740_v26  ;;  %v1739_v2 = vmul.f32 0.2, %v1627_v20  ;;  %v1507_v3 = vmul.f32 %v8704_v7, %v11925_v24  ;;  %v1744_v12 = vmul.f32 0.2, %v1632_v54  ;;  %v11932_v24 = vld [vmem:[#allocation22_spill] sm:$0xff] }
 0x1da   :  { %2558 = vmatprep.subr.bf16.mxu0 %v6510_v62  ;;  %v1748_v21 = vmul.f32 0.2, %v1636_v39  ;;  %v8779_v63 = vadd.f32 %v8723_v29, %v1503_v32  ;;  %v1512_v55 = vmul.f32 %v8710_v33, %v11926_v27  ;;  %v1434_v40 = vadd.f32 0.8, %v1430_v19  ;;  %v6511_v62 = vld [vmem:[#allocation2 + $0x120] ss:$8 sps:$4 sm:$0xff]  }
 0x1db   :  { %6717 = vrsqrt.f32 %v1433_v16  ;;  %v8784_v4 = vadd.f32 %v8723_v29, %v1507_v3  ;;  %v1516_v61 = vmul.f32 %v8710_v33, %v11927_v31  ;;  %v1847_v30 = vmax.f32 %v1623_v8, %v1735_v23  ;;  %v6516_v19 = vld [vmem:[#allocation2 + $0x134] ss:$8 sps:$4 sm:$0xff]  }
 0x1dc   :  { %v1851_v26 = vmax.f32 %v1627_v20, %v1739_v2  ;;  %v8789_v14 = vadd.f32 %v8732_v43, %v1512_v55  ;;  %v1511_v0 = vmul.f32 %v8704_v7, %v11928_v17  ;;  %v1947_v46 = vpack.c.bf16 %v1843_v18, %v1839_v38  ;;  %v11929_v16 = vld [vmem:[#allocation50_spill] sm:$0xff]  ;;  %v11930_v23 = vld [vmem:[#allocation23_spill] sm:$0xff] }
 0x1dd   :  { %2559 = vmatpush1.bf16.msra.mxu0 %v6508_v6  ;;  %v1952_v10 = vpack.c.bf16 %v1852_v57, %v1848_v59  ;;  %v8794_v9 = vadd.f32 %v8732_v43, %v1516_v61  ;;  %v1515_v56 = vmul.f32 %v8704_v7, %v11929_v16  ;;  %v1856_v6 = vmax.f32 %v1632_v54, %v1744_v12  ;;  %v11931_v57 = vld [vmem:[#allocation74_spill] sm:$0xff]  ;;  %v6517_v16 = vld [vmem:[#allocation2 + $0x140] ss:$8 sps:$4 sm:$0xff]  }
 0x1de   :  { %2560 = vmatprep.subr.bf16.mxu0 %v6513_v60  ;;  %v1860_v32 = vmax.f32 %v1636_v39, %v1748_v21  ;;  %v8799_v8 = vmul.f32 0.2, %v8779_v63  ;;  %v8802_v20 = vadd.f32 %v8723_v29, %v1511_v0  ;;  %v8805_v38 = vmul.f32 0.2, %v8784_v4  ;;  %v6514_v60 = vld [vmem:[#allocation2 + $0x130] ss:$8 sps:$4 sm:$0xff]  }
 0x1df   :  { %v8808_v18 = vadd.f32 %v8723_v29, %v1515_v56  ;;  %v1520_v59 = vmul.f32 %v8710_v33, %v11930_v23  ;;  %v1524_v54 = vmul.f32 %v8710_v33, %v11931_v57  ;;  %6719 = vrsqrt.f32 %v1434_v40  ;;  %v6519_v21 = vld [vmem:[#allocation2 + $0x144] ss:$8 sps:$4 sm:$0xff]  }
 0x1e0   :  { %2426 = vmatmul.mubr.bf16.gmra.mrb[4].mxu0 %v1947_v46  ;;  %v1951_v39 = vpack.c.bf16 %v1851_v26, %v1847_v30  ;;  %v8815_v2 = vmul.f32 0.2, %v8789_v14  ;;  %v1519_v3 = vmul.f32 %v8704_v7, %v11932_v24  ;;  %v8820_v12 = vmul.f32 0.2, %v8794_v9  ;;  %v11933_v40 = vld [vmem:[#allocation73_spill] sm:$0xff]  ;;  %v11934_v26 = vld [vmem:[#allocation32_spill] sm:$0xff] }
 0x1e1   :  { %2435 = vmatprep.mubr.bf16.mxu0 %v1952_v10  ;;  %2561 = vmatpush1.bf16.msra.mxu0 %v6511_v62  ;;  %v8823_v27 = vadd.f32 %v8732_v43, %v1520_v59  ;;  %v8826_v55 = vadd.f32 %v8732_v43, %v1524_v54  ;;  %v1523_v31 = vmul.f32 %v8704_v7, %v11933_v40  ;;  %v8833_v62 = vmul.f32 0.2, %v8802_v20 }
 0x1e2   :  { %2562 = vmatprep.subr.bf16.mxu0 %v6516_v19  ;;  %v1855_v61 = vmax.f32 %v8779_v63, %v8799_v8  ;;  %v8836_v30 = vadd.f32 %v8723_v29, %v1519_v3  ;;  %v1528_v17 = vmul.f32 %v8710_v33, %v11934_v26  ;;  %v1956_v0 = vpack.c.bf16 %v1860_v32, %v1856_v6  ;;  %v11935_v8 = vld [vmem:[#allocation36_spill] sm:$0xff]  ;;  %v11937_v3 = vld [vmem:[#allocation35_spill] sm:$0xff] }
 0x1e3   :  { %v1859_v46 = vmax.f32 %v8784_v4, %v8805_v38  ;;  %v1755_v10 = vmul.f32 0.2, %v8808_v18  ;;  %v1651_v19 = vadd.f32 %v8723_v29, %v1523_v31  ;;  %v1864_v63 = vmax.f32 %v8789_v14, %v8815_v2  ;;  %v6522_v38 = vld [vmem:[#allocation2 + $0x154] ss:$8 sps:$4 sm:$0xff]  }
 0x1e4   :  { %v1760_v56 = vmul.f32 0.2, %v8823_v27  ;;  %v1532_v23 = vmul.f32 %v8710_v33, %v11935_v8  ;;  %v1656_v59 = vadd.f32 %v8732_v43, %v1528_v17  ;;  %v1868_v4 = vmax.f32 %v8794_v9, %v8820_v12  ;;  %v11936_v14 = vld [vmem:[#allocation31_spill] sm:$0xff]  ;;  %v11938_v31 = vld [vmem:[#allocation86_spill] sm:$0xff] }
 0x1e5   :  { %2563 = vmatpush1.bf16.msra.mxu0 %v6514_v60  ;;  %v8850_v6 = vpop.eup %6717  ;;  %v1764_v32 = vmul.f32 0.2, %v8826_v55  ;;  %v1759_v57 = vmul.f32 0.2, %v8836_v30  ;;  %v1527_v54 = vmul.f32 %v8704_v7, %v11936_v14  ;;  %v1863_v60 = vmax.f32 %v8802_v20, %v8833_v62  ;;  %v6520_v20 = vld [vmem:[#allocation2 + $0x150] ss:$8 sps:$4 sm:$0xff]  }
 0x1e6   :  { %2564 = vmatprep.subr.bf16.mxu0 %v6519_v21  ;;  %v1763_v2 = vmul.f32 0.2, %v1651_v19  ;;  %v1660_v24 = vadd.f32 %v8732_v43, %v1532_v23  ;;  %v1531_v40 = vmul.f32 %v8704_v7, %v11937_v3  ;;  %v1867_v9 = vmax.f32 %v8808_v18, %v1755_v10  ;;  %v11939_v23 = vld [vmem:[#allocation43_spill] sm:$0xff]  ;;  %v6525_v10 = vld [vmem:[#allocation2 + $0x164] ss:$8 sps:$4 sm:$0xff]  }
 0x1e7   :  { %v1768_v12 = vmul.f32 0.2, %v1656_v59  ;;  %v1655_v21 = vadd.f32 %v8723_v29, %v1527_v54  ;;  %v1536_v26 = vmul.f32 %v8710_v33, %v11938_v31  ;;  %v1872_v17 = vmax.f32 %v8823_v27, %v1760_v56  ;;  %v11940_v31 = vld [vmem:[#allocation85_spill] sm:$0xff] }
 0x1e8   :  { %2436 = vmatmul.mubr.bf16.gmra.mrb[8].mxu0 %v1951_v39  ;;  %v1772_v62 = vmul.f32 0.2, %v1660_v24  ;;  %v1659_v8 = vadd.f32 %v8723_v29, %v1531_v40  ;;  %v1540_v14 = vmul.f32 %v8710_v33, %v11939_v23  ;;  %v1876_v39 = vmax.f32 %v8826_v55, %v1764_v32  ;;  %v11941_v55 = vld [vmem:[#allocation42_spill] sm:$0xff] }
 0x1e9   :  { %2445 = vmatprep.mubr.bf16.mxu0 %v1956_v0  ;;  %2565 = vmatpush1.bf16.msra.mxu0 %v6517_v16  ;;  %v1871_v18 = vmax.f32 %v8836_v30, %v1759_v57  ;;  %v1767_v54 = vmul.f32 0.2, %v1655_v21  ;;  %v1664_v3 = vadd.f32 %v8732_v43, %v1536_v26  ;;  %v8874_v0 = vpop.eup %6719  ;;  %v1875_v16 = vmax.f32 %v1651_v19, %v1763_v2  ;;  %v6528_v2 = vld [vmem:[#allocation2 + $0x174] ss:$8 sps:$4 sm:$0xff]  }
 0x1ea   :  { %2566 = vmatprep.subr.bf16.mxu0 %v6522_v38  ;;  %v1771_v27 = vmul.f32 0.2, %v1659_v8  ;;  %v1668_v56 = vadd.f32 %v8732_v43, %v1540_v14  ;;  %v1535_v40 = vmul.f32 %v8704_v7, %v11940_v31  ;;  %v1880_v53 = vmax.f32 %v1656_v59, %v1768_v12  ;;  %v6523_v38 = vld [vmem:[#allocation2 + $0x160] ss:$8 sps:$4 sm:$0xff]   ;;  %v11942_v59 = vld [vmem:[#allocation46_spill] sm:$0xff] }
 0x1eb   :  { %v1884_v23 = vmax.f32 %v1660_v24, %v1772_v62  ;;  %v1776_v5 = vmul.f32 0.2, %v1664_v3  ;;  %v1539_v32 = vmul.f32 %v8704_v7, %v11941_v55  ;;  %v1955_v30 = vpack.c.bf16 %v1859_v46, %v1855_v61  ;;  %v11943_v46 = vld [vmem:[#allocation45_spill] sm:$0xff] }
 0x1ec   :  { %v1879_v57 = vmax.f32 %v1655_v21, %v1767_v54  ;;  %v1883_v26 = vmax.f32 %v1659_v8, %v1771_v27  ;;  %v8882_v22 = vadd.f32 %v8723_v29, %v1535_v40  ;;  %v1960_v19 = vpack.c.bf16 %v1868_v4, %v1864_v63  ;;  %v11944_v8 = vld [vmem:[#allocation89_spill] sm:$0xff]  ;;  %v11946_v27 = vld [vmem:[#allocation52_spill] sm:$0xff] }
 0x1ed   :  { %2567 = vmatpush1.bf16.msra.mxu0 %v6520_v20  ;;  %v1780_v14 = vmul.f32 0.2, %v1668_v56  ;;  %v8885_v31 = vadd.f32 %v8723_v29, %v1539_v32  ;;  %v1544_v24 = vmul.f32 %v8710_v33, %v11942_v59  ;;  %v1959_v12 = vpack.c.bf16 %v1867_v9, %v1863_v60  ;;  %v6526_v60 = vld [vmem:[#allocation2 + $0x170] ss:$8 sps:$4 sm:$0xff]   ;;  %v6529_v59 = vld [vmem:[#allocation2 + $0x180] ss:$8 sps:$4 sm:$0xff]  }
 0x1ee   :  { %2568 = vmatprep.subr.bf16.mxu0 %v6525_v10  ;;  %v1964_v62 = vpack.c.bf16 %v1876_v39, %v1872_v17  ;;  %v8889_v61 = vpack.c.bf16 %v1875_v16, %v1871_v18  ;;  %v1543_v21 = vmul.f32 %v8704_v7, %v11943_v46  ;;  %v8893_v20 = vpack.c.bf16 %v1884_v23, %v1880_v53  ;;  %v11945_v17 = vld [vmem:[#allocation90_spill] sm:$0xff]  ;;  %v6531_v18 = vld [vmem:[#allocation2 + $0x184] ss:$8 sps:$4 sm:$0xff]  }
 0x1ef   :  { %v1888_v63 = vmax.f32 %v1664_v3, %v1776_v5  ;;  %v8896_v4 = vadd.f32 %v8732_v43, %v1544_v24  ;;  %v1547_v10 = vmul.f32 %v8704_v7, %v11944_v8  ;;  %v8900_v54 = vpack.c.bf16 %v1883_v26, %v1879_v57  ;;  %v11947_v32 = vld [vmem:[#allocation58_spill] sm:$0xff]  ;;  %v11950_v8 = vld [vmem:[#allocation93_spill] sm:$0xff] }
 0x1f0   :  { %2446 = vmatmul.mubr.bf16.gmra.mrb[12].mxu0 %v1955_v30  ;;  %v8903_v9 = vmul.f32 0.2, %v8882_v22  ;;  %v1548_v39 = vmul.f32 %v8710_v33, %v11945_v17  ;;  %v1671_v53 = vadd.f32 %v8723_v29, %v1543_v21  ;;  %v1892_v5 = vmax.f32 %v1668_v56, %v1780_v14 }
 0x1f1   :  { %2455 = vmatprep.mubr.bf16.mxu0 %v1960_v19  ;;  %2569 = vmatpush1.bf16.msra.mxu0 %v6523_v38  ;;  %v8909_v3 = vmul.f32 0.2, %v8885_v31  ;;  %v1675_v16 = vadd.f32 %v8723_v29, %v1547_v10  ;;  %v1552_v40 = vmul.f32 %v8710_v33, %v11946_v27  ;;  %v1556_v30 = vmul.f32 %v8710_v33, %v11947_v32  ;;  %v11948_v38 = vld [vmem:[#allocation41_spill] sm:$0xff] }
 0x1f2   :  { %2570 = vmatprep.subr.bf16.mxu0 %v6528_v2  ;;  %v8915_v23 = vadd.f32 %v8732_v43, %v1548_v39  ;;  %v1783_v55 = vmul.f32 0.2, %v1671_v53  ;;  %v1551_v57 = vmul.f32 %v8704_v7, %v11948_v38  ;;  %v8922_v56 = vmul.f32 0.2, %v8896_v4  ;;  %v11949_v2 = vld [vmem:[#allocation108_spill] sm:$0xff] }
 0x1f3   :  { %v1787_v26 = vmul.f32 0.2, %v1675_v16  ;;  %v1680_v19 = vadd.f32 %v8732_v43, %v1552_v40  ;;  %v1555_v14 = vmul.f32 %v8704_v7, %v11949_v2  ;;  %v1684_v46 = vadd.f32 %v8732_v43, %v1556_v30  ;;  %v6534_v39 = vld [vmem:[#allocation2 + $0x194] ss:$8 sps:$4 sm:$0xff]  }
 0x1f4   :  { %v1895_v24 = vmax.f32 %v1671_v53, %v1783_v55  ;;  %v1679_v21 = vadd.f32 %v8723_v29, %v1551_v57  ;;  %v1560_v10 = vmul.f32 %v8710_v33, %v11950_v8  ;;  %v8931_v17 = vpack.c.bf16 %v1892_v5, %v1888_v63  ;;  %v11952_v63 = vld [vmem:[#allocation96_spill] sm:$0xff] }
 0x1f5   :  { %2571 = vmatpush1.bf16.msra.mxu0 %v6526_v60  ;;  %v1899_v27 = vmax.f32 %v1675_v16, %v1787_v26  ;;  %v1792_v32 = vmul.f32 0.2, %v1680_v19  ;;  %v1683_v40 = vadd.f32 %v8723_v29, %v1555_v14  ;;  %v1796_v38 = vmul.f32 0.2, %v1684_v46  ;;  %v11951_v60 = vld [vmem:[#allocation63_spill] sm:$0xff] }
 0x1f6   :  { %2572 = vmatprep.subr.bf16.mxu0 %v6531_v18  ;;  %v1791_v2 = vmul.f32 0.2, %v1679_v21  ;;  %v1564_v53 = vmul.f32 %v8710_v33, %v11951_v60  ;;  %v1688_v55 = vadd.f32 %v8732_v43, %v1560_v10  ;;  %v1559_v5 = vmul.f32 %v8704_v7, %v11952_v63  ;;  %v6532_v18 = vld [vmem:[#allocation2 + $0x190] ss:$8 sps:$4 sm:$0xff]   ;;  %v6537_v60 = vld [vmem:[#allocation2 + $0x1a4] ss:$8 sps:$4 sm:$0xff]  }
 0x1f7   :  { %v8937_v30 = vpack.c.bf16 %v1899_v27, %v1895_v24  ;;  %v1904_v57 = vmax.f32 %v1680_v19, %v1792_v32  ;;  %v1795_v8 = vmul.f32 0.2, %v1683_v40  ;;  %v1908_v16 = vmax.f32 %v1684_v46, %v1796_v38  ;;  %v11953_v10 = vld [vmem:[#allocation62_spill] sm:$0xff]  ;;  %v11954_v24 = vld [vmem:[#allocation61_spill] sm:$0xff]  ;;  %v11955_v63 = vld [vmem:[#allocation60_spill] sm:$0xff] }
 0x1f8   :  { %2456 = vmatmul.mubr.bf16.gmra.mrb[16].mxu0 %v1959_v12  ;;  %v1903_v26 = vmax.f32 %v1679_v21, %v1791_v2  ;;  %v1692_v14 = vadd.f32 %v8732_v43, %v1564_v53  ;;  %v1800_v1 = vmul.f32 0.2, %v1688_v55  ;;  %v1563_v12 = vmul.f32 %v8704_v7, %v11953_v10  ;;  %v6535_v2 = vld [vmem:[#allocation2 + $0x1a0] ss:$8 sps:$4 sm:$0xff]  }
 0x1f9   :  { %2465 = vmatprep.mubr.bf16.mxu0 %v1964_v62  ;;  %2573 = vmatpush1.bf16.msra.mxu0 %v6529_v59  ;;  %v1907_v36 = vmax.f32 %v1683_v40, %v1795_v8  ;;  %v1687_v19 = vadd.f32 %v8723_v29, %v1559_v5  ;;  %v1568_v27 = vmul.f32 %v8710_v33, %v11954_v24 }
 0x1fa   :  { %2574 = vmatprep.subr.bf16.mxu0 %v6534_v39  ;;  %v8947_v32 = vpack.c.bf16 %v1908_v16, %v1904_v57  ;;  %v1804_v62 = vmul.f32 0.2, %v1692_v14  ;;  %v1912_v59 = vmax.f32 %v1688_v55, %v1800_v1  ;;  %v1572_v46 = vmul.f32 %v8710_v33, %v8558_v25  ;;  %v6540_v25 = vld [vmem:[#allocation2 + $0x1b4] ss:$8 sps:$4 sm:$0xff]  }
 0x1fb   :  { %v8951_v21 = vpack.c.bf16 %v1907_v36, %v1903_v26  ;;  %v1691_v39 = vadd.f32 %v8723_v29, %v1563_v12  ;;  %v1799_v40 = vmul.f32 0.2, %v1687_v19  ;;  %v1696_v38 = vadd.f32 %v8732_v43, %v1568_v27 }
 0x1fc   :  { %v1916_v53 = vmax.f32 %v1692_v14, %v1804_v62  ;;  %v1700_v8 = vadd.f32 %v8732_v43, %v1572_v46  ;;  %v1567_v57 = vmul.f32 %v8704_v7, %v11955_v63  ;;  %v1571_v1 = vmul.f32 %v8704_v7, %v8556_v37 }
 0x1fd   :  { %2575 = vmatpush1.bf16.msra.mxu0 %v6532_v18  ;;  %v1803_v36 = vmul.f32 0.2, %v1691_v39  ;;  %v1911_v55 = vmax.f32 %v1687_v19, %v1799_v40  ;;  %v1808_v5 = vmul.f32 0.2, %v1696_v38  ;;  %v1576_v16 = vmul.f32 %v8710_v33, %v8584_v15  ;;  %v6538_v15 = vld [vmem:[#allocation2 + $0x1b0] ss:$8 sps:$4 sm:$0xff]  }
 0x1fe   :  { %2576 = vmatprep.subr.bf16.mxu0 %v6537_v60  ;;  %v8962_v26 = vpack.c.bf16 %v1916_v53, %v1912_v59  ;;  %v1812_v18 = vmul.f32 0.2, %v1700_v8  ;;  %v1695_v14 = vadd.f32 %v8723_v29, %v1567_v57  ;;  %v1699_v10 = vadd.f32 %v8723_v29, %v1571_v1  ;;  %v6541_v1 = vld [vmem:[#allocation2 + $0x1c0] ss:$8 sps:$4 sm:$0xff]  }
 0x1ff   :  { %v1915_v12 = vmax.f32 %v1691_v39, %v1803_v36  ;;  %v1920_v24 = vmax.f32 %v1696_v38, %v1808_v5  ;;  %v1580_v37 = vmul.f32 %v8710_v33, %v8602_v45  ;;  %v1704_v60 = vadd.f32 %v8732_v43, %v1576_v16  ;;  %v6546_v16 = vld [vmem:[#allocation2 + $0x1d4] ss:$8 sps:$4 sm:$0xff]  }
 0x200   :  { %2466 = vmatmul.mubr.bf16.gmra.mrb[20].mxu0 %v8889_v61  ;;  %v1924_v19 = vmax.f32 %v1700_v8, %v1812_v18  ;;  %v1807_v27 = vmul.f32 0.2, %v1695_v14  ;;  %v1811_v62 = vmul.f32 0.2, %v1699_v10  ;;  %v1575_v59 = vmul.f32 %v8704_v7, %v8582_v42  ;;  %v6543_v61 = vld [vmem:[#allocation2 + $0x1c4] ss:$8 sps:$4 sm:$0xff]  }
 0x201   :  { %2475 = vmatprep.mubr.bf16.mxu0 %v8893_v20  ;;  %2577 = vmatpush1.bf16.msra.mxu0 %v6535_v2  ;;  %v8973_v46 = vpack.c.bf16 %v1915_v12, %v1911_v55  ;;  %v1708_v39 = vadd.f32 %v8732_v43, %v1580_v37  ;;  %v1816_v40 = vmul.f32 0.2, %v1704_v60  ;;  %v1579_v45 = vmul.f32 %v8704_v7, %v8600_v34 }
 0x202   :  { %2578 = vmatprep.subr.bf16.mxu0 %v6540_v25  ;;  %v8978_v38 = vpack.c.bf16 %v1924_v19, %v1920_v24  ;;  %v1919_v20 = vmax.f32 %v1695_v14, %v1807_v27  ;;  %v1923_v2 = vmax.f32 %v1699_v10, %v1811_v62  ;;  %v1703_v53 = vadd.f32 %v8723_v29, %v1575_v59  ;;  %v6549_v62 = vld [vmem:[#allocation2 + $0x1e4] ss:$8 sps:$4 sm:$0xff]  }
 0x203   :  { %v1820_v8 = vmul.f32 0.2, %v1708_v39  ;;  %v1928_v63 = vmax.f32 %v1704_v60, %v1816_v40  ;;  %v1707_v42 = vadd.f32 %v8723_v29, %v1579_v45  ;;  %v1584_v57 = vmul.f32 %v8710_v33, %v8636_v28  ;;  %v6547_v40 = vld [vmem:[#allocation2 + $0x1e0] ss:$8 sps:$4 sm:$0xff]   ;;  %v6740_v45 = vld [vmem:[%s11400_s1 + $0x10] sm:$0xff] }
 0x204   :  { %v8984_v25 = vpack.c.bf16 %v1923_v2, %v1919_v20  ;;  %v1815_v36 = vmul.f32 0.2, %v1703_v53  ;;  %v1588_v34 = vmul.f32 %v8710_v33, %v8660_v44  ;;  %v1583_v55 = vmul.f32 %v8704_v7, %v8634_v35  ;;  %v6552_v20 = vld [vmem:[#allocation2 + $0x1f4] ss:$8 sps:$4 sm:$0xff]  }
 0x205   :  { %2579 = vmatpush1.bf16.msra.mxu0 %v6538_v15  ;;  %v1932_v5 = vmax.f32 %v1708_v39, %v1820_v8  ;;  %v1819_v18 = vmul.f32 0.2, %v1707_v42  ;;  %v1712_v14 = vadd.f32 %v8732_v43, %v1584_v57  ;;  %v1587_v28 = vmul.f32 %v8704_v7, %v8658_v52  ;;  %v6544_v7 = vld [vmem:[#allocation2 + $0x1d0] ss:$8 sps:$4 sm:$0xff]  }
 0x206   :  { %2580 = vmatprep.subr.bf16.mxu0 %v6543_v61  ;;  %v1788_v10 = vmul.f32 0.2, %v8915_v23  ;;  %v1927_v12 = vmax.f32 %v1703_v53, %v1815_v36  ;;  %v1716_v24 = vadd.f32 %v8732_v43, %v1588_v34  ;;  %v1711_v37 = vadd.f32 %v8723_v29, %v1583_v55  ;;  %v11956_v34 = vld [vmem:[#allocation104_spill] sm:$0xff] }
 0x207   :  { %v8997_v44 = vpack.c.bf16 %v1932_v5, %v1928_v63  ;;  %v1931_v35 = vmax.f32 %v1707_v42, %v1819_v18  ;;  %v1824_v33 = vmul.f32 0.2, %v1712_v14  ;;  %v1715_v60 = vadd.f32 %v8723_v29, %v1587_v28  ;;  %v11957_v5 = vld [vmem:[#allocation40_spill] sm:$0xff]  ;;  %v11958_v18 = vld [vmem:[#allocation103_spill] sm:$0xff] }
 0x208   :  { %2476 = vmatmul.mubr.bf16.gmra.mrb[24].mxu0 %v8900_v54  ;;  %v1887_v52 = vmax.f32 %v8882_v22, %v8903_v9  ;;  %v1828_v15 = vmul.f32 0.2, %v1716_v24  ;;  %v1823_v19 = vmul.f32 0.2, %v1711_v37  ;;  %v1891_v43 = vmax.f32 %v8885_v31, %v8909_v3  ;;  %v6739_v9 = vld [vmem:[%s11400_s1 + $0x18] sm:$0xff] }
 0x209   :  { %2485 = vmatprep.mubr.bf16.mxu0 %v8931_v17  ;;  %2581 = vmatpush1.bf16.msra.mxu0 %v6541_v1  ;;  %v9005_v54 = vpack.c.bf16 %v1931_v35, %v1927_v12  ;;  %v1936_v27 = vmax.f32 %v1712_v14, %v1824_v33  ;;  %v1827_v59 = vmul.f32 0.2, %v1715_v60  ;;  %v1896_v29 = vmax.f32 %v8896_v4, %v8922_v56  ;;  %v11959_v28 = vld [vmem:[#allocation39_spill] sm:$0xff]  ;;  %v11960_v12 = vld [vmem:[#allocation29_spill] sm:$0xff] }
 0x20a   :  { %2582 = vmatprep.subr.bf16.mxu0 %v6546_v16  ;;  %v1900_v17 = vmax.f32 %v8915_v23, %v1788_v10  ;;  %v1940_v61 = vmax.f32 %v1716_v24, %v1828_v15  ;;  %v1935_v22 = vmax.f32 %v1711_v37, %v1823_v19  ;;  %v1442_v39 = vmul.f32 %v6739_v9, %v8874_v0  ;;  %v6550_v0 = vld [vmem:[#allocation2 + $0x1f0] ss:$8 sps:$4 sm:$0xff]   ;;  %v11961_v37 = vld [vmem:[#allocation17_spill] sm:$0xff] }
 0x20b   :  { %v1939_v31 = vmax.f32 %v1715_v60, %v1827_v59  ;;  %v1441_v4 = vmul.f32 %v6740_v45, %v8850_v6  ;;  %v1971_v23 = vpack.c.bf16 %v1891_v43, %v1887_v52 }
 0x20c   :  { %v9014_v3 = vpack.c.bf16 %v1940_v61, %v1936_v27  ;;  %v1976_v2 = vpack.c.bf16 %v1900_v17, %v1896_v29  ;;  %v1446_v53 = vmul.f32 %v1442_v39, %v8701_v48  ;;  %v9027_v1 = vrot.slane %v1442_v39, %v8691_v50  ;;  %v11962_v27 = vld [vmem:[#allocation28_spill] sm:$0xff]  ;;  %v11964_v39 = vld [vmem:[#allocation21_spill] sm:$0xff] }
 0x20d   :  { %2583 = vmatpush1.bf16.msra.mxu0 %v6544_v7  ;;  %v9020_v56 = vpack.c.bf16 %v1939_v31, %v1935_v22  ;;  %v1445_v8 = vmul.f32 %v1441_v4, %v8699_v11  ;;  %v9030_v48 = vrot.slane %v1441_v4, %v8691_v50  ;;  %v11963_v29 = vld [vmem:[#allocation16_spill] sm:$0xff] }
 0x20e   :  { %2584 = vmatprep.subr.bf16.mxu0 %v6549_v62  ;;  %v1454_v63 = vrot.slane %v1446_v53, 7  ;;  %v1482_v55 = vmul.f32 %v9027_v1, %v11956_v34  ;;  %v1490_v24 = vmul.f32 %v9027_v1, %v11960_v12  ;;  %v1494_v35 = vmul.f32 %v9027_v1, %v11961_v37  ;;  %v11968_v34 = vld [vmem:[#allocation48_spill] sm:$0xff] }
 0x20f   :  { %v1453_v42 = vrot.slane %v1445_v8, 7  ;;  %v1481_v14 = vmul.f32 %v9030_v48, %v11958_v18  ;;  %v1485_v10 = vmul.f32 %v9030_v48, %v11959_v28  ;;  %v1493_v17 = vmul.f32 %v9030_v48, %v11963_v29  ;;  %v11969_v18 = vld [vmem:[#allocation91_spill] sm:$0xff] }
 0x210   :  { %2486 = vmatmul.mubr.bf16.gmra.mrb[28].mxu0 %v1971_v23  ;;  %v1462_v57 = vsub.f32 %v6739_v9, %v1454_v63  ;;  %v1498_v31 = vmul.f32 %v9027_v1, %v11964_v39  ;;  %v11966_v63 = vld [vmem:[#allocation71_spill] sm:$0xff]  ;;  %v11975_v39 = vld [vmem:[#allocation94_spill] sm:$0xff] }
 0x211   :  { %2495 = vmatprep.mubr.bf16.mxu0 %v1976_v2  ;;  %2585 = vmatpush1.bf16.msra.mxu0 %v6547_v40  ;;  %v1461_v6 = vsub.f32 %v6740_v45, %v1453_v42  ;;  %v11965_v2 = vld [vmem:[#allocation92_spill] sm:$0xff] }
 0x212   :  { %2586 = vmatprep.subr.bf16.mxu0 %v6552_v20  ;;  %v9033_v36 = vrot.slane %v1462_v57, %v8707_v13  ;;  %v1546_v53 = vmul.f32 %v9027_v1, %v11965_v2  ;;  %v11967_v57 = vld [vmem:[#allocation20_spill] sm:$0xff] }
 0x213   :  { %v9036_v11 = vrot.slane %v1461_v6, %v8707_v13  ;;  %v1497_v6 = vmul.f32 %v9030_v48, %v11967_v57 }
 0x214   :  { %v1618_v60 = vadd.f32 %v9033_v36, %v1490_v24  ;;  %v1622_v52 = vadd.f32 %v9033_v36, %v1494_v35  ;;  %v9073_v23 = vadd.f32 %v9033_v36, %v1498_v31  ;;  %v1557_v31 = vmul.f32 %v9030_v48, %v11975_v39 }
 0x215   :  { %2587 = vmatpush1.bf16.msra.mxu0 %v6550_v0  ;;  %v1613_v33 = vadd.f32 %v9036_v11, %v1485_v10  ;;  %v9070_v40 = vadd.f32 %v9036_v11, %v1493_v17  ;;  %v11970_v10 = vld [vmem:[#allocation70_spill] sm:$0xff] }
 0x216   :  { %v1730_v62 = vmul.f32 0.2, %v1618_v60  ;;  %v1734_v59 = vmul.f32 0.2, %v1622_v52  ;;  %v9106_v12 = vmul.f32 %v9030_v48, %v11970_v10  ;;  %v1685_v57 = vadd.f32 %v9036_v11, %v1557_v31 }
 0x217   :  { %v1725_v43 = vmul.f32 0.2, %v1613_v33  ;;  %v9085_v42 = vmul.f32 0.2, %v9070_v40 }
 0x218   :  { %2496 = vmatmul.mubr.bf16.gmra.mrb[32].mxu0 %v8937_v30  ;;  %v1486_v30 = vmul.f32 %v9027_v1, %v11957_v5  ;;  %v1842_v20 = vmax.f32 %v1618_v60, %v1730_v62  ;;  %v1674_v5 = vadd.f32 %v9033_v36, %v1546_v53 }
 0x219   :  { %2505 = vmatprep.mubr.bf16.mxu0 %v8947_v32  ;;  %v1610_v32 = vadd.f32 %v9033_v36, %v1482_v55  ;;  %v1837_v4 = vmax.f32 %v1613_v33, %v1725_v43  ;;  %v1550_v55 = vmul.f32 %v9027_v1, %v11968_v34 }
 0x21a   :  { %v1614_v16 = vadd.f32 %v9033_v36, %v1486_v30  ;;  %v1786_v37 = vmul.f32 0.2, %v1674_v5 }
 0x21b   :  { %v1722_v7 = vmul.f32 0.2, %v1610_v32  ;;  %v1678_v24 = vadd.f32 %v9033_v36, %v1550_v55  ;;  %v11977_v55 = vld [vmem:[#allocation57_spill] sm:$0xff] }
 0x21c   :  { %v1726_v15 = vmul.f32 0.2, %v1614_v16  ;;  %v1898_v43 = vmax.f32 %v1674_v5, %v1786_v37  ;;  %v1566_v5 = vmul.f32 %v9027_v1, %v11977_v55  ;;  %v11978_v37 = vld [vmem:[#allocation53_spill] sm:$0xff] }
 0x21d   :  { %v1834_v61 = vmax.f32 %v1610_v32, %v1722_v7 }
 0x21e   :  { %v1838_v22 = vmax.f32 %v1614_v16, %v1726_v15  ;;  %v9098_v16 = vmul.f32 0.2, %v9073_v23  ;;  %v1845_v15 = vmax.f32 %v9070_v40, %v9085_v42 }
 0x220   :  { %2506 = vmatmul.mubr.bf16.gmra.mrb[36].mxu0 %v8951_v21  ;;  %v1609_v21 = vadd.f32 %v9036_v11, %v1481_v14  ;;  %v9077_v0 = vpack.c.bf16 %v1838_v22, %v1834_v61  ;;  %v1545_v14 = vmul.f32 %v9030_v48, %v11969_v18 }
 0x221   :  { %2515 = vmatprep.mubr.bf16.mxu0 %v8962_v26  ;;  %v1489_v26 = vmul.f32 %v9030_v48, %v11962_v27  ;;  %v11973_v27 = vld [vmem:[#allocation107_spill] sm:$0xff] }
 0x222   :  { %v1721_v19 = vmul.f32 0.2, %v1609_v21  ;;  %v1673_v60 = vadd.f32 %v9036_v11, %v1545_v14 }
 0x223   :  { %v9064_v9 = vadd.f32 %v9036_v11, %v1489_v26  ;;  %v9123_v26 = vadd.f32 %v9036_v11, %v1497_v6 }
 0x224   :  { %v1833_v45 = vmax.f32 %v1609_v21, %v1721_v19  ;;  %v11971_v21 = vld [vmem:[#allocation47_spill] sm:$0xff]  ;;  %v1790_v19 = vmul.f32 0.2, %v1678_v24 }
 0x225   :  { %v9080_v8 = vmul.f32 0.2, %v9064_v9  ;;  %v1549_v33 = vmul.f32 %v9030_v48, %v11971_v21  ;;  %v1561_v21 = vmul.f32 %v9030_v48, %v11978_v37 }
 0x226   :  { %v9092_v30 = vpack.c.bf16 %v1837_v4, %v1833_v45  ;;  %v1902_v17 = vmax.f32 %v1678_v24, %v1790_v19  ;;  %v1797_v24 = vmul.f32 0.2, %v1685_v57 }
 0x227   :  { %v1841_v35 = vmax.f32 %v9064_v9, %v9080_v8  ;;  %v1677_v62 = vadd.f32 %v9036_v11, %v1549_v33  ;;  %v11992_v8 = vld [vmem:[#allocation112_spill] sm:$0xff] }
 0x228   :  { %2516 = vmatmul.mubr.bf16.gmra.mrb[40].mxu0 %v8973_v46  ;;  %v1846_v46 = vmax.f32 %v1622_v52, %v1734_v59  ;;  %v11972_v52 = vld [vmem:[#allocation55_spill] sm:$0xff]  ;;  %v1785_v59 = vmul.f32 0.2, %v1673_v60  ;;  %v9134_v53 = vpack.c.bf16 %v1902_v17, %v1898_v43  ;;  %v1570_v17 = vmul.f32 %v9027_v1, %v8490_v41 }
 0x229   :  { %2525 = vmatprep.mubr.bf16.mxu0 %v8978_v38  ;;  %v1502_v38 = vmul.f32 %v9027_v1, %v11966_v63  ;;  %v1554_v7 = vmul.f32 %v9027_v1, %v11972_v52  ;;  %v1789_v45 = vmul.f32 0.2, %v1677_v62  ;;  %v1518_v40 = vmul.f32 %v9027_v1, %v11992_v8 }
 0x22a   :  { %v9102_v28 = vpack.c.bf16 %v1846_v46, %v1842_v20  ;;  %v1897_v4 = vmax.f32 %v1673_v60, %v1785_v59  ;;  %v11976_v46 = vld [vmem:[#allocation95_spill] sm:$0xff]  ;;  %v1694_v60 = vadd.f32 %v9033_v36, %v1566_v5 }
 0x22b   :  { %v9095_v32 = vadd.f32 %v9033_v36, %v1502_v38  ;;  %v1682_v29 = vadd.f32 %v9033_v36, %v1554_v7  ;;  %v1562_v2 = vmul.f32 %v9027_v1, %v11976_v46  ;;  %v1901_v6 = vmax.f32 %v1677_v62, %v1789_v45  ;;  %v11979_v7 = vld [vmem:[#allocation56_spill] sm:$0xff] }
 0x22c   :  { %v1565_v19 = vmul.f32 %v9030_v48, %v11979_v7  ;;  %v1689_v62 = vadd.f32 %v9036_v11, %v1561_v21  ;;  %v1806_v59 = vmul.f32 0.2, %v1694_v60  ;;  %v1698_v45 = vadd.f32 %v9033_v36, %v1570_v17  ;;  %v11982_v7 = vld [vmem:[#allocation110_spill] sm:$0xff] }
 0x22d   :  { %v1794_v20 = vmul.f32 0.2, %v1682_v29  ;;  %v1690_v18 = vadd.f32 %v9033_v36, %v1562_v2  ;;  %v9144_v33 = vpack.c.bf16 %v1901_v6, %v1897_v4  ;;  %v1573_v4 = vmul.f32 %v9030_v48, %v8542_v58 }
 0x22e   :  { %v1918_v39 = vmax.f32 %v1694_v60, %v1806_v59  ;;  %v1578_v2 = vmul.f32 %v9027_v1, %v8580_v49  ;;  %v11981_v49 = vld [vmem:[#allocation8_spill] sm:$0xff] }
 0x22f   :  { %v1906_v34 = vmax.f32 %v1682_v29, %v1794_v20  ;;  %v1802_v52 = vmul.f32 0.2, %v1690_v18 }
 0x230   :  { %2526 = vmatmul.mubr.bf16.gmra.mrb[44].mxu0 %v8984_v25  ;;  %v1558_v25 = vmul.f32 %v9027_v1, %v11973_v27  ;;  %v1706_v58 = vadd.f32 %v9033_v36, %v1578_v2 }
 0x231   :  { %2535 = vmatprep.mubr.bf16.mxu0 %v8997_v44  ;;  %v11974_v44 = vld [vmem:[#allocation54_spill] sm:$0xff]  ;;  %v1914_v29 = vmax.f32 %v1690_v18, %v1802_v52 }
 0x232   :  { %v1686_v61 = vadd.f32 %v9033_v36, %v1558_v25  ;;  %v1553_v22 = vmul.f32 %v9030_v48, %v11974_v44  ;;  %v1909_v25 = vmax.f32 %v1685_v57, %v1797_v24  ;;  %v1801_v44 = vmul.f32 0.2, %v1689_v62 }
 0x233   :  { %v1818_v60 = vmul.f32 0.2, %v1706_v58 }
 0x234   :  { %v1798_v63 = vmul.f32 0.2, %v1686_v61  ;;  %v1681_v38 = vadd.f32 %v9036_v11, %v1553_v22  ;;  %v1574_v22 = vmul.f32 %v9027_v1, %v8544_v51  ;;  %v1913_v20 = vmax.f32 %v1689_v62, %v1801_v44 }
 0x236   :  { %v1910_v14 = vmax.f32 %v1686_v61, %v1798_v63  ;;  %v1793_v10 = vmul.f32 0.2, %v1681_v38  ;;  %v1702_v46 = vadd.f32 %v9033_v36, %v1574_v22  ;;  %v9169_v63 = vpack.c.bf16 %v1918_v39, %v1914_v29 }
 0x237   :  { %v1930_v29 = vmax.f32 %v1706_v58, %v1818_v60  ;;  %v11987_v58 = vld [vmem:[#allocation69_spill] sm:$0xff] }
 0x238   :  { %2536 = vmatmul.mubr.bf16.gmra.mrb[48].mxu0 %v9005_v54  ;;  %v9150_v43 = vpack.c.bf16 %v1910_v14, %v1906_v34  ;;  %v1905_v27 = vmax.f32 %v1681_v38, %v1793_v10  ;;  %v1693_v54 = vadd.f32 %v9036_v11, %v1565_v19  ;;  %v1810_v38 = vmul.f32 0.2, %v1698_v45  ;;  %v11980_v34 = vld [vmem:[#allocation83_spill] sm:$0xff] }
 0x239   :  { %2545 = vmatprep.mubr.bf16.mxu0 %v9014_v3  ;;  %v1569_v3 = vmul.f32 %v9030_v48, %v8488_v47  ;;  %v1701_v47 = vadd.f32 %v9036_v11, %v1573_v4  ;;  %v1814_v57 = vmul.f32 0.2, %v1702_v46  ;;  %v1582_v55 = vmul.f32 %v9027_v1, %v11980_v34 }
 0x23a   :  { %v9156_v61 = vpack.c.bf16 %v1909_v25, %v1905_v27  ;;  %v1805_v31 = vmul.f32 0.2, %v1693_v54  ;;  %v1922_v18 = vmax.f32 %v1698_v45, %v1810_v38  ;;  %v1577_v10 = vmul.f32 %v9030_v48, %v11981_v49  ;;  %v11983_v27 = vld [vmem:[#allocation109_spill] sm:$0xff] }
 0x23b   :  { %v1697_v41 = vadd.f32 %v9036_v11, %v1569_v3  ;;  %v1813_v14 = vmul.f32 0.2, %v1701_v47  ;;  %v1926_v24 = vmax.f32 %v1702_v46, %v1814_v57  ;;  %v1710_v21 = vadd.f32 %v9033_v36, %v1582_v55  ;;  %v11985_v45 = vld [vmem:[#allocation49_spill] sm:$0xff] }
 0x23c   :  { %v1917_v51 = vmax.f32 %v1693_v54, %v1805_v31  ;;  %v1581_v19 = vmul.f32 %v9030_v48, %v11982_v7  ;;  %v1586_v25 = vmul.f32 %v9027_v1, %v11983_v27  ;;  %v11984_v54 = vld [vmem:[#allocation81_spill] sm:$0xff]  ;;  %v1585_v4 = vmul.f32 %v9030_v48, %v11985_v45 }
 0x23d   :  { %v1809_v6 = vmul.f32 0.2, %v1697_v41  ;;  %v1925_v52 = vmax.f32 %v1701_v47, %v1813_v14  ;;  %v9187_v62 = vpack.c.bf16 %v1926_v24, %v1922_v18  ;;  %v1822_v59 = vmul.f32 0.2, %v1710_v21 }
 0x23e   :  { %v9176_v5 = vpack.c.bf16 %v1917_v51, %v1913_v20  ;;  %v1709_v44 = vadd.f32 %v9036_v11, %v1581_v19  ;;  %v1714_v3 = vadd.f32 %v9033_v36, %v1586_v25  ;;  %v11986_v20 = vld [vmem:[#allocation72_spill] sm:$0xff]  ;;  %v1850_v55 = vmax.f32 %v9073_v23, %v9098_v16 }
 0x23f   :  { %v1921_v37 = vmax.f32 %v1697_v41, %v1809_v6  ;;  %v1934_v39 = vmax.f32 %v1710_v21, %v1822_v59  ;;  %v1589_v46 = vmul.f32 %v9030_v48, %v11986_v20  ;;  %v1742_v41 = vmul.f32 0.2, %v9095_v32 }
 0x240   :  { %2546 = vmatmul.mubr.bf16.gmra.mrb[52].mxu0 %v9020_v56  ;;  %v1705_v56 = vadd.f32 %v9036_v11, %v1577_v10  ;;  %v1821_v2 = vmul.f32 0.2, %v1709_v44  ;;  %v1826_v38 = vmul.f32 0.2, %v1714_v3  ;;  %v1713_v6 = vadd.f32 %v9036_v11, %v1585_v4  ;;  %v11988_v10 = vld [vmem:[#allocation79_spill] sm:$0xff] }
 0x241   :  { %2588 = vmatprep.mubr.bf16.mxu0 %v9077_v0  ;;  %v1590_v0 = vmul.f32 %v9027_v1, %v11984_v54  ;;  %v9191_v17 = vpack.c.bf16 %v1925_v52, %v1921_v37  ;;  %v9201_v47 = vpack.c.bf16 %v1934_v39, %v1930_v29  ;;  %v1717_v34 = vadd.f32 %v9036_v11, %v1589_v46  ;;  %v11991_v39 = vld [vmem:[#allocation100_spill] sm:$0xff] }
 0x242   :  { %v1817_v22 = vmul.f32 0.2, %v1705_v56  ;;  %v1506_v18 = vmul.f32 %v9027_v1, %v11987_v58  ;;  %v1933_v14 = vmax.f32 %v1709_v44, %v1821_v2  ;;  %v1938_v49 = vmax.f32 %v1714_v3, %v1826_v38 }
 0x243   :  { %v1718_v31 = vadd.f32 %v9033_v36, %v1590_v0  ;;  %v1510_v24 = vmul.f32 %v9027_v1, %v11988_v10  ;;  %v1825_v21 = vmul.f32 0.2, %v1713_v6  ;;  %v1829_v60 = vmul.f32 0.2, %v1717_v34  ;;  %v11989_v0 = vld [vmem:[#allocation68_spill] sm:$0xff] }
 0x244   :  { %v1929_v51 = vmax.f32 %v1705_v56, %v1817_v22  ;;  %v1854_v52 = vmax.f32 %v9095_v32, %v1742_v41  ;;  %v1634_v23 = vadd.f32 %v9033_v36, %v1506_v18  ;;  %v1949_v32 = vpack.c.bf16 %v1845_v15, %v1841_v35  ;;  %v11990_v22 = vld [vmem:[#allocation78_spill] sm:$0xff]  ;;  %v11995_v18 = vld [vmem:[#allocation25_spill] sm:$0xff] }
 0x245   :  { %v1830_v57 = vmul.f32 0.2, %v1718_v31  ;;  %v1638_v7 = vadd.f32 %v9033_v36, %v1510_v24  ;;  %v1941_v56 = vmax.f32 %v1717_v34, %v1829_v60  ;;  %v1505_v44 = vmul.f32 %v9030_v48, %v11989_v0  ;;  %v11993_v34 = vld [vmem:[#allocation99_spill] sm:$0xff] }
 0x246   :  { %v9217_v16 = vpack.c.bf16 %v1933_v14, %v1929_v51  ;;  %v1954_v59 = vpack.c.bf16 %v1854_v52, %v1850_v55  ;;  %v1746_v29 = vmul.f32 0.2, %v1634_v23  ;;  %v1509_v3 = vmul.f32 %v9030_v48, %v11990_v22  ;;  %v11994_v55 = vld [vmem:[#allocation9_spill] sm:$0xff]  ;;  %v11998_v0 = vld [vmem:[#allocation75_spill] sm:$0xff]  ;;  %v11999_v22 = vld [vmem:[#allocation34_spill] sm:$0xff] }
 0x247   :  { %v1942_v37 = vmax.f32 %v1718_v31, %v1830_v57  ;;  %v1750_v54 = vmul.f32 0.2, %v1638_v7  ;;  %v1514_v9 = vmul.f32 %v9027_v1, %v11991_v39  ;;  %v1633_v15 = vadd.f32 %v9036_v11, %v1505_v44  ;;  %v12000_v39 = vld [vmem:[#allocation84_spill] sm:$0xff] }
 0x248   :  { %2589 = vmatmul.mubr.bf16.vlgmr.msra.gmra.mrb[0].mxu0 %v9092_v30  ;;  %v1629_v30 = vadd.f32 %v9036_v11, %v9106_v12  ;;  %v1737_v12 = vmul.f32 0.2, %v9123_v26  ;;  %v1637_v31 = vadd.f32 %v9036_v11, %v1509_v3  ;;  %v1858_v45 = vmax.f32 %v1634_v23, %v1746_v29  ;;  %v11997_v29 = vld [vmem:[#allocation24_spill] sm:$0xff] }
 0x249   :  { %2598 = vmatprep.mubr.bf16.mxu0 %v9102_v28  ;;  %v9220_v19 = vpack.c.bf16 %v1942_v37, %v1938_v49  ;;  %v1937_v28 = vmax.f32 %v1713_v6, %v1825_v21  ;;  %v1862_v4 = vmax.f32 %v1638_v7, %v1750_v54  ;;  %v1642_v20 = vadd.f32 %v9033_v36, %v1514_v9  ;;  %v11996_v49 = vld [vmem:[#allocation30_spill] sm:$0xff] }
 0x24a   :  { %v1741_v25 = vmul.f32 0.2, %v1629_v30  ;;  %v1849_v42 = vmax.f32 %v9123_v26, %v1737_v12  ;;  %v1646_v46 = vadd.f32 %v9033_v36, %v1518_v40  ;;  %v1745_v2 = vmul.f32 0.2, %v1633_v15 }
 0x24b   :  { %v9222_v27 = vpack.c.bf16 %v1941_v56, %v1937_v28  ;;  %v1749_v51 = vmul.f32 0.2, %v1637_v31  ;;  %v1958_v38 = vpack.c.bf16 %v1862_v4, %v1858_v45  ;;  %v1754_v57 = vmul.f32 0.2, %v1642_v20 }
 0x24c   :  { %v1853_v35 = vmax.f32 %v1629_v30, %v1741_v25  ;;  %v1758_v6 = vmul.f32 0.2, %v1646_v46  ;;  %v1513_v26 = vmul.f32 %v9030_v48, %v11993_v34  ;;  %v1517_v58 = vmul.f32 %v9030_v48, %v11994_v55  ;;  %v12002_v34 = vld [vmem:[#allocation37_spill] sm:$0xff]  ;;  %v12003_v55 = vld [vmem:[#allocation80_spill] sm:$0xff] }
 0x24d   :  { %v1522_v14 = vmul.f32 %v9027_v1, %v11995_v18  ;;  %v1526_v10 = vmul.f32 %v9027_v1, %v11996_v49  ;;  %v1857_v24 = vmax.f32 %v1633_v15, %v1745_v2  ;;  %v1861_v37 = vmax.f32 %v1637_v31, %v1749_v51  ;;  %v12004_v18 = vld [vmem:[#allocation87_spill] sm:$0xff] }
 0x24e   :  { %v1953_v41 = vpack.c.bf16 %v1853_v35, %v1849_v42  ;;  %v1641_v21 = vadd.f32 %v9036_v11, %v1513_v26  ;;  %v1645_v60 = vadd.f32 %v9036_v11, %v1517_v58  ;;  %v1866_v52 = vmax.f32 %v1642_v20, %v1754_v57  ;;  %v12001_v57 = vld [vmem:[#allocation33_spill] sm:$0xff] }
 0x24f   :  { %v1870_v30 = vmax.f32 %v1646_v46, %v1758_v6  ;;  %v1650_v23 = vadd.f32 %v9033_v36, %v1522_v14  ;;  %v1654_v7 = vadd.f32 %v9033_v36, %v1526_v10  ;;  %v1957_v28 = vpack.c.bf16 %v1861_v37, %v1857_v24 }
 0x250   :  { %2599 = vmatmul.mubr.bf16.gmra.mrb[4].mxu0 %v1949_v32  ;;  %v1753_v56 = vmul.f32 0.2, %v1641_v21  ;;  %v1757_v32 = vmul.f32 0.2, %v1645_v60  ;;  %v1521_v54 = vmul.f32 %v9030_v48, %v11997_v29  ;;  %v1525_v44 = vmul.f32 %v9030_v48, %v11998_v0 }
 0x251   :  { %2608 = vmatprep.mubr.bf16.mxu0 %v1954_v59  ;;  %v1962_v12 = vpack.c.bf16 %v1870_v30, %v1866_v52  ;;  %v1762_v25 = vmul.f32 0.2, %v1650_v23  ;;  %v1766_v59 = vmul.f32 0.2, %v1654_v7  ;;  %v1530_v3 = vmul.f32 %v9027_v1, %v11999_v22 }
 0x252   :  { %v1534_v9 = vmul.f32 %v9027_v1, %v12000_v39  ;;  %v1865_v8 = vmax.f32 %v1641_v21, %v1753_v56  ;;  %v1869_v40 = vmax.f32 %v1645_v60, %v1757_v32  ;;  %v1649_v42 = vadd.f32 %v9036_v11, %v1521_v54 }
 0x253   :  { %v1653_v35 = vadd.f32 %v9036_v11, %v1525_v44  ;;  %v1874_v15 = vmax.f32 %v1650_v23, %v1762_v25  ;;  %v1878_v31 = vmax.f32 %v1654_v7, %v1766_v59  ;;  %v1658_v45 = vadd.f32 %v9033_v36, %v1530_v3  ;;  %v12006_v59 = vld [vmem:[#allocation44_spill] sm:$0xff] }
 0x254   :  { %v1662_v4 = vadd.f32 %v9033_v36, %v1534_v9  ;;  %v1961_v20 = vpack.c.bf16 %v1869_v40, %v1865_v8  ;;  %v1761_v46 = vmul.f32 0.2, %v1649_v42  ;;  %v1529_v6 = vmul.f32 %v9030_v48, %v12001_v57 }
 0x255   :  { %v1966_v2 = vpack.c.bf16 %v1878_v31, %v1874_v15  ;;  %v1770_v51 = vmul.f32 0.2, %v1658_v45  ;;  %v1533_v26 = vmul.f32 %v9030_v48, %v12002_v34  ;;  %v1538_v58 = vmul.f32 %v9027_v1, %v12003_v55 }
 0x256   :  { %v1542_v14 = vmul.f32 %v9027_v1, %v12004_v18  ;;  %v1873_v49 = vmax.f32 %v1649_v42, %v1761_v46  ;;  %v1657_v24 = vadd.f32 %v9036_v11, %v1529_v6  ;;  %v12005_v1 = vld [vmem:[#allocation88_spill] sm:$0xff]  ;;  %v1541_v29 = vmul.f32 %v9030_v48, %v12006_v59 }
 0x257   :  { %v1661_v37 = vadd.f32 %v9036_v11, %v1533_v26  ;;  %v1882_v21 = vmax.f32 %v1658_v45, %v1770_v51  ;;  %v1666_v52 = vadd.f32 %v9033_v36, %v1538_v58  ;;  %v1537_v25 = vmul.f32 %v9030_v48, %v12005_v1  ;;  %v6553_v48 = vld [vmem:[#allocation2 + $0x204] ss:$8 sps:$4 sm:$0xff]  }
 0x258   :  { %2609 = vmatmul.mubr.bf16.gmra.mrb[8].mxu0 %v1953_v41  ;;  %v1765_v41 = vmul.f32 0.2, %v1653_v35  ;;  %v1670_v30 = vadd.f32 %v9033_v36, %v1542_v14  ;;  %v1769_v7 = vmul.f32 0.2, %v1657_v24  ;;  %v1669_v36 = vadd.f32 %v9036_v11, %v1541_v29  ;;  %3401 = vmatprep.subr.bf16.mxu1 %v6553_v48 }
 0x259   :  { %2618 = vmatprep.mubr.bf16.mxu0 %v1958_v38  ;;  %v1774_v38 = vmul.f32 0.2, %v1662_v4  ;;  %v1778_v32 = vmul.f32 0.2, %v1666_v52  ;;  %v1665_v44 = vadd.f32 %v9036_v11, %v1537_v25  ;;  %v6555_v11 = vld [vmem:[#allocation2 + $0x200] ss:$8 sps:$4 sm:$0xff]  }
 0x25a   :  { %v1877_v10 = vmax.f32 %v1653_v35, %v1765_v41  ;;  %v1881_v54 = vmax.f32 %v1657_v24, %v1769_v7  ;;  %v1781_v8 = vmul.f32 0.2, %v1669_v36  ;;  %3402 = vmatpush1.bf16.msra.mxu1 %v6555_v11 }
 0x25b   :  { %v1886_v60 = vmax.f32 %v1662_v4, %v1774_v38  ;;  %v1890_v22 = vmax.f32 %v1666_v52, %v1778_v32  ;;  %v1777_v9 = vmul.f32 0.2, %v1665_v44 }
 0x25c   :  { %v1965_v23 = vpack.c.bf16 %v1877_v10, %v1873_v49  ;;  %v1893_v35 = vmax.f32 %v1669_v36, %v1781_v8 }
 0x25d   :  { %v1970_v56 = vpack.c.bf16 %v1886_v60, %v1882_v21  ;;  %v1889_v42 = vmax.f32 %v1665_v44, %v1777_v9 }
 0x25f   :  { %v1973_v15 = vpack.c.bf16 %v1893_v35, %v1889_v42  ;;  %v6565_v42 = vld [vmem:[#allocation2 + $0x244] ss:$8 sps:$4 sm:$0xff]  }
 0x260   :  { %2619 = vmatmul.mubr.bf16.gmra.mrb[12].mxu0 %v1957_v28  ;;  %v1773_v28 = vmul.f32 0.2, %v1661_v37 }
 0x261   :  { %2628 = vmatprep.mubr.bf16.mxu0 %v1962_v12  ;;  %v1782_v12 = vmul.f32 0.2, %v1670_v30 }
 0x262   :  { %v1885_v0 = vmax.f32 %v1661_v37, %v1773_v28 }
 0x263   :  { %v1894_v3 = vmax.f32 %v1670_v30, %v1782_v12 }
 0x264   :  { %v1969_v39 = vpack.c.bf16 %v1885_v0, %v1881_v54 }
 0x265   :  { %v1974_v40 = vpack.c.bf16 %v1894_v3, %v1890_v22  ;;  %v6562_v3 = vld [vmem:[#allocation2 + $0x234] ss:$8 sps:$4 sm:$0xff]  }
 0x268   :  { %2629 = vmatmul.mubr.bf16.gmra.mrb[16].mxu0 %v1961_v20 }
 0x269   :  { %2638 = vmatprep.mubr.bf16.mxu0 %v1966_v2 }
 0x270   :  { %2639 = vmatmul.mubr.bf16.gmra.mrb[20].mxu0 %v1965_v23 }
 0x271   :  { %2648 = vmatprep.mubr.bf16.mxu0 %v1970_v56 }
 0x278   :  { %2649 = vmatmul.mubr.bf16.gmra.mrb[24].mxu0 %v1969_v39  ;;  %v6564_v39 = vld [vmem:[#allocation2 + $0x230] ss:$8 sps:$4 sm:$0xff]  }
 0x279   :  { %2658 = vmatprep.mubr.bf16.mxu0 %v1974_v40 }
 0x280   :  { %2659 = vmatmul.mubr.bf16.gmra.mrb[28].mxu0 %v1973_v15 }
 0x281   :  { %2668 = vmatprep.mubr.bf16.mxu0 %v9134_v53  ;;  %v6556_v53 = vld [vmem:[#allocation2 + $0x214] ss:$8 sps:$4 sm:$0xff]  }
 0x282   :  { %3403 = vmatprep.subr.bf16.mxu1 %v6556_v53 }
 0x288   :  { %2669 = vmatmul.mubr.bf16.gmra.mrb[32].mxu0 %v9144_v33  ;;  %v6558_v33 = vld [vmem:[#allocation2 + $0x210] ss:$8 sps:$4 sm:$0xff]  }
 0x289   :  { %2678 = vmatprep.mubr.bf16.mxu0 %v9150_v43  ;;  %3404 = vmatpush1.bf16.msra.mxu1 %v6558_v33  ;;  %v6559_v43 = vld [vmem:[#allocation2 + $0x224] ss:$8 sps:$4 sm:$0xff]  }
 0x28a   :  { %3405 = vmatprep.subr.bf16.mxu1 %v6559_v43 }
 0x290   :  { %2679 = vmatmul.mubr.bf16.gmra.mrb[36].mxu0 %v9156_v61  ;;  %v6561_v61 = vld [vmem:[#allocation2 + $0x220] ss:$8 sps:$4 sm:$0xff]  }
 0x291   :  { %2688 = vmatprep.mubr.bf16.mxu0 %v9169_v63  ;;  %3406 = vmatpush1.bf16.msra.mxu1 %v6561_v61  ;;  %v6567_v61 = vld [vmem:[#allocation2 + $0x240] ss:$8 sps:$4 sm:$0xff]  }
 0x292   :  { %3407 = vmatprep.subr.bf16.mxu1 %v6562_v3 }
 0x295   :  { %3408 = vmatpush1.bf16.msra.mxu1 %v6564_v39 }
 0x296   :  { %3409 = vmatprep.subr.bf16.mxu1 %v6565_v42 }
 0x298   :  { %2689 = vmatmul.mubr.bf16.gmra.mrb[40].mxu0 %v9176_v5 }
 0x299   :  { %2698 = vmatprep.mubr.bf16.mxu0 %v9187_v62  ;;  %3410 = vmatpush1.bf16.msra.mxu1 %v6567_v61 }
 0x2a0   :  { %2699 = vmatmul.mubr.bf16.gmra.mrb[44].mxu0 %v9191_v17 }
 0x2a1   :  { %2708 = vmatprep.mubr.bf16.mxu0 %v9201_v47 }
 0x2a8   :  { %2709 = vmatmul.mubr.bf16.gmra.mrb[48].mxu0 %v9217_v16 }
 0x2a9   :  { %2718 = vmatprep.mubr.bf16.mxu0 %v9220_v19 }
 0x2b0   :  { %2719 = vmatmul.mubr.bf16.gmra.mrb[52].mxu0 %v9222_v27 }
 0x31b   :  { %v9298_v63 = vpop.f32.mrb[0].mxu0 }
 0x31c   :  { %v9300_v5 = vpop.f32.mrb[1].mxu0  ;;  %v2797_v17 = vmul.f32 %v9298_v63, %v9298_v63 }
 0x31d   :  { %v9302_v62 = vpop.f32.mrb[2].mxu0  ;;  %v2798_v27 = vmul.f32 %v9300_v5, %v9300_v5 }
 0x31e   :  { %v2729_v47 = vadd.f32 %v9302_v62, %v9298_v63  ;;  %v2799_v16 = vmul.f32 %v9302_v62, %v9302_v62  ;;  %v9310_v19 = vpop.f32.mrb[3].mxu0 }
 0x31f   :  { %v2762_v31 = vadd.f32 %v9310_v19, %v9300_v5  ;;  %v2800_v45 = vmul.f32 %v9310_v19, %v9310_v19 }
 0x320   :  { %v2853_v4 = vadd.f32 %v2799_v16, %v2797_v17 }
 0x321   :  { %v2886_v20 = vadd.f32 %v2800_v45, %v2798_v27 }
 0x323   :  { %v9318_v46 = vpop.f32.mrb[4].mxu0 }
 0x324   :  { %v2730_v41 = vadd.f32 %v2729_v47, %v9318_v46  ;;  %v2801_v2 = vmul.f32 %v9318_v46, %v9318_v46  ;;  %v9323_v51 = vpop.f32.mrb[5].mxu0  ;;  %v6568_v47 = vld [vmem:[#allocation2 + $0x254] ss:$8 sps:$4 sm:$0xff]  }
 0x325   :  { %v2763_v38 = vadd.f32 %v2762_v31, %v9323_v51  ;;  %v2802_v57 = vmul.f32 %v9323_v51, %v9323_v51  ;;  %v9328_v6 = vpop.f32.mrb[6].mxu0  ;;  %v6570_v31 = vld [vmem:[#allocation2 + $0x250] ss:$8 sps:$4 sm:$0xff]   ;;  %3411 = vmatprep.subr.bf16.mxu1 %v6568_v47 }
 0x326   :  { %v2854_v34 = vadd.f32 %v2853_v4, %v2801_v2  ;;  %v2731_v26 = vadd.f32 %v2730_v41, %v9328_v6  ;;  %v2803_v55 = vmul.f32 %v9328_v6, %v9328_v6  ;;  %v9333_v58 = vpop.f32.mrb[7].mxu0  ;;  %v6571_v41 = vld [vmem:[#allocation2 + $0x264] ss:$8 sps:$4 sm:$0xff]   ;;  %3412 = vmatpush1.bf16.msra.mxu1 %v6570_v31 }
 0x327   :  { %v2887_v18 = vadd.f32 %v2886_v20, %v2802_v57  ;;  %v2764_v14 = vadd.f32 %v2763_v38, %v9333_v58  ;;  %v2804_v49 = vmul.f32 %v9333_v58, %v9333_v58  ;;  %3413 = vmatprep.subr.bf16.mxu1 %v6571_v41 }
 0x328   :  { %v2855_v10 = vadd.f32 %v2854_v34, %v2803_v55 }
 0x329   :  { %v2888_v24 = vadd.f32 %v2887_v18, %v2804_v49 }
 0x32b   :  { %v9338_v37 = vpop.f32.mrb[8].mxu0 }
 0x32c   :  { %v2732_v21 = vadd.f32 %v2731_v26, %v9338_v37  ;;  %v2805_v60 = vmul.f32 %v9338_v37, %v9338_v37  ;;  %v9343_v52 = vpop.f32.mrb[9].mxu0 }
 0x32d   :  { %v2765_v30 = vadd.f32 %v2764_v14, %v9343_v52  ;;  %v2806_v23 = vmul.f32 %v9343_v52, %v9343_v52  ;;  %v9348_v7 = vpop.f32.mrb[10].mxu0 }
 0x32e   :  { %v2856_v28 = vadd.f32 %v2855_v10, %v2805_v60  ;;  %v2733_v56 = vadd.f32 %v2732_v21, %v9348_v7  ;;  %v2807_v32 = vmul.f32 %v9348_v7, %v9348_v7  ;;  %v9353_v12 = vpop.f32.mrb[11].mxu0  ;;  %v6574_v60 = vld [vmem:[#allocation2 + $0x274] ss:$8 sps:$4 sm:$0xff]  }
 0x32f   :  { %v2889_v1 = vadd.f32 %v2888_v24, %v2806_v23  ;;  %v2766_v25 = vadd.f32 %v2765_v30, %v9353_v12  ;;  %v2808_v59 = vmul.f32 %v9353_v12, %v9353_v12  ;;  %v6573_v24 = vld [vmem:[#allocation2 + $0x260] ss:$8 sps:$4 sm:$0xff]  }
 0x330   :  { %v2857_v29 = vadd.f32 %v2856_v28, %v2807_v32  ;;  %3414 = vmatpush1.bf16.msra.mxu1 %v6573_v24  ;;  %v6576_v28 = vld [vmem:[#allocation2 + $0x270] ss:$8 sps:$4 sm:$0xff]   ;;  %v6586_v24 = vld [vmem:[#allocation2 + $0x2b4] ss:$8 sps:$4 sm:$0xff]  }
 0x331   :  { %v2890_v54 = vadd.f32 %v2889_v1, %v2808_v59  ;;  %3415 = vmatprep.subr.bf16.mxu1 %v6574_v60 }
 0x333   :  { %v9358_v0 = vpop.f32.mrb[12].mxu0 }
 0x334   :  { %v2734_v44 = vadd.f32 %v2733_v56, %v9358_v0  ;;  %v2809_v36 = vmul.f32 %v9358_v0, %v9358_v0  ;;  %v9363_v22 = vpop.f32.mrb[13].mxu0  ;;  %3416 = vmatpush1.bf16.msra.mxu1 %v6576_v28 }
 0x335   :  { %v2767_v9 = vadd.f32 %v2766_v25, %v9363_v22  ;;  %v2810_v8 = vmul.f32 %v9363_v22, %v9363_v22  ;;  %v9368_v40 = vpop.f32.mrb[14].mxu0  ;;  %v6577_v25 = vld [vmem:[#allocation2 + $0x284] ss:$8 sps:$4 sm:$0xff]  }
 0x336   :  { %v2858_v35 = vadd.f32 %v2857_v29, %v2809_v36  ;;  %v2735_v15 = vadd.f32 %v2734_v44, %v9368_v40  ;;  %v2811_v48 = vmul.f32 %v9368_v40, %v9368_v40  ;;  %v9373_v11 = vpop.f32.mrb[15].mxu0  ;;  %3417 = vmatprep.subr.bf16.mxu1 %v6577_v25  ;;  %v6589_v25 = vld [vmem:[#allocation2 + $0x2c4] ss:$8 sps:$4 sm:$0xff]  }
 0x337   :  { %v2891_v53 = vadd.f32 %v2890_v54, %v2810_v8  ;;  %v2768_v33 = vadd.f32 %v2767_v9, %v9373_v11  ;;  %v2812_v43 = vmul.f32 %v9373_v11, %v9373_v11 }
 0x338   :  { %v2859_v17 = vadd.f32 %v2858_v35, %v2811_v48  ;;  %v6579_v35 = vld [vmem:[#allocation2 + $0x280] ss:$8 sps:$4 sm:$0xff]   ;;  %v6580_v48 = vld [vmem:[#allocation2 + $0x294] ss:$8 sps:$4 sm:$0xff]  }
 0x339   :  { %v2892_v16 = vadd.f32 %v2891_v53, %v2812_v43  ;;  %3418 = vmatpush1.bf16.msra.mxu1 %v6579_v35  ;;  %v6582_v43 = vld [vmem:[#allocation2 + $0x290] ss:$8 sps:$4 sm:$0xff]  }
 0x33a   :  { %3419 = vmatprep.subr.bf16.mxu1 %v6580_v48  ;;  %v6591_v48 = vld [vmem:[#allocation2 + $0x2c0] ss:$8 sps:$4 sm:$0xff]  }
 0x33b   :  { %v9378_v27 = vpop.f32.mrb[16].mxu0 }
 0x33c   :  { %v2736_v45 = vadd.f32 %v2735_v15, %v9378_v27  ;;  %v2813_v4 = vmul.f32 %v9378_v27, %v9378_v27  ;;  %v9383_v20 = vpop.f32.mrb[17].mxu0 }
 0x33d   :  { %v2769_v2 = vadd.f32 %v2768_v33, %v9383_v20  ;;  %v2814_v38 = vmul.f32 %v9383_v20, %v9383_v20  ;;  %v9388_v57 = vpop.f32.mrb[18].mxu0  ;;  %3420 = vmatpush1.bf16.msra.mxu1 %v6582_v43  ;;  %v6592_v43 = vld [vmem:[#allocation2 + $0x2d4] ss:$8 sps:$4 sm:$0xff]  }
 0x33e   :  { %v2860_v34 = vadd.f32 %v2859_v17, %v2813_v4  ;;  %v2737_v26 = vadd.f32 %v2736_v45, %v9388_v57  ;;  %v2815_v55 = vmul.f32 %v9388_v57, %v9388_v57  ;;  %v9393_v18 = vpop.f32.mrb[19].mxu0 }
 0x33f   :  { %v2893_v14 = vadd.f32 %v2892_v16, %v2814_v38  ;;  %v2770_v49 = vadd.f32 %v2769_v2, %v9393_v18  ;;  %v2816_v10 = vmul.f32 %v9393_v18, %v9393_v18  ;;  %v6583_v16 = vld [vmem:[#allocation2 + $0x2a4] ss:$8 sps:$4 sm:$0xff]  }
 0x340   :  { %v2861_v21 = vadd.f32 %v2860_v34, %v2815_v55  ;;  %3421 = vmatprep.subr.bf16.mxu1 %v6583_v16  ;;  %v6594_v16 = vld [vmem:[#allocation2 + $0x2d0] ss:$8 sps:$4 sm:$0xff]  }
 0x341   :  { %v2894_v30 = vadd.f32 %v2893_v14, %v2816_v10 }
 0x343   :  { %v9398_v23 = vpop.f32.mrb[20].mxu0 }
 0x344   :  { %v2738_v56 = vadd.f32 %v2737_v26, %v9398_v23  ;;  %v2817_v32 = vmul.f32 %v9398_v23, %v9398_v23  ;;  %v9403_v1 = vpop.f32.mrb[21].mxu0 }
 0x345   :  { %v2771_v59 = vadd.f32 %v2770_v49, %v9403_v1  ;;  %v2818_v29 = vmul.f32 %v9403_v1, %v9403_v1  ;;  %v9408_v54 = vpop.f32.mrb[22].mxu0  ;;  %v6585_v49 = vld [vmem:[#allocation2 + $0x2a0] ss:$8 sps:$4 sm:$0xff]  }
 0x346   :  { %v2862_v44 = vadd.f32 %v2861_v21, %v2817_v32  ;;  %v2739_v36 = vadd.f32 %v2738_v56, %v9408_v54  ;;  %v2819_v3 = vmul.f32 %v9408_v54, %v9408_v54  ;;  %v9413_v39 = vpop.f32.mrb[23].mxu0  ;;  %3422 = vmatpush1.bf16.msra.mxu1 %v6585_v49 }
 0x347   :  { %v2895_v9 = vadd.f32 %v2894_v30, %v2818_v29  ;;  %v2772_v8 = vadd.f32 %v2771_v59, %v9413_v39  ;;  %v2820_v42 = vmul.f32 %v9413_v39, %v9413_v39  ;;  %v6588_v30 = vld [vmem:[#allocation2 + $0x2b0] ss:$8 sps:$4 sm:$0xff]   ;;  %3423 = vmatprep.subr.bf16.mxu1 %v6586_v24 }
 0x348   :  { %v2863_v15 = vadd.f32 %v2862_v44, %v2819_v3 }
 0x349   :  { %v2896_v53 = vadd.f32 %v2895_v9, %v2820_v42 }
 0x34a   :  { %3424 = vmatpush1.bf16.msra.mxu1 %v6588_v30 }
 0x34b   :  { %v9418_v33 = vpop.f32.mrb[24].mxu0  ;;  %3425 = vmatprep.subr.bf16.mxu1 %v6589_v25 }
 0x34c   :  { %v2740_v61 = vadd.f32 %v2739_v36, %v9418_v33  ;;  %v2821_v17 = vmul.f32 %v9418_v33, %v9418_v33  ;;  %v9423_v47 = vpop.f32.mrb[25].mxu0 }
 0x34d   :  { %v2773_v31 = vadd.f32 %v2772_v8, %v9423_v47  ;;  %v2822_v45 = vmul.f32 %v9423_v47, %v9423_v47  ;;  %v9428_v4 = vpop.f32.mrb[26].mxu0 }
 0x34e   :  { %v2864_v41 = vadd.f32 %v2863_v15, %v2821_v17  ;;  %v2741_v2 = vadd.f32 %v2740_v61, %v9428_v4  ;;  %v2823_v38 = vmul.f32 %v9428_v4, %v9428_v4  ;;  %v9433_v34 = vpop.f32.mrb[27].mxu0  ;;  %3426 = vmatpush1.bf16.msra.mxu1 %v6591_v48 }
 0x34f   :  { %v2897_v26 = vadd.f32 %v2896_v53, %v2822_v45  ;;  %v2774_v55 = vadd.f32 %v2773_v31, %v9433_v34  ;;  %v2824_v14 = vmul.f32 %v9433_v34, %v9433_v34  ;;  %3427 = vmatprep.subr.bf16.mxu1 %v6592_v43 }
 0x350   :  { %v2865_v10 = vadd.f32 %v2864_v41, %v2823_v38 }
 0x351   :  { %v2898_v21 = vadd.f32 %v2897_v26, %v2824_v14 }
 0x352   :  { %3428 = vmatpush1.bf16.msra.mxu1 %v6594_v16 }
 0x353   :  { %v9438_v60 = vpop.f32.mrb[28].mxu0 }
 0x354   :  { %v2742_v28 = vadd.f32 %v2741_v2, %v9438_v60  ;;  %v2825_v56 = vmul.f32 %v9438_v60, %v9438_v60  ;;  %v9443_v32 = vpop.f32.mrb[29].mxu0  ;;  %v6595_v2 = vld [vmem:[#allocation2 + $0x2e4] ss:$8 sps:$4 sm:$0xff]  }
 0x355   :  { %v2775_v59 = vadd.f32 %v2774_v55, %v9443_v32  ;;  %v2826_v29 = vmul.f32 %v9443_v32, %v9443_v32  ;;  %v9448_v44 = vpop.f32.mrb[30].mxu0  ;;  %3429 = vmatprep.subr.bf16.mxu1 %v6595_v2 }
 0x356   :  { %v2866_v36 = vadd.f32 %v2865_v10, %v2825_v56  ;;  %v2743_v3 = vadd.f32 %v2742_v28, %v9448_v44  ;;  %v2827_v9 = vmul.f32 %v9448_v44, %v9448_v44  ;;  %v9453_v8 = vpop.f32.mrb[31].mxu0  ;;  %v6597_v56 = vld [vmem:[#allocation2 + $0x2e0] ss:$8 sps:$4 sm:$0xff]  }
 0x357   :  { %v2899_v42 = vadd.f32 %v2898_v21, %v2826_v29  ;;  %v2776_v35 = vadd.f32 %v2775_v59, %v9453_v8  ;;  %v2828_v15 = vmul.f32 %v9453_v8, %v9453_v8  ;;  %v6598_v59 = vld [vmem:[#allocation2 + $0x2f4] ss:$8 sps:$4 sm:$0xff]   ;;  %3430 = vmatpush1.bf16.msra.mxu1 %v6597_v56 }
 0x358   :  { %v2867_v53 = vadd.f32 %v2866_v36, %v2827_v9  ;;  %3431 = vmatprep.subr.bf16.mxu1 %v6598_v59 }
 0x359   :  { %v2900_v61 = vadd.f32 %v2899_v42, %v2828_v15 }
 0x35b   :  { %v9458_v17 = vpop.f32.mrb[32].mxu0 }
 0x35c   :  { %v2744_v31 = vadd.f32 %v2743_v3, %v9458_v17  ;;  %v2829_v45 = vmul.f32 %v9458_v17, %v9458_v17  ;;  %v9463_v41 = vpop.f32.mrb[33].mxu0  ;;  %v6600_v3 = vld [vmem:[#allocation2 + $0x2f0] ss:$8 sps:$4 sm:$0xff]  }
 0x35d   :  { %v2777_v38 = vadd.f32 %v2776_v35, %v9463_v41  ;;  %v2830_v26 = vmul.f32 %v9463_v41, %v9463_v41  ;;  %v9468_v55 = vpop.f32.mrb[34].mxu0  ;;  %3432 = vmatpush1.bf16.msra.mxu1 %v6600_v3 }
 0x35e   :  { %12007 = vst [vmem:[#allocation59_spill] sm:$0xff] %v9468_v55  ;;  %v2868_v14 = vadd.f32 %v2867_v53, %v2829_v45  ;;  %v2745_v49 = vadd.f32 %v2744_v31, %v9468_v55  ;;  %v2831_v10 = vmul.f32 %v9468_v55, %v9468_v55  ;;  %v9473_v24 = vpop.f32.mrb[35].mxu0 }
 0x35f   :  { %v2901_v21 = vadd.f32 %v2900_v61, %v2830_v26  ;;  %v2778_v30 = vadd.f32 %v2777_v38, %v9473_v24  ;;  %v2832_v28 = vmul.f32 %v9473_v24, %v9473_v24 }
 0x360   :  { %v2869_v25 = vadd.f32 %v2868_v14, %v2831_v10 }
 0x361   :  { %v2902_v29 = vadd.f32 %v2901_v21, %v2832_v28 }
 0x363   :  { %v9478_v36 = vpop.f32.mrb[36].mxu0 }
 0x364   :  { %12008 = vst [vmem:[#allocation105_spill] sm:$0xff] %v9478_v36  ;;  %v2746_v9 = vadd.f32 %v2745_v49, %v9478_v36  ;;  %v2833_v42 = vmul.f32 %v9478_v36, %v9478_v36  ;;  %v9483_v35 = vpop.f32.mrb[37].mxu0 }
 0x365   :  { %12009 = vst [vmem:[#allocation101_spill] sm:$0xff] %v9483_v35  ;;  %v2779_v15 = vadd.f32 %v2778_v30, %v9483_v35  ;;  %v2834_v48 = vmul.f32 %v9483_v35, %v9483_v35  ;;  %v9488_v53 = vpop.f32.mrb[38].mxu0 }
 0x366   :  { %12010 = vst [vmem:[#allocation102_spill] sm:$0xff] %v9488_v53  ;;  %v2870_v43 = vadd.f32 %v2869_v25, %v2833_v42  ;;  %v2747_v61 = vadd.f32 %v2746_v9, %v9488_v53  ;;  %v2835_v16 = vmul.f32 %v9488_v53, %v9488_v53  ;;  %v9493_v31 = vpop.f32.mrb[39].mxu0 }
 0x367   :  { %12011 = vst [vmem:[#allocation38_spill] sm:$0xff] %v9493_v31  ;;  %v2903_v45 = vadd.f32 %v2902_v29, %v2834_v48  ;;  %v2780_v2 = vadd.f32 %v2779_v15, %v9493_v31  ;;  %v2836_v38 = vmul.f32 %v9493_v31, %v9493_v31 }
 0x368   :  { %v2871_v26 = vadd.f32 %v2870_v43, %v2835_v16 }
 0x369   :  { %v2904_v14 = vadd.f32 %v2903_v45, %v2836_v38 }
 0x36b   :  { %v9498_v49 = vpop.f32.mrb[40].mxu0 }
 0x36c   :  { %12012 = vst [vmem:[#allocation111_spill] sm:$0xff] %v9498_v49  ;;  %v2748_v10 = vadd.f32 %v2747_v61, %v9498_v49  ;;  %v2837_v21 = vmul.f32 %v9498_v49, %v9498_v49  ;;  %v9503_v30 = vpop.f32.mrb[41].mxu0 }
 0x36d   :  { %12013 = vst [vmem:[#allocation27_spill] sm:$0xff] %v9503_v30  ;;  %v2781_v28 = vadd.f32 %v2780_v2, %v9503_v30  ;;  %v2838_v56 = vmul.f32 %v9503_v30, %v9503_v30  ;;  %v9508_v25 = vpop.f32.mrb[42].mxu0 }
 0x36e   :  { %12014 = vst [vmem:[#allocation15_spill] sm:$0xff] %v9508_v25  ;;  %v2872_v59 = vadd.f32 %v2871_v26, %v2837_v21  ;;  %v2749_v29 = vadd.f32 %v2748_v10, %v9508_v25  ;;  %v2839_v3 = vmul.f32 %v9508_v25, %v9508_v25  ;;  %v9513_v9 = vpop.f32.mrb[43].mxu0 }
 0x36f   :  { %12015 = vst [vmem:[#allocation26_spill] sm:$0xff] %v9513_v9  ;;  %v2905_v42 = vadd.f32 %v2904_v14, %v2838_v56  ;;  %v2782_v15 = vadd.f32 %v2781_v28, %v9513_v9  ;;  %v2840_v48 = vmul.f32 %v9513_v9, %v9513_v9 }
 0x370   :  { %v2873_v43 = vadd.f32 %v2872_v59, %v2839_v3 }
 0x371   :  { %v2906_v61 = vadd.f32 %v2905_v42, %v2840_v48 }
 0x373   :  { %v9518_v16 = vpop.f32.mrb[44].mxu0 }
 0x374   :  { %12016 = vst [vmem:[#allocation14_spill] sm:$0xff] %v9518_v16  ;;  %v2750_v45 = vadd.f32 %v2749_v29, %v9518_v16  ;;  %v2841_v2 = vmul.f32 %v9518_v16, %v9518_v16  ;;  %v9523_v38 = vpop.f32.mrb[45].mxu0 }
 0x375   :  { %12017 = vst [vmem:[#allocation19_spill] sm:$0xff] %v9523_v38  ;;  %v2783_v26 = vadd.f32 %v2782_v15, %v9523_v38  ;;  %v2842_v14 = vmul.f32 %v9523_v38, %v9523_v38  ;;  %v9528_v10 = vpop.f32.mrb[46].mxu0 }
 0x376   :  { %12018 = vst [vmem:[#allocation67_spill] sm:$0xff] %v9528_v10  ;;  %v2874_v21 = vadd.f32 %v2873_v43, %v2841_v2  ;;  %v2751_v28 = vadd.f32 %v2750_v45, %v9528_v10  ;;  %v2843_v56 = vmul.f32 %v9528_v10, %v9528_v10  ;;  %v9533_v59 = vpop.f32.mrb[47].mxu0 }
 0x377   :  { %12019 = vst [vmem:[#allocation18_spill] sm:$0xff] %v9533_v59  ;;  %v2907_v29 = vadd.f32 %v2906_v61, %v2842_v14  ;;  %v2784_v3 = vadd.f32 %v2783_v26, %v9533_v59  ;;  %v2844_v42 = vmul.f32 %v9533_v59, %v9533_v59 }
 0x378   :  { %v2875_v15 = vadd.f32 %v2874_v21, %v2843_v56 }
 0x379   :  { %v2908_v48 = vadd.f32 %v2907_v29, %v2844_v42 }
 0x37b   :  { %v9538_v13 = vpop.f32.mrb[48].mxu0 }
 0x37c   :  { %12020 = vst [vmem:[#allocation66_spill] sm:$0xff] %v9538_v13  ;;  %v2752_v50 = vadd.f32 %v2751_v28, %v9538_v13  ;;  %v2845_v43 = vmul.f32 %v9538_v13, %v9538_v13  ;;  %v9543_v45 = vpop.f32.mrb[49].mxu0 }
 0x37d   :  { %12021 = vst [vmem:[#allocation65_spill] sm:$0xff] %v9543_v45  ;;  %v2785_v2 = vadd.f32 %v2784_v3, %v9543_v45  ;;  %v2846_v61 = vmul.f32 %v9543_v45, %v9543_v45  ;;  %v9548_v26 = vpop.f32.mrb[50].mxu0 }
 0x37e   :  { %12022 = vst [vmem:[#allocation77_spill] sm:$0xff] %v9548_v26  ;;  %v2876_v14 = vadd.f32 %v2875_v15, %v2845_v43  ;;  %v2753_v21 = vadd.f32 %v2752_v50, %v9548_v26  ;;  %v2847_v56 = vmul.f32 %v9548_v26, %v9548_v26  ;;  %v9553_v29 = vpop.f32.mrb[51].mxu0 }
 0x37f   :  { %12023 = vst [vmem:[#allocation64_spill] sm:$0xff] %v9553_v29  ;;  %v2909_v28 = vadd.f32 %v2908_v48, %v2846_v61  ;;  %v2786_v42 = vadd.f32 %v2785_v2, %v9553_v29  ;;  %v2848_v13 = vmul.f32 %v9553_v29, %v9553_v29 }
 0x380   :  { %v2877_v3 = vadd.f32 %v2876_v14, %v2847_v56 }
 0x381   :  { %v2910_v10 = vadd.f32 %v2909_v28, %v2848_v13 }
 0x383   :  { %v9558_v16 = vpop.f32.mrb[52].mxu0 }
 0x384   :  { %12024 = vst [vmem:[#allocation76_spill] sm:$0xff] %v9558_v16  ;;  %v2754_v45 = vadd.f32 %v2753_v21, %v9558_v16  ;;  %v2849_v50 = vmul.f32 %v9558_v16, %v9558_v16  ;;  %v9563_v15 = vpop.f32.mrb[53].mxu0 }
 0x385   :  { %12025 = vst [vmem:[#allocation98_spill] sm:$0xff] %v9563_v15  ;;  %v2787_v43 = vadd.f32 %v2786_v42, %v9563_v15  ;;  %v2850_v48 = vmul.f32 %v9563_v15, %v9563_v15  ;;  %v2724_v2 = vpop.f32.mrb[54].mxu0 }
 0x386   :  { %v2878_v61 = vadd.f32 %v2877_v3, %v2849_v50  ;;  %v2755_v26 = vadd.f32 %v2754_v45, %v2724_v2  ;;  %v2851_v29 = vmul.f32 %v2724_v2, %v2724_v2  ;;  %v2726_v14 = vpop.f32.mrb[55].mxu0 }
 0x387   :  { %v2911_v13 = vadd.f32 %v2910_v10, %v2850_v48  ;;  %v2788_v56 = vadd.f32 %v2787_v43, %v2726_v14  ;;  %v2852_v28 = vmul.f32 %v2726_v14, %v2726_v14 }
 0x388   :  { %v2756_v59 = vrot.slane %v2755_v26, 4  ;;  %v2879_v21 = vadd.f32 %v2878_v61, %v2851_v29 }
 0x389   :  { %v2789_v38 = vrot.slane %v2788_v56, 4  ;;  %v2912_v25 = vadd.f32 %v2911_v13, %v2852_v28 }
 0x38a   :  { %v2757_v16 = vadd.f32 %v2756_v59, %v2755_v26  ;;  %v2880_v49 = vrot.slane %v2879_v21, 4 }
 0x38b   :  { %v2790_v9 = vadd.f32 %v2789_v38, %v2788_v56  ;;  %v2913_v30 = vrot.slane %v2912_v25, 4 }
 0x38c   :  { %v2758_v42 = vrot.slane %v2757_v16, 2  ;;  %v2881_v53 = vadd.f32 %v2880_v49, %v2879_v21 }
 0x38d   :  { %v2791_v36 = vrot.slane %v2790_v9, 2  ;;  %v2914_v15 = vadd.f32 %v2913_v30, %v2912_v25 }
 0x38e   :  { %v2759_v31 = vadd.f32 %v2758_v42, %v2757_v16  ;;  %v2882_v3 = vrot.slane %v2881_v53, 2 }
 0x38f   :  { %v2792_v45 = vadd.f32 %v2791_v36, %v2790_v9  ;;  %v2915_v50 = vrot.slane %v2914_v15, 2 }
 0x390   :  { %v2760_v35 = vrot.slane %v2759_v31, 1  ;;  %v2883_v10 = vadd.f32 %v2882_v3, %v2881_v53  ;;  %v12026_v53 = vld [vmem:[#allocation10_spill] sm:$0xff]  ;;  %v6742_v3 = vld [vmem:[%s11400_s1 + $0x8] sm:$0xff] }
 0x391   :  { %v2793_v43 = vrot.slane %v2792_v45, 1  ;;  %v2916_v48 = vadd.f32 %v2915_v50, %v2914_v15  ;;  %v9569_v15 = vsub.s32 5, %v12026_v53 }
 0x392   :  { %v2761_v55 = vadd.f32 %v2760_v35, %v2759_v31  ;;  %v2884_v29 = vrot.slane %v2883_v10, 1 }
 0x393   :  { %v2794_v61 = vadd.f32 %v2793_v43, %v2792_v45  ;;  %v2917_v13 = vrot.slane %v2916_v48, 1  ;;  %12027 = vst [vmem:[#allocation51_spill] sm:$0xff] %v9569_v15  ;;  %v3007_v43 = vsub.s32 6, %v12026_v53 }
 0x394   :  { %v2795_v59 = vmul.f32 0.004464286, %v2761_v55  ;;  %v2885_v26 = vadd.f32 %v2884_v29, %v2883_v10  ;;  %v6741_v55 = vld [vmem:[%s11400_s1] sm:$0xff] }
 0x395   :  { %v2796_v38 = vmul.f32 0.004464286, %v2794_v61  ;;  %v2918_v56 = vadd.f32 %v2917_v13, %v2916_v48 }
 0x396   :  { %v2919_v28 = vmul.f32 0.004464286, %v2885_v26  ;;  %v2921_v49 = vmul.f32 %v2795_v59, %v2795_v59 }
 0x397   :  { %v2920_v21 = vmul.f32 0.004464286, %v2918_v56  ;;  %v2922_v30 = vmul.f32 %v2796_v38, %v2796_v38 }
 0x398   :  { %v2923_v25 = vsub.f32 %v2919_v28, %v2921_v49 }
 0x399   :  { %v2924_v16 = vsub.f32 %v2920_v21, %v2922_v30 }
 0x39a   :  { %v2925_v36 = vadd.f32 0.8, %v2923_v25 }
 0x39b   :  { %v2926_v9 = vadd.f32 0.8, %v2924_v16 }
 0x39c   :  { %6721 = vrsqrt.f32 %v2925_v36 }
 0x39d   :  { %6723 = vrsqrt.f32 %v2926_v9 }
 0x3a6   :  { %v6722_v35 = vpop.eup %6721 }
 0x3a7   :  { %v6724_v31 = vpop.eup %6723  ;;  %v2929_v42 = vmul.f32 %v6741_v55, %v6722_v35 }
 0x3a8   :  { %v2930_v45 = vmul.f32 %v6742_v3, %v6724_v31 }
 0x3a9   :  { %v2931_v50 = vmul.f32 %v2929_v42, %v2795_v59  ;;  %v9578_v10 = vrot.slane %v2929_v42, %v9569_v15 }
 0x3aa   :  { %v2932_v48 = vmul.f32 %v2930_v45, %v2796_v38  ;;  %v9582_v29 = vrot.slane %v2930_v45, %v9569_v15 }
 0x3ab   :  { %v2935_v61 = vrot.slane %v2931_v50, 7  ;;  %v3003_v13 = vmul.f32 %v9578_v10, %v2724_v2  ;;  %v2949_v26 = vmul.f32 %v9578_v10, %v9298_v63  ;;  %v2951_v56 = vmul.f32 %v9578_v10, %v9302_v62 }
 0x3ac   :  { %v2936_v28 = vrot.slane %v2932_v48, 7  ;;  %v3004_v59 = vmul.f32 %v9582_v29, %v2726_v14  ;;  %v2950_v49 = vmul.f32 %v9582_v29, %v9300_v5  ;;  %v2952_v38 = vmul.f32 %v9582_v29, %v9310_v19 }
 0x3ad   :  { %v2939_v21 = vsub.f32 %v6741_v55, %v2935_v61  ;;  %v2954_v30 = vmul.f32 %v9582_v29, %v9323_v51  ;;  %v2956_v2 = vmul.f32 %v9582_v29, %v9333_v58  ;;  %v2953_v63 = vmul.f32 %v9578_v10, %v9318_v46 }
 0x3ae   :  { %v2940_v62 = vsub.f32 %v6742_v3, %v2936_v28  ;;  %v2955_v14 = vmul.f32 %v9578_v10, %v9328_v6  ;;  %v2958_v5 = vmul.f32 %v9582_v29, %v9343_v52  ;;  %v2960_v19 = vmul.f32 %v9582_v29, %v9353_v12 }
 0x3af   :  { %v9606_v25 = vrot.slane %v2939_v21, %v3007_v43  ;;  %v2957_v51 = vmul.f32 %v9578_v10, %v9338_v37  ;;  %v2959_v58 = vmul.f32 %v9578_v10, %v9348_v7  ;;  %v2962_v46 = vmul.f32 %v9582_v29, %v9363_v22 }
 0x3b0   :  { %v9614_v16 = vrot.slane %v2940_v62, %v3007_v43  ;;  %v2964_v6 = vmul.f32 %v9582_v29, %v9373_v11  ;;  %v2961_v52 = vmul.f32 %v9578_v10, %v9358_v0  ;;  %v2963_v12 = vmul.f32 %v9578_v10, %v9368_v40 }
 0x3b1   :  { %v9623_v36 = vadd.f32 %v9606_v25, %v3003_v13  ;;  %v3013_v37 = vadd.f32 %v9606_v25, %v2949_v26  ;;  %v3015_v7 = vadd.f32 %v9606_v25, %v2951_v56  ;;  %v3017_v22 = vadd.f32 %v9606_v25, %v2953_v63 }
 0x3b2   :  { %v9629_v9 = vadd.f32 %v9614_v16, %v3004_v59  ;;  %v3014_v11 = vadd.f32 %v9614_v16, %v2950_v49  ;;  %v3016_v35 = vadd.f32 %v9614_v16, %v2952_v38  ;;  %v3018_v0 = vadd.f32 %v9614_v16, %v2954_v30 }
 0x3b3   :  { %v3069_v31 = vmul.f32 0.2, %v3013_v37  ;;  %v3071_v40 = vmul.f32 0.2, %v3015_v7  ;;  %v3020_v55 = vadd.f32 %v9614_v16, %v2956_v2  ;;  %v3019_v50 = vadd.f32 %v9606_v25, %v2955_v14 }
 0x3b4   :  { %v9636_v42 = vmul.f32 0.2, %v9629_v9  ;;  %v3070_v3 = vmul.f32 0.2, %v3014_v11  ;;  %v3072_v45 = vmul.f32 0.2, %v3016_v35  ;;  %v3022_v30 = vadd.f32 %v9614_v16, %v2958_v5 }
 0x3b5   :  { %v3125_v43 = vmax.f32 %v3013_v37, %v3069_v31  ;;  %v3127_v48 = vmax.f32 %v3015_v7, %v3071_v40  ;;  %v3074_v61 = vmul.f32 0.2, %v3018_v0  ;;  %v3076_v13 = vmul.f32 0.2, %v3020_v55 }
 0x3b6   :  { %v3126_v26 = vmax.f32 %v3014_v11, %v3070_v3  ;;  %v3128_v56 = vmax.f32 %v3016_v35, %v3072_v45  ;;  %v3073_v28 = vmul.f32 0.2, %v3017_v22  ;;  %v3075_v59 = vmul.f32 0.2, %v3019_v50 }
 0x3b7   :  { %v3181_v49 = vpack.c.bf16 %v3127_v48, %v3125_v43  ;;  %v3130_v38 = vmax.f32 %v3018_v0, %v3074_v61  ;;  %v3132_v21 = vmax.f32 %v3020_v55, %v3076_v13  ;;  %v3024_v15 = vadd.f32 %v9614_v16, %v2960_v19 }
 0x3b8   :  { %v3182_v2 = vpack.c.bf16 %v3128_v56, %v3126_v26  ;;  %v3129_v63 = vmax.f32 %v3017_v22, %v3073_v28  ;;  %v3131_v62 = vmax.f32 %v3019_v50, %v3075_v59  ;;  %v3078_v14 = vmul.f32 0.2, %v3022_v30 }
 0x3b9   :  { %v3184_v53 = vpack.c.bf16 %v3132_v21, %v3130_v38  ;;  %v3021_v37 = vadd.f32 %v9606_v25, %v2957_v51  ;;  %v3023_v7 = vadd.f32 %v9606_v25, %v2959_v58  ;;  %v3080_v35 = vmul.f32 0.2, %v3024_v15 }
 0x3ba   :  { %3433 = vmatprep.mubr.bf16.mxu1 %v3182_v2  ;;  %v3183_v11 = vpack.c.bf16 %v3131_v62, %v3129_v63  ;;  %v3026_v31 = vadd.f32 %v9614_v16, %v2962_v46  ;;  %v3028_v0 = vadd.f32 %v9614_v16, %v2964_v6  ;;  %v3134_v5 = vmax.f32 %v3022_v30, %v3078_v14 }
 0x3bb   :  { %3434 = vmatmul.mubr.bf16.vlgmr.msra.gmra.mrb[0].mxu1 %v3181_v49  ;;  %v3077_v40 = vmul.f32 0.2, %v3021_v37  ;;  %v3079_v22 = vmul.f32 0.2, %v3023_v7  ;;  %v3025_v55 = vadd.f32 %v9606_v25, %v2961_v52  ;;  %v3136_v19 = vmax.f32 %v3024_v15, %v3080_v35 }
 0x3bc   :  { %3443 = vmatprep.mubr.bf16.mxu1 %v3184_v53  ;;  %v3082_v3 = vmul.f32 0.2, %v3026_v31  ;;  %v3084_v45 = vmul.f32 0.2, %v3028_v0  ;;  %v3027_v51 = vadd.f32 %v9606_v25, %v2963_v12  ;;  %v2966_v46 = vmul.f32 %v9582_v29, %v9383_v20 }
 0x3bd   :  { %v3133_v58 = vmax.f32 %v3021_v37, %v3077_v40  ;;  %v3135_v50 = vmax.f32 %v3023_v7, %v3079_v22  ;;  %v3081_v43 = vmul.f32 0.2, %v3025_v55  ;;  %v3186_v48 = vpack.c.bf16 %v3136_v19, %v3134_v5 }
 0x3be   :  { %v3138_v6 = vmax.f32 %v3026_v31, %v3082_v3  ;;  %v3140_v61 = vmax.f32 %v3028_v0, %v3084_v45  ;;  %v3083_v13 = vmul.f32 0.2, %v3027_v51  ;;  %v2968_v53 = vmul.f32 %v9582_v29, %v9393_v18 }
 0x3bf   :  { %v3185_v26 = vpack.c.bf16 %v3135_v50, %v3133_v58  ;;  %v3137_v56 = vmax.f32 %v3025_v55, %v3081_v43  ;;  %v3030_v15 = vadd.f32 %v9614_v16, %v2966_v46  ;;  %v2965_v12 = vmul.f32 %v9578_v10, %v9378_v27 }
 0x3c0   :  { %v3188_v52 = vpack.c.bf16 %v3140_v61, %v3138_v6  ;;  %v3139_v28 = vmax.f32 %v3027_v51, %v3083_v13  ;;  %v2967_v59 = vmul.f32 %v9578_v10, %v9388_v57  ;;  %v3032_v20 = vadd.f32 %v9614_v16, %v2968_v53 }
 0x3c1   :  { %v3086_v49 = vmul.f32 0.2, %v3030_v15  ;;  %v2970_v38 = vmul.f32 %v9582_v29, %v9403_v1  ;;  %v2972_v21 = vmul.f32 %v9582_v29, %v9413_v39  ;;  %v3029_v30 = vadd.f32 %v9606_v25, %v2965_v12 }
 0x3c2   :  { %v9661_v18 = vpack.c.bf16 %v3139_v28, %v3137_v56  ;;  %v3031_v2 = vadd.f32 %v9606_v25, %v2967_v59  ;;  %v2969_v27 = vmul.f32 %v9578_v10, %v9398_v23  ;;  %v3088_v57 = vmul.f32 0.2, %v3032_v20 }
 0x3c3   :  { %3444 = vmatmul.mubr.bf16.gmra.mrb[4].mxu1 %v3183_v11  ;;  %v3142_v63 = vmax.f32 %v3030_v15, %v3086_v49  ;;  %v3034_v62 = vadd.f32 %v9614_v16, %v2970_v38  ;;  %v3036_v14 = vadd.f32 %v9614_v16, %v2972_v21  ;;  %v3085_v1 = vmul.f32 0.2, %v3029_v30 }
 0x3c4   :  { %3453 = vmatprep.mubr.bf16.mxu1 %v3186_v48  ;;  %v3087_v37 = vmul.f32 0.2, %v3031_v2  ;;  %v2971_v39 = vmul.f32 %v9578_v10, %v9408_v54  ;;  %v3033_v7 = vadd.f32 %v9606_v25, %v2969_v27  ;;  %v3144_v35 = vmax.f32 %v3032_v20, %v3088_v57 }
 0x3c5   :  { %v3090_v31 = vmul.f32 0.2, %v3034_v62  ;;  %v3092_v0 = vmul.f32 0.2, %v3036_v14  ;;  %v2974_v23 = vmul.f32 %v9582_v29, %v9423_v47  ;;  %v3141_v11 = vmax.f32 %v3029_v30, %v3085_v1 }
 0x3c6   :  { %v3143_v5 = vmax.f32 %v3031_v2, %v3087_v37  ;;  %v3035_v40 = vadd.f32 %v9606_v25, %v2971_v39  ;;  %v3089_v22 = vmul.f32 0.2, %v3033_v7  ;;  %v3190_v55 = vpack.c.bf16 %v3144_v35, %v3142_v63 }
 0x3c7   :  { %v3146_v19 = vmax.f32 %v3034_v62, %v3090_v31  ;;  %v3148_v3 = vmax.f32 %v3036_v14, %v3092_v0  ;;  %v2976_v45 = vmul.f32 %v9582_v29, %v9433_v34  ;;  %v3038_v50 = vadd.f32 %v9614_v16, %v2974_v23  ;;  %v12028_v31 = vld [vmem:[#allocation59_spill] sm:$0xff] }
 0x3c8   :  { %v9677_v54 = vpack.c.bf16 %v3143_v5, %v3141_v11  ;;  %v3091_v51 = vmul.f32 0.2, %v3035_v40  ;;  %v3145_v58 = vmax.f32 %v3033_v7, %v3089_v22  ;;  %v2973_v46 = vmul.f32 %v9578_v10, %v9418_v33  ;;  %v12029_v5 = vld [vmem:[#allocation101_spill] sm:$0xff] }
 0x3c9   :  { %v9680_v43 = vpack.c.bf16 %v3148_v3, %v3146_v19  ;;  %v3040_v47 = vadd.f32 %v9614_v16, %v2976_v45  ;;  %v2975_v48 = vmul.f32 %v9578_v10, %v9428_v4  ;;  %v3094_v61 = vmul.f32 0.2, %v3038_v50  ;;  %v12030_v19 = vld [vmem:[#allocation38_spill] sm:$0xff]  ;;  %v12031_v45 = vld [vmem:[#allocation105_spill] sm:$0xff] }
 0x3ca   :  { %v3147_v6 = vmax.f32 %v3035_v40, %v3091_v51  ;;  %v2978_v34 = vmul.f32 %v9582_v29, %v9443_v32  ;;  %v2980_v13 = vmul.f32 %v9582_v29, %v9453_v8  ;;  %v3037_v53 = vadd.f32 %v9606_v25, %v2973_v46 }
 0x3cb   :  { %3454 = vmatmul.mubr.bf16.gmra.mrb[8].mxu1 %v3185_v26  ;;  %v3096_v56 = vmul.f32 0.2, %v3040_v47  ;;  %v3039_v15 = vadd.f32 %v9606_v25, %v2975_v48  ;;  %v2977_v33 = vmul.f32 %v9578_v10, %v9438_v60  ;;  %v3150_v4 = vmax.f32 %v3038_v50, %v3094_v61 }
 0x3cc   :  { %3463 = vmatprep.mubr.bf16.mxu1 %v3188_v52  ;;  %v9695_v28 = vpack.c.bf16 %v3147_v6, %v3145_v58  ;;  %v3042_v12 = vadd.f32 %v9614_v16, %v2978_v34  ;;  %v3044_v32 = vadd.f32 %v9614_v16, %v2980_v13  ;;  %v3093_v20 = vmul.f32 0.2, %v3037_v53 }
 0x3cd   :  { %v3152_v59 = vmax.f32 %v3040_v47, %v3096_v56  ;;  %v3095_v8 = vmul.f32 0.2, %v3039_v15  ;;  %v2979_v26 = vmul.f32 %v9578_v10, %v9448_v44  ;;  %v3041_v21 = vadd.f32 %v9606_v25, %v2977_v33 }
 0x3ce   :  { %v3098_v49 = vmul.f32 0.2, %v3042_v12  ;;  %v3100_v38 = vmul.f32 0.2, %v3044_v32  ;;  %v2982_v60 = vmul.f32 %v9582_v29, %v9463_v41  ;;  %v3149_v30 = vmax.f32 %v3037_v53, %v3093_v20  ;;  %v12033_v53 = vld [vmem:[#allocation27_spill] sm:$0xff] }
 0x3cf   :  { %v9704_v52 = vpack.c.bf16 %v3152_v59, %v3150_v4  ;;  %v3151_v2 = vmax.f32 %v3039_v15, %v3095_v8  ;;  %v3043_v27 = vadd.f32 %v9606_v25, %v2979_v26  ;;  %v3097_v62 = vmul.f32 0.2, %v3041_v21  ;;  %v12034_v8 = vld [vmem:[#allocation26_spill] sm:$0xff] }
 0x3d0   :  { %v3154_v57 = vmax.f32 %v3042_v12, %v3098_v49  ;;  %v3156_v63 = vmax.f32 %v3044_v32, %v3100_v38  ;;  %v2984_v14 = vmul.f32 %v9582_v29, %v9473_v24  ;;  %v3046_v37 = vadd.f32 %v9614_v16, %v2982_v60 }
 0x3d1   :  { %v9709_v44 = vpack.c.bf16 %v3151_v2, %v3149_v30  ;;  %v3099_v1 = vmul.f32 0.2, %v3043_v27  ;;  %v2981_v41 = vmul.f32 %v9578_v10, %v9458_v17  ;;  %v3153_v7 = vmax.f32 %v3041_v21, %v3097_v62  ;;  %v12035_v30 = vld [vmem:[#allocation111_spill] sm:$0xff] }
 0x3d2   :  { %v9714_v39 = vpack.c.bf16 %v3156_v63, %v3154_v57  ;;  %v3048_v35 = vadd.f32 %v9614_v16, %v2984_v14  ;;  %v2983_v0 = vmul.f32 %v9578_v10, %v12028_v31  ;;  %v3102_v24 = vmul.f32 0.2, %v3046_v37  ;;  %v12036_v62 = vld [vmem:[#allocation15_spill] sm:$0xff] }
 0x3d3   :  { %3464 = vmatmul.mubr.bf16.gmra.mrb[12].mxu1 %v9661_v18  ;;  %v3155_v23 = vmax.f32 %v3043_v27, %v3099_v1  ;;  %v3045_v11 = vadd.f32 %v9606_v25, %v2981_v41  ;;  %v2986_v40 = vmul.f32 %v9582_v29, %v12029_v5  ;;  %v2988_v3 = vmul.f32 %v9582_v29, %v12030_v19 }
 0x3d4   :  { %3473 = vmatprep.mubr.bf16.mxu1 %v3190_v55  ;;  %v3104_v22 = vmul.f32 0.2, %v3048_v35  ;;  %v3047_v17 = vadd.f32 %v9606_v25, %v2983_v0  ;;  %v2985_v51 = vmul.f32 %v9578_v10, %v12031_v45  ;;  %v3158_v18 = vmax.f32 %v3046_v37, %v3102_v24  ;;  %v12032_v55 = vld [vmem:[#allocation102_spill] sm:$0xff]  ;;  %v12040_v45 = vld [vmem:[#allocation67_spill] sm:$0xff] }
 0x3d5   :  { %v9728_v58 = vpack.c.bf16 %v3155_v23, %v3153_v7  ;;  %v3101_v50 = vmul.f32 0.2, %v3045_v11  ;;  %v3050_v47 = vadd.f32 %v9614_v16, %v2986_v40  ;;  %v3052_v6 = vadd.f32 %v9614_v16, %v2988_v3  ;;  %v12037_v7 = vld [vmem:[#allocation19_spill] sm:$0xff]  ;;  %v12038_v23 = vld [vmem:[#allocation18_spill] sm:$0xff] }
 0x3d6   :  { %v3160_v46 = vmax.f32 %v3048_v35, %v3104_v22  ;;  %v3103_v48 = vmul.f32 0.2, %v3047_v17  ;;  %v2987_v61 = vmul.f32 %v9578_v10, %v12032_v55  ;;  %v3049_v56 = vadd.f32 %v9606_v25, %v2985_v51 }
 0x3d7   :  { %v3157_v34 = vmax.f32 %v3045_v11, %v3101_v50  ;;  %v3106_v13 = vmul.f32 0.2, %v3050_v47  ;;  %v2990_v15 = vmul.f32 %v9582_v29, %v12033_v53  ;;  %v3108_v12 = vmul.f32 0.2, %v3052_v6  ;;  %v12042_v53 = vld [vmem:[#allocation64_spill] sm:$0xff] }
 0x3d8   :  { %v9737_v33 = vpack.c.bf16 %v3160_v46, %v3158_v18  ;;  %v3159_v4 = vmax.f32 %v3047_v17, %v3103_v48  ;;  %v3051_v32 = vadd.f32 %v9606_v25, %v2987_v61  ;;  %v3105_v20 = vmul.f32 0.2, %v3049_v56  ;;  %v12041_v46 = vld [vmem:[#allocation65_spill] sm:$0xff] }
 0x3d9   :  { %v3162_v59 = vmax.f32 %v3050_v47, %v3106_v13  ;;  %v2992_v26 = vmul.f32 %v9582_v29, %v12034_v8  ;;  %v3054_v49 = vadd.f32 %v9614_v16, %v2990_v15  ;;  %v3164_v21 = vmax.f32 %v3052_v6, %v3108_v12 }
 0x3da   :  { %v9743_v38 = vpack.c.bf16 %v3159_v4, %v3157_v34  ;;  %v3107_v60 = vmul.f32 0.2, %v3051_v32  ;;  %v2989_v2 = vmul.f32 %v9578_v10, %v12035_v30  ;;  %v3161_v27 = vmax.f32 %v3049_v56, %v3105_v20  ;;  %v12043_v20 = vld [vmem:[#allocation66_spill] sm:$0xff] }
 0x3db   :  { %3474 = vmatmul.mubr.bf16.gmra.mrb[16].mxu1 %v9677_v54  ;;  %v3056_v57 = vadd.f32 %v9614_v16, %v2992_v26  ;;  %v3110_v63 = vmul.f32 0.2, %v3054_v49  ;;  %v2991_v14 = vmul.f32 %v9578_v10, %v12036_v62  ;;  %v9752_v1 = vpack.c.bf16 %v3164_v21, %v3162_v59 }
 0x3dc   :  { %3483 = vmatprep.mubr.bf16.mxu1 %v9680_v43  ;;  %v3163_v37 = vmax.f32 %v3051_v32, %v3107_v60  ;;  %v3053_v41 = vadd.f32 %v9606_v25, %v2989_v2  ;;  %v2994_v35 = vmul.f32 %v9582_v29, %v12037_v7  ;;  %v2996_v24 = vmul.f32 %v9582_v29, %v12038_v23  ;;  %v12039_v43 = vld [vmem:[#allocation14_spill] sm:$0xff]  ;;  %v12044_v60 = vld [vmem:[#allocation77_spill] sm:$0xff] }
 0x3dd   :  { %v3112_v31 = vmul.f32 0.2, %v3056_v57  ;;  %v3166_v0 = vmax.f32 %v3054_v49, %v3110_v63  ;;  %v3055_v54 = vadd.f32 %v9606_v25, %v2991_v14  ;;  %v2993_v22 = vmul.f32 %v9578_v10, %v12039_v43 }
 0x3de   :  { %v3199_v11 = vpack.c.bf16 %v3163_v37, %v3161_v27  ;;  %v3109_v5 = vmul.f32 0.2, %v3053_v41  ;;  %v3058_v40 = vadd.f32 %v9614_v16, %v2994_v35  ;;  %v3060_v3 = vadd.f32 %v9614_v16, %v2996_v24 }
 0x3df   :  { %v3168_v17 = vmax.f32 %v3056_v57, %v3112_v31  ;;  %v3111_v19 = vmul.f32 0.2, %v3055_v54  ;;  %v2995_v51 = vmul.f32 %v9578_v10, %v12040_v45  ;;  %v3057_v47 = vadd.f32 %v9606_v25, %v2993_v22  ;;  %v12046_v31 = vld [vmem:[#allocation76_spill] sm:$0xff] }
 0x3e0   :  { %v3165_v18 = vmax.f32 %v3053_v41, %v3109_v5  ;;  %v3114_v50 = vmul.f32 0.2, %v3058_v40  ;;  %v2998_v48 = vmul.f32 %v9582_v29, %v12041_v46  ;;  %v3116_v61 = vmul.f32 0.2, %v3060_v3  ;;  %v6622_v46 = vld [vmem:[#allocation2 + $0x370] ss:$8 sps:$4 sm:$0xff]  }
 0x3e1   :  { %v3202_v6 = vpack.c.bf16 %v3168_v17, %v3166_v0  ;;  %v3167_v55 = vmax.f32 %v3055_v54, %v3111_v19  ;;  %v3059_v34 = vadd.f32 %v9606_v25, %v2995_v51  ;;  %v3113_v56 = vmul.f32 0.2, %v3057_v47 }
 0x3e2   :  { %v3170_v13 = vmax.f32 %v3058_v40, %v3114_v50  ;;  %v3000_v15 = vmul.f32 %v9582_v29, %v12042_v53  ;;  %v3062_v4 = vadd.f32 %v9614_v16, %v2998_v48  ;;  %v3172_v32 = vmax.f32 %v3060_v3, %v3116_v61  ;;  %v6619_v50 = vld [vmem:[#allocation2 + $0x360] ss:$8 sps:$4 sm:$0xff]   ;;  %v6624_v48 = vld [vmem:[#allocation2 + $0x374] ss:$8 sps:$4 sm:$0xff]  }
 0x3e3   :  { %3484 = vmatmul.mubr.bf16.gmra.mrb[20].mxu1 %v9695_v28  ;;  %v3201_v12 = vpack.c.bf16 %v3167_v55, %v3165_v18  ;;  %v3115_v59 = vmul.f32 0.2, %v3059_v34  ;;  %v2997_v8 = vmul.f32 %v9578_v10, %v12043_v20  ;;  %v3169_v26 = vmax.f32 %v3057_v47, %v3113_v56  ;;  %v12045_v28 = vld [vmem:[#allocation98_spill] sm:$0xff]  ;;  %v6621_v47 = vld [vmem:[#allocation2 + $0x364] ss:$8 sps:$4 sm:$0xff]  }
 0x3e4   :  { %3493 = vmatprep.mubr.bf16.mxu1 %v9704_v52  ;;  %v3064_v49 = vadd.f32 %v9614_v16, %v3000_v15  ;;  %v3118_v21 = vmul.f32 0.2, %v3062_v4  ;;  %v2999_v30 = vmul.f32 %v9578_v10, %v12044_v60  ;;  %v3204_v2 = vpack.c.bf16 %v3172_v32, %v3170_v13  ;;  %v6618_v18 = vld [vmem:[#allocation2 + $0x354] ss:$8 sps:$4 sm:$0xff]   ;;  %v6627_v55 = vld [vmem:[#allocation2 + $0x384] ss:$8 sps:$4 sm:$0xff]  }
 0x3e5   :  { %v3171_v27 = vmax.f32 %v3059_v34, %v3115_v59  ;;  %v3061_v57 = vadd.f32 %v9606_v25, %v2997_v8  ;;  %v3002_v63 = vmul.f32 %v9582_v29, %v12045_v28  ;;  %v3123_v62 = vmul.f32 0.2, %v9623_v36 }
 0x3e6   :  { %v3120_v14 = vmul.f32 0.2, %v3064_v49  ;;  %v3174_v37 = vmax.f32 %v3062_v4, %v3118_v21  ;;  %v3063_v52 = vadd.f32 %v9606_v25, %v2999_v30  ;;  %v3001_v0 = vmul.f32 %v9578_v10, %v12046_v31 }
 0x3e7   :  { %v3203_v41 = vpack.c.bf16 %v3171_v27, %v3169_v26  ;;  %v3117_v7 = vmul.f32 0.2, %v3061_v57  ;;  %v3066_v35 = vadd.f32 %v9614_v16, %v3002_v63  ;;  %v3180_v29 = vmax.f32 %v9629_v9, %v9636_v42  ;;  %v6604_v9 = vld [vmem:[#allocation2 + $0x310] ss:$8 sps:$4 sm:$0xff]   ;;  %v6606_v42 = vld [vmem:[#allocation2 + $0x314] ss:$8 sps:$4 sm:$0xff]  }
 0x3e8   :  { %v3176_v54 = vmax.f32 %v3064_v49, %v3120_v14  ;;  %v3119_v23 = vmul.f32 0.2, %v3063_v52  ;;  %v3065_v40 = vadd.f32 %v9606_v25, %v3001_v0  ;;  %v3179_v16 = vmax.f32 %v9623_v36, %v3123_v62  ;;  %v6601_v25 = vld [vmem:[#allocation2 + $0x300] ss:$8 sps:$4 sm:$0xff]   ;;  %v6603_v36 = vld [vmem:[#allocation2 + $0x304] ss:$8 sps:$4 sm:$0xff]  }
 0x3e9   :  { %v3173_v24 = vmax.f32 %v3061_v57, %v3117_v7  ;;  %v3122_v5 = vmul.f32 0.2, %v3066_v35  ;;  %4246 = vmatprep.subr.bf16.mxu1 %v6603_v36 }
 0x3ea   :  { %v3206_v43 = vpack.c.bf16 %v3176_v54, %v3174_v37  ;;  %v3175_v22 = vmax.f32 %v3063_v52, %v3119_v23  ;;  %v3121_v19 = vmul.f32 0.2, %v3065_v40  ;;  %4247 = vmatpush1.bf16.msra.mxu1 %v6601_v25 }
 0x3eb   :  { %3494 = vmatmul.mubr.bf16.gmra.mrb[24].mxu1 %v9709_v44  ;;  %v3178_v17 = vmax.f32 %v3066_v35, %v3122_v5  ;;  %4248 = vmatprep.subr.bf16.mxu1 %v6606_v42  ;;  %v6607_v44 = vld [vmem:[#allocation2 + $0x320] ss:$8 sps:$4 sm:$0xff]   ;;  %v6630_v42 = vld [vmem:[#allocation2 + $0x394] ss:$8 sps:$4 sm:$0xff]  }
 0x3ec   :  { %3503 = vmatprep.mubr.bf16.mxu1 %v9714_v39  ;;  %v3205_v10 = vpack.c.bf16 %v3175_v22, %v3173_v24  ;;  %v3177_v45 = vmax.f32 %v3065_v40, %v3121_v19  ;;  %v6609_v39 = vld [vmem:[#allocation2 + $0x324] ss:$8 sps:$4 sm:$0xff]  }
 0x3ed   :  { %v3208_v3 = vpack.c.bf16 %v3180_v29, %v3178_v17 }
 0x3ee   :  { %v3207_v51 = vpack.c.bf16 %v3179_v16, %v3177_v45  ;;  %4249 = vmatpush1.bf16.msra.mxu1 %v6604_v9  ;;  %v6628_v9 = vld [vmem:[#allocation2 + $0x390] ss:$8 sps:$4 sm:$0xff]  }
 0x3ef   :  { %4250 = vmatprep.subr.bf16.mxu1 %v6609_v39 }
 0x3f2   :  { %4251 = vmatpush1.bf16.msra.mxu1 %v6607_v44 }
 0x3f3   :  { %3504 = vmatmul.mubr.bf16.gmra.mrb[28].mxu1 %v9728_v58  ;;  %v6610_v58 = vld [vmem:[#allocation2 + $0x330] ss:$8 sps:$4 sm:$0xff]  }
 0x3f4   :  { %3513 = vmatprep.mubr.bf16.mxu1 %v9737_v33  ;;  %v6612_v33 = vld [vmem:[#allocation2 + $0x334] ss:$8 sps:$4 sm:$0xff]  }
 0x3f5   :  { %4252 = vmatprep.subr.bf16.mxu1 %v6612_v33  ;;  %v6633_v33 = vld [vmem:[#allocation2 + $0x3a4] ss:$8 sps:$4 sm:$0xff]  }
 0x3f6   :  { %4253 = vmatpush1.bf16.msra.mxu1 %v6610_v58 }
 0x3fb   :  { %3514 = vmatmul.mubr.bf16.gmra.mrb[32].mxu1 %v9743_v38  ;;  %v6613_v38 = vld [vmem:[#allocation2 + $0x340] ss:$8 sps:$4 sm:$0xff]  }
 0x3fc   :  { %3523 = vmatprep.mubr.bf16.mxu1 %v9752_v1  ;;  %v6615_v1 = vld [vmem:[#allocation2 + $0x344] ss:$8 sps:$4 sm:$0xff]  }
 0x3fd   :  { %4254 = vmatprep.subr.bf16.mxu1 %v6615_v1 }
 0x3fe   :  { %4255 = vmatpush1.bf16.msra.mxu1 %v6613_v38 }
 0x3ff   :  { %4256 = vmatprep.subr.bf16.mxu1 %v6618_v18 }
 0x403   :  { %3524 = vmatmul.mubr.bf16.gmra.mrb[36].mxu1 %v3199_v11  ;;  %v6616_v11 = vld [vmem:[#allocation2 + $0x350] ss:$8 sps:$4 sm:$0xff]  }
 0x404   :  { %3533 = vmatprep.mubr.bf16.mxu1 %v3202_v6  ;;  %4257 = vmatpush1.bf16.msra.mxu1 %v6616_v11  ;;  %v6625_v6 = vld [vmem:[#allocation2 + $0x380] ss:$8 sps:$4 sm:$0xff]  }
 0x405   :  { %4258 = vmatprep.subr.bf16.mxu1 %v6621_v47 }
 0x408   :  { %4259 = vmatpush1.bf16.msra.mxu1 %v6619_v50 }
 0x409   :  { %4260 = vmatprep.subr.bf16.mxu1 %v6624_v48  ;;  %v6631_v48 = vld [vmem:[#allocation2 + $0x3a0] ss:$8 sps:$4 sm:$0xff]  }
 0x40b   :  { %3534 = vmatmul.mubr.bf16.gmra.mrb[40].mxu1 %v3201_v12 }
 0x40c   :  { %3543 = vmatprep.mubr.bf16.mxu1 %v3204_v2  ;;  %4261 = vmatpush1.bf16.msra.mxu1 %v6622_v46 }
 0x40d   :  { %4262 = vmatprep.subr.bf16.mxu1 %v6627_v55  ;;  %v6636_v55 = vld [vmem:[#allocation2 + $0x3b4] ss:$8 sps:$4 sm:$0xff]  }
 0x410   :  { %4263 = vmatpush1.bf16.msra.mxu1 %v6625_v6 }
 0x411   :  { %4264 = vmatprep.subr.bf16.mxu1 %v6630_v42 }
 0x413   :  { %3544 = vmatmul.mubr.bf16.gmra.mrb[44].mxu1 %v3203_v41 }
 0x414   :  { %3553 = vmatprep.mubr.bf16.mxu1 %v3206_v43  ;;  %4265 = vmatpush1.bf16.msra.mxu1 %v6628_v9 }
 0x415   :  { %4266 = vmatprep.subr.bf16.mxu1 %v6633_v33 }
 0x418   :  { %4267 = vmatpush1.bf16.msra.mxu1 %v6631_v48 }
 0x419   :  { %4268 = vmatprep.subr.bf16.mxu1 %v6636_v55 }
 0x41b   :  { %3554 = vmatmul.mubr.bf16.gmra.mrb[48].mxu1 %v3205_v10 }
 0x41c   :  { %3563 = vmatprep.mubr.bf16.mxu1 %v3208_v3 }
 0x423   :  { %3564 = vmatmul.mubr.bf16.gmra.mrb[52].mxu1 %v3207_v51 }
 0x48e   :  { %v9798_v61 = vpop.f32.mrb[0].mxu1 }
 0x48f   :  { %v9800_v34 = vpop.f32.mrb[1].mxu1  ;;  %v3642_v56 = vmul.f32 %v9798_v61, %v9798_v61 }
 0x490   :  { %v9802_v13 = vpop.f32.mrb[2].mxu1  ;;  %v3643_v12 = vmul.f32 %v9800_v34, %v9800_v34 }
 0x491   :  { %v3574_v53 = vadd.f32 %v9802_v13, %v9798_v61  ;;  %v3644_v15 = vmul.f32 %v9802_v13, %v9802_v13  ;;  %v9810_v4 = vpop.f32.mrb[3].mxu1 }
 0x492   :  { %v3607_v32 = vadd.f32 %v9810_v4, %v9800_v34  ;;  %v3645_v59 = vmul.f32 %v9810_v4, %v9810_v4 }
 0x493   :  { %v3698_v20 = vadd.f32 %v3644_v15, %v3642_v56  ;;  %v6634_v15 = vld [vmem:[#allocation2 + $0x3b0] ss:$8 sps:$4 sm:$0xff]  }
 0x494   :  { %v3731_v8 = vadd.f32 %v3645_v59, %v3643_v12  ;;  %4269 = vmatpush1.bf16.msra.mxu1 %v6634_v15 }
 0x496   :  { %v9818_v26 = vpop.f32.mrb[4].mxu1 }
 0x497   :  { %v3575_v49 = vadd.f32 %v3574_v53, %v9818_v26  ;;  %v3646_v21 = vmul.f32 %v9818_v26, %v9818_v26  ;;  %v9823_v60 = vpop.f32.mrb[5].mxu1 }
 0x498   :  { %v3608_v30 = vadd.f32 %v3607_v32, %v9823_v60  ;;  %v3647_v2 = vmul.f32 %v9823_v60, %v9823_v60  ;;  %v9828_v27 = vpop.f32.mrb[6].mxu1 }
 0x499   :  { %v3699_v57 = vadd.f32 %v3698_v20, %v3646_v21  ;;  %v3576_v28 = vadd.f32 %v3575_v49, %v9828_v27  ;;  %v3648_v63 = vmul.f32 %v9828_v27, %v9828_v27  ;;  %v9833_v62 = vpop.f32.mrb[7].mxu1  ;;  %v6639_v20 = vld [vmem:[#allocation2 + $0x3c4] ss:$8 sps:$4 sm:$0xff]  }
 0x49a   :  { %v3732_v14 = vadd.f32 %v3731_v8, %v3647_v2  ;;  %v3609_v37 = vadd.f32 %v3608_v30, %v9833_v62  ;;  %v3649_v52 = vmul.f32 %v9833_v62, %v9833_v62  ;;  %4270 = vmatprep.subr.bf16.mxu1 %v6639_v20 }
 0x49b   :  { %v3700_v41 = vadd.f32 %v3699_v57, %v3648_v63 }
 0x49c   :  { %v3733_v7 = vadd.f32 %v3732_v14, %v3649_v52  ;;  %v6637_v52 = vld [vmem:[#allocation2 + $0x3c0] ss:$8 sps:$4 sm:$0xff]  }
 0x49d   :  { %4271 = vmatpush1.bf16.msra.mxu1 %v6637_v52 }
 0x49e   :  { %v9838_v35 = vpop.f32.mrb[8].mxu1 }
 0x49f   :  { %v3577_v31 = vadd.f32 %v3576_v28, %v9838_v35  ;;  %v3650_v0 = vmul.f32 %v9838_v35, %v9838_v35  ;;  %v9843_v54 = vpop.f32.mrb[9].mxu1 }
 0x4a0   :  { %v3610_v23 = vadd.f32 %v3609_v37, %v9843_v54  ;;  %v3651_v24 = vmul.f32 %v9843_v54, %v9843_v54  ;;  %v9848_v5 = vpop.f32.mrb[10].mxu1 }
 0x4a1   :  { %v3701_v29 = vadd.f32 %v3700_v41, %v3650_v0  ;;  %v3578_v40 = vadd.f32 %v3577_v31, %v9848_v5  ;;  %v3652_v43 = vmul.f32 %v9848_v5, %v9848_v5  ;;  %v9853_v22 = vpop.f32.mrb[11].mxu1 }
 0x4a2   :  { %v3734_v17 = vadd.f32 %v3733_v7, %v3651_v24  ;;  %v3611_v19 = vadd.f32 %v3610_v23, %v9853_v22  ;;  %v3653_v16 = vmul.f32 %v9853_v22, %v9853_v22  ;;  %v6642_v7 = vld [vmem:[#allocation2 + $0x3d4] ss:$8 sps:$4 sm:$0xff]   ;;  %v6640_v23 = vld [vmem:[#allocation2 + $0x3d0] ss:$8 sps:$4 sm:$0xff]  }
 0x4a3   :  { %v3702_v10 = vadd.f32 %v3701_v29, %v3652_v43  ;;  %4272 = vmatprep.subr.bf16.mxu1 %v6642_v7  ;;  %v6645_v43 = vld [vmem:[#allocation2 + $0x3e4] ss:$8 sps:$4 sm:$0xff]  }
 0x4a4   :  { %v3735_v3 = vadd.f32 %v3734_v17, %v3653_v16  ;;  %4273 = vmatpush1.bf16.msra.mxu1 %v6640_v23 }
 0x4a5   :  { %4274 = vmatprep.subr.bf16.mxu1 %v6645_v43 }
 0x4a6   :  { %v9858_v45 = vpop.f32.mrb[12].mxu1 }
 0x4a7   :  { %v3579_v51 = vadd.f32 %v3578_v40, %v9858_v45  ;;  %v3654_v25 = vmul.f32 %v9858_v45, %v9858_v45  ;;  %v9863_v36 = vpop.f32.mrb[13].mxu1 }
 0x4a8   :  { %v3612_v44 = vadd.f32 %v3611_v19, %v9863_v36  ;;  %v3655_v39 = vmul.f32 %v9863_v36, %v9863_v36  ;;  %v9868_v58 = vpop.f32.mrb[14].mxu1 }
 0x4a9   :  { %v3703_v38 = vadd.f32 %v3702_v10, %v3654_v25  ;;  %v3580_v1 = vadd.f32 %v3579_v51, %v9868_v58  ;;  %v3656_v11 = vmul.f32 %v9868_v58, %v9868_v58  ;;  %v9873_v18 = vpop.f32.mrb[15].mxu1 }
 0x4aa   :  { %v3736_v50 = vadd.f32 %v3735_v3, %v3655_v39  ;;  %v3613_v47 = vadd.f32 %v3612_v44, %v9873_v18  ;;  %v3657_v46 = vmul.f32 %v9873_v18, %v9873_v18  ;;  %v6643_v39 = vld [vmem:[#allocation2 + $0x3e0] ss:$8 sps:$4 sm:$0xff]  }
 0x4ab   :  { %v3704_v6 = vadd.f32 %v3703_v38, %v3656_v11  ;;  %v6648_v38 = vld [vmem:[#allocation2 + $0x3f4] ss:$8 sps:$4 sm:$0xff]   ;;  %4275 = vmatpush1.bf16.msra.mxu1 %v6643_v39 }
 0x4ac   :  { %v3737_v56 = vadd.f32 %v3736_v50, %v3657_v46  ;;  %v6646_v50 = vld [vmem:[#allocation2 + $0x3f0] ss:$8 sps:$4 sm:$0xff]   ;;  %4276 = vmatprep.subr.bf16.mxu1 %v6648_v38 }
 0x4ae   :  { %v9878_v53 = vpop.f32.mrb[16].mxu1 }
 0x4af   :  { %v3581_v12 = vadd.f32 %v3580_v1, %v9878_v53  ;;  %v3658_v32 = vmul.f32 %v9878_v53, %v9878_v53  ;;  %v9883_v59 = vpop.f32.mrb[17].mxu1  ;;  %4277 = vmatpush1.bf16.msra.mxu1 %v6646_v50 }
 0x4b0   :  { %v3614_v8 = vadd.f32 %v3613_v47, %v9883_v59  ;;  %v3659_v49 = vmul.f32 %v9883_v59, %v9883_v59  ;;  %v9888_v21 = vpop.f32.mrb[18].mxu1 }
 0x4b1   :  { %v3705_v30 = vadd.f32 %v3704_v6, %v3658_v32  ;;  %v3582_v2 = vadd.f32 %v3581_v12, %v9888_v21  ;;  %v3660_v57 = vmul.f32 %v9888_v21, %v9888_v21  ;;  %v9893_v28 = vpop.f32.mrb[19].mxu1 }
 0x4b2   :  { %v3738_v63 = vadd.f32 %v3737_v56, %v3659_v49  ;;  %v3615_v14 = vadd.f32 %v3614_v8, %v9893_v28  ;;  %v3661_v37 = vmul.f32 %v9893_v28, %v9893_v28 }
 0x4b3   :  { %v3706_v41 = vadd.f32 %v3705_v30, %v3660_v57 }
 0x4b4   :  { %v3739_v31 = vadd.f32 %v3738_v63, %v3661_v37 }
 0x4b6   :  { %v9898_v0 = vpop.f32.mrb[20].mxu1 }
 0x4b7   :  { %v3583_v24 = vadd.f32 %v3582_v2, %v9898_v0  ;;  %v3662_v29 = vmul.f32 %v9898_v0, %v9898_v0  ;;  %v9903_v40 = vpop.f32.mrb[21].mxu1 }
 0x4b8   :  { %v3616_v17 = vadd.f32 %v3615_v14, %v9903_v40  ;;  %v3663_v19 = vmul.f32 %v9903_v40, %v9903_v40  ;;  %v9908_v16 = vpop.f32.mrb[22].mxu1 }
 0x4b9   :  { %v3707_v10 = vadd.f32 %v3706_v41, %v3662_v29  ;;  %v3584_v3 = vadd.f32 %v3583_v24, %v9908_v16  ;;  %v3664_v51 = vmul.f32 %v9908_v16, %v9908_v16  ;;  %v9913_v25 = vpop.f32.mrb[23].mxu1 }
 0x4ba   :  { %v3740_v9 = vadd.f32 %v3739_v31, %v3663_v19  ;;  %v3617_v42 = vadd.f32 %v3616_v17, %v9913_v25  ;;  %v3665_v44 = vmul.f32 %v9913_v25, %v9913_v25 }
 0x4bb   :  { %v3708_v33 = vadd.f32 %v3707_v10, %v3664_v51 }
 0x4bc   :  { %v3741_v1 = vadd.f32 %v3740_v9, %v3665_v44 }
 0x4be   :  { %v9918_v11 = vpop.f32.mrb[24].mxu1 }
 0x4bf   :  { %v3585_v47 = vadd.f32 %v3584_v3, %v9918_v11  ;;  %v3666_v46 = vmul.f32 %v9918_v11, %v9918_v11  ;;  %v9923_v48 = vpop.f32.mrb[25].mxu1 }
 0x4c0   :  { %v3618_v6 = vadd.f32 %v3617_v42, %v9923_v48  ;;  %v3667_v55 = vmul.f32 %v9923_v48, %v9923_v48  ;;  %v9928_v56 = vpop.f32.mrb[26].mxu1 }
 0x4c1   :  { %v3709_v15 = vadd.f32 %v3708_v33, %v3666_v46  ;;  %v3586_v12 = vadd.f32 %v3585_v47, %v9928_v56  ;;  %v3668_v32 = vmul.f32 %v9928_v56, %v9928_v56  ;;  %v9933_v20 = vpop.f32.mrb[27].mxu1 }
 0x4c2   :  { %v3742_v8 = vadd.f32 %v3741_v1, %v3667_v55  ;;  %v3619_v49 = vadd.f32 %v3618_v6, %v9933_v20  ;;  %v3669_v30 = vmul.f32 %v9933_v20, %v9933_v20 }
 0x4c3   :  { %v3710_v2 = vadd.f32 %v3709_v15, %v3668_v32 }
 0x4c4   :  { %v3743_v57 = vadd.f32 %v3742_v8, %v3669_v30 }
 0x4c6   :  { %v9938_v63 = vpop.f32.mrb[28].mxu1 }
 0x4c7   :  { %v3587_v14 = vadd.f32 %v3586_v12, %v9938_v63  ;;  %v3670_v37 = vmul.f32 %v9938_v63, %v9938_v63  ;;  %v9943_v52 = vpop.f32.mrb[29].mxu1 }
 0x4c8   :  { %v3620_v41 = vadd.f32 %v3619_v49, %v9943_v52  ;;  %v3671_v7 = vmul.f32 %v9943_v52, %v9943_v52  ;;  %v9948_v31 = vpop.f32.mrb[30].mxu1 }
 0x4c9   :  { %v3711_v23 = vadd.f32 %v3710_v2, %v3670_v37  ;;  %v3588_v24 = vadd.f32 %v3587_v14, %v9948_v31  ;;  %v3672_v29 = vmul.f32 %v9948_v31, %v9948_v31  ;;  %v9953_v43 = vpop.f32.mrb[31].mxu1 }
 0x4ca   :  { %v3744_v17 = vadd.f32 %v3743_v57, %v3671_v7  ;;  %v3621_v19 = vadd.f32 %v3620_v41, %v9953_v43  ;;  %v3673_v10 = vmul.f32 %v9953_v43, %v9953_v43 }
 0x4cb   :  { %v3712_v3 = vadd.f32 %v3711_v23, %v3672_v29 }
 0x4cc   :  { %v3745_v51 = vadd.f32 %v3744_v17, %v3673_v10 }
 0x4ce   :  { %v9958_v9 = vpop.f32.mrb[32].mxu1 }
 0x4cf   :  { %v3589_v42 = vadd.f32 %v3588_v24, %v9958_v9  ;;  %v3674_v44 = vmul.f32 %v9958_v9, %v9958_v9  ;;  %v9963_v39 = vpop.f32.mrb[33].mxu1 }
 0x4d0   :  { %v3622_v33 = vadd.f32 %v3621_v19, %v9963_v39  ;;  %v3675_v38 = vmul.f32 %v9963_v39, %v9963_v39  ;;  %v9968_v1 = vpop.f32.mrb[34].mxu1 }
 0x4d1   :  { %12047 = vst [vmem:[#allocation97_spill] sm:$0xff] %v9968_v1  ;;  %v3713_v50 = vadd.f32 %v3712_v3, %v3674_v44  ;;  %v3590_v47 = vadd.f32 %v3589_v42, %v9968_v1  ;;  %v3676_v46 = vmul.f32 %v9968_v1, %v9968_v1  ;;  %v9973_v6 = vpop.f32.mrb[35].mxu1 }
 0x4d2   :  { %v3746_v55 = vadd.f32 %v3745_v51, %v3675_v38  ;;  %v3623_v15 = vadd.f32 %v3622_v33, %v9973_v6  ;;  %v3677_v12 = vmul.f32 %v9973_v6, %v9973_v6 }
 0x4d3   :  { %v3714_v32 = vadd.f32 %v3713_v50, %v3676_v46 }
 0x4d4   :  { %v3747_v8 = vadd.f32 %v3746_v55, %v3677_v12 }
 0x4d6   :  { %v9978_v49 = vpop.f32.mrb[36].mxu1 }
 0x4d7   :  { %12048 = vst [vmem:[#allocation50_spill] sm:$0xff] %v9978_v49  ;;  %v3591_v30 = vadd.f32 %v3590_v47, %v9978_v49  ;;  %v3678_v2 = vmul.f32 %v9978_v49, %v9978_v49  ;;  %v9983_v57 = vpop.f32.mrb[37].mxu1 }
 0x4d8   :  { %12049 = vst [vmem:[#allocation23_spill] sm:$0xff] %v9983_v57  ;;  %v3624_v14 = vadd.f32 %v3623_v15, %v9983_v57  ;;  %v3679_v37 = vmul.f32 %v9983_v57, %v9983_v57  ;;  %v9988_v41 = vpop.f32.mrb[38].mxu1 }
 0x4d9   :  { %12050 = vst [vmem:[#allocation74_spill] sm:$0xff] %v9988_v41  ;;  %v3715_v7 = vadd.f32 %v3714_v32, %v3678_v2  ;;  %v3592_v23 = vadd.f32 %v3591_v30, %v9988_v41  ;;  %v3680_v24 = vmul.f32 %v9988_v41, %v9988_v41  ;;  %v9993_v29 = vpop.f32.mrb[39].mxu1 }
 0x4da   :  { %12051 = vst [vmem:[#allocation22_spill] sm:$0xff] %v9993_v29  ;;  %v3748_v17 = vadd.f32 %v3747_v8, %v3679_v37  ;;  %v3625_v19 = vadd.f32 %v3624_v14, %v9993_v29  ;;  %v3681_v10 = vmul.f32 %v9993_v29, %v9993_v29 }
 0x4db   :  { %v3716_v3 = vadd.f32 %v3715_v7, %v3680_v24 }
 0x4dc   :  { %v3749_v51 = vadd.f32 %v3748_v17, %v3681_v10 }
 0x4de   :  { %v9998_v42 = vpop.f32.mrb[40].mxu1 }
 0x4df   :  { %12052 = vst [vmem:[#allocation73_spill] sm:$0xff] %v9998_v42  ;;  %v3593_v44 = vadd.f32 %v3592_v23, %v9998_v42  ;;  %v3682_v33 = vmul.f32 %v9998_v42, %v9998_v42  ;;  %v10003_v38 = vpop.f32.mrb[41].mxu1 }
 0x4e0   :  { %12053 = vst [vmem:[#allocation32_spill] sm:$0xff] %v10003_v38  ;;  %v3626_v50 = vadd.f32 %v3625_v19, %v10003_v38  ;;  %v3683_v47 = vmul.f32 %v10003_v38, %v10003_v38  ;;  %v10008_v46 = vpop.f32.mrb[42].mxu1 }
 0x4e1   :  { %12054 = vst [vmem:[#allocation36_spill] sm:$0xff] %v10008_v46  ;;  %v3717_v55 = vadd.f32 %v3716_v3, %v3682_v33  ;;  %v3594_v15 = vadd.f32 %v3593_v44, %v10008_v46  ;;  %v3684_v12 = vmul.f32 %v10008_v46, %v10008_v46  ;;  %v10013_v32 = vpop.f32.mrb[43].mxu1 }
 0x4e2   :  { %12055 = vst [vmem:[#allocation31_spill] sm:$0xff] %v10013_v32  ;;  %v3750_v8 = vadd.f32 %v3749_v51, %v3683_v47  ;;  %v3627_v30 = vadd.f32 %v3626_v50, %v10013_v32  ;;  %v3685_v2 = vmul.f32 %v10013_v32, %v10013_v32 }
 0x4e3   :  { %v3718_v14 = vadd.f32 %v3717_v55, %v3684_v12 }
 0x4e4   :  { %v3751_v37 = vadd.f32 %v3750_v8, %v3685_v2 }
 0x4e6   :  { %v10018_v7 = vpop.f32.mrb[44].mxu1 }
 0x4e7   :  { %12056 = vst [vmem:[#allocation35_spill] sm:$0xff] %v10018_v7  ;;  %v3595_v23 = vadd.f32 %v3594_v15, %v10018_v7  ;;  %v3686_v24 = vmul.f32 %v10018_v7, %v10018_v7  ;;  %v10023_v17 = vpop.f32.mrb[45].mxu1 }
 0x4e8   :  { %12057 = vst [vmem:[#allocation86_spill] sm:$0xff] %v10023_v17  ;;  %v3628_v19 = vadd.f32 %v3627_v30, %v10023_v17  ;;  %v3687_v10 = vmul.f32 %v10023_v17, %v10023_v17  ;;  %v10028_v3 = vpop.f32.mrb[46].mxu1 }
 0x4e9   :  { %12058 = vst [vmem:[#allocation43_spill] sm:$0xff] %v10028_v3  ;;  %v3719_v51 = vadd.f32 %v3718_v14, %v3686_v24  ;;  %v3596_v44 = vadd.f32 %v3595_v23, %v10028_v3  ;;  %v3688_v33 = vmul.f32 %v10028_v3, %v10028_v3  ;;  %v10033_v50 = vpop.f32.mrb[47].mxu1 }
 0x4ea   :  { %12059 = vst [vmem:[#allocation85_spill] sm:$0xff] %v10033_v50  ;;  %v3752_v47 = vadd.f32 %v3751_v37, %v3687_v10  ;;  %v3629_v55 = vadd.f32 %v3628_v19, %v10033_v50  ;;  %v3689_v15 = vmul.f32 %v10033_v50, %v10033_v50 }
 0x4eb   :  { %v3720_v12 = vadd.f32 %v3719_v51, %v3688_v33 }
 0x4ec   :  { %v3753_v8 = vadd.f32 %v3752_v47, %v3689_v15 }
 0x4ee   :  { %v10038_v30 = vpop.f32.mrb[48].mxu1 }
 0x4ef   :  { %12060 = vst [vmem:[#allocation42_spill] sm:$0xff] %v10038_v30  ;;  %v3597_v2 = vadd.f32 %v3596_v44, %v10038_v30  ;;  %v3690_v14 = vmul.f32 %v10038_v30, %v10038_v30  ;;  %v10043_v23 = vpop.f32.mrb[49].mxu1 }
 0x4f0   :  { %12061 = vst [vmem:[#allocation46_spill] sm:$0xff] %v10043_v23  ;;  %v3630_v24 = vadd.f32 %v3629_v55, %v10043_v23  ;;  %v3691_v37 = vmul.f32 %v10043_v23, %v10043_v23  ;;  %v10048_v19 = vpop.f32.mrb[50].mxu1 }
 0x4f1   :  { %12062 = vst [vmem:[#allocation45_spill] sm:$0xff] %v10048_v19  ;;  %v3721_v10 = vadd.f32 %v3720_v12, %v3690_v14  ;;  %v3598_v51 = vadd.f32 %v3597_v2, %v10048_v19  ;;  %v3692_v33 = vmul.f32 %v10048_v19, %v10048_v19  ;;  %v10053_v47 = vpop.f32.mrb[51].mxu1 }
 0x4f2   :  { %12063 = vst [vmem:[#allocation89_spill] sm:$0xff] %v10053_v47  ;;  %v3754_v44 = vadd.f32 %v3753_v8, %v3691_v37  ;;  %v3631_v15 = vadd.f32 %v3630_v24, %v10053_v47  ;;  %v3693_v30 = vmul.f32 %v10053_v47, %v10053_v47 }
 0x4f3   :  { %v3722_v55 = vadd.f32 %v3721_v10, %v3692_v33 }
 0x4f4   :  { %v3755_v3 = vadd.f32 %v3754_v44, %v3693_v30 }
 0x4f6   :  { %v10058_v7 = vpop.f32.mrb[52].mxu1 }
 0x4f7   :  { %12064 = vst [vmem:[#allocation90_spill] sm:$0xff] %v10058_v7  ;;  %v3599_v23 = vadd.f32 %v3598_v51, %v10058_v7  ;;  %v3694_v12 = vmul.f32 %v10058_v7, %v10058_v7  ;;  %v10063_v2 = vpop.f32.mrb[53].mxu1 }
 0x4f8   :  { %12065 = vst [vmem:[#allocation52_spill] sm:$0xff] %v10063_v2  ;;  %v3632_v14 = vadd.f32 %v3631_v15, %v10063_v2  ;;  %v3695_v8 = vmul.f32 %v10063_v2, %v10063_v2  ;;  %v3569_v24 = vpop.f32.mrb[54].mxu1 }
 0x4f9   :  { %v3723_v37 = vadd.f32 %v3722_v55, %v3694_v12  ;;  %v3600_v19 = vadd.f32 %v3599_v23, %v3569_v24  ;;  %v3696_v47 = vmul.f32 %v3569_v24, %v3569_v24  ;;  %v3571_v10 = vpop.f32.mrb[55].mxu1 }
 0x4fa   :  { %v3756_v30 = vadd.f32 %v3755_v3, %v3695_v8  ;;  %v3633_v33 = vadd.f32 %v3632_v14, %v3571_v10  ;;  %v3697_v44 = vmul.f32 %v3571_v10, %v3571_v10 }
 0x4fb   :  { %v3601_v50 = vrot.slane %v3600_v19, 4  ;;  %v3724_v51 = vadd.f32 %v3723_v37, %v3696_v47 }
 0x4fc   :  { %v3634_v17 = vrot.slane %v3633_v33, 4  ;;  %v3757_v46 = vadd.f32 %v3756_v30, %v3697_v44 }
 0x4fd   :  { %v3602_v7 = vadd.f32 %v3601_v50, %v3600_v19  ;;  %v3725_v42 = vrot.slane %v3724_v51, 4 }
 0x4fe   :  { %v3635_v32 = vadd.f32 %v3634_v17, %v3633_v33  ;;  %v3758_v38 = vrot.slane %v3757_v46, 4 }
 0x4ff   :  { %v3603_v15 = vrot.slane %v3602_v7, 2  ;;  %v3726_v41 = vadd.f32 %v3725_v42, %v3724_v51 }
 0x500   :  { %v3636_v49 = vrot.slane %v3635_v32, 2  ;;  %v3759_v2 = vadd.f32 %v3758_v38, %v3757_v46 }
 0x501   :  { %v3604_v29 = vadd.f32 %v3603_v15, %v3602_v7  ;;  %v3727_v55 = vrot.slane %v3726_v41, 2 }
 0x502   :  { %v3637_v23 = vadd.f32 %v3636_v49, %v3635_v32  ;;  %v3760_v12 = vrot.slane %v3759_v2, 2 }
 0x503   :  { %v3605_v57 = vrot.slane %v3604_v29, 1  ;;  %v3728_v3 = vadd.f32 %v3727_v55, %v3726_v41  ;;  %v12066_v41 = vld [vmem:[#allocation10_spill] sm:$0xff]  ;;  %v6744_v55 = vld [vmem:[%s11400_s1 + $0x8] sm:$0xff] }
 0x504   :  { %v3638_v14 = vrot.slane %v3637_v23, 1  ;;  %v3761_v8 = vadd.f32 %v3760_v12, %v3759_v2  ;;  %v3788_v2 = vsub.s32 7, %v12066_v41 }
 0x505   :  { %v3606_v1 = vadd.f32 %v3605_v57, %v3604_v29  ;;  %v3729_v47 = vrot.slane %v3728_v3, 1 }
 0x506   :  { %v3639_v37 = vadd.f32 %v3638_v14, %v3637_v23  ;;  %v3762_v30 = vrot.slane %v3761_v8, 1  ;;  %v37_v14 = vld [vmem:[%s11400_s1 + $0x20] sm:$0xff] }
 0x507   :  { %v3640_v50 = vmul.f32 0.004464286, %v3606_v1  ;;  %v3730_v19 = vadd.f32 %v3729_v47, %v3728_v3  ;;  %v6743_v1 = vld [vmem:[%s11400_s1] sm:$0xff] }
 0x508   :  { %v3641_v17 = vmul.f32 0.004464286, %v3639_v37  ;;  %v3763_v33 = vadd.f32 %v3762_v30, %v3761_v8 }
 0x509   :  { %v3764_v44 = vmul.f32 0.004464286, %v3730_v19  ;;  %v3766_v42 = vmul.f32 %v3640_v50, %v3640_v50  ;;  %v38_v19 = vld [vmem:[%s11400_s1 + $0x28] sm:$0xff] }
 0x50a   :  { %v3765_v51 = vmul.f32 0.004464286, %v3763_v33  ;;  %v3767_v38 = vmul.f32 %v3641_v17, %v3641_v17 }
 0x50b   :  { %v3768_v46 = vsub.f32 %v3764_v44, %v3766_v42 }
 0x50c   :  { %v3769_v7 = vsub.f32 %v3765_v51, %v3767_v38 }
 0x50d   :  { %v3770_v49 = vadd.f32 0.8, %v3768_v46 }
 0x50e   :  { %v3771_v32 = vadd.f32 0.8, %v3769_v7  ;;  %v12067_v7 = vld [vmem:[#allocation11_spill] sm:$0xff] }
 0x50f   :  { %6725 = vrsqrt.f32 %v3770_v49 }
 0x510   :  { %6727 = vrsqrt.f32 %v3771_v32 }
 0x519   :  { %v6726_v57 = vpop.eup %6725 }
 0x51a   :  { %v6728_v29 = vpop.eup %6727  ;;  %v3774_v15 = vmul.f32 %v6743_v1, %v6726_v57 }
 0x51b   :  { %v3775_v23 = vmul.f32 %v6744_v55, %v6728_v29 }
 0x51c   :  { %v3776_v12 = vmul.f32 %v3774_v15, %v3640_v50  ;;  %v10075_v3 = vrot.slane %v3774_v15, %v3788_v2 }
 0x51d   :  { %v3777_v8 = vmul.f32 %v3775_v23, %v3641_v17  ;;  %v10080_v47 = vrot.slane %v3775_v23, %v3788_v2 }
 0x51e   :  { %v3780_v37 = vrot.slane %v3776_v12, 7  ;;  %v3848_v30 = vmul.f32 %v10075_v3, %v3569_v24  ;;  %v3794_v33 = vmul.f32 %v10075_v3, %v9798_v61  ;;  %v3796_v50 = vmul.f32 %v10075_v3, %v9802_v13 }
 0x51f   :  { %v3781_v44 = vrot.slane %v3777_v8, 7  ;;  %v3849_v42 = vmul.f32 %v10080_v47, %v3571_v10  ;;  %v3795_v17 = vmul.f32 %v10080_v47, %v9800_v34  ;;  %v3797_v51 = vmul.f32 %v10080_v47, %v9810_v4 }
 0x520   :  { %v3784_v24 = vsub.f32 %v37_v14, %v3780_v37  ;;  %v3799_v38 = vmul.f32 %v10080_v47, %v9823_v60  ;;  %v3801_v46 = vmul.f32 %v10080_v47, %v9833_v62  ;;  %v3798_v61 = vmul.f32 %v10075_v3, %v9818_v26 }
 0x521   :  { %v3785_v13 = vsub.f32 %v38_v19, %v3781_v44  ;;  %v3800_v10 = vmul.f32 %v10075_v3, %v9828_v27  ;;  %v3803_v34 = vmul.f32 %v10080_v47, %v9843_v54  ;;  %v3805_v4 = vmul.f32 %v10080_v47, %v9853_v22 }
 0x522   :  { %v10108_v49 = vrot.slane %v3784_v24, %v12067_v7  ;;  %v3802_v60 = vmul.f32 %v10075_v3, %v9838_v35  ;;  %v3804_v62 = vmul.f32 %v10075_v3, %v9848_v5  ;;  %v3807_v26 = vmul.f32 %v10080_v47, %v9863_v36 }
 0x523   :  { %v10117_v27 = vrot.slane %v3785_v13, %v12067_v7  ;;  %v3809_v54 = vmul.f32 %v10080_v47, %v9873_v18  ;;  %v3806_v22 = vmul.f32 %v10075_v3, %v9858_v45  ;;  %v3808_v32 = vmul.f32 %v10075_v3, %v9868_v58 }
 0x524   :  { %v10126_v35 = vadd.f32 %v10108_v49, %v3848_v30  ;;  %v3858_v5 = vadd.f32 %v10108_v49, %v3794_v33  ;;  %v3860_v41 = vadd.f32 %v10108_v49, %v3796_v50  ;;  %v3862_v36 = vadd.f32 %v10108_v49, %v3798_v61 }
 0x525   :  { %v10132_v2 = vadd.f32 %v10117_v27, %v3849_v42  ;;  %v3859_v18 = vadd.f32 %v10117_v27, %v3795_v17  ;;  %v3861_v57 = vadd.f32 %v10117_v27, %v3797_v51  ;;  %v3863_v45 = vadd.f32 %v10117_v27, %v3799_v38 }
 0x526   :  { %v3914_v29 = vmul.f32 0.2, %v3858_v5  ;;  %v3916_v58 = vmul.f32 0.2, %v3860_v41  ;;  %v3865_v1 = vadd.f32 %v10117_v27, %v3801_v46  ;;  %v3864_v12 = vadd.f32 %v10108_v49, %v3800_v10 }
 0x527   :  { %v10139_v15 = vmul.f32 0.2, %v10132_v2  ;;  %v3915_v55 = vmul.f32 0.2, %v3859_v18  ;;  %v3917_v23 = vmul.f32 0.2, %v3861_v57  ;;  %v3867_v24 = vadd.f32 %v10117_v27, %v3803_v34 }
 0x528   :  { %v3970_v14 = vmax.f32 %v3858_v5, %v3914_v29  ;;  %v3972_v8 = vmax.f32 %v3860_v41, %v3916_v58  ;;  %v3919_v37 = vmul.f32 0.2, %v3863_v45  ;;  %v3921_v30 = vmul.f32 0.2, %v3865_v1 }
 0x529   :  { %v3971_v19 = vmax.f32 %v3859_v18, %v3915_v55  ;;  %v3973_v33 = vmax.f32 %v3861_v57, %v3917_v23  ;;  %v3918_v50 = vmul.f32 0.2, %v3862_v36  ;;  %v3920_v44 = vmul.f32 0.2, %v3864_v12 }
 0x52a   :  { %v4026_v42 = vpack.c.bf16 %v3972_v8, %v3970_v14  ;;  %v3975_v17 = vmax.f32 %v3863_v45, %v3919_v37  ;;  %v3977_v51 = vmax.f32 %v3865_v1, %v3921_v30  ;;  %v3869_v13 = vadd.f32 %v10117_v27, %v3805_v4 }
 0x52b   :  { %v4027_v38 = vpack.c.bf16 %v3973_v33, %v3971_v19  ;;  %v3974_v46 = vmax.f32 %v3862_v36, %v3918_v50  ;;  %v3976_v61 = vmax.f32 %v3864_v12, %v3920_v44  ;;  %v3923_v10 = vmul.f32 0.2, %v3867_v24 }
 0x52c   :  { %v4029_v7 = vpack.c.bf16 %v3977_v51, %v3975_v17  ;;  %v3866_v5 = vadd.f32 %v10108_v49, %v3802_v60  ;;  %v3868_v41 = vadd.f32 %v10108_v49, %v3804_v62  ;;  %v3925_v57 = vmul.f32 0.2, %v3869_v13 }
 0x52d   :  { %4278 = vmatprep.mubr.bf16.mxu1 %v4027_v38  ;;  %v4028_v18 = vpack.c.bf16 %v3976_v61, %v3974_v46  ;;  %v3871_v29 = vadd.f32 %v10117_v27, %v3807_v26  ;;  %v3873_v45 = vadd.f32 %v10117_v27, %v3809_v54  ;;  %v3979_v34 = vmax.f32 %v3867_v24, %v3923_v10 }
 0x52e   :  { %4279 = vmatmul.mubr.bf16.vlgmr.msra.gmra.mrb[56].mxu1 %v4026_v42  ;;  %v3922_v58 = vmul.f32 0.2, %v3866_v5  ;;  %v3924_v36 = vmul.f32 0.2, %v3868_v41  ;;  %v3870_v1 = vadd.f32 %v10108_v49, %v3806_v22  ;;  %v3981_v4 = vmax.f32 %v3869_v13, %v3925_v57 }
 0x52f   :  { %4288 = vmatprep.mubr.bf16.mxu1 %v4029_v7  ;;  %v3927_v55 = vmul.f32 0.2, %v3871_v29  ;;  %v3929_v23 = vmul.f32 0.2, %v3873_v45  ;;  %v3872_v60 = vadd.f32 %v10108_v49, %v3808_v32  ;;  %v3811_v26 = vmul.f32 %v10080_v47, %v9883_v59 }
 0x530   :  { %v3978_v62 = vmax.f32 %v3866_v5, %v3922_v58  ;;  %v3980_v12 = vmax.f32 %v3868_v41, %v3924_v36  ;;  %v3926_v14 = vmul.f32 0.2, %v3870_v1  ;;  %v4031_v8 = vpack.c.bf16 %v3981_v4, %v3979_v34 }
 0x531   :  { %v3983_v54 = vmax.f32 %v3871_v29, %v3927_v55  ;;  %v3985_v37 = vmax.f32 %v3873_v45, %v3929_v23  ;;  %v3928_v30 = vmul.f32 0.2, %v3872_v60  ;;  %v3813_v22 = vmul.f32 %v10080_v47, %v9893_v28 }
 0x532   :  { %v4030_v19 = vpack.c.bf16 %v3980_v12, %v3978_v62  ;;  %v3982_v33 = vmax.f32 %v3870_v1, %v3926_v14  ;;  %v3875_v50 = vadd.f32 %v10117_v27, %v3811_v26  ;;  %v3810_v32 = vmul.f32 %v10075_v3, %v9878_v53 }
 0x533   :  { %v4033_v44 = vpack.c.bf16 %v3985_v37, %v3983_v54  ;;  %v3984_v42 = vmax.f32 %v3872_v60, %v3928_v30  ;;  %v3812_v17 = vmul.f32 %v10075_v3, %v9888_v21  ;;  %v3877_v59 = vadd.f32 %v10117_v27, %v3813_v22 }
 0x534   :  { %v3931_v51 = vmul.f32 0.2, %v3875_v50  ;;  %v3815_v24 = vmul.f32 %v10080_v47, %v9903_v40  ;;  %v3817_v38 = vmul.f32 %v10080_v47, %v9913_v25  ;;  %v3874_v46 = vadd.f32 %v10108_v49, %v3810_v32 }
 0x535   :  { %v10164_v28 = vpack.c.bf16 %v3984_v42, %v3982_v33  ;;  %v3876_v61 = vadd.f32 %v10108_v49, %v3812_v17  ;;  %v3814_v53 = vmul.f32 %v10075_v3, %v9898_v0  ;;  %v3933_v21 = vmul.f32 0.2, %v3877_v59 }
 0x536   :  { %4289 = vmatmul.mubr.bf16.gmra.mrb[60].mxu1 %v4028_v18  ;;  %v3987_v13 = vmax.f32 %v3875_v50, %v3931_v51  ;;  %v3879_v7 = vadd.f32 %v10117_v27, %v3815_v24  ;;  %v3881_v10 = vadd.f32 %v10117_v27, %v3817_v38  ;;  %v3930_v40 = vmul.f32 0.2, %v3874_v46 }
 0x537   :  { %4298 = vmatprep.mubr.bf16.mxu1 %v4031_v8  ;;  %v3932_v5 = vmul.f32 0.2, %v3876_v61  ;;  %v3816_v25 = vmul.f32 %v10075_v3, %v9908_v16  ;;  %v3878_v41 = vadd.f32 %v10108_v49, %v3814_v53  ;;  %v3989_v57 = vmax.f32 %v3877_v59, %v3933_v21 }
 0x538   :  { %v3935_v29 = vmul.f32 0.2, %v3879_v7  ;;  %v3937_v45 = vmul.f32 0.2, %v3881_v10  ;;  %v3819_v0 = vmul.f32 %v10080_v47, %v9923_v48  ;;  %v3986_v18 = vmax.f32 %v3874_v46, %v3930_v40 }
 0x539   :  { %v3988_v34 = vmax.f32 %v3876_v61, %v3932_v5  ;;  %v3880_v58 = vadd.f32 %v10108_v49, %v3816_v25  ;;  %v3934_v36 = vmul.f32 0.2, %v3878_v41  ;;  %v4035_v1 = vpack.c.bf16 %v3989_v57, %v3987_v13 }
 0x53a   :  { %v3991_v4 = vmax.f32 %v3879_v7, %v3935_v29  ;;  %v3993_v55 = vmax.f32 %v3881_v10, %v3937_v45  ;;  %v3821_v23 = vmul.f32 %v10080_v47, %v9933_v20  ;;  %v3883_v12 = vadd.f32 %v10117_v27, %v3819_v0  ;;  %v12068_v29 = vld [vmem:[#allocation97_spill] sm:$0xff] }
 0x53b   :  { %v10180_v16 = vpack.c.bf16 %v3988_v34, %v3986_v18  ;;  %v3936_v60 = vmul.f32 0.2, %v3880_v58  ;;  %v3990_v62 = vmax.f32 %v3878_v41, %v3934_v36  ;;  %v3818_v26 = vmul.f32 %v10075_v3, %v9918_v11  ;;  %v12069_v34 = vld [vmem:[#allocation23_spill] sm:$0xff] }
 0x53c   :  { %v10183_v14 = vpack.c.bf16 %v3993_v55, %v3991_v4  ;;  %v3885_v48 = vadd.f32 %v10117_v27, %v3821_v23  ;;  %v3820_v8 = vmul.f32 %v10075_v3, %v9928_v56  ;;  %v3939_v37 = vmul.f32 0.2, %v3883_v12  ;;  %v12070_v4 = vld [vmem:[#allocation22_spill] sm:$0xff] }
 0x53d   :  { %v3992_v54 = vmax.f32 %v3880_v58, %v3936_v60  ;;  %v3823_v20 = vmul.f32 %v10080_v47, %v9943_v52  ;;  %v3825_v30 = vmul.f32 %v10080_v47, %v9953_v43  ;;  %v3882_v22 = vadd.f32 %v10108_v49, %v3818_v26  ;;  %v12071_v23 = vld [vmem:[#allocation50_spill] sm:$0xff] }
 0x53e   :  { %4299 = vmatmul.mubr.bf16.gmra.mrb[64].mxu1 %v4030_v19  ;;  %v3941_v33 = vmul.f32 0.2, %v3885_v48  ;;  %v3884_v50 = vadd.f32 %v10108_v49, %v3820_v8  ;;  %v3822_v11 = vmul.f32 %v10075_v3, %v9938_v63  ;;  %v3995_v56 = vmax.f32 %v3883_v12, %v3939_v37 }
 0x53f   :  { %4308 = vmatprep.mubr.bf16.mxu1 %v4033_v44  ;;  %v10198_v42 = vpack.c.bf16 %v3992_v54, %v3990_v62  ;;  %v3887_v32 = vadd.f32 %v10117_v27, %v3823_v20  ;;  %v3889_v52 = vadd.f32 %v10117_v27, %v3825_v30  ;;  %v3938_v59 = vmul.f32 0.2, %v3882_v22 }
 0x540   :  { %v3997_v17 = vmax.f32 %v3885_v48, %v3941_v33  ;;  %v3940_v43 = vmul.f32 0.2, %v3884_v50  ;;  %v3824_v19 = vmul.f32 %v10075_v3, %v9948_v31  ;;  %v3886_v38 = vadd.f32 %v10108_v49, %v3822_v11 }
 0x541   :  { %v3943_v51 = vmul.f32 0.2, %v3887_v32  ;;  %v3945_v24 = vmul.f32 0.2, %v3889_v52  ;;  %v3827_v63 = vmul.f32 %v10080_v47, %v9963_v39  ;;  %v3994_v46 = vmax.f32 %v3882_v22, %v3938_v59  ;;  %v12073_v22 = vld [vmem:[#allocation32_spill] sm:$0xff] }
 0x542   :  { %v10207_v44 = vpack.c.bf16 %v3997_v17, %v3995_v56  ;;  %v3996_v61 = vmax.f32 %v3884_v50, %v3940_v43  ;;  %v3888_v53 = vadd.f32 %v10108_v49, %v3824_v19  ;;  %v3942_v7 = vmul.f32 0.2, %v3886_v38  ;;  %v12074_v43 = vld [vmem:[#allocation31_spill] sm:$0xff] }
 0x543   :  { %v3999_v21 = vmax.f32 %v3887_v32, %v3943_v51  ;;  %v4001_v13 = vmax.f32 %v3889_v52, %v3945_v24  ;;  %v3829_v10 = vmul.f32 %v10080_v47, %v9973_v6  ;;  %v3891_v5 = vadd.f32 %v10117_v27, %v3827_v63 }
 0x544   :  { %v10212_v31 = vpack.c.bf16 %v3996_v61, %v3994_v46  ;;  %v3944_v40 = vmul.f32 0.2, %v3888_v53  ;;  %v3826_v39 = vmul.f32 %v10075_v3, %v9958_v9  ;;  %v3998_v41 = vmax.f32 %v3886_v38, %v3942_v7  ;;  %v12075_v46 = vld [vmem:[#allocation73_spill] sm:$0xff]  ;;  %v12076_v7 = vld [vmem:[#allocation36_spill] sm:$0xff] }
 0x545   :  { %v10217_v25 = vpack.c.bf16 %v4001_v13, %v3999_v21  ;;  %v3893_v57 = vadd.f32 %v10117_v27, %v3829_v10  ;;  %v3828_v45 = vmul.f32 %v10075_v3, %v12068_v29  ;;  %v3947_v6 = vmul.f32 0.2, %v3891_v5 }
 0x546   :  { %4309 = vmatmul.mubr.bf16.gmra.mrb[68].mxu1 %v10164_v28  ;;  %v4000_v0 = vmax.f32 %v3888_v53, %v3944_v40  ;;  %v3890_v18 = vadd.f32 %v10108_v49, %v3826_v39  ;;  %v3831_v58 = vmul.f32 %v10080_v47, %v12069_v34  ;;  %v3833_v55 = vmul.f32 %v10080_v47, %v12070_v4 }
 0x547   :  { %4318 = vmatprep.mubr.bf16.mxu1 %v4035_v1  ;;  %v3949_v36 = vmul.f32 0.2, %v3893_v57  ;;  %v3892_v9 = vadd.f32 %v10108_v49, %v3828_v45  ;;  %v3830_v60 = vmul.f32 %v10075_v3, %v12071_v23  ;;  %v4003_v28 = vmax.f32 %v3891_v5, %v3947_v6  ;;  %v12072_v1 = vld [vmem:[#allocation74_spill] sm:$0xff]  ;;  %v12080_v23 = vld [vmem:[#allocation43_spill] sm:$0xff] }
 0x548   :  { %v10231_v62 = vpack.c.bf16 %v4000_v0, %v3998_v41  ;;  %v3946_v12 = vmul.f32 0.2, %v3890_v18  ;;  %v3895_v48 = vadd.f32 %v10117_v27, %v3831_v58  ;;  %v3897_v54 = vadd.f32 %v10117_v27, %v3833_v55  ;;  %v12077_v41 = vld [vmem:[#allocation86_spill] sm:$0xff]  ;;  %v12078_v0 = vld [vmem:[#allocation85_spill] sm:$0xff] }
 0x549   :  { %v4005_v26 = vmax.f32 %v3893_v57, %v3949_v36  ;;  %v3948_v8 = vmul.f32 0.2, %v3892_v9  ;;  %v3832_v37 = vmul.f32 %v10075_v3, %v12072_v1  ;;  %v3894_v33 = vadd.f32 %v10108_v49, %v3830_v60 }
 0x54a   :  { %v4002_v20 = vmax.f32 %v3890_v18, %v3946_v12  ;;  %v3951_v30 = vmul.f32 0.2, %v3895_v48  ;;  %v3835_v50 = vmul.f32 %v10080_v47, %v12073_v22  ;;  %v3953_v32 = vmul.f32 0.2, %v3897_v54  ;;  %v12082_v22 = vld [vmem:[#allocation89_spill] sm:$0xff] }
 0x54b   :  { %v10240_v11 = vpack.c.bf16 %v4005_v26, %v4003_v28  ;;  %v4004_v56 = vmax.f32 %v3892_v9, %v3948_v8  ;;  %v3896_v52 = vadd.f32 %v10108_v49, %v3832_v37  ;;  %v3950_v59 = vmul.f32 0.2, %v3894_v33  ;;  %v12081_v26 = vld [vmem:[#allocation46_spill] sm:$0xff] }
 0x54c   :  { %v4007_v17 = vmax.f32 %v3895_v48, %v3951_v30  ;;  %v3837_v19 = vmul.f32 %v10080_v47, %v12074_v43  ;;  %v3899_v51 = vadd.f32 %v10117_v27, %v3835_v50  ;;  %v4009_v38 = vmax.f32 %v3897_v54, %v3953_v32 }
 0x54d   :  { %v10246_v24 = vpack.c.bf16 %v4004_v56, %v4002_v20  ;;  %v3952_v63 = vmul.f32 0.2, %v3896_v52  ;;  %v3834_v61 = vmul.f32 %v10075_v3, %v12075_v46  ;;  %v4006_v53 = vmax.f32 %v3894_v33, %v3950_v59  ;;  %v12083_v59 = vld [vmem:[#allocation42_spill] sm:$0xff] }
 0x54e   :  { %4319 = vmatmul.mubr.bf16.gmra.mrb[72].mxu1 %v10180_v16  ;;  %v3901_v21 = vadd.f32 %v10117_v27, %v3837_v19  ;;  %v3955_v13 = vmul.f32 0.2, %v3899_v51  ;;  %v3836_v10 = vmul.f32 %v10075_v3, %v12076_v7  ;;  %v10255_v40 = vpack.c.bf16 %v4009_v38, %v4007_v17 }
 0x54f   :  { %4328 = vmatprep.mubr.bf16.mxu1 %v10183_v14  ;;  %v4008_v5 = vmax.f32 %v3896_v52, %v3952_v63  ;;  %v3898_v39 = vadd.f32 %v10108_v49, %v3834_v61  ;;  %v3839_v57 = vmul.f32 %v10080_v47, %v12077_v41  ;;  %v3841_v6 = vmul.f32 %v10080_v47, %v12078_v0  ;;  %v12079_v14 = vld [vmem:[#allocation35_spill] sm:$0xff]  ;;  %v12084_v63 = vld [vmem:[#allocation45_spill] sm:$0xff] }
 0x550   :  { %v3957_v29 = vmul.f32 0.2, %v3901_v21  ;;  %v4011_v45 = vmax.f32 %v3899_v51, %v3955_v13  ;;  %v3900_v16 = vadd.f32 %v10108_v49, %v3836_v10  ;;  %v3838_v36 = vmul.f32 %v10075_v3, %v12079_v14 }
 0x551   :  { %v4044_v18 = vpack.c.bf16 %v4008_v5, %v4006_v53  ;;  %v3954_v34 = vmul.f32 0.2, %v3898_v39  ;;  %v3903_v58 = vadd.f32 %v10117_v27, %v3839_v57  ;;  %v3905_v55 = vadd.f32 %v10117_v27, %v3841_v6 }
 0x552   :  { %v4013_v9 = vmax.f32 %v3901_v21, %v3957_v29  ;;  %v3956_v4 = vmul.f32 0.2, %v3900_v16  ;;  %v3840_v60 = vmul.f32 %v10075_v3, %v12080_v23  ;;  %v3902_v48 = vadd.f32 %v10108_v49, %v3838_v36  ;;  %v12086_v29 = vld [vmem:[#allocation90_spill] sm:$0xff] }
 0x553   :  { %v4010_v28 = vmax.f32 %v3898_v39, %v3954_v34  ;;  %v3959_v12 = vmul.f32 0.2, %v3903_v58  ;;  %v3843_v8 = vmul.f32 %v10080_v47, %v12081_v26  ;;  %v3961_v37 = vmul.f32 0.2, %v3905_v55  ;;  %v6670_v26 = vld [vmem:[#allocation2 + $0x470] ss:$8 sps:$4 sm:$0xff]  }
 0x554   :  { %v4047_v54 = vpack.c.bf16 %v4013_v9, %v4011_v45  ;;  %v4012_v1 = vmax.f32 %v3900_v16, %v3956_v4  ;;  %v3904_v20 = vadd.f32 %v10108_v49, %v3840_v60  ;;  %v3958_v33 = vmul.f32 0.2, %v3902_v48 }
 0x555   :  { %v4015_v30 = vmax.f32 %v3903_v58, %v3959_v12  ;;  %v3845_v50 = vmul.f32 %v10080_v47, %v12082_v22  ;;  %v3907_v56 = vadd.f32 %v10117_v27, %v3843_v8  ;;  %v4017_v52 = vmax.f32 %v3905_v55, %v3961_v37  ;;  %v6667_v12 = vld [vmem:[#allocation2 + $0x460] ss:$8 sps:$4 sm:$0xff]   ;;  %v6672_v8 = vld [vmem:[#allocation2 + $0x474] ss:$8 sps:$4 sm:$0xff]  }
 0x556   :  { %4329 = vmatmul.mubr.bf16.gmra.mrb[76].mxu1 %v10198_v42  ;;  %v4046_v32 = vpack.c.bf16 %v4012_v1, %v4010_v28  ;;  %v3960_v17 = vmul.f32 0.2, %v3904_v20  ;;  %v3842_v43 = vmul.f32 %v10075_v3, %v12083_v59  ;;  %v4014_v19 = vmax.f32 %v3902_v48, %v3958_v33  ;;  %v12085_v42 = vld [vmem:[#allocation52_spill] sm:$0xff]  ;;  %v6666_v28 = vld [vmem:[#allocation2 + $0x454] ss:$8 sps:$4 sm:$0xff]  }
 0x557   :  { %4338 = vmatprep.mubr.bf16.mxu1 %v10207_v44  ;;  %v3909_v51 = vadd.f32 %v10117_v27, %v3845_v50  ;;  %v3963_v38 = vmul.f32 0.2, %v3907_v56  ;;  %v3844_v46 = vmul.f32 %v10075_v3, %v12084_v63  ;;  %v4049_v61 = vpack.c.bf16 %v4017_v52, %v4015_v30  ;;  %v6669_v48 = vld [vmem:[#allocation2 + $0x464] ss:$8 sps:$4 sm:$0xff]  }
 0x558   :  { %v4016_v53 = vmax.f32 %v3904_v20, %v3960_v17  ;;  %v3906_v21 = vadd.f32 %v10108_v49, %v3842_v43  ;;  %v3847_v13 = vmul.f32 %v10080_v47, %v12085_v42  ;;  %v3968_v7 = vmul.f32 0.2, %v10126_v35  ;;  %v6675_v1 = vld [vmem:[#allocation2 + $0x484] ss:$8 sps:$4 sm:$0xff]  }
 0x559   :  { %v3965_v10 = vmul.f32 0.2, %v3909_v51  ;;  %v4019_v5 = vmax.f32 %v3907_v56, %v3963_v38  ;;  %v3908_v44 = vadd.f32 %v10108_v49, %v3844_v46  ;;  %v3846_v45 = vmul.f32 %v10075_v3, %v12086_v29 }
 0x55a   :  { %v4048_v39 = vpack.c.bf16 %v4016_v53, %v4014_v19  ;;  %v3962_v41 = vmul.f32 0.2, %v3906_v21  ;;  %v3911_v57 = vadd.f32 %v10117_v27, %v3847_v13  ;;  %v4025_v47 = vmax.f32 %v10132_v2, %v10139_v15  ;;  %v6652_v2 = vld [vmem:[#allocation2 + $0x410] ss:$8 sps:$4 sm:$0xff]   ;;  %v6654_v15 = vld [vmem:[#allocation2 + $0x414] ss:$8 sps:$4 sm:$0xff]  }
 0x55b   :  { %v4021_v16 = vmax.f32 %v3909_v51, %v3965_v10  ;;  %v3964_v0 = vmul.f32 0.2, %v3908_v44  ;;  %v3910_v58 = vadd.f32 %v10108_v49, %v3846_v45  ;;  %v4024_v27 = vmax.f32 %v10126_v35, %v3968_v7  ;;  %v6649_v49 = vld [vmem:[#allocation2 + $0x400] ss:$8 sps:$4 sm:$0xff]   ;;  %v6651_v35 = vld [vmem:[#allocation2 + $0x404] ss:$8 sps:$4 sm:$0xff]  }
 0x55c   :  { %v4018_v6 = vmax.f32 %v3906_v21, %v3962_v41  ;;  %v3967_v34 = vmul.f32 0.2, %v3911_v57  ;;  %5091 = vmatprep.subr.bf16.mxu0 %v6651_v35 }
 0x55d   :  { %v4051_v14 = vpack.c.bf16 %v4021_v16, %v4019_v5  ;;  %v4020_v36 = vmax.f32 %v3908_v44, %v3964_v0  ;;  %v3966_v4 = vmul.f32 0.2, %v3910_v58  ;;  %5092 = vmatpush1.bf16.msra.mxu0 %v6649_v49 }
 0x55e   :  { %4339 = vmatmul.mubr.bf16.gmra.mrb[80].mxu1 %v10212_v31  ;;  %v4023_v9 = vmax.f32 %v3911_v57, %v3967_v34  ;;  %5093 = vmatprep.subr.bf16.mxu0 %v6654_v15  ;;  %v6655_v31 = vld [vmem:[#allocation2 + $0x420] ss:$8 sps:$4 sm:$0xff]   ;;  %v6678_v15 = vld [vmem:[#allocation2 + $0x494] ss:$8 sps:$4 sm:$0xff]  }
 0x55f   :  { %4348 = vmatprep.mubr.bf16.mxu1 %v10217_v25  ;;  %v4050_v3 = vpack.c.bf16 %v4020_v36, %v4018_v6  ;;  %v4022_v23 = vmax.f32 %v3910_v58, %v3966_v4  ;;  %v6657_v25 = vld [vmem:[#allocation2 + $0x424] ss:$8 sps:$4 sm:$0xff]  }
 0x560   :  { %v4053_v55 = vpack.c.bf16 %v4025_v47, %v4023_v9 }
 0x561   :  { %v4052_v60 = vpack.c.bf16 %v4024_v27, %v4022_v23  ;;  %5094 = vmatpush1.bf16.msra.mxu0 %v6652_v2  ;;  %v6676_v2 = vld [vmem:[#allocation2 + $0x490] ss:$8 sps:$4 sm:$0xff]  }
 0x562   :  { %5095 = vmatprep.subr.bf16.mxu0 %v6657_v25 }
 0x565   :  { %5096 = vmatpush1.bf16.msra.mxu0 %v6655_v31 }
 0x566   :  { %4349 = vmatmul.mubr.bf16.gmra.mrb[84].mxu1 %v10231_v62  ;;  %v6658_v62 = vld [vmem:[#allocation2 + $0x430] ss:$8 sps:$4 sm:$0xff]  }
 0x567   :  { %4358 = vmatprep.mubr.bf16.mxu1 %v10240_v11  ;;  %v6660_v11 = vld [vmem:[#allocation2 + $0x434] ss:$8 sps:$4 sm:$0xff]  }
 0x568   :  { %5097 = vmatprep.subr.bf16.mxu0 %v6660_v11  ;;  %v6681_v11 = vld [vmem:[#allocation2 + $0x4a4] ss:$8 sps:$4 sm:$0xff]  }
 0x569   :  { %5098 = vmatpush1.bf16.msra.mxu0 %v6658_v62 }
 0x56e   :  { %4359 = vmatmul.mubr.bf16.gmra.mrb[88].mxu1 %v10246_v24  ;;  %v6661_v24 = vld [vmem:[#allocation2 + $0x440] ss:$8 sps:$4 sm:$0xff]  }
 0x56f   :  { %4368 = vmatprep.mubr.bf16.mxu1 %v10255_v40  ;;  %v6663_v40 = vld [vmem:[#allocation2 + $0x444] ss:$8 sps:$4 sm:$0xff]  }
 0x570   :  { %5099 = vmatprep.subr.bf16.mxu0 %v6663_v40 }
 0x571   :  { %5100 = vmatpush1.bf16.msra.mxu0 %v6661_v24 }
 0x572   :  { %5101 = vmatprep.subr.bf16.mxu0 %v6666_v28 }
 0x576   :  { %4369 = vmatmul.mubr.bf16.gmra.mrb[92].mxu1 %v4044_v18  ;;  %v6664_v18 = vld [vmem:[#allocation2 + $0x450] ss:$8 sps:$4 sm:$0xff]  }
 0x577   :  { %4378 = vmatprep.mubr.bf16.mxu1 %v4047_v54  ;;  %5102 = vmatpush1.bf16.msra.mxu0 %v6664_v18  ;;  %v6673_v54 = vld [vmem:[#allocation2 + $0x480] ss:$8 sps:$4 sm:$0xff]  }
 0x578   :  { %5103 = vmatprep.subr.bf16.mxu0 %v6669_v48 }
 0x57b   :  { %5104 = vmatpush1.bf16.msra.mxu0 %v6667_v12 }
 0x57c   :  { %5105 = vmatprep.subr.bf16.mxu0 %v6672_v8  ;;  %v6679_v8 = vld [vmem:[#allocation2 + $0x4a0] ss:$8 sps:$4 sm:$0xff]  }
 0x57e   :  { %4379 = vmatmul.mubr.bf16.gmra.mrb[96].mxu1 %v4046_v32 }
 0x57f   :  { %4388 = vmatprep.mubr.bf16.mxu1 %v4049_v61  ;;  %5106 = vmatpush1.bf16.msra.mxu0 %v6670_v26 }
 0x580   :  { %5107 = vmatprep.subr.bf16.mxu0 %v6675_v1  ;;  %v6684_v1 = vld [vmem:[#allocation2 + $0x4b4] ss:$8 sps:$4 sm:$0xff]  }
 0x583   :  { %5108 = vmatpush1.bf16.msra.mxu0 %v6673_v54 }
 0x584   :  { %5109 = vmatprep.subr.bf16.mxu0 %v6678_v15 }
 0x586   :  { %4389 = vmatmul.mubr.bf16.gmra.mrb[100].mxu1 %v4048_v39 }
 0x587   :  { %4398 = vmatprep.mubr.bf16.mxu1 %v4051_v14  ;;  %5110 = vmatpush1.bf16.msra.mxu0 %v6676_v2 }
 0x588   :  { %5111 = vmatprep.subr.bf16.mxu0 %v6681_v11 }
 0x58b   :  { %5112 = vmatpush1.bf16.msra.mxu0 %v6679_v8 }
 0x58c   :  { %5113 = vmatprep.subr.bf16.mxu0 %v6684_v1 }
 0x58e   :  { %4399 = vmatmul.mubr.bf16.gmra.mrb[104].mxu1 %v4050_v3 }
 0x58f   :  { %4408 = vmatprep.mubr.bf16.mxu1 %v4053_v55 }
 0x596   :  { %4409 = vmatmul.mubr.bf16.gmra.mrb[108].mxu1 %v4052_v60 }
 0x601   :  { %v10301_v37 = vpop.f32.mrb[56].mxu1 }
 0x602   :  { %v10303_v20 = vpop.f32.mrb[57].mxu1  ;;  %v4487_v33 = vmul.f32 %v10301_v37, %v10301_v37 }
 0x603   :  { %v10305_v30 = vpop.f32.mrb[58].mxu1  ;;  %v4488_v32 = vmul.f32 %v10303_v20, %v10303_v20 }
 0x604   :  { %v4419_v22 = vadd.f32 %v10305_v30, %v10301_v37  ;;  %v4489_v50 = vmul.f32 %v10305_v30, %v10305_v30  ;;  %v10313_v56 = vpop.f32.mrb[59].mxu1 }
 0x605   :  { %v4452_v52 = vadd.f32 %v10313_v56, %v10303_v20  ;;  %v4490_v17 = vmul.f32 %v10313_v56, %v10313_v56 }
 0x606   :  { %v4543_v59 = vadd.f32 %v4489_v50, %v4487_v33  ;;  %v6682_v50 = vld [vmem:[#allocation2 + $0x4b0] ss:$8 sps:$4 sm:$0xff]  }
 0x607   :  { %v4576_v43 = vadd.f32 %v4490_v17, %v4488_v32  ;;  %5114 = vmatpush1.bf16.msra.mxu0 %v6682_v50 }
 0x609   :  { %v10321_v19 = vpop.f32.mrb[60].mxu1 }
 0x60a   :  { %v4420_v51 = vadd.f32 %v4419_v22, %v10321_v19  ;;  %v4491_v38 = vmul.f32 %v10321_v19, %v10321_v19  ;;  %v10326_v63 = vpop.f32.mrb[61].mxu1 }
 0x60b   :  { %v4453_v46 = vadd.f32 %v4452_v52, %v10326_v63  ;;  %v4492_v61 = vmul.f32 %v10326_v63, %v10326_v63  ;;  %v10331_v53 = vpop.f32.mrb[62].mxu1 }
 0x60c   :  { %v4544_v21 = vadd.f32 %v4543_v59, %v4491_v38  ;;  %v4421_v42 = vadd.f32 %v4420_v51, %v10331_v53  ;;  %v4493_v13 = vmul.f32 %v10331_v53, %v10331_v53  ;;  %v10336_v7 = vpop.f32.mrb[63].mxu1  ;;  %v6687_v59 = vld [vmem:[#allocation2 + $0x4c4] ss:$8 sps:$4 sm:$0xff]  }
 0x60d   :  { %v4577_v10 = vadd.f32 %v4576_v43, %v4492_v61  ;;  %v4454_v5 = vadd.f32 %v4453_v46, %v10336_v7  ;;  %v4494_v44 = vmul.f32 %v10336_v7, %v10336_v7  ;;  %5115 = vmatprep.subr.bf16.mxu0 %v6687_v59 }
 0x60e   :  { %v4545_v39 = vadd.f32 %v4544_v21, %v4493_v13 }
 0x60f   :  { %v4578_v41 = vadd.f32 %v4577_v10, %v4494_v44  ;;  %v6685_v44 = vld [vmem:[#allocation2 + $0x4c0] ss:$8 sps:$4 sm:$0xff]  }
 0x610   :  { %5116 = vmatpush1.bf16.msra.mxu0 %v6685_v44 }
 0x611   :  { %v10341_v57 = vpop.f32.mrb[64].mxu1 }
 0x612   :  { %v4422_v29 = vadd.f32 %v4421_v42, %v10341_v57  ;;  %v4495_v45 = vmul.f32 %v10341_v57, %v10341_v57  ;;  %v10346_v16 = vpop.f32.mrb[65].mxu1 }
 0x613   :  { %v4455_v0 = vadd.f32 %v4454_v5, %v10346_v16  ;;  %v4496_v6 = vmul.f32 %v10346_v16, %v10346_v16  ;;  %v10351_v34 = vpop.f32.mrb[66].mxu1 }
 0x614   :  { %v4546_v47 = vadd.f32 %v4545_v39, %v4495_v45  ;;  %v4423_v58 = vadd.f32 %v4422_v29, %v10351_v34  ;;  %v4497_v14 = vmul.f32 %v10351_v34, %v10351_v34  ;;  %v10356_v36 = vpop.f32.mrb[67].mxu1 }
 0x615   :  { %v4579_v9 = vadd.f32 %v4578_v41, %v4496_v6  ;;  %v4456_v4 = vadd.f32 %v4455_v0, %v10356_v36  ;;  %v4498_v27 = vmul.f32 %v10356_v36, %v10356_v36  ;;  %v6690_v41 = vld [vmem:[#allocation2 + $0x4d4] ss:$8 sps:$4 sm:$0xff]   ;;  %v6688_v0 = vld [vmem:[#allocation2 + $0x4d0] ss:$8 sps:$4 sm:$0xff]  }
 0x616   :  { %v4547_v3 = vadd.f32 %v4546_v47, %v4497_v14  ;;  %5117 = vmatprep.subr.bf16.mxu0 %v6690_v41  ;;  %v6693_v14 = vld [vmem:[#allocation2 + $0x4e4] ss:$8 sps:$4 sm:$0xff]  }
 0x617   :  { %v4580_v55 = vadd.f32 %v4579_v9, %v4498_v27  ;;  %5118 = vmatpush1.bf16.msra.mxu0 %v6688_v0 }
 0x618   :  { %5119 = vmatprep.subr.bf16.mxu0 %v6693_v14 }
 0x619   :  { %v10361_v23 = vpop.f32.mrb[68].mxu1 }
 0x61a   :  { %v4424_v60 = vadd.f32 %v4423_v58, %v10361_v23  ;;  %v4499_v49 = vmul.f32 %v10361_v23, %v10361_v23  ;;  %v10366_v35 = vpop.f32.mrb[69].mxu1 }
 0x61b   :  { %v4457_v31 = vadd.f32 %v4456_v4, %v10366_v35  ;;  %v4500_v25 = vmul.f32 %v10366_v35, %v10366_v35  ;;  %v10371_v62 = vpop.f32.mrb[70].mxu1 }
 0x61c   :  { %v4548_v24 = vadd.f32 %v4547_v3, %v4499_v49  ;;  %v4425_v40 = vadd.f32 %v4424_v60, %v10371_v62  ;;  %v4501_v18 = vmul.f32 %v10371_v62, %v10371_v62  ;;  %v10376_v28 = vpop.f32.mrb[71].mxu1 }
 0x61d   :  { %v4581_v12 = vadd.f32 %v4580_v55, %v4500_v25  ;;  %v4458_v48 = vadd.f32 %v4457_v31, %v10376_v28  ;;  %v4502_v26 = vmul.f32 %v10376_v28, %v10376_v28  ;;  %v6691_v25 = vld [vmem:[#allocation2 + $0x4e0] ss:$8 sps:$4 sm:$0xff]  }
 0x61e   :  { %v4549_v54 = vadd.f32 %v4548_v24, %v4501_v18  ;;  %v6696_v24 = vld [vmem:[#allocation2 + $0x4f4] ss:$8 sps:$4 sm:$0xff]   ;;  %5120 = vmatpush1.bf16.msra.mxu0 %v6691_v25 }
 0x61f   :  { %v4582_v33 = vadd.f32 %v4581_v12, %v4502_v26  ;;  %v6694_v12 = vld [vmem:[#allocation2 + $0x4f0] ss:$8 sps:$4 sm:$0xff]   ;;  %5121 = vmatprep.subr.bf16.mxu0 %v6696_v24 }
 0x621   :  { %v10381_v22 = vpop.f32.mrb[72].mxu1 }
 0x622   :  { %v4426_v32 = vadd.f32 %v4425_v40, %v10381_v22  ;;  %v4503_v52 = vmul.f32 %v10381_v22, %v10381_v22  ;;  %v10386_v17 = vpop.f32.mrb[73].mxu1  ;;  %5122 = vmatpush1.bf16.msra.mxu0 %v6694_v12 }
 0x623   :  { %v4459_v43 = vadd.f32 %v4458_v48, %v10386_v17  ;;  %v4504_v51 = vmul.f32 %v10386_v17, %v10386_v17  ;;  %v10391_v38 = vpop.f32.mrb[74].mxu1 }
 0x624   :  { %v4550_v46 = vadd.f32 %v4549_v54, %v4503_v52  ;;  %v4427_v61 = vadd.f32 %v4426_v32, %v10391_v38  ;;  %v4505_v21 = vmul.f32 %v10391_v38, %v10391_v38  ;;  %v10396_v42 = vpop.f32.mrb[75].mxu1 }
 0x625   :  { %v4583_v13 = vadd.f32 %v4582_v33, %v4504_v51  ;;  %v4460_v10 = vadd.f32 %v4459_v43, %v10396_v42  ;;  %v4506_v5 = vmul.f32 %v10396_v42, %v10396_v42 }
 0x626   :  { %v4551_v39 = vadd.f32 %v4550_v46, %v4505_v21 }
 0x627   :  { %v4584_v29 = vadd.f32 %v4583_v13, %v4506_v5 }
 0x629   :  { %v10401_v45 = vpop.f32.mrb[76].mxu1 }
 0x62a   :  { %v4428_v6 = vadd.f32 %v4427_v61, %v10401_v45  ;;  %v4507_v47 = vmul.f32 %v10401_v45, %v10401_v45  ;;  %v10406_v58 = vpop.f32.mrb[77].mxu1 }
 0x62b   :  { %v4461_v9 = vadd.f32 %v4460_v10, %v10406_v58  ;;  %v4508_v4 = vmul.f32 %v10406_v58, %v10406_v58  ;;  %v10411_v27 = vpop.f32.mrb[78].mxu1 }
 0x62c   :  { %v4552_v3 = vadd.f32 %v4551_v39, %v4507_v47  ;;  %v4429_v55 = vadd.f32 %v4428_v6, %v10411_v27  ;;  %v4509_v60 = vmul.f32 %v10411_v27, %v10411_v27  ;;  %v10416_v49 = vpop.f32.mrb[79].mxu1 }
 0x62d   :  { %v4585_v2 = vadd.f32 %v4584_v29, %v4508_v4  ;;  %v4462_v15 = vadd.f32 %v4461_v9, %v10416_v49  ;;  %v4510_v31 = vmul.f32 %v10416_v49, %v10416_v49 }
 0x62e   :  { %v4553_v11 = vadd.f32 %v4552_v3, %v4509_v60 }
 0x62f   :  { %v4586_v40 = vadd.f32 %v4585_v2, %v4510_v31 }
 0x631   :  { %v10421_v18 = vpop.f32.mrb[80].mxu1 }
 0x632   :  { %v4430_v48 = vadd.f32 %v4429_v55, %v10421_v18  ;;  %v4511_v26 = vmul.f32 %v10421_v18, %v10421_v18  ;;  %v10426_v8 = vpop.f32.mrb[81].mxu1 }
 0x633   :  { %v4463_v54 = vadd.f32 %v4462_v15, %v10426_v8  ;;  %v4512_v1 = vmul.f32 %v10426_v8, %v10426_v8  ;;  %v10431_v33 = vpop.f32.mrb[82].mxu1 }
 0x634   :  { %v4554_v50 = vadd.f32 %v4553_v11, %v4511_v26  ;;  %v4431_v32 = vadd.f32 %v4430_v48, %v10431_v33  ;;  %v4513_v52 = vmul.f32 %v10431_v33, %v10431_v33  ;;  %v10436_v59 = vpop.f32.mrb[83].mxu1 }
 0x635   :  { %v4587_v43 = vadd.f32 %v4586_v40, %v4512_v1  ;;  %v4464_v51 = vadd.f32 %v4463_v54, %v10436_v59  ;;  %v4514_v46 = vmul.f32 %v10436_v59, %v10436_v59 }
 0x636   :  { %v4555_v61 = vadd.f32 %v4554_v50, %v4513_v52 }
 0x637   :  { %v4588_v21 = vadd.f32 %v4587_v43, %v4514_v46 }
 0x639   :  { %v10441_v13 = vpop.f32.mrb[84].mxu1 }
 0x63a   :  { %v4432_v10 = vadd.f32 %v4431_v32, %v10441_v13  ;;  %v4515_v5 = vmul.f32 %v10441_v13, %v10441_v13  ;;  %v10446_v44 = vpop.f32.mrb[85].mxu1 }
 0x63b   :  { %v4465_v39 = vadd.f32 %v4464_v51, %v10446_v44  ;;  %v4516_v41 = vmul.f32 %v10446_v44, %v10446_v44  ;;  %v10451_v29 = vpop.f32.mrb[86].mxu1 }
 0x63c   :  { %v4556_v0 = vadd.f32 %v4555_v61, %v4515_v5  ;;  %v4433_v6 = vadd.f32 %v4432_v10, %v10451_v29  ;;  %v4517_v47 = vmul.f32 %v10451_v29, %v10451_v29  ;;  %v10456_v14 = vpop.f32.mrb[87].mxu1 }
 0x63d   :  { %v4589_v9 = vadd.f32 %v4588_v21, %v4516_v41  ;;  %v4466_v4 = vadd.f32 %v4465_v39, %v10456_v14  ;;  %v4518_v3 = vmul.f32 %v10456_v14, %v10456_v14 }
 0x63e   :  { %v4557_v55 = vadd.f32 %v4556_v0, %v4517_v47 }
 0x63f   :  { %v4590_v60 = vadd.f32 %v4589_v9, %v4518_v3 }
 0x641   :  { %v10461_v2 = vpop.f32.mrb[88].mxu1 }
 0x642   :  { %v4434_v15 = vadd.f32 %v4433_v6, %v10461_v2  ;;  %v4519_v31 = vmul.f32 %v10461_v2, %v10461_v2  ;;  %v10466_v25 = vpop.f32.mrb[89].mxu1 }
 0x643   :  { %v4467_v11 = vadd.f32 %v4466_v4, %v10466_v25  ;;  %v4520_v24 = vmul.f32 %v10466_v25, %v10466_v25  ;;  %v10471_v40 = vpop.f32.mrb[90].mxu1 }
 0x644   :  { %12087 = vst [vmem:[#allocation58_spill] sm:$0xff] %v10471_v40  ;;  %v4558_v12 = vadd.f32 %v4557_v55, %v4519_v31  ;;  %v4435_v48 = vadd.f32 %v4434_v15, %v10471_v40  ;;  %v4521_v26 = vmul.f32 %v10471_v40, %v10471_v40  ;;  %v10476_v54 = vpop.f32.mrb[91].mxu1 }
 0x645   :  { %v4591_v1 = vadd.f32 %v4590_v60, %v4520_v24  ;;  %v4468_v50 = vadd.f32 %v4467_v11, %v10476_v54  ;;  %v4522_v32 = vmul.f32 %v10476_v54, %v10476_v54 }
 0x646   :  { %v4559_v52 = vadd.f32 %v4558_v12, %v4521_v26 }
 0x647   :  { %v4592_v43 = vadd.f32 %v4591_v1, %v4522_v32 }
 0x649   :  { %v10481_v51 = vpop.f32.mrb[92].mxu1 }
 0x64a   :  { %12088 = vst [vmem:[#allocation41_spill] sm:$0xff] %v10481_v51  ;;  %v4436_v46 = vadd.f32 %v4435_v48, %v10481_v51  ;;  %v4523_v61 = vmul.f32 %v10481_v51, %v10481_v51  ;;  %v10486_v21 = vpop.f32.mrb[93].mxu1 }
 0x64b   :  { %12089 = vst [vmem:[#allocation108_spill] sm:$0xff] %v10486_v21  ;;  %v4469_v10 = vadd.f32 %v4468_v50, %v10486_v21  ;;  %v4524_v5 = vmul.f32 %v10486_v21, %v10486_v21  ;;  %v10491_v39 = vpop.f32.mrb[94].mxu1 }
 0x64c   :  { %12090 = vst [vmem:[#allocation93_spill] sm:$0xff] %v10491_v39  ;;  %v4560_v41 = vadd.f32 %v4559_v52, %v4523_v61  ;;  %v4437_v0 = vadd.f32 %v4436_v46, %v10491_v39  ;;  %v4525_v6 = vmul.f32 %v10491_v39, %v10491_v39  ;;  %v10496_v47 = vpop.f32.mrb[95].mxu1 }
 0x64d   :  { %12091 = vst [vmem:[#allocation63_spill] sm:$0xff] %v10496_v47  ;;  %v4593_v9 = vadd.f32 %v4592_v43, %v4524_v5  ;;  %v4470_v4 = vadd.f32 %v4469_v10, %v10496_v47  ;;  %v4526_v3 = vmul.f32 %v10496_v47, %v10496_v47 }
 0x64e   :  { %v4561_v55 = vadd.f32 %v4560_v41, %v4525_v6 }
 0x64f   :  { %v4594_v60 = vadd.f32 %v4593_v9, %v4526_v3 }
 0x651   :  { %v10501_v15 = vpop.f32.mrb[96].mxu1 }
 0x652   :  { %12092 = vst [vmem:[#allocation96_spill] sm:$0xff] %v10501_v15  ;;  %v4438_v31 = vadd.f32 %v4437_v0, %v10501_v15  ;;  %v4527_v11 = vmul.f32 %v10501_v15, %v10501_v15  ;;  %v10506_v24 = vpop.f32.mrb[97].mxu1 }
 0x653   :  { %12093 = vst [vmem:[#allocation62_spill] sm:$0xff] %v10506_v24  ;;  %v4471_v12 = vadd.f32 %v4470_v4, %v10506_v24  ;;  %v4528_v48 = vmul.f32 %v10506_v24, %v10506_v24  ;;  %v10511_v26 = vpop.f32.mrb[98].mxu1 }
 0x654   :  { %12094 = vst [vmem:[#allocation61_spill] sm:$0xff] %v10511_v26  ;;  %v4562_v1 = vadd.f32 %v4561_v55, %v4527_v11  ;;  %v4439_v50 = vadd.f32 %v4438_v31, %v10511_v26  ;;  %v4529_v32 = vmul.f32 %v10511_v26, %v10511_v26  ;;  %v10516_v52 = vpop.f32.mrb[99].mxu1 }
 0x655   :  { %12095 = vst [vmem:[#allocation60_spill] sm:$0xff] %v10516_v52  ;;  %v4595_v43 = vadd.f32 %v4594_v60, %v4528_v48  ;;  %v4472_v46 = vadd.f32 %v4471_v12, %v10516_v52  ;;  %v4530_v61 = vmul.f32 %v10516_v52, %v10516_v52 }
 0x656   :  { %v4563_v10 = vadd.f32 %v4562_v1, %v4529_v32 }
 0x657   :  { %v4596_v5 = vadd.f32 %v4595_v43, %v4530_v61 }
 0x659   :  { %v10521_v41 = vpop.f32.mrb[100].mxu1 }
 0x65a   :  { %12096 = vst [vmem:[#allocation104_spill] sm:$0xff] %v10521_v41  ;;  %v4440_v0 = vadd.f32 %v4439_v50, %v10521_v41  ;;  %v4531_v6 = vmul.f32 %v10521_v41, %v10521_v41  ;;  %v10526_v9 = vpop.f32.mrb[101].mxu1 }
 0x65b   :  { %12097 = vst [vmem:[#allocation40_spill] sm:$0xff] %v10526_v9  ;;  %v4473_v4 = vadd.f32 %v4472_v46, %v10526_v9  ;;  %v4532_v3 = vmul.f32 %v10526_v9, %v10526_v9  ;;  %v10531_v55 = vpop.f32.mrb[102].mxu1 }
 0x65c   :  { %12098 = vst [vmem:[#allocation103_spill] sm:$0xff] %v10531_v55  ;;  %v4564_v60 = vadd.f32 %v4563_v10, %v4531_v6  ;;  %v4441_v31 = vadd.f32 %v4440_v0, %v10531_v55  ;;  %v4533_v11 = vmul.f32 %v10531_v55, %v10531_v55  ;;  %v10536_v12 = vpop.f32.mrb[103].mxu1 }
 0x65d   :  { %12099 = vst [vmem:[#allocation39_spill] sm:$0xff] %v10536_v12  ;;  %v4597_v48 = vadd.f32 %v4596_v5, %v4532_v3  ;;  %v4474_v1 = vadd.f32 %v4473_v4, %v10536_v12  ;;  %v4534_v50 = vmul.f32 %v10536_v12, %v10536_v12 }
 0x65e   :  { %v4565_v32 = vadd.f32 %v4564_v60, %v4533_v11 }
 0x65f   :  { %v4598_v43 = vadd.f32 %v4597_v48, %v4534_v50 }
 0x661   :  { %v10541_v46 = vpop.f32.mrb[104].mxu1 }
 0x662   :  { %12100 = vst [vmem:[#allocation29_spill] sm:$0xff] %v10541_v46  ;;  %v4442_v61 = vadd.f32 %v4441_v31, %v10541_v46  ;;  %v4535_v10 = vmul.f32 %v10541_v46, %v10541_v46  ;;  %v10546_v0 = vpop.f32.mrb[105].mxu1 }
 0x663   :  { %12101 = vst [vmem:[#allocation17_spill] sm:$0xff] %v10546_v0  ;;  %v4475_v6 = vadd.f32 %v4474_v1, %v10546_v0  ;;  %v4536_v5 = vmul.f32 %v10546_v0, %v10546_v0  ;;  %v10551_v4 = vpop.f32.mrb[106].mxu1 }
 0x664   :  { %12102 = vst [vmem:[#allocation28_spill] sm:$0xff] %v10551_v4  ;;  %v4566_v3 = vadd.f32 %v4565_v32, %v4535_v10  ;;  %v4443_v60 = vadd.f32 %v4442_v61, %v10551_v4  ;;  %v4537_v11 = vmul.f32 %v10551_v4, %v10551_v4  ;;  %v10556_v48 = vpop.f32.mrb[107].mxu1 }
 0x665   :  { %12103 = vst [vmem:[#allocation16_spill] sm:$0xff] %v10556_v48  ;;  %v4599_v31 = vadd.f32 %v4598_v43, %v4536_v5  ;;  %v4476_v50 = vadd.f32 %v4475_v6, %v10556_v48  ;;  %v4538_v46 = vmul.f32 %v10556_v48, %v10556_v48 }
 0x666   :  { %v4567_v1 = vadd.f32 %v4566_v3, %v4537_v11 }
 0x667   :  { %v4600_v55 = vadd.f32 %v4599_v31, %v4538_v46 }
 0x669   :  { %v10561_v41 = vpop.f32.mrb[108].mxu1 }
 0x66a   :  { %12104 = vst [vmem:[#allocation21_spill] sm:$0xff] %v10561_v41  ;;  %v4444_v0 = vadd.f32 %v4443_v60, %v10561_v41  ;;  %v4539_v32 = vmul.f32 %v10561_v41, %v10561_v41  ;;  %v10566_v61 = vpop.f32.mrb[109].mxu1 }
 0x66b   :  { %12105 = vst [vmem:[#allocation92_spill] sm:$0xff] %v10566_v61  ;;  %v4477_v10 = vadd.f32 %v4476_v50, %v10566_v61  ;;  %v4540_v43 = vmul.f32 %v10566_v61, %v10566_v61  ;;  %v4414_v6 = vpop.f32.mrb[110].mxu1 }
 0x66c   :  { %v4568_v5 = vadd.f32 %v4567_v1, %v4539_v32  ;;  %v4445_v4 = vadd.f32 %v4444_v0, %v4414_v6  ;;  %v4541_v48 = vmul.f32 %v4414_v6, %v4414_v6  ;;  %v4416_v3 = vpop.f32.mrb[111].mxu1 }
 0x66d   :  { %v4601_v46 = vadd.f32 %v4600_v55, %v4540_v43  ;;  %v4478_v11 = vadd.f32 %v4477_v10, %v4416_v3  ;;  %v4542_v31 = vmul.f32 %v4416_v3, %v4416_v3 }
 0x66e   :  { %v4446_v12 = vrot.slane %v4445_v4, 4  ;;  %v4569_v60 = vadd.f32 %v4568_v5, %v4541_v48 }
 0x66f   :  { %v4479_v9 = vrot.slane %v4478_v11, 4  ;;  %v4602_v26 = vadd.f32 %v4601_v46, %v4542_v31 }
 0x670   :  { %v4447_v41 = vadd.f32 %v4446_v12, %v4445_v4  ;;  %v4570_v15 = vrot.slane %v4569_v60, 4 }
 0x671   :  { %v4480_v52 = vadd.f32 %v4479_v9, %v4478_v11  ;;  %v4603_v24 = vrot.slane %v4602_v26, 4 }
 0x672   :  { %v4448_v50 = vrot.slane %v4447_v41, 2  ;;  %v4571_v39 = vadd.f32 %v4570_v15, %v4569_v60 }
 0x673   :  { %v4481_v51 = vrot.slane %v4480_v52, 2  ;;  %v4604_v61 = vadd.f32 %v4603_v24, %v4602_v26 }
 0x674   :  { %v4449_v47 = vadd.f32 %v4448_v50, %v4447_v41  ;;  %v4572_v1 = vrot.slane %v4571_v39, 2 }
 0x675   :  { %v4482_v0 = vadd.f32 %v4481_v51, %v4480_v52  ;;  %v4605_v32 = vrot.slane %v4604_v61, 2 }
 0x676   :  { %v4450_v21 = vrot.slane %v4449_v47, 1  ;;  %v4573_v55 = vadd.f32 %v4572_v1, %v4571_v39 }
 0x677   :  { %v4483_v10 = vrot.slane %v4482_v0, 1  ;;  %v4606_v43 = vadd.f32 %v4605_v32, %v4604_v61 }
 0x678   :  { %v4451_v40 = vadd.f32 %v4450_v21, %v4449_v47  ;;  %v4574_v48 = vrot.slane %v4573_v55, 1  ;;  %v6745_v21 = vld [vmem:[%s11400_s1 + $0x20] sm:$0xff]  ;;  %v6746_v47 = vld [vmem:[%s11400_s1 + $0x28] sm:$0xff] }
 0x679   :  { %v4484_v5 = vadd.f32 %v4483_v10, %v4482_v0  ;;  %v4607_v46 = vrot.slane %v4606_v43, 1  ;;  %v12106_v0 = vld [vmem:[#allocation12_spill] sm:$0xff] }
 0x67a   :  { %v4485_v12 = vmul.f32 0.004464286, %v4451_v40  ;;  %v4575_v4 = vadd.f32 %v4574_v48, %v4573_v55 }
 0x67b   :  { %v4486_v9 = vmul.f32 0.004464286, %v4484_v5  ;;  %v4608_v11 = vadd.f32 %v4607_v46, %v4606_v43 }
 0x67c   :  { %v4609_v31 = vmul.f32 0.004464286, %v4575_v4  ;;  %v4611_v15 = vmul.f32 %v4485_v12, %v4485_v12 }
 0x67d   :  { %v4610_v60 = vmul.f32 0.004464286, %v4608_v11  ;;  %v4612_v24 = vmul.f32 %v4486_v9, %v4486_v9 }
 0x67e   :  { %v4613_v26 = vsub.f32 %v4609_v31, %v4611_v15 }
 0x67f   :  { %v4614_v41 = vsub.f32 %v4610_v60, %v4612_v24  ;;  %v12107_v60 = vld [vmem:[#allocation13_spill] sm:$0xff] }
 0x680   :  { %v4615_v51 = vadd.f32 0.8, %v4613_v26 }
 0x681   :  { %v4616_v52 = vadd.f32 0.8, %v4614_v41 }
 0x682   :  { %6729 = vrsqrt.f32 %v4615_v51 }
 0x683   :  { %6731 = vrsqrt.f32 %v4616_v52 }
 0x68c   :  { %v6730_v39 = vpop.eup %6729 }
 0x68d   :  { %v6732_v61 = vpop.eup %6731  ;;  %v4619_v40 = vmul.f32 %v6745_v21, %v6730_v39 }
 0x68e   :  { %v4620_v50 = vmul.f32 %v6746_v47, %v6732_v61 }
 0x68f   :  { %v4621_v1 = vmul.f32 %v4619_v40, %v4485_v12  ;;  %v10578_v32 = vrot.slane %v4619_v40, %v12106_v0 }
 0x690   :  { %v4622_v55 = vmul.f32 %v4620_v50, %v4486_v9  ;;  %v10581_v10 = vrot.slane %v4620_v50, %v12106_v0 }
 0x691   :  { %v4625_v43 = vrot.slane %v4621_v1, 7  ;;  %v4693_v48 = vmul.f32 %v10578_v32, %v4414_v6  ;;  %v4639_v5 = vmul.f32 %v10578_v32, %v10301_v37  ;;  %v4641_v46 = vmul.f32 %v10578_v32, %v10305_v30 }
 0x692   :  { %v4626_v4 = vrot.slane %v4622_v55, 7  ;;  %v4694_v11 = vmul.f32 %v10581_v10, %v4416_v3  ;;  %v4640_v12 = vmul.f32 %v10581_v10, %v10303_v20  ;;  %v4642_v9 = vmul.f32 %v10581_v10, %v10313_v56 }
 0x693   :  { %v4629_v31 = vsub.f32 %v6745_v21, %v4625_v43  ;;  %v4644_v15 = vmul.f32 %v10581_v10, %v10326_v63  ;;  %v4646_v6 = vmul.f32 %v10581_v10, %v10336_v7  ;;  %v4643_v37 = vmul.f32 %v10578_v32, %v10321_v19 }
 0x694   :  { %v4630_v30 = vsub.f32 %v6746_v47, %v4626_v4  ;;  %v4645_v3 = vmul.f32 %v10578_v32, %v10331_v53  ;;  %v4648_v20 = vmul.f32 %v10581_v10, %v10346_v16  ;;  %v4650_v56 = vmul.f32 %v10581_v10, %v10356_v36 }
 0x695   :  { %v10606_v24 = vrot.slane %v4629_v31, %v12107_v60  ;;  %v4647_v63 = vmul.f32 %v10578_v32, %v10341_v57  ;;  %v4649_v7 = vmul.f32 %v10578_v32, %v10351_v34  ;;  %v4652_v19 = vmul.f32 %v10581_v10, %v10366_v35 }
 0x696   :  { %v10615_v53 = vrot.slane %v4630_v30, %v12107_v60  ;;  %v4654_v16 = vmul.f32 %v10581_v10, %v10376_v28  ;;  %v4651_v36 = vmul.f32 %v10578_v32, %v10361_v23  ;;  %v4653_v26 = vmul.f32 %v10578_v32, %v10371_v62 }
 0x697   :  { %v10624_v57 = vadd.f32 %v10606_v24, %v4693_v48  ;;  %v4703_v34 = vadd.f32 %v10606_v24, %v4639_v5  ;;  %v4705_v41 = vadd.f32 %v10606_v24, %v4641_v46  ;;  %v4707_v35 = vadd.f32 %v10606_v24, %v4643_v37 }
 0x698   :  { %v10630_v51 = vadd.f32 %v10615_v53, %v4694_v11  ;;  %v4704_v28 = vadd.f32 %v10615_v53, %v4640_v12  ;;  %v4706_v52 = vadd.f32 %v10615_v53, %v4642_v9  ;;  %v4708_v23 = vadd.f32 %v10615_v53, %v4644_v15 }
 0x699   :  { %v4759_v39 = vmul.f32 0.2, %v4703_v34  ;;  %v4761_v62 = vmul.f32 0.2, %v4705_v41  ;;  %v4710_v61 = vadd.f32 %v10615_v53, %v4646_v6  ;;  %v4709_v50 = vadd.f32 %v10606_v24, %v4645_v3 }
 0x69a   :  { %v10637_v21 = vmul.f32 0.2, %v10630_v51  ;;  %v4760_v40 = vmul.f32 0.2, %v4704_v28  ;;  %v4762_v47 = vmul.f32 0.2, %v4706_v52  ;;  %v4712_v31 = vadd.f32 %v10615_v53, %v4648_v20 }
 0x69b   :  { %v4815_v1 = vmax.f32 %v4703_v34, %v4759_v39  ;;  %v4817_v0 = vmax.f32 %v4705_v41, %v4761_v62  ;;  %v4764_v55 = vmul.f32 0.2, %v4708_v23  ;;  %v4766_v43 = vmul.f32 0.2, %v4710_v61 }
 0x69c   :  { %v4816_v48 = vmax.f32 %v4704_v28, %v4760_v40  ;;  %v4818_v5 = vmax.f32 %v4706_v52, %v4762_v47  ;;  %v4763_v46 = vmul.f32 0.2, %v4707_v35  ;;  %v4765_v4 = vmul.f32 0.2, %v4709_v50 }
 0x69d   :  { %v4871_v11 = vpack.c.bf16 %v4817_v0, %v4815_v1  ;;  %v4820_v12 = vmax.f32 %v4708_v23, %v4764_v55  ;;  %v4822_v9 = vmax.f32 %v4710_v61, %v4766_v43  ;;  %v4714_v30 = vadd.f32 %v10615_v53, %v4650_v56 }
 0x69e   :  { %v4872_v15 = vpack.c.bf16 %v4818_v5, %v4816_v48  ;;  %v4819_v6 = vmax.f32 %v4707_v35, %v4763_v46  ;;  %v4821_v37 = vmax.f32 %v4709_v50, %v4765_v4  ;;  %v4768_v3 = vmul.f32 0.2, %v4712_v31 }
 0x69f   :  { %v4874_v60 = vpack.c.bf16 %v4822_v9, %v4820_v12  ;;  %v4711_v34 = vadd.f32 %v10606_v24, %v4647_v63  ;;  %v4713_v41 = vadd.f32 %v10606_v24, %v4649_v7  ;;  %v4770_v52 = vmul.f32 0.2, %v4714_v30 }
 0x6a0   :  { %5123 = vmatprep.mubr.bf16.mxu0 %v4872_v15  ;;  %v4873_v28 = vpack.c.bf16 %v4821_v37, %v4819_v6  ;;  %v4716_v39 = vadd.f32 %v10615_v53, %v4652_v19  ;;  %v4718_v23 = vadd.f32 %v10615_v53, %v4654_v16  ;;  %v4824_v20 = vmax.f32 %v4712_v31, %v4768_v3 }
 0x6a1   :  { %5124 = vmatmul.mubr.bf16.vlgmr.msra.gmra.mrb[56].mxu0 %v4871_v11  ;;  %v4767_v62 = vmul.f32 0.2, %v4711_v34  ;;  %v4769_v35 = vmul.f32 0.2, %v4713_v41  ;;  %v4715_v61 = vadd.f32 %v10606_v24, %v4651_v36  ;;  %v4826_v56 = vmax.f32 %v4714_v30, %v4770_v52 }
 0x6a2   :  { %5133 = vmatprep.mubr.bf16.mxu0 %v4874_v60  ;;  %v4772_v40 = vmul.f32 0.2, %v4716_v39  ;;  %v4774_v47 = vmul.f32 0.2, %v4718_v23  ;;  %v4717_v63 = vadd.f32 %v10606_v24, %v4653_v26  ;;  %v4656_v19 = vmul.f32 %v10581_v10, %v10386_v17 }
 0x6a3   :  { %v4823_v7 = vmax.f32 %v4711_v34, %v4767_v62  ;;  %v4825_v50 = vmax.f32 %v4713_v41, %v4769_v35  ;;  %v4771_v1 = vmul.f32 0.2, %v4715_v61  ;;  %v4876_v0 = vpack.c.bf16 %v4826_v56, %v4824_v20 }
 0x6a4   :  { %v4828_v16 = vmax.f32 %v4716_v39, %v4772_v40  ;;  %v4830_v55 = vmax.f32 %v4718_v23, %v4774_v47  ;;  %v4773_v43 = vmul.f32 0.2, %v4717_v63  ;;  %v4658_v36 = vmul.f32 %v10581_v10, %v10396_v42 }
 0x6a5   :  { %v4875_v48 = vpack.c.bf16 %v4825_v50, %v4823_v7  ;;  %v4827_v5 = vmax.f32 %v4715_v61, %v4771_v1  ;;  %v4720_v46 = vadd.f32 %v10615_v53, %v4656_v19  ;;  %v4655_v26 = vmul.f32 %v10578_v32, %v10381_v22 }
 0x6a6   :  { %v4878_v4 = vpack.c.bf16 %v4830_v55, %v4828_v16  ;;  %v4829_v11 = vmax.f32 %v4717_v63, %v4773_v43  ;;  %v4657_v12 = vmul.f32 %v10578_v32, %v10391_v38  ;;  %v4722_v17 = vadd.f32 %v10615_v53, %v4658_v36 }
 0x6a7   :  { %v4776_v9 = vmul.f32 0.2, %v4720_v46  ;;  %v4660_v31 = vmul.f32 %v10581_v10, %v10406_v58  ;;  %v4662_v15 = vmul.f32 %v10581_v10, %v10416_v49  ;;  %v4719_v6 = vadd.f32 %v10606_v24, %v4655_v26 }
 0x6a8   :  { %v10662_v42 = vpack.c.bf16 %v4829_v11, %v4827_v5  ;;  %v4721_v37 = vadd.f32 %v10606_v24, %v4657_v12  ;;  %v4659_v22 = vmul.f32 %v10578_v32, %v10401_v45  ;;  %v4778_v38 = vmul.f32 0.2, %v4722_v17 }
 0x6a9   :  { %5134 = vmatmul.mubr.bf16.gmra.mrb[60].mxu0 %v4873_v28  ;;  %v4832_v30 = vmax.f32 %v4720_v46, %v4776_v9  ;;  %v4724_v60 = vadd.f32 %v10615_v53, %v4660_v31  ;;  %v4726_v3 = vadd.f32 %v10615_v53, %v4662_v15  ;;  %v4775_v58 = vmul.f32 0.2, %v4719_v6 }
 0x6aa   :  { %5143 = vmatprep.mubr.bf16.mxu0 %v4876_v0  ;;  %v4777_v34 = vmul.f32 0.2, %v4721_v37  ;;  %v4661_v49 = vmul.f32 %v10578_v32, %v10411_v27  ;;  %v4723_v41 = vadd.f32 %v10606_v24, %v4659_v22  ;;  %v4834_v52 = vmax.f32 %v4722_v17, %v4778_v38 }
 0x6ab   :  { %v4780_v39 = vmul.f32 0.2, %v4724_v60  ;;  %v4782_v23 = vmul.f32 0.2, %v4726_v3  ;;  %v4664_v45 = vmul.f32 %v10581_v10, %v10426_v8  ;;  %v4831_v28 = vmax.f32 %v4719_v6, %v4775_v58 }
 0x6ac   :  { %v4833_v20 = vmax.f32 %v4721_v37, %v4777_v34  ;;  %v4725_v62 = vadd.f32 %v10606_v24, %v4661_v49  ;;  %v4779_v35 = vmul.f32 0.2, %v4723_v41  ;;  %v4880_v61 = vpack.c.bf16 %v4834_v52, %v4832_v30 }
 0x6ad   :  { %v4836_v56 = vmax.f32 %v4724_v60, %v4780_v39  ;;  %v4838_v40 = vmax.f32 %v4726_v3, %v4782_v23  ;;  %v4666_v47 = vmul.f32 %v10581_v10, %v10436_v59  ;;  %v4728_v50 = vadd.f32 %v10615_v53, %v4664_v45  ;;  %v12108_v39 = vld [vmem:[#allocation58_spill] sm:$0xff] }
 0x6ae   :  { %v10678_v27 = vpack.c.bf16 %v4833_v20, %v4831_v28  ;;  %v4781_v63 = vmul.f32 0.2, %v4725_v62  ;;  %v4835_v7 = vmax.f32 %v4723_v41, %v4779_v35  ;;  %v4663_v19 = vmul.f32 %v10578_v32, %v10421_v18  ;;  %v12109_v20 = vld [vmem:[#allocation108_spill] sm:$0xff] }
 0x6af   :  { %v10681_v1 = vpack.c.bf16 %v4838_v40, %v4836_v56  ;;  %v4730_v8 = vadd.f32 %v10615_v53, %v4666_v47  ;;  %v4665_v0 = vmul.f32 %v10578_v32, %v10431_v33  ;;  %v4784_v55 = vmul.f32 0.2, %v4728_v50  ;;  %v12110_v56 = vld [vmem:[#allocation63_spill] sm:$0xff]  ;;  %v12111_v47 = vld [vmem:[#allocation41_spill] sm:$0xff] }
 0x6b0   :  { %v4837_v16 = vmax.f32 %v4725_v62, %v4781_v63  ;;  %v4668_v59 = vmul.f32 %v10581_v10, %v10446_v44  ;;  %v4670_v43 = vmul.f32 %v10581_v10, %v10456_v14  ;;  %v4727_v36 = vadd.f32 %v10606_v24, %v4663_v19 }
 0x6b1   :  { %5144 = vmatmul.mubr.bf16.gmra.mrb[64].mxu0 %v4875_v48  ;;  %v4786_v5 = vmul.f32 0.2, %v4730_v8  ;;  %v4729_v46 = vadd.f32 %v10606_v24, %v4665_v0  ;;  %v4667_v18 = vmul.f32 %v10578_v32, %v10441_v13  ;;  %v4840_v33 = vmax.f32 %v4728_v50, %v4784_v55 }
 0x6b2   :  { %5153 = vmatprep.mubr.bf16.mxu0 %v4878_v4  ;;  %v10696_v11 = vpack.c.bf16 %v4837_v16, %v4835_v7  ;;  %v4732_v26 = vadd.f32 %v10615_v53, %v4668_v59  ;;  %v4734_v44 = vadd.f32 %v10615_v53, %v4670_v43  ;;  %v4783_v17 = vmul.f32 0.2, %v4727_v36 }
 0x6b3   :  { %v4842_v12 = vmax.f32 %v4730_v8, %v4786_v5  ;;  %v4785_v14 = vmul.f32 0.2, %v4729_v46  ;;  %v4669_v48 = vmul.f32 %v10578_v32, %v10451_v29  ;;  %v4731_v15 = vadd.f32 %v10606_v24, %v4667_v18 }
 0x6b4   :  { %v4788_v9 = vmul.f32 0.2, %v4732_v26  ;;  %v4790_v31 = vmul.f32 0.2, %v4734_v44  ;;  %v4672_v13 = vmul.f32 %v10581_v10, %v10466_v25  ;;  %v4839_v6 = vmax.f32 %v4727_v36, %v4783_v17  ;;  %v12113_v36 = vld [vmem:[#allocation62_spill] sm:$0xff] }
 0x6b5   :  { %v10705_v4 = vpack.c.bf16 %v4842_v12, %v4840_v33  ;;  %v4841_v37 = vmax.f32 %v4729_v46, %v4785_v14  ;;  %v4733_v22 = vadd.f32 %v10606_v24, %v4669_v48  ;;  %v4787_v60 = vmul.f32 0.2, %v4731_v15  ;;  %v12114_v14 = vld [vmem:[#allocation60_spill] sm:$0xff] }
 0x6b6   :  { %v4844_v38 = vmax.f32 %v4732_v26, %v4788_v9  ;;  %v4846_v30 = vmax.f32 %v4734_v44, %v4790_v31  ;;  %v4674_v3 = vmul.f32 %v10581_v10, %v10476_v54  ;;  %v4736_v34 = vadd.f32 %v10615_v53, %v4672_v13 }
 0x6b7   :  { %v10710_v29 = vpack.c.bf16 %v4841_v37, %v4839_v6  ;;  %v4789_v58 = vmul.f32 0.2, %v4733_v22  ;;  %v4671_v25 = vmul.f32 %v10578_v32, %v10461_v2  ;;  %v4843_v41 = vmax.f32 %v4731_v15, %v4787_v60  ;;  %v12115_v6 = vld [vmem:[#allocation96_spill] sm:$0xff]  ;;  %v12116_v60 = vld [vmem:[#allocation61_spill] sm:$0xff] }
 0x6b8   :  { %v10715_v49 = vpack.c.bf16 %v4846_v30, %v4844_v38  ;;  %v4738_v52 = vadd.f32 %v10615_v53, %v4674_v3  ;;  %v4673_v23 = vmul.f32 %v10578_v32, %v12108_v39  ;;  %v4792_v54 = vmul.f32 0.2, %v4736_v34 }
 0x6b9   :  { %5154 = vmatmul.mubr.bf16.gmra.mrb[68].mxu0 %v10662_v42  ;;  %v4845_v45 = vmax.f32 %v4733_v22, %v4789_v58  ;;  %v4735_v28 = vadd.f32 %v10606_v24, %v4671_v25  ;;  %v4676_v62 = vmul.f32 %v10581_v10, %v12109_v20  ;;  %v4678_v40 = vmul.f32 %v10581_v10, %v12110_v56 }
 0x6ba   :  { %5163 = vmatprep.mubr.bf16.mxu0 %v4880_v61  ;;  %v4794_v35 = vmul.f32 0.2, %v4738_v52  ;;  %v4737_v2 = vadd.f32 %v10606_v24, %v4673_v23  ;;  %v4675_v63 = vmul.f32 %v10578_v32, %v12111_v47  ;;  %v4848_v42 = vmax.f32 %v4736_v34, %v4792_v54  ;;  %v12112_v61 = vld [vmem:[#allocation93_spill] sm:$0xff]  ;;  %v12120_v47 = vld [vmem:[#allocation103_spill] sm:$0xff] }
 0x6bb   :  { %v10729_v7 = vpack.c.bf16 %v4845_v45, %v4843_v41  ;;  %v4791_v50 = vmul.f32 0.2, %v4735_v28  ;;  %v4740_v8 = vadd.f32 %v10615_v53, %v4676_v62  ;;  %v4742_v16 = vadd.f32 %v10615_v53, %v4678_v40  ;;  %v12117_v41 = vld [vmem:[#allocation40_spill] sm:$0xff]  ;;  %v12118_v45 = vld [vmem:[#allocation39_spill] sm:$0xff] }
 0x6bc   :  { %v4850_v19 = vmax.f32 %v4738_v52, %v4794_v35  ;;  %v4793_v0 = vmul.f32 0.2, %v4737_v2  ;;  %v4677_v55 = vmul.f32 %v10578_v32, %v12112_v61  ;;  %v4739_v5 = vadd.f32 %v10606_v24, %v4675_v63 }
 0x6bd   :  { %v4847_v59 = vmax.f32 %v4735_v28, %v4791_v50  ;;  %v4796_v43 = vmul.f32 0.2, %v4740_v8  ;;  %v4680_v46 = vmul.f32 %v10581_v10, %v12113_v36  ;;  %v4798_v26 = vmul.f32 0.2, %v4742_v16  ;;  %v12122_v36 = vld [vmem:[#allocation16_spill] sm:$0xff] }
 0x6be   :  { %v10738_v18 = vpack.c.bf16 %v4850_v19, %v4848_v42  ;;  %v4849_v33 = vmax.f32 %v4737_v2, %v4793_v0  ;;  %v4741_v44 = vadd.f32 %v10606_v24, %v4677_v55  ;;  %v4795_v17 = vmul.f32 0.2, %v4739_v5  ;;  %v12121_v19 = vld [vmem:[#allocation17_spill] sm:$0xff] }
 0x6bf   :  { %v4852_v12 = vmax.f32 %v4740_v8, %v4796_v43  ;;  %v4682_v48 = vmul.f32 %v10581_v10, %v12114_v14  ;;  %v4744_v9 = vadd.f32 %v10615_v53, %v4680_v46  ;;  %v4854_v15 = vmax.f32 %v4742_v16, %v4798_v26 }
 0x6c0   :  { %v10744_v31 = vpack.c.bf16 %v4849_v33, %v4847_v59  ;;  %v4797_v13 = vmul.f32 0.2, %v4741_v44  ;;  %v4679_v37 = vmul.f32 %v10578_v32, %v12115_v6  ;;  %v4851_v22 = vmax.f32 %v4739_v5, %v4795_v17  ;;  %v12123_v17 = vld [vmem:[#allocation29_spill] sm:$0xff] }
 0x6c1   :  { %5164 = vmatmul.mubr.bf16.gmra.mrb[72].mxu0 %v10678_v27  ;;  %v4746_v38 = vadd.f32 %v10615_v53, %v4682_v48  ;;  %v4800_v30 = vmul.f32 0.2, %v4744_v9  ;;  %v4681_v3 = vmul.f32 %v10578_v32, %v12116_v60  ;;  %v10753_v58 = vpack.c.bf16 %v4854_v15, %v4852_v12 }
 0x6c2   :  { %5173 = vmatprep.mubr.bf16.mxu0 %v10681_v1  ;;  %v4853_v34 = vmax.f32 %v4741_v44, %v4797_v13  ;;  %v4743_v25 = vadd.f32 %v10606_v24, %v4679_v37  ;;  %v4684_v52 = vmul.f32 %v10581_v10, %v12117_v41  ;;  %v4686_v54 = vmul.f32 %v10581_v10, %v12118_v45  ;;  %v12119_v1 = vld [vmem:[#allocation104_spill] sm:$0xff] }
 0x6c3   :  { %v4802_v39 = vmul.f32 0.2, %v4746_v38  ;;  %v4856_v23 = vmax.f32 %v4744_v9, %v4800_v30  ;;  %v4745_v27 = vadd.f32 %v10606_v24, %v4681_v3  ;;  %v4683_v35 = vmul.f32 %v10578_v32, %v12119_v1  ;;  %v12124_v13 = vld [vmem:[#allocation28_spill] sm:$0xff] }
 0x6c4   :  { %v4889_v28 = vpack.c.bf16 %v4853_v34, %v4851_v22  ;;  %v4799_v20 = vmul.f32 0.2, %v4743_v25  ;;  %v4748_v62 = vadd.f32 %v10615_v53, %v4684_v52  ;;  %v4750_v40 = vadd.f32 %v10615_v53, %v4686_v54 }
 0x6c5   :  { %v4858_v2 = vmax.f32 %v4746_v38, %v4802_v39  ;;  %v4801_v56 = vmul.f32 0.2, %v4745_v27  ;;  %v4685_v63 = vmul.f32 %v10578_v32, %v12120_v47  ;;  %v4747_v8 = vadd.f32 %v10606_v24, %v4683_v35  ;;  %v12126_v39 = vld [vmem:[#allocation21_spill] sm:$0xff] }
 0x6c6   :  { %v4855_v42 = vmax.f32 %v4743_v25, %v4799_v20  ;;  %v4804_v50 = vmul.f32 0.2, %v4748_v62  ;;  %v4688_v0 = vmul.f32 %v10581_v10, %v12121_v19  ;;  %v4806_v55 = vmul.f32 0.2, %v4750_v40 }
 0x6c7   :  { %v4892_v16 = vpack.c.bf16 %v4858_v2, %v4856_v23  ;;  %v4857_v61 = vmax.f32 %v4745_v27, %v4801_v56  ;;  %v4749_v59 = vadd.f32 %v10606_v24, %v4685_v63  ;;  %v4803_v5 = vmul.f32 0.2, %v4747_v8 }
 0x6c8   :  { %v4860_v43 = vmax.f32 %v4748_v62, %v4804_v50  ;;  %v4690_v46 = vmul.f32 %v10581_v10, %v12122_v36  ;;  %v4752_v33 = vadd.f32 %v10615_v53, %v4688_v0  ;;  %v4862_v44 = vmax.f32 %v4750_v40, %v4806_v55 }
 0x6c9   :  { %5174 = vmatmul.mubr.bf16.gmra.mrb[76].mxu0 %v10696_v11  ;;  %v4891_v26 = vpack.c.bf16 %v4857_v61, %v4855_v42  ;;  %v4805_v12 = vmul.f32 0.2, %v4749_v59  ;;  %v4687_v14 = vmul.f32 %v10578_v32, %v12123_v17  ;;  %v4859_v48 = vmax.f32 %v4747_v8, %v4803_v5  ;;  %v12125_v11 = vld [vmem:[#allocation92_spill] sm:$0xff] }
 0x6ca   :  { %5183 = vmatprep.mubr.bf16.mxu0 %v10705_v4  ;;  %v4754_v9 = vadd.f32 %v10615_v53, %v4690_v46  ;;  %v4808_v15 = vmul.f32 0.2, %v4752_v33  ;;  %v4689_v6 = vmul.f32 %v10578_v32, %v12124_v13  ;;  %v4894_v37 = vpack.c.bf16 %v4862_v44, %v4860_v43 }
 0x6cb   :  { %v4861_v22 = vmax.f32 %v4749_v59, %v4805_v12  ;;  %v4751_v38 = vadd.f32 %v10606_v24, %v4687_v14  ;;  %v4692_v30 = vmul.f32 %v10581_v10, %v12125_v11  ;;  %v4813_v60 = vmul.f32 0.2, %v10624_v57 }
 0x6cc   :  { %v4810_v3 = vmul.f32 0.2, %v4754_v9  ;;  %v4864_v34 = vmax.f32 %v4752_v33, %v4808_v15  ;;  %v4753_v4 = vadd.f32 %v10606_v24, %v4689_v6  ;;  %v4691_v23 = vmul.f32 %v10578_v32, %v12126_v39 }
 0x6cd   :  { %v4893_v25 = vpack.c.bf16 %v4861_v22, %v4859_v48  ;;  %v4807_v41 = vmul.f32 0.2, %v4751_v38  ;;  %v4756_v52 = vadd.f32 %v10615_v53, %v4692_v30  ;;  %v4870_v10 = vmax.f32 %v10630_v51, %v10637_v21  ;;  %v6699_v51 = vld [vmem:[%s11402_s3 + $0x48] sm:$0xff]  }
 0x6ce   :  { %v4866_v27 = vmax.f32 %v4754_v9, %v4810_v3  ;;  %v4809_v45 = vmul.f32 0.2, %v4753_v4  ;;  %v4755_v62 = vadd.f32 %v10606_v24, %v4691_v23  ;;  %v4869_v53 = vmax.f32 %v10624_v57, %v4813_v60  ;;  %v6697_v24 = vld [vmem:[%s11402_s3 + $0x40] sm:$0xff]   ;;  %v6700_v21 = vld [vmem:[%s11402_s3 + $0x8] sm:$0xff]  }
 0x6cf   :  { %v4863_v54 = vmax.f32 %v4751_v38, %v4807_v41  ;;  %v4812_v20 = vmul.f32 0.2, %v4756_v52  ;;  %6242 = vmatprep.subr.bf16.mxu1 %v6697_v24  ;;  %v6698_v57 = vld [vmem:[%s11402_s3] sm:$0xff]  }
 0x6d0   :  { %v4896_v1 = vpack.c.bf16 %v4866_v27, %v4864_v34  ;;  %v4865_v35 = vmax.f32 %v4753_v4, %v4809_v45  ;;  %v4811_v56 = vmul.f32 0.2, %v4755_v62  ;;  %6243 = vmatpush3.bf16.msra.mxu1 %v6698_v57  ;;  %v6707_v57 = vld [vmem:[%s11402_s3 + $0x68] sm:$0xff]  }
 0x6d1   :  { %5184 = vmatmul.mubr.bf16.gmra.mrb[80].mxu0 %v10710_v29  ;;  %v4868_v2 = vmax.f32 %v4756_v52, %v4812_v20  ;;  %6244 = vmatprep.subr.bf16.mxu1 %v6699_v51  ;;  %v6701_v29 = vld [vmem:[%s11402_s3 + $0x50] sm:$0xff]   ;;  %v6708_v51 = vld [vmem:[%s11402_s3 + $0x28] sm:$0xff]  }
 0x6d2   :  { %5193 = vmatprep.mubr.bf16.mxu0 %v10715_v49  ;;  %v4895_v32 = vpack.c.bf16 %v4865_v35, %v4863_v54  ;;  %v4867_v47 = vmax.f32 %v4755_v62, %v4811_v56  ;;  %v6702_v49 = vld [vmem:[%s11402_s3 + $0x10] sm:$0xff]  }
 0x6d3   :  { %v4898_v40 = vpack.c.bf16 %v4870_v10, %v4868_v2 }
 0x6d4   :  { %v4897_v63 = vpack.c.bf16 %v4869_v53, %v4867_v47  ;;  %6245 = vmatpush3.bf16.msra.mxu1 %v6700_v21  ;;  %v6709_v21 = vld [vmem:[%s11402_s3 + $0x70] sm:$0xff]  }
 0x6d5   :  { %6246 = vmatprep.subr.bf16.mxu1 %v6701_v29 }
 0x6d8   :  { %6247 = vmatpush3.bf16.msra.mxu1 %v6702_v49 }
 0x6d9   :  { %5194 = vmatmul.mubr.bf16.gmra.mrb[84].mxu0 %v10729_v7  ;;  %v6703_v7 = vld [vmem:[%s11402_s3 + $0x58] sm:$0xff]  }
 0x6da   :  { %5203 = vmatprep.mubr.bf16.mxu0 %v10738_v18  ;;  %v6704_v18 = vld [vmem:[%s11402_s3 + $0x18] sm:$0xff]   ;;  %6248 = vmatprep.subr.bf16.mxu1 %v6703_v7 }
 0x6dc   :  { %6249 = vmatpush3.bf16.msra.mxu1 %v6704_v18 }
 0x6e1   :  { %5204 = vmatmul.mubr.bf16.gmra.mrb[88].mxu0 %v10744_v31  ;;  %v6705_v31 = vld [vmem:[%s11402_s3 + $0x60] sm:$0xff]  }
 0x6e2   :  { %5213 = vmatprep.mubr.bf16.mxu0 %v10753_v58  ;;  %6250 = vmatprep.subr.bf16.mxu1 %v6705_v31  ;;  %v6706_v58 = vld [vmem:[%s11402_s3 + $0x20] sm:$0xff]  }
 0x6e3   :  { %6251 = vmatpush3.bf16.msra.mxu1 %v6706_v58  ;;  %v6710_v58 = vld [vmem:[%s11402_s3 + $0x30] sm:$0xff]  }
 0x6e4   :  { %6252 = vmatprep.subr.bf16.mxu1 %v6707_v57 }
 0x6e7   :  { %6253 = vmatpush3.bf16.msra.mxu1 %v6708_v51 }
 0x6e8   :  { %6254 = vmatprep.subr.bf16.mxu1 %v6709_v21 }
 0x6e9   :  { %5214 = vmatmul.mubr.bf16.gmra.mrb[92].mxu0 %v4889_v28 }
 0x6ea   :  { %5223 = vmatprep.mubr.bf16.mxu0 %v4892_v16 }
 0x6eb   :  { %6255 = vmatpush3.bf16.msra.mxu1 %v6710_v58 }
 0x6f1   :  { %5224 = vmatmul.mubr.bf16.gmra.mrb[96].mxu0 %v4891_v26 }
 0x6f2   :  { %5233 = vmatprep.mubr.bf16.mxu0 %v4894_v37 }
 0x6f9   :  { %5234 = vmatmul.mubr.bf16.gmra.mrb[100].mxu0 %v4893_v25 }
 0x6fa   :  { %5243 = vmatprep.mubr.bf16.mxu0 %v4896_v1 }
 0x701   :  { %5244 = vmatmul.mubr.bf16.gmra.mrb[104].mxu0 %v4895_v32 }
 0x702   :  { %5253 = vmatprep.mubr.bf16.mxu0 %v4898_v40 }
 0x709   :  { %5254 = vmatmul.mubr.bf16.gmra.mrb[108].mxu0 %v4897_v63 }
 0x774   :  { %v10829_v28 = vpop.f32.mrb[56].mxu0 }
 0x775   :  { %v10831_v42 = vpop.f32.mrb[57].mxu0  ;;  %v5332_v8 = vmul.f32 %v10829_v28, %v10829_v28 }
 0x776   :  { %v10833_v50 = vpop.f32.mrb[58].mxu0  ;;  %v5333_v61 = vmul.f32 %v10831_v42, %v10831_v42 }
 0x777   :  { %v5264_v19 = vadd.f32 %v10833_v50, %v10829_v28  ;;  %v5334_v0 = vmul.f32 %v10833_v50, %v10833_v50  ;;  %v10841_v16 = vpop.f32.mrb[59].mxu0 }
 0x778   :  { %v5297_v55 = vadd.f32 %v10841_v16, %v10831_v42  ;;  %v5335_v59 = vmul.f32 %v10841_v16, %v10841_v16 }
 0x779   :  { %v5388_v43 = vadd.f32 %v5334_v0, %v5332_v8  ;;  %v6711_v8 = vld [vmem:[%s11402_s3 + $0x78] sm:$0xff]  }
 0x77a   :  { %v5421_v5 = vadd.f32 %v5335_v59, %v5333_v61  ;;  %6256 = vmatprep.subr.bf16.mxu1 %v6711_v8 }
 0x77c   :  { %v10849_v36 = vpop.f32.mrb[60].mxu0 }
 0x77d   :  { %v5265_v46 = vadd.f32 %v5264_v19, %v10849_v36  ;;  %v5336_v33 = vmul.f32 %v10849_v36, %v10849_v36  ;;  %v10854_v26 = vpop.f32.mrb[61].mxu0 }
 0x77e   :  { %v5298_v44 = vadd.f32 %v5297_v55, %v10854_v26  ;;  %v5337_v12 = vmul.f32 %v10854_v26, %v10854_v26  ;;  %v10859_v17 = vpop.f32.mrb[62].mxu0 }
 0x77f   :  { %v5389_v14 = vadd.f32 %v5388_v43, %v5336_v33  ;;  %v5266_v48 = vadd.f32 %v5265_v46, %v10859_v17  ;;  %v5338_v9 = vmul.f32 %v10859_v17, %v10859_v17  ;;  %v10864_v15 = vpop.f32.mrb[63].mxu0  ;;  %v6712_v46 = vld [vmem:[%s11402_s3 + $0x38] sm:$0xff]  }
 0x780   :  { %v5422_v13 = vadd.f32 %v5421_v5, %v5337_v12  ;;  %v5299_v6 = vadd.f32 %v5298_v44, %v10864_v15  ;;  %v5339_v37 = vmul.f32 %v10864_v15, %v10864_v15  ;;  %6257 = vmatpush3.bf16.msra.mxu1 %v6712_v46 }
 0x781   :  { %v5390_v22 = vadd.f32 %v5389_v14, %v5338_v9 }
 0x782   :  { %v5423_v38 = vadd.f32 %v5422_v13, %v5339_v37 }
 0x784   :  { %v10869_v11 = vpop.f32.mrb[64].mxu0 }
 0x785   :  { %v5267_v30 = vadd.f32 %v5266_v48, %v10869_v11  ;;  %v5340_v60 = vmul.f32 %v10869_v11, %v10869_v11  ;;  %v10874_v3 = vpop.f32.mrb[65].mxu0 }
 0x786   :  { %v5300_v34 = vadd.f32 %v5299_v6, %v10874_v3  ;;  %v5341_v4 = vmul.f32 %v10874_v3, %v10874_v3  ;;  %v10879_v25 = vpop.f32.mrb[66].mxu0 }
 0x787   :  { %v5391_v41 = vadd.f32 %v5390_v22, %v5340_v60  ;;  %v5268_v52 = vadd.f32 %v5267_v30, %v10879_v25  ;;  %v5342_v39 = vmul.f32 %v10879_v25, %v10879_v25  ;;  %v10884_v23 = vpop.f32.mrb[67].mxu0 }
 0x788   :  { %v5424_v27 = vadd.f32 %v5423_v38, %v5341_v4  ;;  %v5301_v45 = vadd.f32 %v5300_v34, %v10884_v23  ;;  %v5343_v54 = vmul.f32 %v10884_v23, %v10884_v23 }
 0x789   :  { %v5392_v20 = vadd.f32 %v5391_v41, %v5342_v39 }
 0x78a   :  { %v5425_v10 = vadd.f32 %v5424_v27, %v5343_v54 }
 0x78c   :  { %v10889_v62 = vpop.f32.mrb[68].mxu0 }
 0x78d   :  { %v5269_v1 = vadd.f32 %v5268_v52, %v10889_v62  ;;  %v5344_v35 = vmul.f32 %v10889_v62, %v10889_v62  ;;  %v10894_v2 = vpop.f32.mrb[69].mxu0 }
 0x78e   :  { %v5302_v56 = vadd.f32 %v5301_v45, %v10894_v2  ;;  %v5345_v53 = vmul.f32 %v10894_v2, %v10894_v2  ;;  %v10899_v32 = vpop.f32.mrb[70].mxu0 }
 0x78f   :  { %v5393_v40 = vadd.f32 %v5392_v20, %v5344_v35  ;;  %v5270_v47 = vadd.f32 %v5269_v1, %v10899_v32  ;;  %v5346_v63 = vmul.f32 %v10899_v32, %v10899_v32  ;;  %v10904_v24 = vpop.f32.mrb[71].mxu0 }
 0x790   :  { %v5426_v29 = vadd.f32 %v5425_v10, %v5345_v53  ;;  %v5303_v49 = vadd.f32 %v5302_v56, %v10904_v24  ;;  %v5347_v7 = vmul.f32 %v10904_v24, %v10904_v24 }
 0x791   :  { %v5394_v18 = vadd.f32 %v5393_v40, %v5346_v63 }
 0x792   :  { %v5427_v31 = vadd.f32 %v5426_v29, %v5347_v7 }
 0x794   :  { %v10924_v19 = vpop.f32.mrb[72].mxu0 }
 0x795   :  { %v5271_v0 = vadd.f32 %v5270_v47, %v10924_v19  ;;  %v5348_v61 = vmul.f32 %v10924_v19, %v10924_v19  ;;  %v10929_v55 = vpop.f32.mrb[73].mxu0 }
 0x796   :  { %v5304_v59 = vadd.f32 %v5303_v49, %v10929_v55  ;;  %v5349_v43 = vmul.f32 %v10929_v55, %v10929_v55  ;;  %v10934_v5 = vpop.f32.mrb[74].mxu0 }
 0x797   :  { %v5395_v33 = vadd.f32 %v5394_v18, %v5348_v61  ;;  %v5272_v44 = vadd.f32 %v5271_v0, %v10934_v5  ;;  %v5350_v12 = vmul.f32 %v10934_v5, %v10934_v5  ;;  %v10942_v14 = vpop.f32.mrb[75].mxu0 }
 0x798   :  { %v5428_v48 = vadd.f32 %v5427_v31, %v5349_v43  ;;  %v5305_v9 = vadd.f32 %v5304_v59, %v10942_v14  ;;  %v5351_v13 = vmul.f32 %v10942_v14, %v10942_v14 }
 0x799   :  { %v5396_v6 = vadd.f32 %v5395_v33, %v5350_v12 }
 0x79a   :  { %v5429_v37 = vadd.f32 %v5428_v48, %v5351_v13 }
 0x79c   :  { %v10947_v22 = vpop.f32.mrb[76].mxu0 }
 0x79d   :  { %v5273_v38 = vadd.f32 %v5272_v44, %v10947_v22  ;;  %v5352_v30 = vmul.f32 %v10947_v22, %v10947_v22  ;;  %v10952_v60 = vpop.f32.mrb[77].mxu0 }
 0x79e   :  { %v5306_v34 = vadd.f32 %v5305_v9, %v10952_v60  ;;  %v5353_v4 = vmul.f32 %v10952_v60, %v10952_v60  ;;  %v10957_v41 = vpop.f32.mrb[78].mxu0 }
 0x79f   :  { %v5397_v52 = vadd.f32 %v5396_v6, %v5352_v30  ;;  %v5274_v39 = vadd.f32 %v5273_v38, %v10957_v41  ;;  %v5354_v27 = vmul.f32 %v10957_v41, %v10957_v41  ;;  %v10962_v45 = vpop.f32.mrb[79].mxu0 }
 0x7a0   :  { %v5430_v54 = vadd.f32 %v5429_v37, %v5353_v4  ;;  %v5307_v20 = vadd.f32 %v5306_v34, %v10962_v45  ;;  %v5355_v10 = vmul.f32 %v10962_v45, %v10962_v45 }
 0x7a1   :  { %v5398_v1 = vadd.f32 %v5397_v52, %v5354_v27 }
 0x7a2   :  { %v5431_v35 = vadd.f32 %v5430_v54, %v5355_v10 }
 0x7a4   :  { %v10967_v56 = vpop.f32.mrb[80].mxu0 }
 0x7a5   :  { %v5275_v53 = vadd.f32 %v5274_v39, %v10967_v56  ;;  %v5356_v40 = vmul.f32 %v10967_v56, %v10967_v56  ;;  %v10972_v47 = vpop.f32.mrb[81].mxu0 }
 0x7a6   :  { %v5308_v63 = vadd.f32 %v5307_v20, %v10972_v47  ;;  %v5357_v57 = vmul.f32 %v10972_v47, %v10972_v47  ;;  %v10977_v51 = vpop.f32.mrb[82].mxu0 }
 0x7a7   :  { %v5399_v21 = vadd.f32 %v5398_v1, %v5356_v40  ;;  %v5276_v29 = vadd.f32 %v5275_v53, %v10977_v51  ;;  %v5358_v49 = vmul.f32 %v10977_v51, %v10977_v51  ;;  %v10982_v7 = vpop.f32.mrb[83].mxu0 }
 0x7a8   :  { %v5432_v18 = vadd.f32 %v5431_v35, %v5357_v57  ;;  %v5309_v31 = vadd.f32 %v5308_v63, %v10982_v7  ;;  %v5359_v58 = vmul.f32 %v10982_v7, %v10982_v7 }
 0x7a9   :  { %v5400_v8 = vadd.f32 %v5399_v21, %v5358_v49 }
 0x7aa   :  { %v5433_v0 = vadd.f32 %v5432_v18, %v5359_v58 }
 0x7ac   :  { %v10987_v61 = vpop.f32.mrb[84].mxu0 }
 0x7ad   :  { %v5277_v59 = vadd.f32 %v5276_v29, %v10987_v61  ;;  %v5360_v43 = vmul.f32 %v10987_v61, %v10987_v61  ;;  %v10992_v46 = vpop.f32.mrb[85].mxu0 }
 0x7ae   :  { %v5310_v33 = vadd.f32 %v5309_v31, %v10992_v46  ;;  %v5361_v44 = vmul.f32 %v10992_v46, %v10992_v46  ;;  %v10997_v12 = vpop.f32.mrb[86].mxu0 }
 0x7af   :  { %v5401_v48 = vadd.f32 %v5400_v8, %v5360_v43  ;;  %v5278_v9 = vadd.f32 %v5277_v59, %v10997_v12  ;;  %v5362_v13 = vmul.f32 %v10997_v12, %v10997_v12  ;;  %v11002_v6 = vpop.f32.mrb[87].mxu0 }
 0x7b0   :  { %v5434_v37 = vadd.f32 %v5433_v0, %v5361_v44  ;;  %v5311_v38 = vadd.f32 %v5310_v33, %v11002_v6  ;;  %v5363_v30 = vmul.f32 %v11002_v6, %v11002_v6 }
 0x7b1   :  { %v5402_v34 = vadd.f32 %v5401_v48, %v5362_v13 }
 0x7b2   :  { %v5435_v4 = vadd.f32 %v5434_v37, %v5363_v30 }
 0x7b4   :  { %v11007_v52 = vpop.f32.mrb[88].mxu0 }
 0x7b5   :  { %v5279_v39 = vadd.f32 %v5278_v9, %v11007_v52  ;;  %v5364_v27 = vmul.f32 %v11007_v52, %v11007_v52  ;;  %v11012_v54 = vpop.f32.mrb[89].mxu0 }
 0x7b6   :  { %v5312_v20 = vadd.f32 %v5311_v38, %v11012_v54  ;;  %v5365_v10 = vmul.f32 %v11012_v54, %v11012_v54  ;;  %v11017_v1 = vpop.f32.mrb[90].mxu0 }
 0x7b7   :  { %12127 = vst [vmem:[#allocation71_spill] sm:$0xff] %v11017_v1  ;;  %v5403_v35 = vadd.f32 %v5402_v34, %v5364_v27  ;;  %v5280_v53 = vadd.f32 %v5279_v39, %v11017_v1  ;;  %v5366_v40 = vmul.f32 %v11017_v1, %v11017_v1  ;;  %v11022_v63 = vpop.f32.mrb[91].mxu0 }
 0x7b8   :  { %v5436_v57 = vadd.f32 %v5435_v4, %v5365_v10  ;;  %v5313_v21 = vadd.f32 %v5312_v20, %v11022_v63  ;;  %v5367_v29 = vmul.f32 %v11022_v63, %v11022_v63 }
 0x7b9   :  { %v5404_v49 = vadd.f32 %v5403_v35, %v5366_v40 }
 0x7ba   :  { %v5437_v18 = vadd.f32 %v5436_v57, %v5367_v29 }
 0x7bc   :  { %v11027_v31 = vpop.f32.mrb[92].mxu0 }
 0x7bd   :  { %12128 = vst [vmem:[#allocation20_spill] sm:$0xff] %v11027_v31  ;;  %v5281_v58 = vadd.f32 %v5280_v53, %v11027_v31  ;;  %v5368_v8 = vmul.f32 %v11027_v31, %v11027_v31  ;;  %v11032_v0 = vpop.f32.mrb[93].mxu0 }
 0x7be   :  { %12129 = vst [vmem:[#allocation48_spill] sm:$0xff] %v11032_v0  ;;  %v5314_v59 = vadd.f32 %v5313_v21, %v11032_v0  ;;  %v5369_v43 = vmul.f32 %v11032_v0, %v11032_v0  ;;  %v11037_v33 = vpop.f32.mrb[94].mxu0 }
 0x7bf   :  { %12130 = vst [vmem:[#allocation91_spill] sm:$0xff] %v11037_v33  ;;  %v5405_v44 = vadd.f32 %v5404_v49, %v5368_v8  ;;  %v5282_v48 = vadd.f32 %v5281_v58, %v11037_v33  ;;  %v5370_v9 = vmul.f32 %v11037_v33, %v11037_v33  ;;  %v11042_v13 = vpop.f32.mrb[95].mxu0 }
 0x7c0   :  { %12131 = vst [vmem:[#allocation70_spill] sm:$0xff] %v11042_v13  ;;  %v5438_v37 = vadd.f32 %v5437_v18, %v5369_v43  ;;  %v5315_v38 = vadd.f32 %v5314_v59, %v11042_v13  ;;  %v5371_v30 = vmul.f32 %v11042_v13, %v11042_v13 }
 0x7c1   :  { %v5406_v34 = vadd.f32 %v5405_v44, %v5370_v9 }
 0x7c2   :  { %v5439_v4 = vadd.f32 %v5438_v37, %v5371_v30 }
 0x7c4   :  { %v11047_v39 = vpop.f32.mrb[96].mxu0 }
 0x7c5   :  { %12132 = vst [vmem:[#allocation47_spill] sm:$0xff] %v11047_v39  ;;  %v5283_v27 = vadd.f32 %v5282_v48, %v11047_v39  ;;  %v5372_v20 = vmul.f32 %v11047_v39, %v11047_v39  ;;  %v11052_v10 = vpop.f32.mrb[97].mxu0 }
 0x7c6   :  { %12133 = vst [vmem:[#allocation55_spill] sm:$0xff] %v11052_v10  ;;  %v5316_v35 = vadd.f32 %v5315_v38, %v11052_v10  ;;  %v5373_v53 = vmul.f32 %v11052_v10, %v11052_v10  ;;  %v11057_v40 = vpop.f32.mrb[98].mxu0 }
 0x7c7   :  { %12134 = vst [vmem:[#allocation107_spill] sm:$0xff] %v11057_v40  ;;  %v5407_v57 = vadd.f32 %v5406_v34, %v5372_v20  ;;  %v5284_v21 = vadd.f32 %v5283_v27, %v11057_v40  ;;  %v5374_v29 = vmul.f32 %v11057_v40, %v11057_v40  ;;  %v11062_v49 = vpop.f32.mrb[99].mxu0 }
 0x7c8   :  { %12135 = vst [vmem:[#allocation54_spill] sm:$0xff] %v11062_v49  ;;  %v5440_v18 = vadd.f32 %v5439_v4, %v5373_v53  ;;  %v5317_v58 = vadd.f32 %v5316_v35, %v11062_v49  ;;  %v5375_v8 = vmul.f32 %v11062_v49, %v11062_v49 }
 0x7c9   :  { %v5408_v59 = vadd.f32 %v5407_v57, %v5374_v29 }
 0x7ca   :  { %v5441_v43 = vadd.f32 %v5440_v18, %v5375_v8 }
 0x7cc   :  { %v11067_v44 = vpop.f32.mrb[100].mxu0 }
 0x7cd   :  { %12136 = vst [vmem:[#allocation94_spill] sm:$0xff] %v11067_v44  ;;  %v5285_v48 = vadd.f32 %v5284_v21, %v11067_v44  ;;  %v5376_v9 = vmul.f32 %v11067_v44, %v11067_v44  ;;  %v11072_v37 = vpop.f32.mrb[101].mxu0 }
 0x7ce   :  { %12137 = vst [vmem:[#allocation95_spill] sm:$0xff] %v11072_v37  ;;  %v5318_v38 = vadd.f32 %v5317_v58, %v11072_v37  ;;  %v5377_v30 = vmul.f32 %v11072_v37, %v11072_v37  ;;  %v11077_v34 = vpop.f32.mrb[102].mxu0 }
 0x7cf   :  { %12138 = vst [vmem:[#allocation57_spill] sm:$0xff] %v11077_v34  ;;  %v5409_v4 = vadd.f32 %v5408_v59, %v5376_v9  ;;  %v5286_v27 = vadd.f32 %v5285_v48, %v11077_v34  ;;  %v5378_v20 = vmul.f32 %v11077_v34, %v11077_v34  ;;  %v11082_v35 = vpop.f32.mrb[103].mxu0 }
 0x7d0   :  { %12139 = vst [vmem:[#allocation53_spill] sm:$0xff] %v11082_v35  ;;  %v5442_v53 = vadd.f32 %v5441_v43, %v5377_v30  ;;  %v5319_v57 = vadd.f32 %v5318_v38, %v11082_v35  ;;  %v5379_v21 = vmul.f32 %v11082_v35, %v11082_v35 }
 0x7d1   :  { %v5410_v29 = vadd.f32 %v5409_v4, %v5378_v20 }
 0x7d2   :  { %v5443_v18 = vadd.f32 %v5442_v53, %v5379_v21 }
 0x7d4   :  { %v11087_v58 = vpop.f32.mrb[104].mxu0 }
 0x7d5   :  { %12140 = vst [vmem:[#allocation56_spill] sm:$0xff] %v11087_v58  ;;  %v5287_v8 = vadd.f32 %v5286_v27, %v11087_v58  ;;  %v5380_v59 = vmul.f32 %v11087_v58, %v11087_v58  ;;  %v11092_v48 = vpop.f32.mrb[105].mxu0 }
 0x7d6   :  { %12141 = vst [vmem:[#allocation83_spill] sm:$0xff] %v11092_v48  ;;  %v5320_v9 = vadd.f32 %v5319_v57, %v11092_v48  ;;  %v5381_v43 = vmul.f32 %v11092_v48, %v11092_v48  ;;  %v11097_v38 = vpop.f32.mrb[106].mxu0 }
 0x7d7   :  { %12142 = vst [vmem:[#allocation8_spill] sm:$0xff] %v11097_v38  ;;  %v5411_v30 = vadd.f32 %v5410_v29, %v5380_v59  ;;  %v5288_v4 = vadd.f32 %v5287_v8, %v11097_v38  ;;  %v5382_v20 = vmul.f32 %v11097_v38, %v11097_v38  ;;  %v11102_v53 = vpop.f32.mrb[107].mxu0 }
 0x7d8   :  { %12143 = vst [vmem:[#allocation110_spill] sm:$0xff] %v11102_v53  ;;  %v5444_v27 = vadd.f32 %v5443_v18, %v5381_v43  ;;  %v5321_v21 = vadd.f32 %v5320_v9, %v11102_v53  ;;  %v5383_v58 = vmul.f32 %v11102_v53, %v11102_v53 }
 0x7d9   :  { %v5412_v57 = vadd.f32 %v5411_v30, %v5382_v20 }
 0x7da   :  { %v5445_v34 = vadd.f32 %v5444_v27, %v5383_v58 }
 0x7dc   :  { %v11107_v44 = vpop.f32.mrb[108].mxu0 }
 0x7dd   :  { %12144 = vst [vmem:[#allocation109_spill] sm:$0xff] %v11107_v44  ;;  %v5289_v48 = vadd.f32 %v5288_v4, %v11107_v44  ;;  %v5384_v29 = vmul.f32 %v11107_v44, %v11107_v44  ;;  %v11112_v8 = vpop.f32.mrb[109].mxu0 }
 0x7de   :  { %12145 = vst [vmem:[#allocation81_spill] sm:$0xff] %v11112_v8  ;;  %v5322_v59 = vadd.f32 %v5321_v21, %v11112_v8  ;;  %v5385_v18 = vmul.f32 %v11112_v8, %v11112_v8  ;;  %v5259_v9 = vpop.f32.mrb[110].mxu0 }
 0x7df   :  { %v5413_v43 = vadd.f32 %v5412_v57, %v5384_v29  ;;  %v5290_v38 = vadd.f32 %v5289_v48, %v5259_v9  ;;  %v5386_v53 = vmul.f32 %v5259_v9, %v5259_v9  ;;  %v5261_v30 = vpop.f32.mrb[111].mxu0 }
 0x7e0   :  { %v5446_v58 = vadd.f32 %v5445_v34, %v5385_v18  ;;  %v5323_v20 = vadd.f32 %v5322_v59, %v5261_v30  ;;  %v5387_v27 = vmul.f32 %v5261_v30, %v5261_v30 }
 0x7e1   :  { %v5291_v35 = vrot.slane %v5290_v38, 4  ;;  %v5414_v4 = vadd.f32 %v5413_v43, %v5386_v53 }
 0x7e2   :  { %v5324_v37 = vrot.slane %v5323_v20, 4  ;;  %v5447_v40 = vadd.f32 %v5446_v58, %v5387_v27 }
 0x7e3   :  { %v5292_v44 = vadd.f32 %v5291_v35, %v5290_v38  ;;  %v5415_v39 = vrot.slane %v5414_v4, 4 }
 0x7e4   :  { %v5325_v49 = vadd.f32 %v5324_v37, %v5323_v20  ;;  %v5448_v10 = vrot.slane %v5447_v40, 4 }
 0x7e5   :  { %v5293_v21 = vrot.slane %v5292_v44, 2  ;;  %v5416_v33 = vadd.f32 %v5415_v39, %v5414_v4 }
 0x7e6   :  { %v5326_v31 = vrot.slane %v5325_v49, 2  ;;  %v5449_v8 = vadd.f32 %v5448_v10, %v5447_v40 }
 0x7e7   :  { %v5294_v13 = vadd.f32 %v5293_v21, %v5292_v44  ;;  %v5417_v57 = vrot.slane %v5416_v33, 2 }
 0x7e8   :  { %v5327_v48 = vadd.f32 %v5326_v31, %v5325_v49  ;;  %v5450_v29 = vrot.slane %v5449_v8, 2 }
 0x7e9   :  { %v5295_v0 = vrot.slane %v5294_v13, 1  ;;  %v5418_v34 = vadd.f32 %v5417_v57, %v5416_v33 }
 0x7ea   :  { %v5328_v59 = vrot.slane %v5327_v48, 1  ;;  %v5451_v18 = vadd.f32 %v5450_v29, %v5449_v8 }
 0x7eb   :  { %v5296_v1 = vadd.f32 %v5295_v0, %v5294_v13  ;;  %v5419_v53 = vrot.slane %v5418_v34, 1  ;;  %v11120_v0 = vld [vmem:[%s11400_s1 + $0x20] sm:$0xff]  ;;  %v6748_v13 = vld [vmem:[%s11400_s1 + $0x28] sm:$0xff]  ;;  %s6803_s1 = smov [#allocation5]  }
 0x7ec   :  { %v5329_v43 = vadd.f32 %v5328_v59, %v5327_v48  ;;  %v5452_v58 = vrot.slane %v5451_v18, 1  ;;  %v12146_v48 = vld [vmem:[#allocation82_spill] sm:$0xff]  ;;  %s6054_s22 = sshll.u32 %s6803_s1, 4  ;;  %s6055_s22 = int_to_ptr.vmem [resolvable:$true] %s6054_s22 }
 0x7ed   :  { %v5330_v35 = vmul.f32 0.004464286, %v5296_v1  ;;  %v5420_v38 = vadd.f32 %v5419_v53, %v5418_v34  ;;  %s6771_s23 = scalar_lea.vmem %s6055_s22, 3584  ;;  %p6776_p9 = scmp.lt.s32.totalorder %s6055_s22, %s6055_s22 }
 0x7ee   :  { %v5331_v37 = vmul.f32 0.004464286, %v5329_v43  ;;  %v5453_v20 = vadd.f32 %v5452_v58, %v5451_v18  ;;  %p6772_p8 = scmp.ne.s32.totalorder %s6055_s22, %s6771_s23  ;;  %p6777_p10 = scmp.lt.s32.totalorder %s6771_s23, %s6771_s23 }
 0x7ef   :  { %v5454_v27 = vmul.f32 0.004464286, %v5420_v38  ;;  %v5456_v39 = vmul.f32 %v5330_v35, %v5330_v35 }
 0x7f0   :  { %v5455_v4 = vmul.f32 0.004464286, %v5453_v20  ;;  %v5457_v10 = vmul.f32 %v5331_v37, %v5331_v37  ;;  %p6778_p11 = por %p6777_p10, %p6776_p9 }
 0x7f1   :  { %v5458_v40 = vsub.f32 %v5454_v27, %v5456_v39 }
 0x7f2   :  { %v5459_v44 = vsub.f32 %v5455_v4, %v5457_v10  ;;  %v12147_v4 = vld [vmem:[#allocation106_spill] sm:$0xff]  ;;  %p6779_p12 = pnand %p6778_p11, %p6772_p8 }
 0x7f3   :  { %v5460_v31 = vadd.f32 0.8, %v5458_v40 }
 0x7f4   :  { %v5461_v49 = vadd.f32 0.8, %v5459_v44 }
 0x7f5   :  { %6733 = vrsqrt.f32 %v5460_v31 }
 0x7f6   :  { %6735 = vrsqrt.f32 %v5461_v49 }
 0x7ff   :  { %v6734_v33 = vpop.eup %6733 }
 0x800   :  { %v6736_v8 = vpop.eup %6735  ;;  %v5464_v1 = vmul.f32 %v11120_v0, %v6734_v33 }
 0x801   :  { %v5465_v21 = vmul.f32 %v6748_v13, %v6736_v8 }
 0x802   :  { %v5466_v57 = vmul.f32 %v5464_v1, %v5330_v35  ;;  %v11127_v29 = vrot.slane %v5464_v1, %v12146_v48 }
 0x803   :  { %v5467_v34 = vmul.f32 %v5465_v21, %v5331_v37  ;;  %v11130_v59 = vrot.slane %v5465_v21, %v12146_v48 }
 0x804   :  { %v5470_v18 = vrot.slane %v5466_v57, 7  ;;  %v5538_v53 = vmul.f32 %v11127_v29, %v5259_v9  ;;  %v5484_v43 = vmul.f32 %v11127_v29, %v10829_v28  ;;  %v5486_v58 = vmul.f32 %v11127_v29, %v10833_v50 }
 0x805   :  { %v5471_v38 = vrot.slane %v5467_v34, 7  ;;  %v5539_v20 = vmul.f32 %v11130_v59, %v5261_v30  ;;  %v5485_v35 = vmul.f32 %v11130_v59, %v10831_v42  ;;  %v5487_v37 = vmul.f32 %v11130_v59, %v10841_v16 }
 0x806   :  { %v5474_v27 = vsub.f32 %v11120_v0, %v5470_v18  ;;  %v5489_v9 = vmul.f32 %v11130_v59, %v10854_v26  ;;  %v5491_v28 = vmul.f32 %v11130_v59, %v10864_v15  ;;  %v5488_v50 = vmul.f32 %v11127_v29, %v10849_v36 }
 0x807   :  { %v5475_v39 = vsub.f32 %v6748_v13, %v5471_v38  ;;  %v5490_v30 = vmul.f32 %v11127_v29, %v10859_v17  ;;  %v5493_v42 = vmul.f32 %v11130_v59, %v10874_v3  ;;  %v5495_v16 = vmul.f32 %v11130_v59, %v10884_v23 }
 0x808   :  { %v11156_v10 = vrot.slane %v5474_v27, %v12147_v4  ;;  %v5492_v26 = vmul.f32 %v11127_v29, %v10869_v11  ;;  %v5494_v15 = vmul.f32 %v11127_v29, %v10879_v25  ;;  %v5497_v36 = vmul.f32 %v11130_v59, %v10894_v2 }
 0x809   :  { %v11165_v17 = vrot.slane %v5475_v39, %v12147_v4  ;;  %v5499_v3 = vmul.f32 %v11130_v59, %v10904_v24  ;;  %v5496_v23 = vmul.f32 %v11127_v29, %v10889_v62  ;;  %v5498_v40 = vmul.f32 %v11127_v29, %v10899_v32 }
 0x80a   :  { %v11174_v11 = vadd.f32 %v11156_v10, %v5538_v53  ;;  %v5548_v25 = vadd.f32 %v11156_v10, %v5484_v43  ;;  %v5550_v44 = vadd.f32 %v11156_v10, %v5486_v58  ;;  %v5552_v2 = vadd.f32 %v11156_v10, %v5488_v50 }
 0x80b   :  { %v11180_v31 = vadd.f32 %v11165_v17, %v5539_v20  ;;  %v5549_v24 = vadd.f32 %v11165_v17, %v5485_v35  ;;  %v5551_v49 = vadd.f32 %v11165_v17, %v5487_v37  ;;  %v5553_v62 = vadd.f32 %v11165_v17, %v5489_v9 }
 0x80c   :  { %v5604_v33 = vmul.f32 0.2, %v5548_v25  ;;  %v5606_v32 = vmul.f32 0.2, %v5550_v44  ;;  %v5555_v8 = vadd.f32 %v11165_v17, %v5491_v28  ;;  %v11187_v1 = vmul.f32 0.2, %v11174_v11 }
 0x80d   :  { %v5605_v13 = vmul.f32 0.2, %v5549_v24  ;;  %v5607_v21 = vmul.f32 0.2, %v5551_v49  ;;  %v5554_v57 = vadd.f32 %v11156_v10, %v5490_v30  ;;  %v5609_v18 = vmul.f32 0.2, %v5553_v62 }
 0x80e   :  { %v5660_v48 = vmax.f32 %v5548_v25, %v5604_v33  ;;  %v5662_v34 = vmax.f32 %v5550_v44, %v5606_v32  ;;  %v5611_v53 = vmul.f32 0.2, %v5555_v8  ;;  %v11191_v43 = vmul.f32 0.2, %v11180_v31 }
 0x80f   :  { %v5661_v58 = vmax.f32 %v5549_v24, %v5605_v13  ;;  %v5663_v38 = vmax.f32 %v5551_v49, %v5607_v21  ;;  %v5608_v20 = vmul.f32 0.2, %v5552_v2  ;;  %v5665_v37 = vmax.f32 %v5553_v62, %v5609_v18 }
 0x810   :  { %v5716_v35 = vpack.c.bf16 %v5662_v34, %v5660_v48  ;;  %v5667_v27 = vmax.f32 %v5555_v8, %v5611_v53  ;;  %v5610_v9 = vmul.f32 0.2, %v5554_v57  ;;  %v5557_v39 = vadd.f32 %v11165_v17, %v5493_v42 }
 0x811   :  { %v5717_v28 = vpack.c.bf16 %v5663_v38, %v5661_v58  ;;  %v5664_v50 = vmax.f32 %v5552_v2, %v5608_v20  ;;  %v5559_v30 = vadd.f32 %v11165_v17, %v5495_v16  ;;  %v5556_v44 = vadd.f32 %v11156_v10, %v5492_v26 }
 0x812   :  { %v5719_v4 = vpack.c.bf16 %v5667_v27, %v5665_v37  ;;  %v5666_v25 = vmax.f32 %v5554_v57, %v5610_v9  ;;  %v5558_v33 = vadd.f32 %v11156_v10, %v5494_v15  ;;  %v5613_v24 = vmul.f32 0.2, %v5557_v39 }
 0x813   :  { %5908 = vmatprep.mubr.bf16.mxu1 %v5717_v28  ;;  %v5615_v49 = vmul.f32 0.2, %v5559_v30  ;;  %v5561_v32 = vadd.f32 %v11165_v17, %v5497_v36  ;;  %v5563_v62 = vadd.f32 %v11165_v17, %v5499_v3  ;;  %v5612_v2 = vmul.f32 0.2, %v5556_v44 }
 0x814   :  { %5909 = vmatmul.mubr.bf16.vlgmr.msra.gmra.mrb[112].mxu1 %v5716_v35  ;;  %v5718_v8 = vpack.c.bf16 %v5666_v25, %v5664_v50  ;;  %v5614_v13 = vmul.f32 0.2, %v5558_v33  ;;  %v5560_v42 = vadd.f32 %v11156_v10, %v5496_v23  ;;  %v5669_v16 = vmax.f32 %v5557_v39, %v5613_v24 }
 0x815   :  { %5916 = vmatprep.mubr.bf16.mxu1 %v5719_v4  ;;  %v5671_v21 = vmax.f32 %v5559_v30, %v5615_v49  ;;  %v5617_v57 = vmul.f32 0.2, %v5561_v32  ;;  %v5619_v26 = vmul.f32 0.2, %v5563_v62  ;;  %v5668_v48 = vmax.f32 %v5556_v44, %v5612_v2 }
 0x816   :  { %v5670_v15 = vmax.f32 %v5558_v33, %v5614_v13  ;;  %v5562_v34 = vadd.f32 %v11156_v10, %v5498_v40  ;;  %v5616_v18 = vmul.f32 0.2, %v5560_v42  ;;  %v5501_v3 = vmul.f32 %v11130_v59, %v10929_v55 }
 0x817   :  { %v5721_v53 = vpack.c.bf16 %v5671_v21, %v5669_v16  ;;  %v5673_v36 = vmax.f32 %v5561_v32, %v5617_v57  ;;  %v5675_v58 = vmax.f32 %v5563_v62, %v5619_v26  ;;  %v5503_v23 = vmul.f32 %v11130_v59, %v10942_v14 }
 0x818   :  { %v5720_v38 = vpack.c.bf16 %v5670_v15, %v5668_v48  ;;  %v5618_v20 = vmul.f32 0.2, %v5562_v34  ;;  %v5672_v35 = vmax.f32 %v5560_v42, %v5616_v18  ;;  %v5565_v27 = vadd.f32 %v11165_v17, %v5501_v3 }
 0x819   :  { %v5723_v37 = vpack.c.bf16 %v5675_v58, %v5673_v36  ;;  %v5500_v9 = vmul.f32 %v11127_v29, %v10924_v19  ;;  %v5502_v40 = vmul.f32 %v11127_v29, %v10934_v5  ;;  %v5567_v50 = vadd.f32 %v11165_v17, %v5503_v23 }
 0x81a   :  { %v5674_v28 = vmax.f32 %v5562_v34, %v5618_v20  ;;  %v5505_v55 = vmul.f32 %v11130_v59, %v10952_v60  ;;  %v5507_v39 = vmul.f32 %v11130_v59, %v10962_v45  ;;  %v5621_v30 = vmul.f32 0.2, %v5565_v27 }
 0x81b   :  { %v5564_v14 = vadd.f32 %v11156_v10, %v5500_v9  ;;  %v5566_v4 = vadd.f32 %v11156_v10, %v5502_v40  ;;  %v5504_v19 = vmul.f32 %v11127_v29, %v10947_v22  ;;  %v5623_v5 = vmul.f32 0.2, %v5567_v50 }
 0x81c   :  { %5917 = vmatmul.mubr.bf16.gmra.mrb[116].mxu1 %v5718_v8  ;;  %v11219_v25 = vpack.c.bf16 %v5674_v28, %v5672_v35  ;;  %v5569_v44 = vadd.f32 %v11165_v17, %v5505_v55  ;;  %v5571_v33 = vadd.f32 %v11165_v17, %v5507_v39  ;;  %v5677_v60 = vmax.f32 %v5565_v27, %v5621_v30 }
 0x81d   :  { %5924 = vmatprep.mubr.bf16.mxu1 %v5721_v53  ;;  %v5620_v24 = vmul.f32 0.2, %v5564_v14  ;;  %v5622_v45 = vmul.f32 0.2, %v5566_v4  ;;  %v5506_v49 = vmul.f32 %v11127_v29, %v10957_v41  ;;  %v5679_v32 = vmax.f32 %v5567_v50, %v5623_v5 }
 0x81e   :  { %v5625_v62 = vmul.f32 0.2, %v5569_v44  ;;  %v5627_v2 = vmul.f32 0.2, %v5571_v33  ;;  %v5568_v22 = vadd.f32 %v11156_v10, %v5504_v19  ;;  %v5509_v16 = vmul.f32 %v11130_v59, %v10972_v47 }
 0x81f   :  { %v5676_v8 = vmax.f32 %v5564_v14, %v5620_v24  ;;  %v5678_v13 = vmax.f32 %v5566_v4, %v5622_v45  ;;  %v5570_v42 = vadd.f32 %v11156_v10, %v5506_v49  ;;  %v5725_v21 = vpack.c.bf16 %v5679_v32, %v5677_v60 }
 0x820   :  { %v5681_v57 = vmax.f32 %v5569_v44, %v5625_v62  ;;  %v5683_v26 = vmax.f32 %v5571_v33, %v5627_v2  ;;  %v5624_v48 = vmul.f32 0.2, %v5568_v22  ;;  %v5511_v41 = vmul.f32 %v11130_v59, %v10982_v7 }
 0x821   :  { %v11229_v15 = vpack.c.bf16 %v5678_v13, %v5676_v8  ;;  %v5626_v34 = vmul.f32 0.2, %v5570_v42  ;;  %v5573_v18 = vadd.f32 %v11165_v17, %v5509_v16  ;;  %v5508_v58 = vmul.f32 %v11127_v29, %v10967_v56  ;;  %v12149_v16 = vld [vmem:[#allocation48_spill] sm:$0xff] }
 0x822   :  { %v11234_v53 = vpack.c.bf16 %v5683_v26, %v5681_v57  ;;  %v5680_v36 = vmax.f32 %v5568_v22, %v5624_v48  ;;  %v5510_v47 = vmul.f32 %v11127_v29, %v10977_v51  ;;  %v5575_v20 = vadd.f32 %v11165_v17, %v5511_v41  ;;  %v12148_v22 = vld [vmem:[#allocation71_spill] sm:$0xff]  ;;  %v12150_v41 = vld [vmem:[#allocation70_spill] sm:$0xff] }
 0x823   :  { %v5682_v3 = vmax.f32 %v5570_v42, %v5626_v34  ;;  %v5629_v35 = vmul.f32 0.2, %v5573_v18  ;;  %v5513_v23 = vmul.f32 %v11130_v59, %v10992_v46  ;;  %v5572_v7 = vadd.f32 %v11156_v10, %v5508_v58  ;;  %v12151_v58 = vld [vmem:[#allocation20_spill] sm:$0xff] }
 0x824   :  { %5925 = vmatmul.mubr.bf16.gmra.mrb[120].mxu1 %v5720_v38  ;;  %v5574_v27 = vadd.f32 %v11156_v10, %v5510_v47  ;;  %v5515_v9 = vmul.f32 %v11130_v59, %v11002_v6  ;;  %v5512_v56 = vmul.f32 %v11127_v29, %v10987_v61  ;;  %v5631_v40 = vmul.f32 0.2, %v5575_v20 }
 0x825   :  { %5932 = vmatprep.mubr.bf16.mxu1 %v5723_v37  ;;  %v11249_v51 = vpack.c.bf16 %v5682_v3, %v5680_v36  ;;  %v5685_v28 = vmax.f32 %v5573_v18, %v5629_v35  ;;  %v5577_v50 = vadd.f32 %v11165_v17, %v5513_v23  ;;  %v5628_v55 = vmul.f32 0.2, %v5572_v7 }
 0x826   :  { %v5630_v46 = vmul.f32 0.2, %v5574_v27  ;;  %v5579_v38 = vadd.f32 %v11165_v17, %v5515_v9  ;;  %v5514_v39 = vmul.f32 %v11127_v29, %v10997_v12  ;;  %v5687_v30 = vmax.f32 %v5575_v20, %v5631_v40 }
 0x827   :  { %v5633_v14 = vmul.f32 0.2, %v5577_v50  ;;  %v5576_v6 = vadd.f32 %v11156_v10, %v5512_v56  ;;  %v5517_v61 = vmul.f32 %v11130_v59, %v11012_v54  ;;  %v5684_v37 = vmax.f32 %v5572_v7, %v5628_v55  ;;  %v12152_v7 = vld [vmem:[#allocation91_spill] sm:$0xff] }
 0x828   :  { %v5686_v4 = vmax.f32 %v5574_v27, %v5630_v46  ;;  %v5635_v19 = vmul.f32 0.2, %v5579_v38  ;;  %v5578_v5 = vadd.f32 %v11156_v10, %v5514_v39  ;;  %v11259_v44 = vpack.c.bf16 %v5687_v30, %v5685_v28  ;;  %v12153_v56 = vld [vmem:[#allocation55_spill] sm:$0xff] }
 0x829   :  { %v5689_v33 = vmax.f32 %v5577_v50, %v5633_v14  ;;  %v5632_v60 = vmul.f32 0.2, %v5576_v6  ;;  %v5519_v24 = vmul.f32 %v11130_v59, %v11022_v63  ;;  %v5581_v32 = vadd.f32 %v11165_v17, %v5517_v61  ;;  %v12154_v14 = vld [vmem:[#allocation54_spill] sm:$0xff] }
 0x82a   :  { %v11263_v12 = vpack.c.bf16 %v5686_v4, %v5684_v37  ;;  %v5691_v45 = vmax.f32 %v5579_v38, %v5635_v19  ;;  %v5634_v49 = vmul.f32 0.2, %v5578_v5  ;;  %v5516_v2 = vmul.f32 %v11127_v29, %v11007_v52  ;;  %v12155_v19 = vld [vmem:[#allocation47_spill] sm:$0xff] }
 0x82b   :  { %v5688_v62 = vmax.f32 %v5576_v6, %v5632_v60  ;;  %v5583_v54 = vadd.f32 %v11165_v17, %v5519_v24  ;;  %v5518_v8 = vmul.f32 %v11127_v29, %v12148_v22  ;;  %v5637_v42 = vmul.f32 0.2, %v5581_v32 }
 0x82c   :  { %5933 = vmatmul.mubr.bf16.gmra.mrb[124].mxu1 %v11219_v25  ;;  %v11272_v13 = vpack.c.bf16 %v5691_v45, %v5689_v33  ;;  %v5690_v63 = vmax.f32 %v5578_v5, %v5634_v49  ;;  %v5521_v57 = vmul.f32 %v11130_v59, %v12149_v16  ;;  %v5580_v48 = vadd.f32 %v11156_v10, %v5516_v2  ;;  %v12156_v45 = vld [vmem:[#allocation107_spill] sm:$0xff] }
 0x82d   :  { %5940 = vmatprep.mubr.bf16.mxu1 %v5725_v21  ;;  %v5639_v26 = vmul.f32 0.2, %v5583_v54  ;;  %v5582_v34 = vadd.f32 %v11156_v10, %v5518_v8  ;;  %v5523_v52 = vmul.f32 %v11130_v59, %v12150_v41  ;;  %v5693_v36 = vmax.f32 %v5581_v32, %v5637_v42  ;;  %v12157_v2 = vld [vmem:[#allocation95_spill] sm:$0xff]  ;;  %v12158_v42 = vld [vmem:[#allocation53_spill] sm:$0xff] }
 0x82e   :  { %v11280_v18 = vpack.c.bf16 %v5690_v63, %v5688_v62  ;;  %v5585_v25 = vadd.f32 %v11165_v17, %v5521_v57  ;;  %v5520_v47 = vmul.f32 %v11127_v29, %v12151_v58  ;;  %v5636_v20 = vmul.f32 0.2, %v5580_v48 }
 0x82f   :  { %v5695_v3 = vmax.f32 %v5583_v54, %v5639_v26  ;;  %v5638_v35 = vmul.f32 0.2, %v5582_v34  ;;  %v5587_v21 = vadd.f32 %v11165_v17, %v5523_v52  ;;  %v5522_v27 = vmul.f32 %v11127_v29, %v12152_v7 }
 0x830   :  { %v5641_v23 = vmul.f32 0.2, %v5585_v25  ;;  %v5584_v9 = vadd.f32 %v11156_v10, %v5520_v47  ;;  %v5525_v40 = vmul.f32 %v11130_v59, %v12153_v56  ;;  %v5692_v50 = vmax.f32 %v5580_v48, %v5636_v20 }
 0x831   :  { %v11291_v28 = vpack.c.bf16 %v5695_v3, %v5693_v36  ;;  %v5694_v55 = vmax.f32 %v5582_v34, %v5638_v35  ;;  %v5643_v46 = vmul.f32 0.2, %v5587_v21  ;;  %v5586_v39 = vadd.f32 %v11156_v10, %v5522_v27  ;;  %v12160_v3 = vld [vmem:[#allocation57_spill] sm:$0xff]  ;;  %v12161_v27 = vld [vmem:[#allocation83_spill] sm:$0xff] }
 0x832   :  { %v5697_v38 = vmax.f32 %v5585_v25, %v5641_v23  ;;  %v5640_v30 = vmul.f32 0.2, %v5584_v9  ;;  %v5527_v6 = vmul.f32 %v11130_v59, %v12154_v14  ;;  %v5589_v4 = vadd.f32 %v11165_v17, %v5525_v40  ;;  %v12163_v14 = vld [vmem:[#allocation56_spill] sm:$0xff] }
 0x833   :  { %v11296_v61 = vpack.c.bf16 %v5694_v55, %v5692_v50  ;;  %v5699_v37 = vmax.f32 %v5587_v21, %v5643_v46  ;;  %v5524_v5 = vmul.f32 %v11127_v29, %v12155_v19  ;;  %v5642_v33 = vmul.f32 0.2, %v5586_v39  ;;  %v12162_v55 = vld [vmem:[#allocation110_spill] sm:$0xff] }
 0x834   :  { %5941 = vmatmul.mubr.bf16.gmra.mrb[128].mxu1 %v11229_v15  ;;  %v5696_v60 = vmax.f32 %v5584_v9, %v5640_v30  ;;  %v5591_v24 = vadd.f32 %v11165_v17, %v5527_v6  ;;  %v5526_v49 = vmul.f32 %v11127_v29, %v12156_v45  ;;  %v5645_v62 = vmul.f32 0.2, %v5589_v4  ;;  %v12165_v45 = vld [vmem:[#allocation81_spill] sm:$0xff] }
 0x835   :  { %5948 = vmatprep.mubr.bf16.mxu1 %v11234_v53  ;;  %v11306_v32 = vpack.c.bf16 %v5699_v37, %v5697_v38  ;;  %v5588_v54 = vadd.f32 %v11156_v10, %v5524_v5  ;;  %v5529_v22 = vmul.f32 %v11130_v59, %v12157_v2  ;;  %v5698_v8 = vmax.f32 %v5586_v39, %v5642_v33  ;;  %v12159_v53 = vld [vmem:[#allocation94_spill] sm:$0xff]  ;;  %v12164_v5 = vld [vmem:[#allocation8_spill] sm:$0xff] }
 0x836   :  { %v5647_v63 = vmul.f32 0.2, %v5591_v24  ;;  %v5590_v15 = vadd.f32 %v11156_v10, %v5526_v49  ;;  %v5531_v16 = vmul.f32 %v11130_v59, %v12158_v42  ;;  %v5701_v57 = vmax.f32 %v5589_v4, %v5645_v62 }
 0x837   :  { %v5644_v26 = vmul.f32 0.2, %v5588_v54  ;;  %v5593_v48 = vadd.f32 %v11165_v17, %v5529_v22  ;;  %v5528_v34 = vmul.f32 %v11127_v29, %v12159_v53  ;;  %v5734_v41 = vpack.c.bf16 %v5698_v8, %v5696_v60  ;;  %v12166_v22 = vld [vmem:[#allocation109_spill] sm:$0xff] }
 0x838   :  { %v5703_v52 = vmax.f32 %v5591_v24, %v5647_v63  ;;  %v5646_v36 = vmul.f32 0.2, %v5590_v15  ;;  %v5595_v25 = vadd.f32 %v11165_v17, %v5531_v16  ;;  %v5530_v20 = vmul.f32 %v11127_v29, %v12160_v3 }
 0x839   :  { %v5700_v58 = vmax.f32 %v5588_v54, %v5644_v26  ;;  %v5649_v47 = vmul.f32 0.2, %v5593_v48  ;;  %v5592_v35 = vadd.f32 %v11156_v10, %v5528_v34  ;;  %v5533_v9 = vmul.f32 %v11130_v59, %v12161_v27 }
 0x83a   :  { %v5737_v21 = vpack.c.bf16 %v5703_v52, %v5701_v57  ;;  %v5702_v23 = vmax.f32 %v5590_v15, %v5646_v36  ;;  %v5651_v7 = vmul.f32 0.2, %v5595_v25  ;;  %v5594_v40 = vadd.f32 %v11156_v10, %v5530_v20 }
 0x83b   :  { %v5705_v56 = vmax.f32 %v5593_v48, %v5649_v47  ;;  %v5648_v50 = vmul.f32 0.2, %v5592_v35  ;;  %v5535_v46 = vmul.f32 %v11130_v59, %v12162_v55  ;;  %v5597_v30 = vadd.f32 %v11165_v17, %v5533_v9 }
 0x83c   :  { %5949 = vmatmul.mubr.bf16.gmra.mrb[132].mxu1 %v11249_v51  ;;  %v5736_v38 = vpack.c.bf16 %v5702_v23, %v5700_v58  ;;  %v5707_v39 = vmax.f32 %v5595_v25, %v5651_v7  ;;  %v5532_v6 = vmul.f32 %v11127_v29, %v12163_v14  ;;  %v5650_v37 = vmul.f32 0.2, %v5594_v40 }
 0x83d   :  { %5956 = vmatprep.mubr.bf16.mxu1 %v11259_v44  ;;  %v5704_v4 = vmax.f32 %v5592_v35, %v5648_v50  ;;  %v5599_v19 = vadd.f32 %v11165_v17, %v5535_v46  ;;  %v5534_v33 = vmul.f32 %v11127_v29, %v12164_v5  ;;  %v5653_v24 = vmul.f32 0.2, %v5597_v30 }
 0x83e   :  { %v5739_v60 = vpack.c.bf16 %v5707_v39, %v5705_v56  ;;  %v5596_v51 = vadd.f32 %v11156_v10, %v5532_v6  ;;  %v5537_v49 = vmul.f32 %v11130_v59, %v12165_v45  ;;  %v5706_v62 = vmax.f32 %v5594_v40, %v5650_v37 }
 0x83f   :  { %v5655_v54 = vmul.f32 0.2, %v5599_v19  ;;  %v5598_v2 = vadd.f32 %v11156_v10, %v5534_v33  ;;  %v5536_v44 = vmul.f32 %v11127_v29, %v12166_v22  ;;  %v5709_v8 = vmax.f32 %v5597_v30, %v5653_v24 }
 0x840   :  { %v5652_v63 = vmul.f32 0.2, %v5596_v51  ;;  %v5601_v15 = vadd.f32 %v11165_v17, %v5537_v49  ;;  %v5738_v42 = vpack.c.bf16 %v5706_v62, %v5704_v4  ;;  %v5715_v48 = vmax.f32 %v11180_v31, %v11191_v43 }
 0x841   :  { %v5711_v16 = vmax.f32 %v5599_v19, %v5655_v54  ;;  %v5654_v57 = vmul.f32 0.2, %v5598_v2  ;;  %v5600_v26 = vadd.f32 %v11156_v10, %v5536_v44  ;;  %v5714_v29 = vmax.f32 %v11174_v11, %v11187_v1  ;;  %v12167_v11 = vld [vmem:[#allocation51_spill] sm:$0xff] }
 0x842   :  { %v5708_v59 = vmax.f32 %v5596_v51, %v5652_v63  ;;  %v5657_v53 = vmul.f32 0.2, %v5601_v15  ;;  %v11354_v31 = vrot.slane %v11120_v0, %v12167_v11 }
 0x843   :  { %v5741_v34 = vpack.c.bf16 %v5711_v16, %v5709_v8  ;;  %v5710_v52 = vmax.f32 %v5598_v2, %v5654_v57  ;;  %v5656_v36 = vmul.f32 0.2, %v5600_v26 }
 0x844   :  { %5957 = vmatmul.mubr.bf16.gmra.mrb[136].mxu1 %v11263_v12  ;;  %v5713_v25 = vmax.f32 %v5601_v15, %v5657_v53 }
 0x845   :  { %5964 = vmatprep.mubr.bf16.mxu1 %v11272_v13  ;;  %v5740_v17 = vpack.c.bf16 %v5710_v52, %v5708_v59  ;;  %v5712_v58 = vmax.f32 %v5600_v26, %v5656_v36 }
 0x846   :  { %v5743_v47 = vpack.c.bf16 %v5715_v48, %v5713_v25 }
 0x847   :  { %v5742_v10 = vpack.c.bf16 %v5714_v29, %v5712_v58 }
 0x84c   :  { %5965 = vmatmul.mubr.bf16.gmra.mrb[140].mxu1 %v11280_v18 }
 0x84d   :  { %5972 = vmatprep.mubr.bf16.mxu1 %v11291_v28 }
 0x854   :  { %5973 = vmatmul.mubr.bf16.gmra.mrb[144].mxu1 %v11296_v61 }
 0x855   :  { %5980 = vmatprep.mubr.bf16.mxu1 %v11306_v32 }
 0x85c   :  { %5981 = vmatmul.mubr.bf16.gmra.mrb[148].mxu1 %v5734_v41 }
 0x85d   :  { %5988 = vmatprep.mubr.bf16.mxu1 %v5737_v21 }
 0x864   :  { %5989 = vmatmul.mubr.bf16.gmra.mrb[152].mxu1 %v5736_v38 }
 0x865   :  { %5996 = vmatprep.mubr.bf16.mxu1 %v5739_v60 }
 0x86c   :  { %5997 = vmatmul.mubr.bf16.gmra.mrb[156].mxu1 %v5738_v42 }
 0x86d   :  { %6004 = vmatprep.mubr.bf16.mxu1 %v5741_v34 }
 0x874   :  { %6005 = vmatmul.mubr.bf16.gmra.mrb[160].mxu1 %v5740_v17 }
 0x875   :  { %6012 = vmatprep.mubr.bf16.mxu1 %v5743_v47 }
 0x87c   :  { %6013 = vmatmul.mubr.bf16.gmra.mrb[164].mxu1 %v5742_v10 }
 0x8e7   :  { %v6258_v1 = vpop.f32.mrb[112].mxu1 }
 0x8e8   :  { %v6259_v43 = vpop.f32.mrb[113].mxu1 }
 0x8e9   :  { %v6260_v12 = vadd.f32 %v6259_v43, %v6258_v1  ;;  %v6261_v13 = vpop.f32.mrb[114].mxu1 }
 0x8ea   :  { %v6262_v18 = vpop.f32.mrb[115].mxu1 }
 0x8eb   :  { %v5911_v28 = vadd.f32 %v6260_v12, %v11354_v31  ;;  %v6263_v61 = vadd.f32 %v6262_v18, %v6261_v13 }
 0x8ed   :  { %6021 = vst [vmem:[#allocation5] sm:$0xff] %v5911_v28  ;;  %v5914_v32 = vadd.f32 %v6263_v61, %v11354_v31 }
 0x8ef   :  { %6022 = vst [vmem:[#allocation5 + $0x8] sm:$0xff] %v5914_v32  ;;  %v6264_v41 = vpop.f32.mrb[116].mxu1 }
 0x8f0   :  { %v6265_v3 = vpop.f32.mrb[117].mxu1 }
 0x8f1   :  { %v6266_v20 = vadd.f32 %v6265_v3, %v6264_v41  ;;  %v6267_v35 = vpop.f32.mrb[118].mxu1 }
 0x8f2   :  { %v6268_v21 = vpop.f32.mrb[119].mxu1 }
 0x8f3   :  { %v5919_v0 = vadd.f32 %v6266_v20, %v11354_v31  ;;  %v6269_v23 = vadd.f32 %v6268_v21, %v6267_v35 }
 0x8f5   :  { %6023 = vst [vmem:[#allocation5 + $0x10] sm:$0xff] %v5919_v0  ;;  %v5922_v7 = vadd.f32 %v6269_v23, %v11354_v31 }
 0x8f7   :  { %6024 = vst [vmem:[#allocation5 + $0x18] sm:$0xff] %v5922_v7  ;;  %v6270_v27 = vpop.f32.mrb[120].mxu1 }
 0x8f8   :  { %v6271_v9 = vpop.f32.mrb[121].mxu1 }
 0x8f9   :  { %v6272_v56 = vadd.f32 %v6271_v9, %v6270_v27  ;;  %v6273_v40 = vpop.f32.mrb[122].mxu1 }
 0x8fa   :  { %v6274_v50 = vpop.f32.mrb[123].mxu1 }
 0x8fb   :  { %v5927_v55 = vadd.f32 %v6272_v56, %v11354_v31  ;;  %v6275_v46 = vadd.f32 %v6274_v50, %v6273_v40 }
 0x8fd   :  { %6025 = vst [vmem:[#allocation5 + $0x20] sm:$0xff] %v5927_v55  ;;  %v5930_v38 = vadd.f32 %v6275_v46, %v11354_v31 }
 0x8ff   :  { %6026 = vst [vmem:[#allocation5 + $0x28] sm:$0xff] %v5930_v38  ;;  %v6276_v39 = vpop.f32.mrb[124].mxu1 }
 0x900   :  { %v6277_v30 = vpop.f32.mrb[125].mxu1 }
 0x901   :  { %v6278_v14 = vadd.f32 %v6277_v30, %v6276_v39  ;;  %v6279_v6 = vpop.f32.mrb[126].mxu1 }
 0x902   :  { %v6280_v37 = vpop.f32.mrb[127].mxu1 }
 0x903   :  { %v5935_v4 = vadd.f32 %v6278_v14, %v11354_v31  ;;  %v6281_v19 = vadd.f32 %v6280_v37, %v6279_v6 }
 0x905   :  { %6027 = vst [vmem:[#allocation5 + $0x30] sm:$0xff] %v5935_v4  ;;  %v5938_v5 = vadd.f32 %v6281_v19, %v11354_v31 }
 0x907   :  { %6028 = vst [vmem:[#allocation5 + $0x38] sm:$0xff] %v5938_v5  ;;  %v6282_v33 = vpop.f32.mrb[128].mxu1 }
 0x908   :  { %v6283_v60 = vpop.f32.mrb[129].mxu1 }
 0x909   :  { %v6284_v24 = vadd.f32 %v6283_v60, %v6282_v33  ;;  %v6285_v51 = vpop.f32.mrb[130].mxu1 }
 0x90a   :  { %v6286_v45 = vpop.f32.mrb[131].mxu1 }
 0x90b   :  { %v5943_v49 = vadd.f32 %v6284_v24, %v11354_v31  ;;  %v6287_v62 = vadd.f32 %v6286_v45, %v6285_v51 }
 0x90d   :  { %6029 = vst [vmem:[#allocation5 + $0x40] sm:$0xff] %v5943_v49  ;;  %v5946_v54 = vadd.f32 %v6287_v62, %v11354_v31 }
 0x90f   :  { %6030 = vst [vmem:[#allocation5 + $0x48] sm:$0xff] %v5946_v54  ;;  %v6288_v2 = vpop.f32.mrb[132].mxu1 }
 0x910   :  { %v6289_v22 = vpop.f32.mrb[133].mxu1 }
 0x911   :  { %v6290_v44 = vadd.f32 %v6289_v22, %v6288_v2  ;;  %v6291_v8 = vpop.f32.mrb[134].mxu1 }
 0x912   :  { %v6292_v63 = vpop.f32.mrb[135].mxu1 }
 0x913   :  { %v5951_v15 = vadd.f32 %v6290_v44, %v11354_v31  ;;  %v6293_v42 = vadd.f32 %v6292_v63, %v6291_v8 }
 0x915   :  { %6031 = vst [vmem:[#allocation5 + $0x50] sm:$0xff] %v5951_v15  ;;  %v5954_v16 = vadd.f32 %v6293_v42, %v11354_v31 }
 0x917   :  { %6032 = vst [vmem:[#allocation5 + $0x58] sm:$0xff] %v5954_v16  ;;  %v6294_v57 = vpop.f32.mrb[136].mxu1 }
 0x918   :  { %v6295_v26 = vpop.f32.mrb[137].mxu1 }
 0x919   :  { %v6296_v48 = vadd.f32 %v6295_v26, %v6294_v57  ;;  %v6297_v59 = vpop.f32.mrb[138].mxu1 }
 0x91a   :  { %v6298_v53 = vpop.f32.mrb[139].mxu1 }
 0x91b   :  { %v5959_v34 = vadd.f32 %v6296_v48, %v11354_v31  ;;  %v6299_v52 = vadd.f32 %v6298_v53, %v6297_v59 }
 0x91d   :  { %6033 = vst [vmem:[#allocation5 + $0x60] sm:$0xff] %v5959_v34  ;;  %v5962_v36 = vadd.f32 %v6299_v52, %v11354_v31 }
 0x91f   :  { %6034 = vst [vmem:[#allocation5 + $0x68] sm:$0xff] %v5962_v36  ;;  %v6300_v29 = vpop.f32.mrb[140].mxu1 }
 0x920   :  { %v6301_v25 = vpop.f32.mrb[141].mxu1 }
 0x921   :  { %v6302_v17 = vadd.f32 %v6301_v25, %v6300_v29  ;;  %v6303_v58 = vpop.f32.mrb[142].mxu1 }
 0x922   :  { %v6304_v47 = vpop.f32.mrb[143].mxu1 }
 0x923   :  { %v5967_v10 = vadd.f32 %v6302_v17, %v11354_v31  ;;  %v6305_v11 = vadd.f32 %v6304_v47, %v6303_v58 }
 0x925   :  { %6035 = vst [vmem:[#allocation5 + $0x70] sm:$0xff] %v5967_v10  ;;  %v5970_v1 = vadd.f32 %v6305_v11, %v11354_v31 }
 0x927   :  { %6036 = vst [vmem:[#allocation5 + $0x78] sm:$0xff] %v5970_v1  ;;  %v6306_v43 = vpop.f32.mrb[144].mxu1 }
 0x928   :  { %v6307_v12 = vpop.f32.mrb[145].mxu1 }
 0x929   :  { %v6308_v13 = vadd.f32 %v6307_v12, %v6306_v43  ;;  %v6309_v18 = vpop.f32.mrb[146].mxu1 }
 0x92a   :  { %v6310_v28 = vpop.f32.mrb[147].mxu1 }
 0x92b   :  { %v5975_v61 = vadd.f32 %v6308_v13, %v11354_v31  ;;  %v6311_v32 = vadd.f32 %v6310_v28, %v6309_v18 }
 0x92d   :  { %6037 = vst [vmem:[#allocation5 + $0x80] sm:$0xff] %v5975_v61  ;;  %v5978_v41 = vadd.f32 %v6311_v32, %v11354_v31 }
 0x92f   :  { %6038 = vst [vmem:[#allocation5 + $0x88] sm:$0xff] %v5978_v41  ;;  %v6312_v3 = vpop.f32.mrb[148].mxu1 }
 0x930   :  { %v6313_v20 = vpop.f32.mrb[149].mxu1 }
 0x931   :  { %v6314_v35 = vadd.f32 %v6313_v20, %v6312_v3  ;;  %v6315_v21 = vpop.f32.mrb[150].mxu1 }
 0x932   :  { %v6316_v0 = vpop.f32.mrb[151].mxu1 }
 0x933   :  { %v5983_v23 = vadd.f32 %v6314_v35, %v11354_v31  ;;  %v6317_v7 = vadd.f32 %v6316_v0, %v6315_v21 }
 0x935   :  { %6039 = vst [vmem:[#allocation5 + $0x90] sm:$0xff] %v5983_v23  ;;  %v5986_v27 = vadd.f32 %v6317_v7, %v11354_v31 }
 0x937   :  { %6040 = vst [vmem:[#allocation5 + $0x98] sm:$0xff] %v5986_v27  ;;  %v6318_v9 = vpop.f32.mrb[152].mxu1 }
 0x938   :  { %v6319_v56 = vpop.f32.mrb[153].mxu1 }
 0x939   :  { %v6320_v40 = vadd.f32 %v6319_v56, %v6318_v9  ;;  %v6321_v50 = vpop.f32.mrb[154].mxu1 }
 0x93a   :  { %v6322_v55 = vpop.f32.mrb[155].mxu1 }
 0x93b   :  { %v5991_v46 = vadd.f32 %v6320_v40, %v11354_v31  ;;  %v6323_v38 = vadd.f32 %v6322_v55, %v6321_v50 }
 0x93d   :  { %6041 = vst [vmem:[#allocation5 + $0xa0] sm:$0xff] %v5991_v46  ;;  %v5994_v39 = vadd.f32 %v6323_v38, %v11354_v31 }
 0x93f   :  { %6042 = vst [vmem:[#allocation5 + $0xa8] sm:$0xff] %v5994_v39  ;;  %v6324_v30 = vpop.f32.mrb[156].mxu1 }
 0x940   :  { %v6325_v14 = vpop.f32.mrb[157].mxu1 }
 0x941   :  { %v6326_v6 = vadd.f32 %v6325_v14, %v6324_v30  ;;  %v6327_v37 = vpop.f32.mrb[158].mxu1 }
 0x942   :  { %v6328_v4 = vpop.f32.mrb[159].mxu1 }
 0x943   :  { %v5999_v19 = vadd.f32 %v6326_v6, %v11354_v31  ;;  %v6329_v5 = vadd.f32 %v6328_v4, %v6327_v37 }
 0x945   :  { %6043 = vst [vmem:[#allocation5 + $0xb0] sm:$0xff] %v5999_v19  ;;  %v6002_v33 = vadd.f32 %v6329_v5, %v11354_v31 }
 0x947   :  { %6044 = vst [vmem:[#allocation5 + $0xb8] sm:$0xff] %v6002_v33  ;;  %v6330_v60 = vpop.f32.mrb[160].mxu1 }
 0x948   :  { %v6331_v24 = vpop.f32.mrb[161].mxu1 }
 0x949   :  { %v6332_v51 = vadd.f32 %v6331_v24, %v6330_v60  ;;  %v6333_v45 = vpop.f32.mrb[162].mxu1 }
 0x94a   :  { %v6334_v49 = vpop.f32.mrb[163].mxu1 }
 0x94b   :  { %v6007_v62 = vadd.f32 %v6332_v51, %v11354_v31  ;;  %v6335_v54 = vadd.f32 %v6334_v49, %v6333_v45 }
 0x94d   :  { %6045 = vst [vmem:[#allocation5 + $0xc0] sm:$0xff] %v6007_v62  ;;  %v6010_v2 = vadd.f32 %v6335_v54, %v11354_v31 }
 0x94f   :  { %6046 = vst [vmem:[#allocation5 + $0xc8] sm:$0xff] %v6010_v2  ;;  %v6336_v22 = vpop.f32.mrb[164].mxu1 }
 0x950   :  { %v6337_v44 = vpop.f32.mrb[165].mxu1 }
 0x951   :  { %v6338_v8 = vadd.f32 %v6337_v44, %v6336_v22  ;;  %v6339_v63 = vpop.f32.mrb[166].mxu1 }
 0x952   :  { %v6340_v15 = vpop.f32.mrb[167].mxu1 }
 0x953   :  { %v6015_v42 = vadd.f32 %v6338_v8, %v11354_v31  ;;  %v6341_v16 = vadd.f32 %v6340_v15, %v6339_v63 }
 0x955   :  { %6047 = vst [vmem:[#allocation5 + $0xd0] sm:$0xff] %v6015_v42  ;;  %v6018_v57 = vadd.f32 %v6341_v16, %v11354_v31 }
 0x957   :  { %6048 = vst [vmem:[#allocation5 + $0xd8] sm:$0xff] %v6018_v57 }
 0x958   :  { %6782 = shalt.err (!%p6779_p12)
}
 0x959   :  { %s6783_s28 = scalar_lea.hbm %s11403_s4, 3584 }
 0x95a   :  { %p6784_p13 = scmp.ne.s32.totalorder %s11403_s4, %s6783_s28  ;;  %p6787_p0 = scmp.lt.u32.totalorder %s6783_s28, %s11403_s4 }
 0x95c   :  { %p6789_p1 = pnand %p6787_p0, %p6784_p13 }
 0x95e   :  { %6792 = shalt.err (!%p6789_p1)
}
 0x95f   :  { %6060 = dma.vmem_to_hbm [thread:$0]  %s6055_s22, 3584, %s11403_s4, [#allocation4], %s6798_s25, %s6798_s25, %s6799_s26  }
 0x960   :  { %6795 = dma.done.wait [#allocation4], 3584  }
 0x961   :  { %6796 = vsyncadd [#allocation4], 4294963712 }
 0x962   :  { %6064 = vsyncpa [#allocation3], 1 }
 0x963   :  { %6065 = vsyncpa [#allocation4], 1 }

</bundles_post_ra>
